<compile_context>
chip_gen: v7x
topology: tpu7x:2x2x1
jax: 0.10.0
libtpu: 0.0.40
codegen_flags: <defaults>
</compile_context>

<pallas_src>
import jax
import jax.numpy as jnp
import numpy as np
from jax import lax
from jax.experimental import pallas as pl
from jax.experimental.pallas import tpu as pltpu


def tinyseg_kernel(x_ref, w1_ref, b1_ref, w2_ref, b2_ref, w3_ref, b3_ref,
                   w4t_ref, b4_ref, o_ref, sin_ref, s16_ref, s32_ref):
    # x_ref:   (1, H, W, 3)   unpadded NHWC image (one batch element)
    # w*_ref:  (9*Cin, Cout)  packed 3x3 weights; w4t_ref: (1, 16) transposed 1x1
    # b*_ref:  (1, Cout)
    # o_ref:   (1, 1, H*W)    lane-dense output
    # s*_ref:  padded activation scratch, shape (H+2, W+2, C)
    H, W = x_ref.shape[1], x_ref.shape[2]

    def zero_halo(s_ref):
        c = s_ref.shape[-1]
        zrow = jnp.zeros((1, W + 2, c), jnp.float32)
        zcol = jnp.zeros((H + 2, 1, c), jnp.float32)
        s_ref[0:1, :, :] = zrow
        s_ref[H + 1:H + 2, :, :] = zrow
        s_ref[:, 0:1, :] = zcol
        s_ref[:, W + 1:W + 2, :] = zcol

    # Interiors are fully overwritten every step; only the halo must be zero.
    zero_halo(sin_ref)
    zero_halo(s16_ref)
    zero_halo(s32_ref)

    # In-kernel "padding=1": place the image in the scratch interior.
    sin_ref[1:H + 1, 1:W + 1, :] = x_ref[0]

    def conv3x3_relu(s_ref, w_ref, b_ref):
        cin = s_ref.shape[-1]
        # im2col: 9 shifted taps, concatenated on the channel axis -> one matmul.
        patches = [
            s_ref[dy:dy + H, dx:dx + W, :].reshape(H * W, cin)
            for dy in range(3) for dx in range(3)
        ]
        lhs = jnp.concatenate(patches, axis=1)                    # (H*W, 9*Cin)
        acc = jnp.dot(lhs, w_ref[...],
                      preferred_element_type=jnp.float32)         # single MXU matmul
        return jnp.maximum(acc + b_ref[...], 0.0)                 # (H*W, Cout)

    # --- encoder ---
    a1 = conv3x3_relu(sin_ref, w1_ref, b1_ref)                    # (H*W, 16)
    s16_ref[1:H + 1, 1:W + 1, :] = a1.reshape(H, W, 16)
    a2 = conv3x3_relu(s16_ref, w2_ref, b2_ref)                    # (H*W, 32)
    s32_ref[1:H + 1, 1:W + 1, :] = a2.reshape(H, W, 32)

    # --- decoder ---
    a3 = conv3x3_relu(s32_ref, w3_ref, b3_ref)                    # (H*W, 16)

    # 1x1 conv (16 -> 1, no ReLU), computed transposed so the result
    # lands as (1, H*W) with H*W on the lane axis (dense store).
    out_t = lax.dot_general(w4t_ref[...], a3,
                            dimension_numbers=(((1,), (1,)), ((), ())),
                            preferred_element_type=jnp.float32)   # (1, H*W)
    o_ref[...] = (out_t + b4_ref[...]).reshape(1, 1, H * W)


def init_params(key):
    """Deterministic parameter init. 3x3 weights stored HWIO."""
    shapes_hwio = [(3, 3, 3, 16), (3, 3, 16, 32), (3, 3, 32, 16), (1, 1, 16, 1)]
    keys = jax.random.split(key, 2 * len(shapes_hwio))
    params_hwio = []
    for i, s in enumerate(shapes_hwio):
        fan_in = s[0] * s[1] * s[2]
        w = jax.random.normal(keys[2 * i], s, jnp.float32) / np.sqrt(fan_in)
        b = 0.01 * jax.random.normal(keys[2 * i + 1], (s[3],), jnp.float32)
        params_hwio.append((w, b))
    return params_hwio


def pack_params(params_hwio):
    """HWIO params -> kernel layout: 3x3 as (9*Cin, Cout); 1x1 transposed (Cout, Cin)."""
    packed = []
    for (w, b) in params_hwio:
        kh, kw, cin, cout = w.shape
        if kh == 1 and kw == 1:
            packed.append(w.reshape(cin, cout).T)          # (1, 16)
            packed.append(b.reshape(1, cout))              # (1, 1)
        else:
            packed.append(w.reshape(kh * kw * cin, cout))  # (9*Cin, Cout)
            packed.append(b.reshape(1, cout))
    return packed


@jax.jit
def tinysegnet_forward(x_nchw, w1, b1, w2, b2, w3, b3, w4t, b4):
    N, C, H, W = x_nchw.shape
    x = jnp.transpose(x_nchw, (0, 2, 3, 1)).astype(jnp.float32)   # NCHW -> NHWC

    out = pl.pallas_call(
        tinyseg_kernel,
        out_shape=jax.ShapeDtypeStruct((N, 1, H * W), jnp.float32),
        grid_spec=pltpu.PrefetchScalarGridSpec(
            num_scalar_prefetch=0,
            grid=(N,),
            in_specs=[
                pl.BlockSpec((1, H, W, C), lambda n: (n, 0, 0, 0)),
                pl.BlockSpec(w1.shape, lambda n: (0, 0)),
                pl.BlockSpec(b1.shape, lambda n: (0, 0)),
                pl.BlockSpec(w2.shape, lambda n: (0, 0)),
                pl.BlockSpec(b2.shape, lambda n: (0, 0)),
                pl.BlockSpec(w3.shape, lambda n: (0, 0)),
                pl.BlockSpec(b3.shape, lambda n: (0, 0)),
                pl.BlockSpec(w4t.shape, lambda n: (0, 0)),
                pl.BlockSpec(b4.shape, lambda n: (0, 0)),
            ],
            out_specs=pl.BlockSpec((1, 1, H * W), lambda n: (n, 0, 0)),
            scratch_shapes=[
                pltpu.VMEM((H + 2, W + 2, C), jnp.float32),   # padded input
                pltpu.VMEM((H + 2, W + 2, 16), jnp.float32),  # padded act 1
                pltpu.VMEM((H + 2, W + 2, 32), jnp.float32),  # padded act 2
            ],
        ),
        compiler_params=pltpu.CompilerParams(
            dimension_semantics=("parallel",)),
    )(x, w1, b1, w2, b2, w3, b3, w4t, b4)

    return out.reshape(N, 1, H, W)                                # C == 1: free


def reference_forward(x_nchw, params_hwio):
    """Pure-JAX reference for correctness checking."""
    x = jnp.transpose(x_nchw, (0, 2, 3, 1)).astype(jnp.float32)
    dn = ("NHWC", "HWIO", "NHWC")

    def conv(x, w, b):
        y = lax.conv_general_dilated(x, w, (1, 1), "SAME",
                                     dimension_numbers=dn)
        return y + b

    (w1, b1), (w2, b2), (w3, b3), (w4, b4) = params_hwio
    x = jax.nn.relu(conv(x, w1, b1))
    x = jax.nn.relu(conv(x, w2, b2))
    x = jax.nn.relu(conv(x, w3, b3))
    x = conv(x, w4, b4)
    return jnp.transpose(x, (0, 3, 1, 2))


if __name__ == "__main__":
    key = jax.random.PRNGKey(0)
    k_x, k_p = jax.random.split(key)

    # Input matching the PyTorch module's expectation: NCHW, 3 channels.
    x = jax.random.normal(k_x, (2, 3, 16, 16), jnp.float32)

    params_hwio = init_params(k_p)
    packed = pack_params(params_hwio)

    out = tinysegnet_forward(x, *packed)
    out = jax.block_until_ready(out)

    ref = reference_forward(x, params_hwio)
    assert out.shape == (2, 1, 16, 16), out.shape
    np.testing.assert_allclose(np.asarray(out), np.asarray(ref),
                               rtol=1e-4, atol=1e-4)
    print("KERNEL_OK")
</pallas_src>

<mosaic_0001>
module attributes {stable_mosaic.version = 11 : i64} {
  func.func @tinyseg_kernel(%arg0: i32, %arg1: memref<1x16x16x3xf32, #tpu.memory_space<vmem>>, %arg2: memref<27x16xf32, #tpu.memory_space<vmem>>, %arg3: memref<1x16xf32, #tpu.memory_space<vmem>>, %arg4: memref<144x32xf32, #tpu.memory_space<vmem>>, %arg5: memref<1x32xf32, #tpu.memory_space<vmem>>, %arg6: memref<288x16xf32, #tpu.memory_space<vmem>>, %arg7: memref<1x16xf32, #tpu.memory_space<vmem>>, %arg8: memref<1x16xf32, #tpu.memory_space<vmem>>, %arg9: memref<1x1xf32, #tpu.memory_space<vmem>>, %arg10: memref<1x1x256xf32, #tpu.memory_space<vmem>>, %arg11: memref<18x18x3xf32, #tpu.memory_space<vmem>>, %arg12: memref<18x18x16xf32, #tpu.memory_space<vmem>>, %arg13: memref<18x18x32xf32, #tpu.memory_space<vmem>>) attributes {dimension_semantics = [#tpu.dimension_semantics<parallel>], iteration_bounds = array<i64: 2>, scalar_prefetch = 0 : i64, scratch_operands = 3 : i64, tpu.core_type = #tpu.core_type<tc>, window_params = [{transform_indices = @transform_0, window_bounds = array<i64: 1, 16, 16, 3>}, {pipeline_mode = #tpu.pipeline_mode<synchronous>, transform_indices = @transform_1, window_bounds = array<i64: 27, 16>}, {pipeline_mode = #tpu.pipeline_mode<synchronous>, transform_indices = @transform_2, window_bounds = array<i64: 1, 16>}, {pipeline_mode = #tpu.pipeline_mode<synchronous>, transform_indices = @transform_3, window_bounds = array<i64: 144, 32>}, {pipeline_mode = #tpu.pipeline_mode<synchronous>, transform_indices = @transform_4, window_bounds = array<i64: 1, 32>}, {pipeline_mode = #tpu.pipeline_mode<synchronous>, transform_indices = @transform_5, window_bounds = array<i64: 288, 16>}, {pipeline_mode = #tpu.pipeline_mode<synchronous>, transform_indices = @transform_6, window_bounds = array<i64: 1, 16>}, {pipeline_mode = #tpu.pipeline_mode<synchronous>, transform_indices = @transform_7, window_bounds = array<i64: 1, 16>}, {pipeline_mode = #tpu.pipeline_mode<synchronous>, transform_indices = @transform_8, window_bounds = array<i64: 1, 1>}, {transform_indices = @transform_9, window_bounds = array<i64: 1, 1, 256>}]} {
    %cst = arith.constant 0.000000e+00 : f32
    %0 = vector.broadcast %cst : f32 to vector<1x18x3xf32>
    %cst_0 = arith.constant 0.000000e+00 : f32
    %1 = vector.broadcast %cst_0 : f32 to vector<18x1x3xf32>
    %c0 = arith.constant 0 : index
    %c0_1 = arith.constant 0 : index
    %c0_2 = arith.constant 0 : index
    %2 = vector.load %arg11[%c0, %c0_1, %c0_2] : memref<18x18x3xf32, #tpu.memory_space<vmem>>, vector<1x18x3xf32>
    tpu.vector_store %arg11[%c0, %c0_1, %c0_2], %0 {strides = array<i32>} : memref<18x18x3xf32, #tpu.memory_space<vmem>>, vector<1x18x3xf32>,
    %c17 = arith.constant 17 : index
    %c0_3 = arith.constant 0 : index
    %c0_4 = arith.constant 0 : index
    %3 = vector.load %arg11[%c17, %c0_3, %c0_4] : memref<18x18x3xf32, #tpu.memory_space<vmem>>, vector<1x18x3xf32>
    tpu.vector_store %arg11[%c17, %c0_3, %c0_4], %0 {strides = array<i32>} : memref<18x18x3xf32, #tpu.memory_space<vmem>>, vector<1x18x3xf32>,
    %c0_5 = arith.constant 0 : index
    %c0_6 = arith.constant 0 : index
    %c0_7 = arith.constant 0 : index
    %4 = vector.load %arg11[%c0_5, %c0_6, %c0_7] : memref<18x18x3xf32, #tpu.memory_space<vmem>>, vector<18x1x3xf32>
    tpu.vector_store %arg11[%c0_5, %c0_6, %c0_7], %1 {strides = array<i32>} : memref<18x18x3xf32, #tpu.memory_space<vmem>>, vector<18x1x3xf32>,
    %c0_8 = arith.constant 0 : index
    %c17_9 = arith.constant 17 : index
    %c0_10 = arith.constant 0 : index
    %5 = vector.load %arg11[%c0_8, %c17_9, %c0_10] : memref<18x18x3xf32, #tpu.memory_space<vmem>>, vector<18x1x3xf32>
    tpu.vector_store %arg11[%c0_8, %c17_9, %c0_10], %1 {strides = array<i32>} : memref<18x18x3xf32, #tpu.memory_space<vmem>>, vector<18x1x3xf32>,
    %cst_11 = arith.constant 0.000000e+00 : f32
    %6 = vector.broadcast %cst_11 : f32 to vector<1x18x16xf32>
    %cst_12 = arith.constant 0.000000e+00 : f32
    %7 = vector.broadcast %cst_12 : f32 to vector<18x1x16xf32>
    %c0_13 = arith.constant 0 : index
    %c0_14 = arith.constant 0 : index
    %c0_15 = arith.constant 0 : index
    %8 = vector.load %arg12[%c0_13, %c0_14, %c0_15] : memref<18x18x16xf32, #tpu.memory_space<vmem>>, vector<1x18x16xf32>
    tpu.vector_store %arg12[%c0_13, %c0_14, %c0_15], %6 {strides = array<i32>} : memref<18x18x16xf32, #tpu.memory_space<vmem>>, vector<1x18x16xf32>,
    %c17_16 = arith.constant 17 : index
    %c0_17 = arith.constant 0 : index
    %c0_18 = arith.constant 0 : index
    %9 = vector.load %arg12[%c17_16, %c0_17, %c0_18] : memref<18x18x16xf32, #tpu.memory_space<vmem>>, vector<1x18x16xf32>
    tpu.vector_store %arg12[%c17_16, %c0_17, %c0_18], %6 {strides = array<i32>} : memref<18x18x16xf32, #tpu.memory_space<vmem>>, vector<1x18x16xf32>,
    %c0_19 = arith.constant 0 : index
    %c0_20 = arith.constant 0 : index
    %c0_21 = arith.constant 0 : index
    %10 = vector.load %arg12[%c0_19, %c0_20, %c0_21] : memref<18x18x16xf32, #tpu.memory_space<vmem>>, vector<18x1x16xf32>
    tpu.vector_store %arg12[%c0_19, %c0_20, %c0_21], %7 {strides = array<i32>} : memref<18x18x16xf32, #tpu.memory_space<vmem>>, vector<18x1x16xf32>,
    %c0_22 = arith.constant 0 : index
    %c17_23 = arith.constant 17 : index
    %c0_24 = arith.constant 0 : index
    %11 = vector.load %arg12[%c0_22, %c17_23, %c0_24] : memref<18x18x16xf32, #tpu.memory_space<vmem>>, vector<18x1x16xf32>
    tpu.vector_store %arg12[%c0_22, %c17_23, %c0_24], %7 {strides = array<i32>} : memref<18x18x16xf32, #tpu.memory_space<vmem>>, vector<18x1x16xf32>,
    %cst_25 = arith.constant 0.000000e+00 : f32
    %12 = vector.broadcast %cst_25 : f32 to vector<1x18x32xf32>
    %cst_26 = arith.constant 0.000000e+00 : f32
    %13 = vector.broadcast %cst_26 : f32 to vector<18x1x32xf32>
    %c0_27 = arith.constant 0 : index
    %c0_28 = arith.constant 0 : index
    %c0_29 = arith.constant 0 : index
    %14 = vector.load %arg13[%c0_27, %c0_28, %c0_29] : memref<18x18x32xf32, #tpu.memory_space<vmem>>, vector<1x18x32xf32>
    tpu.vector_store %arg13[%c0_27, %c0_28, %c0_29], %12 {strides = array<i32>} : memref<18x18x32xf32, #tpu.memory_space<vmem>>, vector<1x18x32xf32>,
    %c17_30 = arith.constant 17 : index
    %c0_31 = arith.constant 0 : index
    %c0_32 = arith.constant 0 : index
    %15 = vector.load %arg13[%c17_30, %c0_31, %c0_32] : memref<18x18x32xf32, #tpu.memory_space<vmem>>, vector<1x18x32xf32>
    tpu.vector_store %arg13[%c17_30, %c0_31, %c0_32], %12 {strides = array<i32>} : memref<18x18x32xf32, #tpu.memory_space<vmem>>, vector<1x18x32xf32>,
    %c0_33 = arith.constant 0 : index
    %c0_34 = arith.constant 0 : index
    %c0_35 = arith.constant 0 : index
    %16 = vector.load %arg13[%c0_33, %c0_34, %c0_35] : memref<18x18x32xf32, #tpu.memory_space<vmem>>, vector<18x1x32xf32>
    tpu.vector_store %arg13[%c0_33, %c0_34, %c0_35], %13 {strides = array<i32>} : memref<18x18x32xf32, #tpu.memory_space<vmem>>, vector<18x1x32xf32>,
    %c0_36 = arith.constant 0 : index
    %c17_37 = arith.constant 17 : index
    %c0_38 = arith.constant 0 : index
    %17 = vector.load %arg13[%c0_36, %c17_37, %c0_38] : memref<18x18x32xf32, #tpu.memory_space<vmem>>, vector<18x1x32xf32>
    tpu.vector_store %arg13[%c0_36, %c17_37, %c0_38], %13 {strides = array<i32>} : memref<18x18x32xf32, #tpu.memory_space<vmem>>, vector<18x1x32xf32>,
    %c0_39 = arith.constant 0 : index
    %c0_40 = arith.constant 0 : index
    %c0_41 = arith.constant 0 : index
    %c0_42 = arith.constant 0 : index
    %18 = vector.load %arg1[%c0_39, %c0_40, %c0_41, %c0_42] : memref<1x16x16x3xf32, #tpu.memory_space<vmem>>, vector<1x16x16x3xf32>
    %19 = vector.shape_cast %18 : vector<1x16x16x3xf32> to vector<16x16x3xf32>
    %c1 = arith.constant 1 : index
    %c1_43 = arith.constant 1 : index
    %c0_44 = arith.constant 0 : index
    %20 = vector.load %arg11[%c1, %c1_43, %c0_44] : memref<18x18x3xf32, #tpu.memory_space<vmem>>, vector<16x16x3xf32>
    tpu.vector_store %arg11[%c1, %c1_43, %c0_44], %19 {strides = array<i32>} : memref<18x18x3xf32, #tpu.memory_space<vmem>>, vector<16x16x3xf32>,
    %c0_45 = arith.constant 0 : index
    %c0_46 = arith.constant 0 : index
    %c0_47 = arith.constant 0 : index
    %21 = vector.load %arg11[%c0_45, %c0_46, %c0_47] : memref<18x18x3xf32, #tpu.memory_space<vmem>>, vector<16x16x3xf32>
    %22 = vector.shape_cast %21 : vector<16x16x3xf32> to vector<256x3xf32>
    %c0_48 = arith.constant 0 : index
    %c1_49 = arith.constant 1 : index
    %c0_50 = arith.constant 0 : index
    %23 = vector.load %arg11[%c0_48, %c1_49, %c0_50] : memref<18x18x3xf32, #tpu.memory_space<vmem>>, vector<16x16x3xf32>
    %24 = vector.shape_cast %23 : vector<16x16x3xf32> to vector<256x3xf32>
    %c0_51 = arith.constant 0 : index
    %c2 = arith.constant 2 : index
    %c0_52 = arith.constant 0 : index
    %25 = vector.load %arg11[%c0_51, %c2, %c0_52] : memref<18x18x3xf32, #tpu.memory_space<vmem>>, vector<16x16x3xf32>
    %26 = vector.shape_cast %25 : vector<16x16x3xf32> to vector<256x3xf32>
    %c1_53 = arith.constant 1 : index
    %c0_54 = arith.constant 0 : index
    %c0_55 = arith.constant 0 : index
    %27 = vector.load %arg11[%c1_53, %c0_54, %c0_55] : memref<18x18x3xf32, #tpu.memory_space<vmem>>, vector<16x16x3xf32>
    %28 = vector.shape_cast %27 : vector<16x16x3xf32> to vector<256x3xf32>
    %c1_56 = arith.constant 1 : index
    %c1_57 = arith.constant 1 : index
    %c0_58 = arith.constant 0 : index
    %29 = vector.load %arg11[%c1_56, %c1_57, %c0_58] : memref<18x18x3xf32, #tpu.memory_space<vmem>>, vector<16x16x3xf32>
    %30 = vector.shape_cast %29 : vector<16x16x3xf32> to vector<256x3xf32>
    %c1_59 = arith.constant 1 : index
    %c2_60 = arith.constant 2 : index
    %c0_61 = arith.constant 0 : index
    %31 = vector.load %arg11[%c1_59, %c2_60, %c0_61] : memref<18x18x3xf32, #tpu.memory_space<vmem>>, vector<16x16x3xf32>
    %32 = vector.shape_cast %31 : vector<16x16x3xf32> to vector<256x3xf32>
    %c2_62 = arith.constant 2 : index
    %c0_63 = arith.constant 0 : index
    %c0_64 = arith.constant 0 : index
    %33 = vector.load %arg11[%c2_62, %c0_63, %c0_64] : memref<18x18x3xf32, #tpu.memory_space<vmem>>, vector<16x16x3xf32>
    %34 = vector.shape_cast %33 : vector<16x16x3xf32> to vector<256x3xf32>
    %c2_65 = arith.constant 2 : index
    %c1_66 = arith.constant 1 : index
    %c0_67 = arith.constant 0 : index
    %35 = vector.load %arg11[%c2_65, %c1_66, %c0_67] : memref<18x18x3xf32, #tpu.memory_space<vmem>>, vector<16x16x3xf32>
    %36 = vector.shape_cast %35 : vector<16x16x3xf32> to vector<256x3xf32>
    %c2_68 = arith.constant 2 : index
    %c2_69 = arith.constant 2 : index
    %c0_70 = arith.constant 0 : index
    %37 = vector.load %arg11[%c2_68, %c2_69, %c0_70] : memref<18x18x3xf32, #tpu.memory_space<vmem>>, vector<16x16x3xf32>
    %38 = vector.shape_cast %37 : vector<16x16x3xf32> to vector<256x3xf32>
    %39 = tpu.concatenate %22, %24, %26, %28, %30, %32, %34, %36, %38 in 1 : vector<256x3xf32>, vector<256x3xf32>, vector<256x3xf32>, vector<256x3xf32>, vector<256x3xf32>, vector<256x3xf32>, vector<256x3xf32>, vector<256x3xf32>, vector<256x3xf32> -> vector<256x27xf32>
    %c0_71 = arith.constant 0 : index
    %c0_72 = arith.constant 0 : index
    %40 = vector.load %arg2[%c0_71, %c0_72] : memref<27x16xf32, #tpu.memory_space<vmem>>, vector<27x16xf32>
    %cst_73 = arith.constant dense<0.000000e+00> : vector<256x16xf32>
    %41 = tpu.matmul %39, %40, %cst_73 {dimension_numbers = #tpu.dot_dimension_numbers<[1], [0], [0], [1], [0, 0, 1, 1], [], []>} : vector<256x27xf32>, vector<27x16xf32>, vector<256x16xf32> -> vector<256x16xf32>
    %c0_74 = arith.constant 0 : index
    %c0_75 = arith.constant 0 : index
    %42 = vector.load %arg3[%c0_74, %c0_75] : memref<1x16xf32, #tpu.memory_space<vmem>>, vector<1x16xf32>
    %43 = vector.broadcast %42 : vector<1x16xf32> to vector<256x16xf32>
    %44 = arith.addf %41, %43 : vector<256x16xf32>
    %cst_76 = arith.constant 0.000000e+00 : f32
    %45 = vector.broadcast %cst_76 : f32 to vector<256x16xf32>
    %46 = arith.maximumf %44, %45 : vector<256x16xf32>
    %47 = vector.shape_cast %46 : vector<256x16xf32> to vector<16x16x16xf32>
    %c1_77 = arith.constant 1 : index
    %c1_78 = arith.constant 1 : index
    %c0_79 = arith.constant 0 : index
    %48 = vector.load %arg12[%c1_77, %c1_78, %c0_79] : memref<18x18x16xf32, #tpu.memory_space<vmem>>, vector<16x16x16xf32>
    tpu.vector_store %arg12[%c1_77, %c1_78, %c0_79], %47 {strides = array<i32>} : memref<18x18x16xf32, #tpu.memory_space<vmem>>, vector<16x16x16xf32>,
    %c0_80 = arith.constant 0 : index
    %c0_81 = arith.constant 0 : index
    %c0_82 = arith.constant 0 : index
    %49 = vector.load %arg12[%c0_80, %c0_81, %c0_82] : memref<18x18x16xf32, #tpu.memory_space<vmem>>, vector<16x16x16xf32>
    %50 = vector.shape_cast %49 : vector<16x16x16xf32> to vector<256x16xf32>
    %c0_83 = arith.constant 0 : index
    %c1_84 = arith.constant 1 : index
    %c0_85 = arith.constant 0 : index
    %51 = vector.load %arg12[%c0_83, %c1_84, %c0_85] : memref<18x18x16xf32, #tpu.memory_space<vmem>>, vector<16x16x16xf32>
    %52 = vector.shape_cast %51 : vector<16x16x16xf32> to vector<256x16xf32>
    %c0_86 = arith.constant 0 : index
    %c2_87 = arith.constant 2 : index
    %c0_88 = arith.constant 0 : index
    %53 = vector.load %arg12[%c0_86, %c2_87, %c0_88] : memref<18x18x16xf32, #tpu.memory_space<vmem>>, vector<16x16x16xf32>
    %54 = vector.shape_cast %53 : vector<16x16x16xf32> to vector<256x16xf32>
    %c1_89 = arith.constant 1 : index
    %c0_90 = arith.constant 0 : index
    %c0_91 = arith.constant 0 : index
    %55 = vector.load %arg12[%c1_89, %c0_90, %c0_91] : memref<18x18x16xf32, #tpu.memory_space<vmem>>, vector<16x16x16xf32>
    %56 = vector.shape_cast %55 : vector<16x16x16xf32> to vector<256x16xf32>
    %c1_92 = arith.constant 1 : index
    %c1_93 = arith.constant 1 : index
    %c0_94 = arith.constant 0 : index
    %57 = vector.load %arg12[%c1_92, %c1_93, %c0_94] : memref<18x18x16xf32, #tpu.memory_space<vmem>>, vector<16x16x16xf32>
    %58 = vector.shape_cast %57 : vector<16x16x16xf32> to vector<256x16xf32>
    %c1_95 = arith.constant 1 : index
    %c2_96 = arith.constant 2 : index
    %c0_97 = arith.constant 0 : index
    %59 = vector.load %arg12[%c1_95, %c2_96, %c0_97] : memref<18x18x16xf32, #tpu.memory_space<vmem>>, vector<16x16x16xf32>
    %60 = vector.shape_cast %59 : vector<16x16x16xf32> to vector<256x16xf32>
    %c2_98 = arith.constant 2 : index
    %c0_99 = arith.constant 0 : index
    %c0_100 = arith.constant 0 : index
    %61 = vector.load %arg12[%c2_98, %c0_99, %c0_100] : memref<18x18x16xf32, #tpu.memory_space<vmem>>, vector<16x16x16xf32>
    %62 = vector.shape_cast %61 : vector<16x16x16xf32> to vector<256x16xf32>
    %c2_101 = arith.constant 2 : index
    %c1_102 = arith.constant 1 : index
    %c0_103 = arith.constant 0 : index
    %63 = vector.load %arg12[%c2_101, %c1_102, %c0_103] : memref<18x18x16xf32, #tpu.memory_space<vmem>>, vector<16x16x16xf32>
    %64 = vector.shape_cast %63 : vector<16x16x16xf32> to vector<256x16xf32>
    %c2_104 = arith.constant 2 : index
    %c2_105 = arith.constant 2 : index
    %c0_106 = arith.constant 0 : index
    %65 = vector.load %arg12[%c2_104, %c2_105, %c0_106] : memref<18x18x16xf32, #tpu.memory_space<vmem>>, vector<16x16x16xf32>
    %66 = vector.shape_cast %65 : vector<16x16x16xf32> to vector<256x16xf32>
    %67 = tpu.concatenate %50, %52, %54, %56, %58, %60, %62, %64, %66 in 1 : vector<256x16xf32>, vector<256x16xf32>, vector<256x16xf32>, vector<256x16xf32>, vector<256x16xf32>, vector<256x16xf32>, vector<256x16xf32>, vector<256x16xf32>, vector<256x16xf32> -> vector<256x144xf32>
    %c0_107 = arith.constant 0 : index
    %c0_108 = arith.constant 0 : index
    %68 = vector.load %arg4[%c0_107, %c0_108] : memref<144x32xf32, #tpu.memory_space<vmem>>, vector<144x32xf32>
    %cst_109 = arith.constant dense<0.000000e+00> : vector<256x32xf32>
    %69 = tpu.matmul %67, %68, %cst_109 {dimension_numbers = #tpu.dot_dimension_numbers<[1], [0], [0], [1], [0, 0, 1, 1], [], []>} : vector<256x144xf32>, vector<144x32xf32>, vector<256x32xf32> -> vector<256x32xf32>
    %c0_110 = arith.constant 0 : index
    %c0_111 = arith.constant 0 : index
    %70 = vector.load %arg5[%c0_110, %c0_111] : memref<1x32xf32, #tpu.memory_space<vmem>>, vector<1x32xf32>
    %71 = vector.broadcast %70 : vector<1x32xf32> to vector<256x32xf32>
    %72 = arith.addf %69, %71 : vector<256x32xf32>
    %cst_112 = arith.constant 0.000000e+00 : f32
    %73 = vector.broadcast %cst_112 : f32 to vector<256x32xf32>
    %74 = arith.maximumf %72, %73 : vector<256x32xf32>
    %75 = vector.shape_cast %74 : vector<256x32xf32> to vector<16x16x32xf32>
    %c1_113 = arith.constant 1 : index
    %c1_114 = arith.constant 1 : index
    %c0_115 = arith.constant 0 : index
    %76 = vector.load %arg13[%c1_113, %c1_114, %c0_115] : memref<18x18x32xf32, #tpu.memory_space<vmem>>, vector<16x16x32xf32>
    tpu.vector_store %arg13[%c1_113, %c1_114, %c0_115], %75 {strides = array<i32>} : memref<18x18x32xf32, #tpu.memory_space<vmem>>, vector<16x16x32xf32>,
    %c0_116 = arith.constant 0 : index
    %c0_117 = arith.constant 0 : index
    %c0_118 = arith.constant 0 : index
    %77 = vector.load %arg13[%c0_116, %c0_117, %c0_118] : memref<18x18x32xf32, #tpu.memory_space<vmem>>, vector<16x16x32xf32>
    %78 = vector.shape_cast %77 : vector<16x16x32xf32> to vector<256x32xf32>
    %c0_119 = arith.constant 0 : index
    %c1_120 = arith.constant 1 : index
    %c0_121 = arith.constant 0 : index
    %79 = vector.load %arg13[%c0_119, %c1_120, %c0_121] : memref<18x18x32xf32, #tpu.memory_space<vmem>>, vector<16x16x32xf32>
    %80 = vector.shape_cast %79 : vector<16x16x32xf32> to vector<256x32xf32>
    %c0_122 = arith.constant 0 : index
    %c2_123 = arith.constant 2 : index
    %c0_124 = arith.constant 0 : index
    %81 = vector.load %arg13[%c0_122, %c2_123, %c0_124] : memref<18x18x32xf32, #tpu.memory_space<vmem>>, vector<16x16x32xf32>
    %82 = vector.shape_cast %81 : vector<16x16x32xf32> to vector<256x32xf32>
    %c1_125 = arith.constant 1 : index
    %c0_126 = arith.constant 0 : index
    %c0_127 = arith.constant 0 : index
    %83 = vector.load %arg13[%c1_125, %c0_126, %c0_127] : memref<18x18x32xf32, #tpu.memory_space<vmem>>, vector<16x16x32xf32>
    %84 = vector.shape_cast %83 : vector<16x16x32xf32> to vector<256x32xf32>
    %c1_128 = arith.constant 1 : index
    %c1_129 = arith.constant 1 : index
    %c0_130 = arith.constant 0 : index
    %85 = vector.load %arg13[%c1_128, %c1_129, %c0_130] : memref<18x18x32xf32, #tpu.memory_space<vmem>>, vector<16x16x32xf32>
    %86 = vector.shape_cast %85 : vector<16x16x32xf32> to vector<256x32xf32>
    %c1_131 = arith.constant 1 : index
    %c2_132 = arith.constant 2 : index
    %c0_133 = arith.constant 0 : index
    %87 = vector.load %arg13[%c1_131, %c2_132, %c0_133] : memref<18x18x32xf32, #tpu.memory_space<vmem>>, vector<16x16x32xf32>
    %88 = vector.shape_cast %87 : vector<16x16x32xf32> to vector<256x32xf32>
    %c2_134 = arith.constant 2 : index
    %c0_135 = arith.constant 0 : index
    %c0_136 = arith.constant 0 : index
    %89 = vector.load %arg13[%c2_134, %c0_135, %c0_136] : memref<18x18x32xf32, #tpu.memory_space<vmem>>, vector<16x16x32xf32>
    %90 = vector.shape_cast %89 : vector<16x16x32xf32> to vector<256x32xf32>
    %c2_137 = arith.constant 2 : index
    %c1_138 = arith.constant 1 : index
    %c0_139 = arith.constant 0 : index
    %91 = vector.load %arg13[%c2_137, %c1_138, %c0_139] : memref<18x18x32xf32, #tpu.memory_space<vmem>>, vector<16x16x32xf32>
    %92 = vector.shape_cast %91 : vector<16x16x32xf32> to vector<256x32xf32>
    %c2_140 = arith.constant 2 : index
    %c2_141 = arith.constant 2 : index
    %c0_142 = arith.constant 0 : index
    %93 = vector.load %arg13[%c2_140, %c2_141, %c0_142] : memref<18x18x32xf32, #tpu.memory_space<vmem>>, vector<16x16x32xf32>
    %94 = vector.shape_cast %93 : vector<16x16x32xf32> to vector<256x32xf32>
    %95 = tpu.concatenate %78, %80, %82, %84, %86, %88, %90, %92, %94 in 1 : vector<256x32xf32>, vector<256x32xf32>, vector<256x32xf32>, vector<256x32xf32>, vector<256x32xf32>, vector<256x32xf32>, vector<256x32xf32>, vector<256x32xf32>, vector<256x32xf32> -> vector<256x288xf32>
    %c0_143 = arith.constant 0 : index
    %c0_144 = arith.constant 0 : index
    %96 = vector.load %arg6[%c0_143, %c0_144] : memref<288x16xf32, #tpu.memory_space<vmem>>, vector<288x16xf32>
    %cst_145 = arith.constant dense<0.000000e+00> : vector<256x16xf32>
    %97 = tpu.matmul %95, %96, %cst_145 {dimension_numbers = #tpu.dot_dimension_numbers<[1], [0], [0], [1], [0, 0, 1, 1], [], []>} : vector<256x288xf32>, vector<288x16xf32>, vector<256x16xf32> -> vector<256x16xf32>
    %c0_146 = arith.constant 0 : index
    %c0_147 = arith.constant 0 : index
    %98 = vector.load %arg7[%c0_146, %c0_147] : memref<1x16xf32, #tpu.memory_space<vmem>>, vector<1x16xf32>
    %99 = vector.broadcast %98 : vector<1x16xf32> to vector<256x16xf32>
    %100 = arith.addf %97, %99 : vector<256x16xf32>
    %cst_148 = arith.constant 0.000000e+00 : f32
    %101 = vector.broadcast %cst_148 : f32 to vector<256x16xf32>
    %102 = arith.maximumf %100, %101 : vector<256x16xf32>
    %c0_149 = arith.constant 0 : index
    %c0_150 = arith.constant 0 : index
    %103 = vector.load %arg8[%c0_149, %c0_150] : memref<1x16xf32, #tpu.memory_space<vmem>>, vector<1x16xf32>
    %cst_151 = arith.constant dense<0.000000e+00> : vector<1x256xf32>
    %104 = tpu.matmul %103, %102, %cst_151 {dimension_numbers = #tpu.dot_dimension_numbers<[1], [1], [0], [0], [0, 0, 1, 0], [], []>} : vector<1x16xf32>, vector<256x16xf32>, vector<1x256xf32> -> vector<1x256xf32>
    %c0_152 = arith.constant 0 : index
    %c0_153 = arith.constant 0 : index
    %105 = vector.load %arg9[%c0_152, %c0_153] : memref<1x1xf32, #tpu.memory_space<vmem>>, vector<1x1xf32>
    %106 = vector.broadcast %105 : vector<1x1xf32> to vector<1x256xf32>
    %107 = arith.addf %104, %106 : vector<1x256xf32>
    %108 = vector.shape_cast %107 : vector<1x256xf32> to vector<1x1x256xf32>
    %c0_154 = arith.constant 0 : index
    %c0_155 = arith.constant 0 : index
    %c0_156 = arith.constant 0 : index
    %109 = vector.load %arg10[%c0_154, %c0_155, %c0_156] : memref<1x1x256xf32, #tpu.memory_space<vmem>>, vector<1x1x256xf32>
    tpu.vector_store %arg10[%c0_154, %c0_155, %c0_156], %108 {strides = array<i32>} : memref<1x1x256xf32, #tpu.memory_space<vmem>>, vector<1x1x256xf32>,
    return
  }
  func.func @transform_0(%arg0: i32) -> (i32, i32, i32, i32) {
    %c0_i32 = arith.constant 0 : i32
    %c0_i32_0 = arith.constant 0 : i32
    %c0_i32_1 = arith.constant 0 : i32
    %c0_i32_2 = arith.constant 0 : i32
    return %arg0, %c0_i32, %c0_i32_0, %c0_i32_1 : i32, i32, i32, i32
  }
  func.func @transform_1(%arg0: i32) -> (i32, i32) {
    %c0_i32 = arith.constant 0 : i32
    %c0_i32_0 = arith.constant 0 : i32
    %c0_i32_1 = arith.constant 0 : i32
    return %c0_i32, %c0_i32_0 : i32, i32
  }
  func.func @transform_2(%arg0: i32) -> (i32, i32) {
    %c0_i32 = arith.constant 0 : i32
    %c0_i32_0 = arith.constant 0 : i32
    %c0_i32_1 = arith.constant 0 : i32
    return %c0_i32, %c0_i32_0 : i32, i32
  }
  func.func @transform_3(%arg0: i32) -> (i32, i32) {
    %c0_i32 = arith.constant 0 : i32
    %c0_i32_0 = arith.constant 0 : i32
    %c0_i32_1 = arith.constant 0 : i32
    return %c0_i32, %c0_i32_0 : i32, i32
  }
  func.func @transform_4(%arg0: i32) -> (i32, i32) {
    %c0_i32 = arith.constant 0 : i32
    %c0_i32_0 = arith.constant 0 : i32
    %c0_i32_1 = arith.constant 0 : i32
    return %c0_i32, %c0_i32_0 : i32, i32
  }
  func.func @transform_5(%arg0: i32) -> (i32, i32) {
    %c0_i32 = arith.constant 0 : i32
    %c0_i32_0 = arith.constant 0 : i32
    %c0_i32_1 = arith.constant 0 : i32
    return %c0_i32, %c0_i32_0 : i32, i32
  }
  func.func @transform_6(%arg0: i32) -> (i32, i32) {
    %c0_i32 = arith.constant 0 : i32
    %c0_i32_0 = arith.constant 0 : i32
    %c0_i32_1 = arith.constant 0 : i32
    return %c0_i32, %c0_i32_0 : i32, i32
  }
  func.func @transform_7(%arg0: i32) -> (i32, i32) {
    %c0_i32 = arith.constant 0 : i32
    %c0_i32_0 = arith.constant 0 : i32
    %c0_i32_1 = arith.constant 0 : i32
    return %c0_i32, %c0_i32_0 : i32, i32
  }
  func.func @transform_8(%arg0: i32) -> (i32, i32) {
    %c0_i32 = arith.constant 0 : i32
    %c0_i32_0 = arith.constant 0 : i32
    %c0_i32_1 = arith.constant 0 : i32
    return %c0_i32, %c0_i32_0 : i32, i32
  }
  func.func @transform_9(%arg0: i32) -> (i32, i32, i32) {
    %c0_i32 = arith.constant 0 : i32
    %c0_i32_0 = arith.constant 0 : i32
    %c0_i32_1 = arith.constant 0 : i32
    return %arg0, %c0_i32, %c0_i32_0 : i32, i32, i32
  }
}

</mosaic_0001>

<bundles_post_ra>
// kernel: tinysegnet_forward.1
= control target key start
LH: loop header
LB: loop body
LE: loop exit
PB: predicated region body
PF: predicated region fallthrough
CT: control target
= control target key end

     0   :  { %s8129_s11 = smov 0   ;;  %s11430_s0 = inlined_call_operand.vmem [shape: f32[2,16,16,3], index: 0, kind: input, shape index: {}]   ;;  %s11431_s1 = inlined_call_operand.vmem [shape: f32[27,16], index: 1, kind: input, shape index: {}]   ;;  %s11432_s2 = inlined_call_operand.vmem [shape: f32[1,16], index: 2, kind: input, shape index: {}]   ;;  %s11433_s3 = inlined_call_operand.vmem [shape: f32[144,32], index: 3, kind: input, shape index: {}]   ;;  %s11434_s4 = inlined_call_operand.vmem [shape: f32[1,32], index: 4, kind: input, shape index: {}]   ;;  %s11435_s5 = inlined_call_operand.vmem [shape: f32[288,16], index: 5, kind: input, shape index: {}]   ;;  %s11436_s6 = inlined_call_operand.vmem [shape: f32[1,16], index: 6, kind: input, shape index: {}]   ;;  %s11437_s7 = inlined_call_operand.vmem [shape: f32[1,16], index: 7, kind: input, shape index: {}]   ;;  %s11438_s8 = inlined_call_operand.<no memory space> [shape: f32[1,1], index: 8, kind: input, shape index: {}]   ;;  %s11439_s9 = inlined_call_operand.vmem [shape: f32[2,1,256], index: 9, kind: output, shape index: {}]  }
   0x1   :  { %v14_v0 = vstv %s11438_s8 }
   0x2   :  { %15 = vst [vmem:[#allocation5] sm:$0x1] %v14_v0 }
   0x3 LB: > { %s6466_s12 = sadd.s32 4294967295, %s8054_s11   ;;  %p6470_p0 = scmp.ge.s32.totalorder %s8054_s11, 1  ;;  %s8054_s11 = sphi %s8129_s11, %s21_s11  }
   0x4   : > { %p289_p1 = scmp.lt.s32.totalorder %s8054_s11, 3 }
   0x6   : > { %p290_p2 = pnand %p6470_p0, %p289_p1 }
   0x8   : > { %293 = sbr.rel (%p290_p2) target bundleno = 1845 (0x735), region = 56 }
   0xf   : > { %vm333_vm0 = vcmask 23552   ;;  %vm336_vm1 = vcmask 17408   ;;  %p8139_p3 = scmp.lt.s32.totalorder %s6466_s12, 1  ;;  %vm342_vm2 = vcmask 16384   ;;  %v11440_v1 = vmov 0.0   ;;  %s8057_s17 = smov 3  }
  0x10   : > { %334 = vst.msk [vmem:[#allocation2] sm:$0xff] %vm333_vm0, %v11440_v1  ;;  %335 = vst.msk [vmem:[#allocation2 + $0x8] sm:$0xff] %vm333_vm0, %v11440_v1  ;;  %s8058_s18 = smov 6   ;;  %s8059_s19 = smov 9   ;;  %vm2220_vm3 = vcmask 1042432   ;;  %vm8063_vm4 = vmmov 1  }
  0x11   : > { %339 = vst.msk [vmem:[#allocation2 + $0x198] sm:$0xff] %vm333_vm0, %v11440_v1  ;;  %340 = vst.msk [vmem:[#allocation2 + $0x1a0] sm:$0xff] %vm333_vm0, %v11440_v1  ;;  %s11531_s12 = smov (!%p8139_p3, %s6466_s12), 1  ;;  %s8060_s20 = smov 12   ;;  %vm1881_vm6 = vcmask 48128   ;;  %vm1914_vm7 = vcmask 72704  }
  0x12   : > { %337 = vst.msk [vmem:[#allocation2 + $0x10] sm:$0x3] %vm336_vm1, %v11440_v1  ;;  %341 = vst.msk [vmem:[#allocation2 + $0x1a8] sm:$0x3] %vm336_vm1, %v11440_v1  ;;  %s6609_s13 = sshll.u32 %s11531_s12, 8  ;;  %s8061_s21 = smov 15  }
  0x13   : > { %344 = vst.msk [vmem:[#allocation2 + $0x18] sm:$0x1] %vm342_vm2, %v11440_v1  ;;  %345 = vst.msk [vmem:[#allocation2 + $0x30] sm:$0x1] %vm342_vm2, %v11440_v1  ;;  %s8235_s16 = scalar_lea.vmem %s11430_s0, %s6609_s13  ;;  %s8062_s26 = smov 18   ;;  %vm1947_vm8 = vcmask 97280  }
  0x14   : > { %346 = vst.msk [vmem:[#allocation2 + $0x48] sm:$0x1] %vm342_vm2, %v11440_v1  ;;  %347 = vst.msk [vmem:[#allocation2 + $0x60] sm:$0x1] %vm342_vm2, %v11440_v1  ;;  %v471_v2 = vld [vmem:[%s8235_s16] sm:$0xff]  ;;  %v473_v3 = vld [vmem:[%s8235_s16 + $0x10] sm:$0xff] }
  0x15   : > { %348 = vst.msk [vmem:[#allocation2 + $0x78] sm:$0x1] %vm342_vm2, %v11440_v1  ;;  %349 = vst.msk [vmem:[#allocation2 + $0x90] sm:$0x1] %vm342_vm2, %v11440_v1  ;;  %v472_v4 = vld [vmem:[%s8235_s16 + $0x8] sm:$0xff]  ;;  %v475_v5 = vld [vmem:[%s8235_s16 + $0x20] sm:$0xff] }
  0x16   : > { %350 = vst.msk [vmem:[#allocation2 + $0xa8] sm:$0x1] %vm342_vm2, %v11440_v1  ;;  %351 = vst.msk [vmem:[#allocation2 + $0xc0] sm:$0x1] %vm342_vm2, %v11440_v1  ;;  %v474_v6 = vld [vmem:[%s8235_s16 + $0x18] sm:$0xff]  ;;  %v477_v7 = vld [vmem:[%s8235_s16 + $0x30] sm:$0xff] }
  0x17   : > { %352 = vst.msk [vmem:[#allocation2 + $0xd8] sm:$0x1] %vm342_vm2, %v11440_v1  ;;  %353 = vst.msk [vmem:[#allocation2 + $0xf0] sm:$0x1] %vm342_vm2, %v11440_v1  ;;  %v568_v8 = vld [vmem:[#allocation2 + $0x1] sm:$0xff]  ;;  %v478_v12 = vld [vmem:[%s8235_s16 + $0x38] sm:$0xff] }
  0x18   : > { %354 = vst.msk [vmem:[#allocation2 + $0x108] sm:$0x1] %vm342_vm2, %v11440_v1  ;;  %355 = vst.msk [vmem:[#allocation2 + $0x120] sm:$0x1] %vm342_vm2, %v11440_v1  ;;  %v476_v10 = vld [vmem:[%s8235_s16 + $0x28] sm:$0xff]  ;;  %857 = vrot.lane.b32.xlu0 %v568_v8, %s8057_s17  ;;  %v479_v11 = vld [vmem:[%s8235_s16 + $0x40] sm:$0xff] }
  0x19   : > { %356 = vst.msk [vmem:[#allocation2 + $0x138] sm:$0x1] %vm342_vm2, %v11440_v1  ;;  %357 = vst.msk [vmem:[#allocation2 + $0x150] sm:$0x1] %vm342_vm2, %v11440_v1  ;;  %v569_v9 = vld [vmem:[#allocation2 + $0x9] sm:$0xff]  ;;  %v483_v15 = vld [vmem:[%s8235_s16 + $0x60] sm:$0xff] }
  0x1a   : > { %358 = vst.msk [vmem:[#allocation2 + $0x168] sm:$0x1] %vm342_vm2, %v11440_v1  ;;  %359 = vst.msk [vmem:[#allocation2 + $0x180] sm:$0x1] %vm342_vm2, %v11440_v1  ;;  %v481_v13 = vld [vmem:[%s8235_s16 + $0x50] sm:$0xff]  ;;  %v480_v14 = vld [vmem:[%s8235_s16 + $0x48] sm:$0xff] }
  0x1b   : > { %362 = vst.msk [vmem:[#allocation2 + $0x29] sm:$0x1] %vm342_vm2, %v11440_v1  ;;  %363 = vst.msk [vmem:[#allocation2 + $0x41] sm:$0x1] %vm342_vm2, %v11440_v1  ;;  %v482_v16 = vld [vmem:[%s8235_s16 + $0x58] sm:$0xff]  ;;  %v485_v17 = vld [vmem:[%s8235_s16 + $0x70] sm:$0xff] }
  0x1c   : > { %364 = vst.msk [vmem:[#allocation2 + $0x59] sm:$0x1] %vm342_vm2, %v11440_v1  ;;  %365 = vst.msk [vmem:[#allocation2 + $0x71] sm:$0x1] %vm342_vm2, %v11440_v1  ;;  %v484_v18 = vld [vmem:[%s8235_s16 + $0x68] sm:$0xff]  ;;  %v487_v19 = vld [vmem:[%s8235_s16 + $0x80] sm:$0xff]  ;;  %859 = vrot.lane.b32.xlu0 %v569_v9, %s8057_s17 }
  0x1d   : > { %366 = vst.msk [vmem:[#allocation2 + $0x89] sm:$0x1] %vm342_vm2, %v11440_v1  ;;  %367 = vst.msk [vmem:[#allocation2 + $0xa1] sm:$0x1] %vm342_vm2, %v11440_v1  ;;  %v486_v20 = vld [vmem:[%s8235_s16 + $0x78] sm:$0xff]  ;;  %v489_v21 = vld [vmem:[%s8235_s16 + $0x90] sm:$0xff] }
  0x1e   : > { %368 = vst.msk [vmem:[#allocation2 + $0xb9] sm:$0x1] %vm342_vm2, %v11440_v1  ;;  %369 = vst.msk [vmem:[#allocation2 + $0xd1] sm:$0x1] %vm342_vm2, %v11440_v1  ;;  %v488_v22 = vld [vmem:[%s8235_s16 + $0x88] sm:$0xff]  ;;  %v491_v23 = vld [vmem:[%s8235_s16 + $0xa0] sm:$0xff] }
  0x1f   : > { %370 = vst.msk [vmem:[#allocation2 + $0xe9] sm:$0x1] %vm342_vm2, %v11440_v1  ;;  %371 = vst.msk [vmem:[#allocation2 + $0x101] sm:$0x1] %vm342_vm2, %v11440_v1  ;;  %v490_v24 = vld [vmem:[%s8235_s16 + $0x98] sm:$0xff]  ;;  %v493_v25 = vld [vmem:[%s8235_s16 + $0xb0] sm:$0xff] }
  0x20   : > { %372 = vst.msk [vmem:[#allocation2 + $0x119] sm:$0x1] %vm342_vm2, %v11440_v1  ;;  %373 = vst.msk [vmem:[#allocation2 + $0x131] sm:$0x1] %vm342_vm2, %v11440_v1  ;;  %v492_v29 = vld [vmem:[%s8235_s16 + $0xa8] sm:$0xff]  ;;  %v495_v30 = vld [vmem:[%s8235_s16 + $0xc0] sm:$0xff] }
  0x21   : > { %374 = vst.msk [vmem:[#allocation2 + $0x149] sm:$0x1] %vm342_vm2, %v11440_v1  ;;  %375 = vst.msk [vmem:[#allocation2 + $0x161] sm:$0x1] %vm342_vm2, %v11440_v1  ;;  %v494_v34 = vld [vmem:[%s8235_s16 + $0xb8] sm:$0xff]  ;;  %v497_v35 = vld [vmem:[%s8235_s16 + $0xd0] sm:$0xff] }
  0x22   : > { %376 = vst.msk [vmem:[#allocation2 + $0x179] sm:$0x1] %vm342_vm2, %v11440_v1  ;;  %377 = vst.msk [vmem:[#allocation2 + $0x191] sm:$0x1] %vm342_vm2, %v11440_v1  ;;  %v496_v36 = vld [vmem:[%s8235_s16 + $0xc8] sm:$0xff]  ;;  %v499_v37 = vld [vmem:[%s8235_s16 + $0xe0] sm:$0xff] }
  0x23   : > { %361 = vst.msk [vmem:[#allocation2 + $0x11] sm:$0x1] %vm342_vm2, %v11440_v1  ;;  %343 = vst.msk [vmem:[#allocation2] sm:$0x1] %vm342_vm2, %v11440_v1  ;;  %v498_v38 = vld [vmem:[%s8235_s16 + $0xd8] sm:$0xff]  ;;  %v500_v40 = vld [vmem:[%s8235_s16 + $0xe8] sm:$0xff] }
  0x24   : > { %360 = vst.msk [vmem:[#allocation2 + $0x198] sm:$0x1] %vm342_vm2, %v11440_v1  ;;  %378 = vst.msk [vmem:[#allocation2 + $0x1a9] sm:$0x1] %vm342_vm2, %v11440_v1  ;;  %v600_v63 = vld [vmem:[#allocation2 + $0x2] sm:$0xff]  ;;  %s8064_s10 = smov 21  }
  0x25   : > { %504 = vst.msk [vmem:[#allocation2 + $0x19] sm:$0xff] %vm333_vm0, %v471_v2  ;;  %506 = vst.msk [vmem:[#allocation2 + $0x31] sm:$0xff] %vm333_vm0, %v473_v3  ;;  %s8065_s8 = smov 24   ;;  %vm1980_vm9 = vcmask 121856   ;;  %vm2013_vm10 = vcmask 146432   ;;  %vm2046_vm11 = vcmask 171008  }
  0x26   : > { %505 = vst.msk [vmem:[#allocation2 + $0x21] sm:$0xff] %vm333_vm0, %v472_v4  ;;  %508 = vst.msk [vmem:[#allocation2 + $0x49] sm:$0xff] %vm333_vm0, %v475_v5  ;;  %vm2079_vm12 = vcmask 195584   ;;  %vm2123_vm13 = vcmask 220160   ;;  %vm379_vm14 = vcmask 130048   ;;  %vm388_vm15 = vcmask 122880  }
  0x27   : > { %507 = vst.msk [vmem:[#allocation2 + $0x39] sm:$0xff] %vm333_vm0, %v474_v6  ;;  %510 = vst.msk [vmem:[#allocation2 + $0x61] sm:$0xff] %vm333_vm0, %v477_v7  ;;  %vm382_vm1 = vcmask 123904   ;;  %vm425_vm2 = vcmask 261120   ;;  %s8067_s15 = smov 16   ;;  %s8068_s22 = smov 48  }
  0x28   : > { %509 = vst.msk [vmem:[#allocation2 + $0x51] sm:$0xff] %vm333_vm0, %v476_v10  ;;  %512 = vst.msk [vmem:[#allocation2 + $0x79] sm:$0xff] %vm333_vm0, %v479_v11  ;;  %s8069_s23 = smov 32   ;;  %s8072_s24 = smov 112  }
  0x29   : > { %511 = vst.msk [vmem:[#allocation2 + $0x69] sm:$0xff] %vm333_vm0, %v478_v12  ;;  %514 = vst.msk [vmem:[#allocation2 + $0x91] sm:$0xff] %vm333_vm0, %v481_v13  ;;  %s8073_s25 = smov 96  }
  0x2a   : > { %513 = vst.msk [vmem:[#allocation2 + $0x81] sm:$0xff] %vm333_vm0, %v480_v14  ;;  %516 = vst.msk [vmem:[#allocation2 + $0xa9] sm:$0xff] %vm333_vm0, %v483_v15  ;;  %v601_v3 = vld [vmem:[#allocation2 + $0xa] sm:$0xff] }
  0x2b   : > { %515 = vst.msk [vmem:[#allocation2 + $0x99] sm:$0xff] %vm333_vm0, %v482_v16  ;;  %518 = vst.msk [vmem:[#allocation2 + $0xc1] sm:$0xff] %vm333_vm0, %v485_v17 }
  0x2c   : > { %517 = vst.msk [vmem:[#allocation2 + $0xb1] sm:$0xff] %vm333_vm0, %v484_v18  ;;  %520 = vst.msk [vmem:[#allocation2 + $0xd9] sm:$0xff] %vm333_vm0, %v487_v19  ;;  %v8280_v26 = vld [vmem:[#allocation2 + $0x19] sm:$0xff]  ;;  %v8282_v27 = vld [vmem:[#allocation2 + $0x31] sm:$0xff] }
  0x2d   : > { %519 = vst.msk [vmem:[#allocation2 + $0xc9] sm:$0xff] %vm333_vm0, %v486_v20  ;;  %522 = vst.msk [vmem:[#allocation2 + $0xf1] sm:$0xff] %vm333_vm0, %v489_v21  ;;  %861 = vrot.lane.b32.xlu1 %v8280_v26, %s8057_s17  ;;  %v8289_v28 = vld [vmem:[#allocation2 + $0x21] sm:$0xff]  ;;  %865 = vrot.lane.b32.xlu0 %v8282_v27, %s8057_s17  ;;  %v8297_v31 = vld [vmem:[#allocation2 + $0x49] sm:$0xff] }
  0x2e   : > { %521 = vst.msk [vmem:[#allocation2 + $0xe1] sm:$0xff] %vm333_vm0, %v488_v22  ;;  %524 = vst.msk [vmem:[#allocation2 + $0x109] sm:$0xff] %vm333_vm0, %v491_v23  ;;  %v8301_v32 = vld [vmem:[#allocation2 + $0x39] sm:$0xff]  ;;  %v8305_v33 = vld [vmem:[#allocation2 + $0x61] sm:$0xff] }
  0x2f   : > { %523 = vst.msk [vmem:[#allocation2 + $0xf9] sm:$0xff] %vm333_vm0, %v490_v24  ;;  %526 = vst.msk [vmem:[#allocation2 + $0x121] sm:$0xff] %vm333_vm0, %v493_v25  ;;  %v8317_v39 = vld [vmem:[#allocation2 + $0x51] sm:$0xff]  ;;  %v8325_v41 = vld [vmem:[#allocation2 + $0x79] sm:$0xff] }
  0x30   : > { %525 = vst.msk [vmem:[#allocation2 + $0x111] sm:$0xff] %vm333_vm0, %v492_v29  ;;  %528 = vst.msk [vmem:[#allocation2 + $0x139] sm:$0xff] %vm333_vm0, %v495_v30  ;;  %v8329_v42 = vld [vmem:[#allocation2 + $0x69] sm:$0xff]  ;;  %v8333_v43 = vld [vmem:[#allocation2 + $0x91] sm:$0xff] }
  0x31   : > { %863 = vrot.lane.b32.xlu1 %v8289_v28, %s8057_s17  ;;  %869 = vrot.lane.b32.xlu0 %v8297_v31, %s8057_s17  ;;  %527 = vst.msk [vmem:[#allocation2 + $0x129] sm:$0xff] %vm333_vm0, %v494_v34  ;;  %530 = vst.msk [vmem:[#allocation2 + $0x151] sm:$0xff] %vm333_vm0, %v497_v35  ;;  %v8337_v44 = vld [vmem:[#allocation2 + $0x81] sm:$0xff]  ;;  %v8341_v45 = vld [vmem:[#allocation2 + $0xa9] sm:$0xff] }
  0x32   : > { %529 = vst.msk [vmem:[#allocation2 + $0x141] sm:$0xff] %vm333_vm0, %v496_v36  ;;  %532 = vst.msk [vmem:[#allocation2 + $0x169] sm:$0xff] %vm333_vm0, %v499_v37  ;;  %v8345_v46 = vld [vmem:[#allocation2 + $0x99] sm:$0xff]  ;;  %v584_v47 = vld [vmem:[#allocation2 + $0xc1] sm:$0xff] }
  0x33   : > { %531 = vst.msk [vmem:[#allocation2 + $0x159] sm:$0xff] %vm333_vm0, %v498_v38  ;;  %533 = vst.msk [vmem:[#allocation2 + $0x171] sm:$0xff] %vm333_vm0, %v500_v40  ;;  %v8351_v48 = vld [vmem:[#allocation2 + $0xb1] sm:$0xff]  ;;  %v586_v49 = vld [vmem:[#allocation2 + $0xd9] sm:$0xff] }
  0x34   : > { %v585_v50 = vld [vmem:[#allocation2 + $0xc9] sm:$0xff]  ;;  %v588_v51 = vld [vmem:[#allocation2 + $0xf1] sm:$0xff]  ;;  %v8371_v2 = vld [vmem:[#allocation2 + $0x1a] sm:$0xff] }
  0x35   : > { %867 = vrot.lane.b32.xlu1 %v8301_v32, %s8057_s17  ;;  %873 = vrot.lane.b32.xlu0 %v8305_v33, %s8057_s17  ;;  %v587_v52 = vld [vmem:[#allocation2 + $0xe1] sm:$0xff]  ;;  %v590_v53 = vld [vmem:[#allocation2 + $0x109] sm:$0xff]  ;;  %v8376_v4 = vld [vmem:[#allocation2 + $0x32] sm:$0xff] }
  0x36   : > { %v589_v54 = vld [vmem:[#allocation2 + $0xf9] sm:$0xff]  ;;  %v592_v55 = vld [vmem:[#allocation2 + $0x121] sm:$0xff]  ;;  %v8383_v6 = vld [vmem:[#allocation2 + $0x4a] sm:$0xff] }
  0x37   : > { %v591_v56 = vld [vmem:[#allocation2 + $0x111] sm:$0xff]  ;;  %v594_v57 = vld [vmem:[#allocation2 + $0x139] sm:$0xff]  ;;  %v8379_v5 = vld [vmem:[#allocation2 + $0x22] sm:$0xff] }
  0x38   : > { %v593_v58 = vld [vmem:[#allocation2 + $0x129] sm:$0xff]  ;;  %v596_v59 = vld [vmem:[#allocation2 + $0x151] sm:$0xff]  ;;  %v8387_v7 = vld [vmem:[#allocation2 + $0x3a] sm:$0xff] }
  0x39   : > { %871 = vrot.lane.b32.xlu1 %v8317_v39, %s8057_s17  ;;  %877 = vrot.lane.b32.xlu0 %v8325_v41, %s8057_s17  ;;  %v595_v60 = vld [vmem:[#allocation2 + $0x141] sm:$0xff]  ;;  %v598_v61 = vld [vmem:[#allocation2 + $0x169] sm:$0xff]  ;;  %v8395_v9 = vld [vmem:[#allocation2 + $0x52] sm:$0xff] }
  0x3a   : > { %v597_v62 = vld [vmem:[#allocation2 + $0x159] sm:$0xff]  ;;  %v599_v0 = vld [vmem:[#allocation2 + $0x171] sm:$0xff]  ;;  %v8391_v8 = vld [vmem:[#allocation2 + $0x62] sm:$0xff] }
  0x3b   : > { %v8399_v10 = vld [vmem:[#allocation2 + $0x7a] sm:$0xff]  ;;  %v8403_v11 = vld [vmem:[#allocation2 + $0x6a] sm:$0xff]  ;;  %v8407_v12 = vld [vmem:[#allocation2 + $0x92] sm:$0xff] }
  0x3c   : > { %v8411_v13 = vld [vmem:[#allocation2 + $0x82] sm:$0xff]  ;;  %v8415_v14 = vld [vmem:[#allocation2 + $0xaa] sm:$0xff]  ;;  %v8419_v15 = vld [vmem:[#allocation2 + $0x9a] sm:$0xff] }
  0x3d   : > { %875 = vrot.lane.b32.xlu1 %v8329_v42, %s8057_s17  ;;  %881 = vrot.lane.b32.xlu0 %v8333_v43, %s8057_s17  ;;  %v8423_v16 = vld [vmem:[#allocation2 + $0xc2] sm:$0xff]  ;;  %v8427_v17 = vld [vmem:[#allocation2 + $0xb2] sm:$0xff]  ;;  %v8431_v18 = vld [vmem:[#allocation2 + $0xda] sm:$0xff] }
  0x3e   : > { %v8435_v19 = vld [vmem:[#allocation2 + $0xca] sm:$0xff]  ;;  %v620_v20 = vld [vmem:[#allocation2 + $0xf2] sm:$0xff]  ;;  %v8441_v21 = vld [vmem:[#allocation2 + $0xe2] sm:$0xff] }
  0x3f   : > { %v622_v22 = vld [vmem:[#allocation2 + $0x10a] sm:$0xff]  ;;  %v621_v23 = vld [vmem:[#allocation2 + $0xfa] sm:$0xff]  ;;  %v624_v24 = vld [vmem:[#allocation2 + $0x122] sm:$0xff] }
  0x40   : > { %v623_v25 = vld [vmem:[#allocation2 + $0x112] sm:$0xff]  ;;  %v626_v29 = vld [vmem:[#allocation2 + $0x13a] sm:$0xff]  ;;  %v625_v34 = vld [vmem:[#allocation2 + $0x12a] sm:$0xff] }
  0x41   : > { %879 = vrot.lane.b32.xlu1 %v8337_v44, %s8057_s17  ;;  %885 = vrot.lane.b32.xlu0 %v8341_v45, %s8057_s17  ;;  %v628_v35 = vld [vmem:[#allocation2 + $0x152] sm:$0xff]  ;;  %v627_v37 = vld [vmem:[#allocation2 + $0x142] sm:$0xff]  ;;  %v630_v40 = vld [vmem:[#allocation2 + $0x16a] sm:$0xff] }
  0x42   : > { %vm6833_vm5 = vmpackc.low %vm2220_vm3, %vm8063_vm4  ;;  %vm3796_vm3 = vcmask 523264   ;;  %vm3829_vm4 = vcmask 654336  }
  0x45   : > { %883 = vrot.lane.b32.xlu1 %v8345_v46, %s8057_s17  ;;  %889 = vrot.lane.b32.xlu0 %v584_v47, %s8057_s17 }
  0x49   : > { %887 = vrot.lane.b32.xlu1 %v8351_v48, %s8057_s17  ;;  %893 = vrot.lane.b32.xlu0 %v586_v49, %s8057_s17  ;;  %v629_v49 = vld [vmem:[#allocation2 + $0x15a] sm:$0xff] }
  0x4d   : > { %891 = vrot.lane.b32.xlu1 %v585_v50, %s8057_s17  ;;  %897 = vrot.lane.b32.xlu0 %v588_v51, %s8057_s17 }
  0x51   : > { %895 = vrot.lane.b32.xlu1 %v587_v52, %s8057_s17  ;;  %901 = vrot.lane.b32.xlu0 %v590_v53, %s8057_s17  ;;  %v8468_v52 = vld [vmem:[#allocation2 + $0x18] sm:$0xff] }
  0x52   : > { %v631_v53 = vld [vmem:[#allocation2 + $0x172] sm:$0xff] }
  0x55   : > { %899 = vrot.lane.b32.xlu1 %v589_v54, %s8057_s17  ;;  %905 = vrot.lane.b32.xlu0 %v592_v55, %s8057_s17 }
  0x59   : > { %903 = vrot.lane.b32.xlu1 %v591_v56, %s8057_s17  ;;  %909 = vrot.lane.b32.xlu0 %v594_v57, %s8057_s17  ;;  %v8481_v57 = vld [vmem:[#allocation2 + $0x20] sm:$0xff] }
  0x5d   : > { %907 = vrot.lane.b32.xlu1 %v593_v58, %s8057_s17  ;;  %913 = vrot.lane.b32.xlu0 %v596_v59, %s8057_s17 }
  0x61   : > { %911 = vrot.lane.b32.xlu1 %v595_v60, %s8057_s17  ;;  %917 = vrot.lane.b32.xlu0 %v598_v61, %s8057_s17  ;;  %v2112_v60 = vld [vmem:[%s11431_s1] sm:$0xff] }
  0x65   : > { %915 = vrot.lane.b32.xlu1 %v597_v62, %s8057_s17  ;;  %985 = vrot.lane.b32.xlu0 %v600_v63, %s8058_s18  ;;  %v8501_v63 = vld [vmem:[#allocation2 + $0x30] sm:$0xff] }
  0x69   : > { %919 = vrot.lane.b32.xlu1 %v599_v0, %s8057_s17  ;;  %989 = vrot.lane.b32.xlu0 %v8371_v2, %s8058_s18 }
  0x6d   : > { %987 = vrot.lane.b32.xlu1 %v601_v3, %s8058_s18  ;;  %993 = vrot.lane.b32.xlu0 %v8376_v4, %s8058_s18  ;;  %v2115_v3 = vld [vmem:[%s11431_s1 + $0x18] sm:$0x7] }
  0x71   : > { %991 = vrot.lane.b32.xlu1 %v8379_v5, %s8058_s18  ;;  %997 = vrot.lane.b32.xlu0 %v8383_v6, %s8058_s18 }
  0x75   : > { %995 = vrot.lane.b32.xlu1 %v8387_v7, %s8058_s18  ;;  %1001 = vrot.lane.b32.xlu0 %v8391_v8, %s8058_s18 }
  0x79   : > { %999 = vrot.lane.b32.xlu1 %v8395_v9, %s8058_s18  ;;  %1005 = vrot.lane.b32.xlu0 %v8399_v10, %s8058_s18 }
  0x7d   : > { %1003 = vrot.lane.b32.xlu1 %v8403_v11, %s8058_s18  ;;  %1009 = vrot.lane.b32.xlu0 %v8407_v12, %s8058_s18 }
  0x81   : > { %1007 = vrot.lane.b32.xlu1 %v8411_v13, %s8058_s18  ;;  %1013 = vrot.lane.b32.xlu0 %v8415_v14, %s8058_s18 }
  0x85   : > { %1011 = vrot.lane.b32.xlu1 %v8419_v15, %s8058_s18  ;;  %1017 = vrot.lane.b32.xlu0 %v8423_v16, %s8058_s18 }
  0x89   : > { %1015 = vrot.lane.b32.xlu1 %v8427_v17, %s8058_s18  ;;  %1021 = vrot.lane.b32.xlu0 %v8431_v18, %s8058_s18 }
  0x8a   : > { %v8449_v30 = vpop.permute.xlu0 %857 }
  0x8d   : > { %1019 = vrot.lane.b32.xlu1 %v8435_v19, %s8058_s18  ;;  %1025 = vrot.lane.b32.xlu0 %v620_v20, %s8058_s18 }
  0x8e   : > { %v8453_v36 = vpop.permute.xlu0 %859 }
  0x91   : > { %1023 = vrot.lane.b32.xlu1 %v8441_v21, %s8058_s18  ;;  %1029 = vrot.lane.b32.xlu0 %v622_v22, %s8058_s18  ;;  %v8517_v22 = vld [vmem:[#allocation2 + $0x38] sm:$0xff] }
  0x95   : > { %1027 = vrot.lane.b32.xlu1 %v621_v23, %s8058_s18  ;;  %1033 = vrot.lane.b32.xlu0 %v624_v24, %s8058_s18 }
  0x99   : > { %1031 = vrot.lane.b32.xlu1 %v623_v25, %s8058_s18  ;;  %1037 = vrot.lane.b32.xlu0 %v626_v29, %s8058_s18 }
  0x9d   : > { %1035 = vrot.lane.b32.xlu1 %v625_v34, %s8058_s18  ;;  %1041 = vrot.lane.b32.xlu0 %v628_v35, %s8058_s18 }
  0x9f   : > { %v8457_v38 = vpop.permute.xlu1 %861  ;;  %v8459_v47 = vpop.permute.xlu0 %865 }
  0xa1   : > { %1039 = vrot.lane.b32.xlu1 %v627_v37, %s8058_s18  ;;  %1045 = vrot.lane.b32.xlu0 %v630_v40, %s8058_s18 }
  0xa3   : > { %v8463_v50 = vpop.permute.xlu1 %863  ;;  %v8465_v51 = vpop.permute.xlu0 %869 }
  0xa5   : > { %1043 = vrot.lane.b32.xlu1 %v629_v49, %s8058_s18  ;;  %1113 = vrot.lane.b32.xlu0 %v8468_v52, %s8059_s19 }
  0xa7   : > { %v8472_v54 = vpop.permute.xlu1 %867  ;;  %v8474_v55 = vpop.permute.xlu0 %873 }
  0xa9   : > { %1047 = vrot.lane.b32.xlu1 %v631_v53, %s8058_s18  ;;  %1241 = vrot.lane.b32.xlu0 %v8280_v26, %s8060_s20  ;;  %v2113_v26 = vld [vmem:[%s11431_s1 + $0x8] sm:$0xff] }
  0xaa   : > { %v6828_v62 = vpack.c.bf16 %v2113_v26, %v2112_v60  ;;  %v8573_v26 = vld [vmem:[#allocation2 + $0x50] sm:$0xff] }
  0xab   : > { %v8479_v56 = vpop.permute.xlu1 %871  ;;  %v8483_v58 = vpop.permute.xlu0 %877 }
  0xac   : > { %6829 = vmatprep.subr.bf16.mxu0 %v6828_v62 }
  0xad   : > { %1115 = vrot.lane.b32.xlu1 %v8481_v57, %s8059_s19  ;;  %1369 = vrot.lane.b32.xlu0 %v8371_v2, %s8061_s21  ;;  %v2114_v2 = vld [vmem:[%s11431_s1 + $0x10] sm:$0xff] }
  0xae   : > { %6831 = vmatpush3.bf16.msra.mxu0 %v6828_v62  ;;  %v6832_v20 = vpack.c.bf16 %v2115_v3, %v2114_v2 }
  0xaf   : > { %v8489_v59 = vpop.permute.xlu1 %875  ;;  %v8497_v61 = vpop.permute.xlu0 %881 }
  0xb0   : > { %6834 = vmatprep.subr.msk.bf16.mxu0 %vm6833_vm5, %v6832_v20 }
  0xb1   : > { %1243 = vrot.lane.b32.xlu1 %v8289_v28, %s8060_s20  ;;  %1497 = vrot.lane.b32.xlu0 %v8501_v63, %s8062_s26 }
  0xb2   : > { %6837 = vmatpush3.bf16.msk.msra.mxu0 %vm6833_vm5, %v6832_v20  ;;  %vm3862_vm5 = vcmask 785408  }
  0xb3   : > { %v8505_v0 = vpop.permute.xlu1 %879  ;;  %v8513_v28 = vpop.permute.xlu0 %885 }
  0xb4   : > { %11445 = vst [vmem:[#allocation6_spill] sm:$0xff] %v8513_v28  ;;  %v537_v28 = vld [vmem:[#allocation2 + $0x8] sm:$0xff] }
  0xb5   : > { %1371 = vrot.lane.b32.xlu1 %v8379_v5, %s8061_s21  ;;  %1499 = vrot.lane.b32.xlu0 %v8517_v22, %s8062_s26 }
  0xb7   : > { %v8521_v23 = vpop.permute.xlu1 %883  ;;  %v8523_v24 = vpop.permute.xlu0 %889 }
  0xb8   : > { %11446 = vst [vmem:[#allocation7_spill] sm:$0xff] %v8521_v23  ;;  %11447 = vst [vmem:[#allocation8_spill] sm:$0xff] %v8523_v24 }
  0xb9   : > { %1117 = vrot.lane.b32.xlu1 %v8501_v63, %s8059_s19  ;;  %1119 = vrot.lane.b32.xlu0 %v8517_v22, %s8059_s19 }
  0xbb   : > { %v8529_v5 = vpop.permute.xlu1 %887  ;;  %v8531_v25 = vpop.permute.xlu0 %893 }
  0xbc   : > { %11448 = vst [vmem:[#allocation9_spill] sm:$0xff] %v8529_v5  ;;  %11449 = vst [vmem:[#allocation10_spill] sm:$0xff] %v8531_v25 }
  0xbd   : > { %1625 = vrot.lane.b32.xlu1 %v8282_v27, %s8064_s10  ;;  %1627 = vrot.lane.b32.xlu0 %v8301_v32, %s8064_s10 }
  0xbf   : > { %v8537_v29 = vpop.permute.xlu1 %891  ;;  %v8539_v34 = vpop.permute.xlu0 %897 }
  0xc0   : > { %11450 = vst [vmem:[#allocation11_spill] sm:$0xff] %v8537_v29  ;;  %11451 = vst [vmem:[#allocation12_spill] sm:$0xff] %v8539_v34  ;;  %v8677_v29 = vld [vmem:[#allocation2 + $0x80] sm:$0xff] }
  0xc1   : > { %1245 = vrot.lane.b32.xlu1 %v8282_v27, %s8060_s20  ;;  %1247 = vrot.lane.b32.xlu0 %v8301_v32, %s8060_s20  ;;  %v8559_v27 = vld [vmem:[#allocation2 + $0x48] sm:$0xff] }
  0xc3   : > { %v8545_v35 = vpop.permute.xlu1 %895  ;;  %v8547_v37 = vpop.permute.xlu0 %901 }
  0xc4   : > { %11452 = vst [vmem:[#allocation13_spill] sm:$0xff] %v8545_v35  ;;  %11453 = vst [vmem:[#allocation14_spill] sm:$0xff] %v8547_v37  ;;  %v8663_v35 = vld [vmem:[#allocation2 + $0x78] sm:$0xff] }
  0xc5   : > { %1753 = vrot.lane.b32.xlu1 %v8376_v4, %s8065_s8  ;;  %1755 = vrot.lane.b32.xlu0 %v8387_v7, %s8065_s8 }
  0xc7   : > { %v8553_v40 = vpop.permute.xlu1 %899  ;;  %v8555_v49 = vpop.permute.xlu0 %905 }
  0xc8   : > { %11454 = vst [vmem:[#allocation15_spill] sm:$0xff] %v8553_v40  ;;  %11455 = vst [vmem:[#allocation16_spill] sm:$0xff] %v8555_v49 }
  0xc9   : > { %1373 = vrot.lane.b32.xlu1 %v8376_v4, %s8061_s21  ;;  %1501 = vrot.lane.b32.xlu0 %v8559_v27, %s8062_s26 }
  0xcb   : > { %v8563_v32 = vpop.permute.xlu1 %903  ;;  %v8565_v53 = vpop.permute.xlu0 %909 }
  0xcc   : > { %11456 = vst [vmem:[#allocation17_spill] sm:$0xff] %v8563_v32  ;;  %11457 = vst [vmem:[#allocation18_spill] sm:$0xff] %v8565_v53 }
  0xcd   : > { %1375 = vrot.lane.b32.xlu1 %v8387_v7, %s8061_s21  ;;  %1629 = vrot.lane.b32.xlu0 %v8297_v31, %s8064_s10 }
  0xcf   : > { %v8571_v60 = vpop.permute.xlu1 %907  ;;  %v8575_v4 = vpop.permute.xlu0 %913 }
  0xd0   : > { %11458 = vst [vmem:[#allocation19_spill] sm:$0xff] %v8571_v60  ;;  %11459 = vst [vmem:[#allocation20_spill] sm:$0xff] %v8575_v4  ;;  %v8611_v4 = vld [vmem:[#allocation2 + $0x60] sm:$0xff] }
  0xd1   : > { %1503 = vrot.lane.b32.xlu1 %v8573_v26, %s8062_s26  ;;  %1757 = vrot.lane.b32.xlu0 %v8383_v6, %s8065_s8 }
  0xd3   : > { %v8581_v62 = vpop.permute.xlu1 %911  ;;  %v8583_v2 = vpop.permute.xlu0 %917 }
  0xd4   : > { %11460 = vst [vmem:[#allocation21_spill] sm:$0xff] %v8581_v62  ;;  %11461 = vst [vmem:[#allocation22_spill] sm:$0xff] %v8583_v2  ;;  %v8625_v62 = vld [vmem:[#allocation2 + $0x68] sm:$0xff] }
  0xd5   : > { %1631 = vrot.lane.b32.xlu1 %v8317_v39, %s8064_s10  ;;  %1121 = vrot.lane.b32.xlu0 %v8559_v27, %s8059_s19 }
  0xd7   : > { %v8589_v7 = vpop.permute.xlu1 %915  ;;  %v8591_v3 = vpop.permute.xlu0 %985 }
  0xd8   : > { %11462 = vst [vmem:[#allocation23_spill] sm:$0xff] %v8589_v7 }
  0xd9   : > { %1759 = vrot.lane.b32.xlu1 %v8395_v9, %s8065_s8  ;;  %1249 = vrot.lane.b32.xlu0 %v8297_v31, %s8060_s20 }
  0xdb   : > { %v8597_v20 = vpop.permute.xlu1 %919  ;;  %v8599_v1 = vpop.permute.xlu0 %989 }
  0xdc   : > { %11463 = vst [vmem:[#allocation24_spill] sm:$0xff] %v8597_v20 }
  0xdd   : > { %1123 = vrot.lane.b32.xlu1 %v8573_v26, %s8059_s19  ;;  %1377 = vrot.lane.b32.xlu0 %v8383_v6, %s8061_s21 }
  0xdf   : > { %v8605_v2 = vpop.permute.xlu1 %987  ;;  %v8607_v7 = vpop.permute.xlu0 %993 }
  0xe1   : > { %1251 = vrot.lane.b32.xlu1 %v8317_v39, %s8060_s20  ;;  %1505 = vrot.lane.b32.xlu0 %v8611_v4, %s8062_s26 }
  0xe3   : > { %v8615_v31 = vpop.permute.xlu1 %991  ;;  %v8617_v20 = vpop.permute.xlu0 %997 }
  0xe5   : > { %1379 = vrot.lane.b32.xlu1 %v8395_v9, %s8061_s21  ;;  %1633 = vrot.lane.b32.xlu0 %v8305_v33, %s8064_s10 }
  0xe7   : > { %v8623_v6 = vpop.permute.xlu1 %995  ;;  %v8627_v39 = vpop.permute.xlu0 %1001 }
  0xe9   : > { %1507 = vrot.lane.b32.xlu1 %v8625_v62, %s8062_s26  ;;  %1761 = vrot.lane.b32.xlu0 %v8391_v8, %s8065_s8 }
  0xeb   : > { %v8633_v53 = vpop.permute.xlu1 %999  ;;  %v8635_v60 = vpop.permute.xlu0 %1005 }
  0xed   : > { %1635 = vrot.lane.b32.xlu1 %v8329_v42, %s8064_s10  ;;  %1125 = vrot.lane.b32.xlu0 %v8611_v4, %s8059_s19 }
  0xef   : > { %v8641_v9 = vpop.permute.xlu1 %1003  ;;  %v8643_v49 = vpop.permute.xlu0 %1009 }
  0xf0   : > { %11464 = vst [vmem:[#allocation25_spill] sm:$0xff] %v8643_v49 }
  0xf1   : > { %1763 = vrot.lane.b32.xlu1 %v8403_v11, %s8065_s8  ;;  %1253 = vrot.lane.b32.xlu0 %v8305_v33, %s8060_s20 }
  0xf3   : > { %v8649_v32 = vpop.permute.xlu1 %1007  ;;  %v8651_v37 = vpop.permute.xlu0 %1013 }
  0xf4   : > { %11465 = vst [vmem:[#allocation26_spill] sm:$0xff] %v8651_v37  ;;  %v536_v37 = vld [vmem:[#allocation2] sm:$0xff] }
  0xf5   : > { %1127 = vrot.lane.b32.xlu1 %v8625_v62, %s8059_s19  ;;  %1381 = vrot.lane.b32.xlu0 %v8391_v8, %s8061_s21 }
  0xf7   : > { %v8657_v40 = vpop.permute.xlu1 %1011  ;;  %v8659_v34 = vpop.permute.xlu0 %1017 }
  0xf8   : > { %11466 = vst [vmem:[#allocation27_spill] sm:$0xff] %v8657_v40  ;;  %11467 = vst [vmem:[#allocation28_spill] sm:$0xff] %v8659_v34  ;;  %v8761_v40 = vld [vmem:[#allocation2 + $0xb0] sm:$0xff] }
  0xf9   : > { %1255 = vrot.lane.b32.xlu1 %v8329_v42, %s8060_s20  ;;  %1509 = vrot.lane.b32.xlu0 %v8663_v35, %s8062_s26 }
  0xfb   : > { %v8667_v33 = vpop.permute.xlu1 %1015  ;;  %v8669_v25 = vpop.permute.xlu0 %1021 }
  0xfc   : > { %11468 = vst [vmem:[#allocation29_spill] sm:$0xff] %v8667_v33  ;;  %11469 = vst [vmem:[#allocation30_spill] sm:$0xff] %v8669_v25  ;;  %v8751_v33 = vld [vmem:[#allocation2 + $0xa8] sm:$0xff] }
  0xfd   : > { %1383 = vrot.lane.b32.xlu1 %v8403_v11, %s8061_s21  ;;  %1637 = vrot.lane.b32.xlu0 %v8325_v41, %s8064_s10 }
  0xff   : > { %v8675_v8 = vpop.permute.xlu1 %1019  ;;  %v8679_v42 = vpop.permute.xlu0 %1025 }
 0x100   : > { %11470 = vst [vmem:[#allocation31_spill] sm:$0xff] %v8675_v8  ;;  %11471 = vst [vmem:[#allocation32_spill] sm:$0xff] %v8679_v42 }
 0x101   : > { %1511 = vrot.lane.b32.xlu1 %v8677_v29, %s8062_s26  ;;  %1765 = vrot.lane.b32.xlu0 %v8399_v10, %s8065_s8 }
 0x103   : > { %v8685_v34 = vpop.permute.xlu1 %1023  ;;  %v8687_v25 = vpop.permute.xlu0 %1029 }
 0x104   : > { %11472 = vst [vmem:[#allocation33_spill] sm:$0xff] %v8685_v34  ;;  %11473 = vst [vmem:[#allocation34_spill] sm:$0xff] %v8687_v25 }
 0x105   : > { %1639 = vrot.lane.b32.xlu1 %v8337_v44, %s8064_s10  ;;  %1129 = vrot.lane.b32.xlu0 %v8663_v35, %s8059_s19 }
 0x107   : > { %v8693_v11 = vpop.permute.xlu1 %1027  ;;  %v8695_v8 = vpop.permute.xlu0 %1033 }
 0x108   : > { %11474 = vst [vmem:[#allocation35_spill] sm:$0xff] %v8693_v11  ;;  %11475 = vst [vmem:[#allocation36_spill] sm:$0xff] %v8695_v8  ;;  %v8715_v8 = vld [vmem:[#allocation2 + $0x90] sm:$0xff] }
 0x109   : > { %1767 = vrot.lane.b32.xlu1 %v8411_v13, %s8065_s8  ;;  %1257 = vrot.lane.b32.xlu0 %v8325_v41, %s8060_s20  ;;  %11480 = vst [vmem:[#allocation41_spill] sm:$0xff] %v8715_v8 }
 0x10b   : > { %v8701_v42 = vpop.permute.xlu1 %1031  ;;  %v8703_v34 = vpop.permute.xlu0 %1037 }
 0x10c   : > { %11476 = vst [vmem:[#allocation37_spill] sm:$0xff] %v8701_v42  ;;  %11477 = vst [vmem:[#allocation38_spill] sm:$0xff] %v8703_v34 }
 0x10d   : > { %1131 = vrot.lane.b32.xlu1 %v8677_v29, %s8059_s19  ;;  %1385 = vrot.lane.b32.xlu0 %v8399_v10, %s8061_s21 }
 0x10f   : > { %v8709_v25 = vpop.permute.xlu1 %1035  ;;  %v8711_v11 = vpop.permute.xlu0 %1041 }
 0x110   : > { %11478 = vst [vmem:[#allocation39_spill] sm:$0xff] %v8709_v25  ;;  %11479 = vst [vmem:[#allocation40_spill] sm:$0xff] %v8711_v11  ;;  %v8729_v11 = vld [vmem:[#allocation2 + $0x98] sm:$0xff] }
 0x111   : > { %1259 = vrot.lane.b32.xlu1 %v8337_v44, %s8060_s20  ;;  %1513 = vrot.lane.b32.xlu0 %v8715_v8, %s8062_s26  ;;  %11484 = vst [vmem:[#allocation45_spill] sm:$0xff] %v8729_v11 }
 0x113   : > { %v8719_v41 = vpop.permute.xlu1 %1039  ;;  %v8721_v34 = vpop.permute.xlu0 %1045 }
 0x114   : > { %11481 = vst [vmem:[#allocation42_spill] sm:$0xff] %v8719_v41  ;;  %11482 = vst [vmem:[#allocation43_spill] sm:$0xff] %v8721_v34 }
 0x115   : > { %1387 = vrot.lane.b32.xlu1 %v8411_v13, %s8061_s21  ;;  %1641 = vrot.lane.b32.xlu0 %v8333_v43, %s8064_s10 }
 0x117   : > { %v8727_v10 = vpop.permute.xlu1 %1043  ;;  %v1114_v44 = vpop.permute.xlu0 %1113 }
 0x118   : > { %11483 = vst [vmem:[#allocation44_spill] sm:$0xff] %v8727_v10 }
 0x119   : > { %1515 = vrot.lane.b32.xlu1 %v8729_v11, %s8062_s26  ;;  %1769 = vrot.lane.b32.xlu0 %v8407_v12, %s8065_s8 }
 0x11b   : > { %v8735_v41 = vpop.permute.xlu1 %1047  ;;  %v1242_v34 = vpop.permute.xlu0 %1241 }
 0x11c   : > { %11485 = vst [vmem:[#allocation46_spill] sm:$0xff] %v8735_v41 }
 0x11d   : > { %1643 = vrot.lane.b32.xlu1 %v8345_v46, %s8064_s10  ;;  %1133 = vrot.lane.b32.xlu0 %v8715_v8, %s8059_s19 }
 0x11f   : > { %v1116_v13 = vpop.permute.xlu1 %1115  ;;  %v1370_v10 = vpop.permute.xlu0 %1369 }
 0x121   : > { %1771 = vrot.lane.b32.xlu1 %v8419_v15, %s8065_s8  ;;  %1261 = vrot.lane.b32.xlu0 %v8333_v43, %s8060_s20 }
 0x123   : > { %v1244_v25 = vpop.permute.xlu1 %1243  ;;  %v1498_v42 = vpop.permute.xlu0 %1497 }
 0x125   : > { %1135 = vrot.lane.b32.xlu1 %v8729_v11, %s8059_s19  ;;  %1389 = vrot.lane.b32.xlu0 %v8407_v12, %s8061_s21  ;;  %v1850_v11 = vsel %vm333_vm0, %v537_v28, %v8453_v36 }
 0x127   : > { %v1372_v41 = vpop.permute.xlu1 %1371  ;;  %v1500_v24 = vpop.permute.xlu0 %1499 }
 0x129   : > { %1263 = vrot.lane.b32.xlu1 %v8345_v46, %s8060_s20  ;;  %1517 = vrot.lane.b32.xlu0 %v8751_v33, %s8062_s26  ;;  %v1849_v46 = vsel %vm333_vm0, %v536_v37, %v8449_v30 }
 0x12b   : > { %v1118_v5 = vpop.permute.xlu1 %1117  ;;  %v8755_v43 = vpop.permute.xlu0 %1119 }
 0x12d   : > { %1391 = vrot.lane.b32.xlu1 %v8419_v15, %s8061_s21  ;;  %1645 = vrot.lane.b32.xlu0 %v8341_v45, %s8064_s10  ;;  %v1882_v15 = vsel %vm1881_vm6, %v1849_v46, %v8591_v3  ;;  %v1883_v45 = vsel %vm1881_vm6, %v1850_v11, %v8605_v2 }
 0x12e   : > { %v1915_v49 = vsel %vm1914_vm7, %v1882_v15, %v1114_v44  ;;  %v1916_v8 = vsel %vm1914_vm7, %v1883_v45, %v1116_v13 }
 0x12f   : > { %v1626_v12 = vpop.permute.xlu1 %1625  ;;  %v1628_v23 = vpop.permute.xlu0 %1627  ;;  %v1948_v36 = vsel %vm1947_vm8, %v1915_v49, %v1242_v34  ;;  %v1949_v28 = vsel %vm1947_vm8, %v1916_v8, %v1244_v25  ;;  %v676_v8 = vld [vmem:[#allocation2 + $0xa9] sm:$0xff] }
 0x130   : > { %v1981_v37 = vsel %vm1980_vm9, %v1948_v36, %v1370_v10  ;;  %v1982_v3 = vsel %vm1980_vm9, %v1949_v28, %v1372_v41 }
 0x131   : > { %1519 = vrot.lane.b32.xlu1 %v8761_v40, %s8062_s26  ;;  %1773 = vrot.lane.b32.xlu0 %v8415_v14, %s8065_s8  ;;  %v2014_v11 = vsel %vm2013_vm10, %v1981_v37, %v1498_v42  ;;  %v2015_v25 = vsel %vm2013_vm10, %v1982_v3, %v1500_v24  ;;  %v1851_v24 = vsel %vm333_vm0, %v8468_v52, %v8457_v38  ;;  %v8809_v38 = vld [vmem:[#allocation2 + $0xc0] sm:$0xff] }
 0x132   : > { %v2047_v44 = vsel %vm2046_vm11, %v2014_v11, %v1626_v12  ;;  %v2048_v41 = vsel %vm2046_vm11, %v2015_v25, %v1628_v23  ;;  %v1884_v23 = vsel %vm1881_vm6, %v1851_v24, %v8599_v1  ;;  %v677_v12 = vld [vmem:[#allocation2 + $0xb1] sm:$0xff] }
 0x133   : > { %v1246_v30 = vpop.permute.xlu1 %1245  ;;  %v1248_v2 = vpop.permute.xlu0 %1247  ;;  %v1917_v46 = vsel %vm1914_vm7, %v1884_v23, %v1118_v5  ;;  %v773_v5 = vld [vmem:[#allocation2 + $0xc1] sm:$0xff] }
 0x134   : > { %v1950_v45 = vsel %vm1947_vm8, %v1917_v46, %v1246_v30 }
 0x135   : > { %1647 = vrot.lane.b32.xlu1 %v8351_v48, %s8064_s10  ;;  %1137 = vrot.lane.b32.xlu0 %v8751_v33, %s8059_s19 }
 0x137   : > { %v1754_v34 = vpop.permute.xlu1 %1753  ;;  %v1756_v10 = vpop.permute.xlu0 %1755 }
 0x138   : > { %v2080_v49 = vsel %vm2079_vm12, %v2047_v44, %v1754_v34  ;;  %v2081_v48 = vsel %vm2079_vm12, %v2048_v41, %v1756_v10 }
 0x139   : > { %1775 = vrot.lane.b32.xlu1 %v8427_v17, %s8065_s8  ;;  %6724 = vmatprep.mubr.msk.f32.mxu0 %vm2123_vm13, %v2080_v49  ;;  %v774_v49 = vld [vmem:[#allocation2 + $0xc9] sm:$0xff] }
 0x13a   : > { %1265 = vrot.lane.b32.xlu0 %v676_v8, %s8060_s20  ;;  %6725 = vmatmul.mubr.msk.f32.vlgmr.msra.gmra.mrb[0].mxu0 %vm2123_vm13, %v2081_v48 }
 0x13b   : > { %v1374_v42 = vpop.permute.xlu1 %1373  ;;  %v1502_v13 = vpop.permute.xlu0 %1501 }
 0x13c   : > { %v1983_v36 = vsel %vm1980_vm9, %v1950_v45, %v1374_v42  ;;  %v8856_v45 = vld [vmem:[#allocation2 + $0xd8] sm:$0xff] }
 0x13d   : > { %1139 = vrot.lane.b32.xlu1 %v8761_v40, %s8059_s19  ;;  %v2016_v52 = vsel %vm2013_vm10, %v1983_v36, %v1502_v13  ;;  %v1853_v13 = vsel %vm333_vm0, %v8501_v63, %v8459_v47  ;;  %v775_v63 = vld [vmem:[#allocation2 + $0xd9] sm:$0xff] }
 0x13e   : > { %1393 = vrot.lane.b32.xlu0 %v8415_v14, %s8061_s21  ;;  %v1852_v14 = vsel %vm333_vm0, %v8481_v57, %v8463_v50  ;;  %v8827_v50 = vld [vmem:[#allocation2 + $0xc8] sm:$0xff] }
 0x13f   : > { %v1376_v15 = vpop.permute.xlu1 %1375  ;;  %v1630_v28 = vpop.permute.xlu0 %1629  ;;  %v1885_v3 = vsel %vm1881_vm6, %v1852_v14, %v8615_v31 }
 0x140   : > { %v2049_v30 = vsel %vm2046_vm11, %v2016_v52, %v1630_v28  ;;  %v1918_v44 = vsel %vm1914_vm7, %v1885_v3, %v8755_v43  ;;  %v8875_v3 = vld [vmem:[#allocation2 + $0xe0] sm:$0xff] }
 0x141   : > { %1267 = vrot.lane.b32.xlu1 %v677_v12, %s8060_s20  ;;  %v1951_v57 = vsel %vm1947_vm8, %v1918_v44, %v1248_v2  ;;  %v1886_v12 = vsel %vm1881_vm6, %v1853_v13, %v8607_v7  ;;  %v1854_v7 = vsel %vm333_vm0, %v8517_v22, %v8472_v54 }
 0x142   : > { %1521 = vrot.lane.b32.xlu0 %v8809_v38, %s8062_s26  ;;  %v1984_v25 = vsel %vm1980_vm9, %v1951_v57, %v1376_v15 }
 0x143   : > { %v1504_v1 = vpop.permute.xlu1 %1503  ;;  %v1758_v37 = vpop.permute.xlu0 %1757 }
 0x144   : > { %v2082_v11 = vsel %vm2079_vm12, %v2049_v30, %v1758_v37  ;;  %v2017_v31 = vsel %vm2013_vm10, %v1984_v25, %v1504_v1 }
 0x145   : > { %1395 = vrot.lane.b32.xlu1 %v8427_v17, %s8061_s21  ;;  %6727 = vmatprep.mubr.msk.f32.mxu0 %vm2123_vm13, %v2082_v11 }
 0x146   : > { %1649 = vrot.lane.b32.xlu0 %v773_v5, %s8064_s10 }
 0x147   : > { %v1632_v34 = vpop.permute.xlu1 %1631  ;;  %v1122_v17 = vpop.permute.xlu0 %1121 }
 0x148   : > { %v2050_v43 = vsel %vm2046_vm11, %v2017_v31, %v1632_v34  ;;  %v1919_v46 = vsel %vm1914_vm7, %v1886_v12, %v1122_v17 }
 0x149   : > { %1523 = vrot.lane.b32.xlu1 %v8827_v50, %s8062_s26 }
 0x14a   : > { %1777 = vrot.lane.b32.xlu0 %v8423_v16, %s8065_s8 }
 0x14b   : > { %v1760_v8 = vpop.permute.xlu1 %1759  ;;  %v1250_v10 = vpop.permute.xlu0 %1249 }
 0x14c   : > { %v2083_v41 = vsel %vm2079_vm12, %v2050_v43, %v1760_v8  ;;  %v1952_v36 = vsel %vm1947_vm8, %v1919_v46, %v1250_v10  ;;  %v1855_v8 = vsel %vm333_vm0, %v8559_v27, %v8465_v51  ;;  %v777_v27 = vld [vmem:[#allocation2 + $0xf1] sm:$0xff] }
 0x14d   : > { %1651 = vrot.lane.b32.xlu1 %v774_v49, %s8064_s10  ;;  %6728 = vmatmul.mubr.msk.f32.gmra.mrb[2].mxu0 %vm2123_vm13, %v2083_v41  ;;  %v1888_v10 = vsel %vm1881_vm6, %v1855_v8, %v8617_v20  ;;  %v1856_v20 = vsel %vm333_vm0, %v8573_v26, %v8479_v56  ;;  %v809_v26 = vld [vmem:[#allocation2 + $0xf2] sm:$0xff]  ;;  %v8959_v8 = vld [vmem:[#allocation2 + $0x109] sm:$0xff] }
 0x14e   : > { %1141 = vrot.lane.b32.xlu0 %v8809_v38, %s8059_s19  ;;  %v1889_v46 = vsel %vm1881_vm6, %v1856_v20, %v8633_v53  ;;  %v8992_v20 = vld [vmem:[#allocation2 + $0x111] sm:$0xff] }
 0x14f   : > { %v1124_v2 = vpop.permute.xlu1 %1123  ;;  %v1378_v48 = vpop.permute.xlu0 %1377 }
 0x150   : > { %v1985_v28 = vsel %vm1980_vm9, %v1952_v36, %v1378_v48  ;;  %v8904_v48 = vld [vmem:[#allocation2 + $0xf0] sm:$0xff] }
 0x151   : > { %1779 = vrot.lane.b32.xlu1 %v8435_v19, %s8065_s8 }
 0x152   : > { %1269 = vrot.lane.b32.xlu0 %v773_v5, %s8060_s20  ;;  %v1887_v5 = vsel %vm1881_vm6, %v1854_v7, %v8623_v6  ;;  %v776_v6 = vld [vmem:[#allocation2 + $0xe1] sm:$0xff]  ;;  %v778_v7 = vld [vmem:[#allocation2 + $0xf9] sm:$0xff] }
 0x153   : > { %v1252_v42 = vpop.permute.xlu1 %1251  ;;  %v1506_v24 = vpop.permute.xlu0 %1505  ;;  %v1920_v30 = vsel %vm1914_vm7, %v1887_v5, %v1124_v2 }
 0x154   : > { %v1953_v54 = vsel %vm1947_vm8, %v1920_v30, %v1252_v42 }
 0x155   : > { %1143 = vrot.lane.b32.xlu1 %v8827_v50, %s8059_s19 }
 0x156   : > { %1397 = vrot.lane.b32.xlu0 %v8423_v16, %s8061_s21  ;;  %v2018_v16 = vsel %vm2013_vm10, %v1985_v28, %v1506_v24  ;;  %v713_v24 = vld [vmem:[#allocation2 + $0xe2] sm:$0xff] }
 0x157   : > { %v1380_v23 = vpop.permute.xlu1 %1379  ;;  %v1634_v15 = vpop.permute.xlu0 %1633 }
 0x158   : > { %v2051_v1 = vsel %vm2046_vm11, %v2018_v16, %v1634_v15  ;;  %v1986_v22 = vsel %vm1980_vm9, %v1953_v54, %v1380_v23 }
 0x159   : > { %1271 = vrot.lane.b32.xlu1 %v774_v49, %s8060_s20 }
 0x15a   : > { %1525 = vrot.lane.b32.xlu0 %v8856_v45, %s8062_s26 }
 0x15b   : > { %v1508_v47 = vpop.permute.xlu1 %1507  ;;  %v1762_v52 = vpop.permute.xlu0 %1761 }
 0x15c   : > { %v2084_v14 = vsel %vm2079_vm12, %v2051_v1, %v1762_v52  ;;  %v501_v1 = vld [vmem:[%s8235_s16 + $0xf0] sm:$0xff] }
 0x15d   : > { %1399 = vrot.lane.b32.xlu1 %v8435_v19, %s8061_s21  ;;  %6730 = vmatprep.mubr.msk.f32.mxu0 %vm2123_vm13, %v2084_v14  ;;  %v2019_v19 = vsel %vm2013_vm10, %v1986_v22, %v1508_v47  ;;  %v8922_v47 = vld [vmem:[#allocation2 + $0xf8] sm:$0xff]  ;;  %534 = vst.msk [vmem:[#allocation2 + $0x181] sm:$0xff] %vm333_vm0, %v501_v1 }
 0x15e   : > { %1653 = vrot.lane.b32.xlu0 %v775_v63, %s8064_s10  ;;  %v502_v22 = vld [vmem:[%s8235_s16 + $0xf8] sm:$0xff] }
 0x15f   : > { %v1636_v37 = vpop.permute.xlu1 %1635  ;;  %v1126_v11 = vpop.permute.xlu0 %1125  ;;  %535 = vst.msk [vmem:[#allocation2 + $0x189] sm:$0xff] %vm333_vm0, %v502_v22 }
 0x160   : > { %v2052_v44 = vsel %vm2046_vm11, %v2019_v19, %v1636_v37  ;;  %v810_v37 = vld [vmem:[#allocation2 + $0xfa] sm:$0xff] }
 0x161   : > { %1527 = vrot.lane.b32.xlu1 %v8875_v3, %s8062_s26 }
 0x162   : > { %1781 = vrot.lane.b32.xlu0 %v8431_v18, %s8065_s8 }
 0x163   : > { %v1764_v34 = vpop.permute.xlu1 %1763  ;;  %v1254_v25 = vpop.permute.xlu0 %1253 }
 0x164   : > { %v2085_v57 = vsel %vm2079_vm12, %v2052_v44, %v1764_v34  ;;  %v1857_v44 = vsel %vm333_vm0, %v8611_v4, %v8474_v55 }
 0x165   : > { %1655 = vrot.lane.b32.xlu1 %v776_v6, %s8064_s10  ;;  %6731 = vmatmul.mubr.msk.f32.gmra.mrb[4].mxu0 %vm2123_vm13, %v2085_v57  ;;  %v1890_v57 = vsel %vm1881_vm6, %v1857_v44, %v8627_v39  ;;  %v1858_v39 = vsel %vm333_vm0, %v8625_v62, %v8489_v59  ;;  %v11486_v59 = vmov 0.0   ;;  %v8981_v62 = vld [vmem:[#allocation2 + $0x110] sm:$0xff] }
 0x166   : > { %1145 = vrot.lane.b32.xlu0 %v8856_v45, %s8059_s19  ;;  %380 = vst.msk [vmem:[#allocation3] sm:$0xff] %vm379_vm14, %v11486_v59  ;;  %381 = vst.msk [vmem:[#allocation3 + $0x8] sm:$0xff] %vm379_vm14, %v11486_v59 }
 0x167   : > { %v1128_v17 = vpop.permute.xlu1 %1127  ;;  %v1382_v31 = vpop.permute.xlu0 %1381  ;;  %385 = vst.msk [vmem:[#allocation3 + $0x198] sm:$0xff] %vm379_vm14, %v11486_v59  ;;  %386 = vst.msk [vmem:[#allocation3 + $0x1a0] sm:$0xff] %vm379_vm14, %v11486_v59 }
 0x168   : > { %v1922_v36 = vsel %vm1914_vm7, %v1889_v46, %v1128_v17  ;;  %390 = vst.msk [vmem:[#allocation3 + $0x18] sm:$0x1] %vm388_vm15, %v11486_v59  ;;  %389 = vst.msk [vmem:[#allocation3] sm:$0x1] %vm388_vm15, %v11486_v59 }
 0x169   : > { %1783 = vrot.lane.b32.xlu1 %v8441_v21, %s8065_s8  ;;  %v1921_v21 = vsel %vm1914_vm7, %v1888_v10, %v1126_v11  ;;  %391 = vst.msk [vmem:[#allocation3 + $0x30] sm:$0x1] %vm388_vm15, %v11486_v59  ;;  %392 = vst.msk [vmem:[#allocation3 + $0x48] sm:$0x1] %vm388_vm15, %v11486_v59 }
 0x16a   : > { %1273 = vrot.lane.b32.xlu0 %v775_v63, %s8060_s20  ;;  %v1954_v42 = vsel %vm1947_vm8, %v1921_v21, %v1254_v25  ;;  %v1891_v21 = vsel %vm1881_vm6, %v1858_v39, %v8641_v9  ;;  %393 = vst.msk [vmem:[#allocation3 + $0x60] sm:$0x1] %vm388_vm15, %v11486_v59  ;;  %394 = vst.msk [vmem:[#allocation3 + $0x78] sm:$0x1] %vm388_vm15, %v11486_v59 }
 0x16b   : > { %v1256_v49 = vpop.permute.xlu1 %1255  ;;  %v1510_v43 = vpop.permute.xlu0 %1509  ;;  %v1987_v13 = vsel %vm1980_vm9, %v1954_v42, %v1382_v31  ;;  %v8952_v31 = vld [vmem:[#allocation2 + $0x108] sm:$0xff]  ;;  %395 = vst.msk [vmem:[#allocation3 + $0x90] sm:$0x1] %vm388_vm15, %v11486_v59  ;;  %396 = vst.msk [vmem:[#allocation3 + $0xa8] sm:$0x1] %vm388_vm15, %v11486_v59 }
 0x16c   : > { %v2020_v51 = vsel %vm2013_vm10, %v1987_v13, %v1510_v43  ;;  %v1955_v56 = vsel %vm1947_vm8, %v1922_v36, %v1256_v49  ;;  %v8984_v13 = vld [vmem:[#allocation2 + $0x10a] sm:$0xff]  ;;  %397 = vst.msk [vmem:[#allocation3 + $0xc0] sm:$0x1] %vm388_vm15, %v11486_v59  ;;  %398 = vst.msk [vmem:[#allocation3 + $0xd8] sm:$0x1] %vm388_vm15, %v11486_v59  ;;  %v812_v36 = vld [vmem:[#allocation2 + $0x112] sm:$0xff] }
 0x16d   : > { %1147 = vrot.lane.b32.xlu1 %v8875_v3, %s8059_s19  ;;  %399 = vst.msk [vmem:[#allocation3 + $0xf0] sm:$0x1] %vm388_vm15, %v11486_v59  ;;  %400 = vst.msk [vmem:[#allocation3 + $0x108] sm:$0x1] %vm388_vm15, %v11486_v59 }
 0x16e   : > { %1401 = vrot.lane.b32.xlu0 %v8431_v18, %s8061_s21  ;;  %401 = vst.msk [vmem:[#allocation3 + $0x120] sm:$0x1] %vm388_vm15, %v11486_v59  ;;  %402 = vst.msk [vmem:[#allocation3 + $0x138] sm:$0x1] %vm388_vm15, %v11486_v59 }
 0x16f   : > { %v1384_v41 = vpop.permute.xlu1 %1383  ;;  %v1638_v2 = vpop.permute.xlu0 %1637  ;;  %403 = vst.msk [vmem:[#allocation3 + $0x150] sm:$0x1] %vm388_vm15, %v11486_v59  ;;  %404 = vst.msk [vmem:[#allocation3 + $0x168] sm:$0x1] %vm388_vm15, %v11486_v59 }
 0x170   : > { %v2053_v23 = vsel %vm2046_vm11, %v2020_v51, %v1638_v2  ;;  %v1988_v16 = vsel %vm1980_vm9, %v1955_v56, %v1384_v41  ;;  %405 = vst.msk [vmem:[#allocation3 + $0x180] sm:$0x1] %vm388_vm15, %v11486_v59  ;;  %406 = vst.msk [vmem:[#allocation3 + $0x198] sm:$0x1] %vm388_vm15, %v11486_v59 }
 0x171   : > { %1275 = vrot.lane.b32.xlu1 %v776_v6, %s8060_s20  ;;  %408 = vst.msk [vmem:[#allocation3 + $0x29] sm:$0x1] %vm388_vm15, %v11486_v59  ;;  %409 = vst.msk [vmem:[#allocation3 + $0x41] sm:$0x1] %vm388_vm15, %v11486_v59 }
 0x172   : > { %1529 = vrot.lane.b32.xlu0 %v8904_v48, %s8062_s26  ;;  %410 = vst.msk [vmem:[#allocation3 + $0x59] sm:$0x1] %vm388_vm15, %v11486_v59  ;;  %411 = vst.msk [vmem:[#allocation3 + $0x71] sm:$0x1] %vm388_vm15, %v11486_v59 }
 0x173   : > { %v1512_v18 = vpop.permute.xlu1 %1511  ;;  %v1766_v12 = vpop.permute.xlu0 %1765  ;;  %412 = vst.msk [vmem:[#allocation3 + $0x89] sm:$0x1] %vm388_vm15, %v11486_v59  ;;  %413 = vst.msk [vmem:[#allocation3 + $0xa1] sm:$0x1] %vm388_vm15, %v11486_v59 }
 0x174   : > { %v2086_v15 = vsel %vm2079_vm12, %v2053_v23, %v1766_v12  ;;  %v2021_v53 = vsel %vm2013_vm10, %v1988_v16, %v1512_v18  ;;  %414 = vst.msk [vmem:[#allocation3 + $0xb9] sm:$0x1] %vm388_vm15, %v11486_v59  ;;  %415 = vst.msk [vmem:[#allocation3 + $0xd1] sm:$0x1] %vm388_vm15, %v11486_v59 }
 0x175   : > { %1403 = vrot.lane.b32.xlu1 %v713_v24, %s8061_s21  ;;  %6733 = vmatprep.mubr.msk.f32.mxu0 %vm2123_vm13, %v2086_v15  ;;  %416 = vst.msk [vmem:[#allocation3 + $0xe9] sm:$0x1] %vm388_vm15, %v11486_v59  ;;  %417 = vst.msk [vmem:[#allocation3 + $0x101] sm:$0x1] %vm388_vm15, %v11486_v59 }
 0x176   : > { %1657 = vrot.lane.b32.xlu0 %v777_v27, %s8064_s10  ;;  %418 = vst.msk [vmem:[#allocation3 + $0x119] sm:$0x1] %vm388_vm15, %v11486_v59  ;;  %419 = vst.msk [vmem:[#allocation3 + $0x131] sm:$0x1] %vm388_vm15, %v11486_v59 }
 0x177   : > { %v1640_v28 = vpop.permute.xlu1 %1639  ;;  %v1130_v63 = vpop.permute.xlu0 %1129  ;;  %420 = vst.msk [vmem:[#allocation3 + $0x149] sm:$0x1] %vm388_vm15, %v11486_v59  ;;  %421 = vst.msk [vmem:[#allocation3 + $0x161] sm:$0x1] %vm388_vm15, %v11486_v59 }
 0x178   : > { %v2054_v52 = vsel %vm2046_vm11, %v2021_v53, %v1640_v28  ;;  %v1923_v25 = vsel %vm1914_vm7, %v1890_v57, %v1130_v63  ;;  %422 = vst.msk [vmem:[#allocation3 + $0x179] sm:$0x1] %vm388_vm15, %v11486_v59  ;;  %423 = vst.msk [vmem:[#allocation3 + $0x191] sm:$0x1] %vm388_vm15, %v11486_v59  ;;  %v1859_v63 = vsel %vm333_vm0, %v8663_v35, %v8483_v58 }
 0x179   : > { %1531 = vrot.lane.b32.xlu1 %v8922_v47, %s8062_s26  ;;  %383 = vst.msk [vmem:[#allocation3 + $0x10] sm:$0x3] %vm382_vm1, %v11486_v59  ;;  %387 = vst.msk [vmem:[#allocation3 + $0x1a8] sm:$0x3] %vm382_vm1, %v11486_v59 }
 0x17a   : > { %1785 = vrot.lane.b32.xlu0 %v809_v26, %s8065_s8  ;;  %407 = vst.msk [vmem:[#allocation3 + $0x11] sm:$0x1] %vm388_vm15, %v11486_v59  ;;  %424 = vst.msk [vmem:[#allocation3 + $0x1a9] sm:$0x1] %vm388_vm15, %v11486_v59 }
 0x17b   : > { %v1768_v5 = vpop.permute.xlu1 %1767  ;;  %v1258_v30 = vpop.permute.xlu0 %1257  ;;  %426 = vst.msk [vmem:[#allocation4] sm:$0xff] %vm425_vm2, %v11486_v59  ;;  %427 = vst.msk [vmem:[#allocation4 + $0x8] sm:$0xff] %vm425_vm2, %v11486_v59 }
 0x17c   : > { %v2087_v14 = vsel %vm2079_vm12, %v2054_v52, %v1768_v5  ;;  %v1956_v49 = vsel %vm1947_vm8, %v1923_v25, %v1258_v30  ;;  %v9093_v5 = vld [vmem:[#allocation2 + $0x120] sm:$0xff]  ;;  %431 = vst.msk [vmem:[#allocation4 + $0x198] sm:$0xff] %vm425_vm2, %v11486_v59  ;;  %432 = vst.msk [vmem:[#allocation4 + $0x1a0] sm:$0xff] %vm425_vm2, %v11486_v59 }
 0x17d   : > { %1659 = vrot.lane.b32.xlu1 %v778_v7, %s8064_s10  ;;  %6734 = vmatmul.mubr.msk.f32.gmra.mrb[6].mxu0 %vm2123_vm13, %v2087_v14 }
 0x17e   : > { %1149 = vrot.lane.b32.xlu0 %v8904_v48, %s8059_s19 }
 0x17f   : > { %v1132_v54 = vpop.permute.xlu1 %1131  ;;  %v1386_v11 = vpop.permute.xlu0 %1385 }
 0x180   : > { %v1989_v43 = vsel %vm1980_vm9, %v1956_v49, %v1386_v11  ;;  %v1924_v42 = vsel %vm1914_vm7, %v1891_v21, %v1132_v54 }
 0x181   : > { %1787 = vrot.lane.b32.xlu1 %v810_v37, %s8065_s8 }
 0x182   : > { %1277 = vrot.lane.b32.xlu0 %v777_v27, %s8060_s20 }
 0x183   : > { %v1260_v19 = vpop.permute.xlu1 %1259  ;;  %v1514_v6 = vpop.permute.xlu0 %1513 }
 0x184   : > { %v2022_v4 = vsel %vm2013_vm10, %v1989_v43, %v1514_v6  ;;  %v1957_v9 = vsel %vm1947_vm8, %v1924_v42, %v1260_v19 }
 0x185   : > { %1151 = vrot.lane.b32.xlu1 %v8922_v47, %s8059_s19 }
 0x186   : > { %1405 = vrot.lane.b32.xlu0 %v809_v26, %s8061_s21 }
 0x187   : > { %v1388_v34 = vpop.permute.xlu1 %1387  ;;  %v1642_v17 = vpop.permute.xlu0 %1641 }
 0x188   : > { %v2055_v41 = vsel %vm2046_vm11, %v2022_v4, %v1642_v17  ;;  %v1990_v18 = vsel %vm1980_vm9, %v1957_v9, %v1388_v34  ;;  %v9111_v34 = vld [vmem:[#allocation2 + $0x128] sm:$0xff] }
 0x189   : > { %1279 = vrot.lane.b32.xlu1 %v778_v7, %s8060_s20  ;;  %v1892_v7 = vsel %vm1881_vm6, %v1859_v63, %v8635_v60  ;;  %v781_v60 = vld [vmem:[#allocation2 + $0x121] sm:$0xff]  ;;  %v782_v17 = vld [vmem:[#allocation2 + $0x129] sm:$0xff] }
 0x18a   : > { %1533 = vrot.lane.b32.xlu0 %v8952_v31, %s8062_s26  ;;  %v11488_v9 = vld [vmem:[#allocation25_spill] sm:$0xff] }
 0x18b   : > { %v1516_v55 = vpop.permute.xlu1 %1515  ;;  %v1770_v10 = vpop.permute.xlu0 %1769 }
 0x18c   : > { %v2088_v2 = vsel %vm2079_vm12, %v2055_v41, %v1770_v10  ;;  %v2023_v27 = vsel %vm2013_vm10, %v1990_v18, %v1516_v55  ;;  %v751_v18 = vld [vmem:[#allocation2 + $0x138] sm:$0xff] }
 0x18d   : > { %1407 = vrot.lane.b32.xlu1 %v810_v37, %s8061_s21  ;;  %6736 = vmatprep.mubr.msk.f32.mxu0 %vm2123_vm13, %v2088_v2  ;;  %v1860_v37 = vsel %vm333_vm0, %v8677_v29, %v8505_v0  ;;  %v813_v29 = vld [vmem:[#allocation2 + $0x122] sm:$0xff] }
 0x18e   : > { %1661 = vrot.lane.b32.xlu0 %v8959_v8, %s8064_s10  ;;  %v1893_v11 = vsel %vm1881_vm6, %v1860_v37, %v8649_v32  ;;  %v11487_v2 = vld [vmem:[#allocation41_spill] sm:$0xff]  ;;  %v784_v37 = vld [vmem:[#allocation2 + $0x141] sm:$0xff] }
 0x18f   : > { %v1644_v24 = vpop.permute.xlu1 %1643  ;;  %v8987_v51 = vpop.permute.xlu0 %1133  ;;  %v1861_v42 = vsel %vm333_vm0, %v11487_v2, %v8497_v61  ;;  %v11494_v2 = vld [vmem:[#allocation9_spill] sm:$0xff] }
 0x190   : > { %v2056_v23 = vsel %vm2046_vm11, %v2023_v27, %v1644_v24  ;;  %v1925_v1 = vsel %vm1914_vm7, %v1892_v7, %v8987_v51  ;;  %v752_v7 = vld [vmem:[#allocation2 + $0x140] sm:$0xff] }
 0x191   : > { %1535 = vrot.lane.b32.xlu1 %v8981_v62, %s8062_s26 }
 0x192   : > { %1789 = vrot.lane.b32.xlu0 %v8984_v13, %s8065_s8 }
 0x193   : > { %v1772_v12 = vpop.permute.xlu1 %1771  ;;  %v1262_v15 = vpop.permute.xlu0 %1261 }
 0x194   : > { %v2089_v46 = vsel %vm2079_vm12, %v2056_v23, %v1772_v12  ;;  %v1958_v14 = vsel %vm1947_vm8, %v1925_v1, %v1262_v15  ;;  %v11489_v15 = vld [vmem:[#allocation7_spill] sm:$0xff] }
 0x195   : > { %1663 = vrot.lane.b32.xlu1 %v8992_v20, %s8064_s10  ;;  %6737 = vmatmul.mubr.msk.f32.gmra.mrb[8].mxu0 %vm2123_vm13, %v2089_v46  ;;  %v783_v46 = vld [vmem:[#allocation2 + $0x139] sm:$0xff] }
 0x196   : > { %1153 = vrot.lane.b32.xlu0 %v8952_v31, %s8059_s19 }
 0x197   : > { %v1136_v28 = vpop.permute.xlu1 %1135  ;;  %v1390_v56 = vpop.permute.xlu0 %1389 }
 0x198   : > { %v1991_v58 = vsel %vm1980_vm9, %v1958_v14, %v1390_v56  ;;  %v1926_v6 = vsel %vm1914_vm7, %v1893_v11, %v1136_v28 }
 0x199   : > { %1791 = vrot.lane.b32.xlu1 %v812_v36, %s8065_s8 }
 0x19a   : > { %1281 = vrot.lane.b32.xlu0 %v8959_v8, %s8060_s20  ;;  %v814_v8 = vld [vmem:[#allocation2 + $0x12a] sm:$0xff] }
 0x19b   : > { %v1264_v26 = vpop.permute.xlu1 %1263  ;;  %v1518_v16 = vpop.permute.xlu0 %1517 }
 0x19c   : > { %v2024_v30 = vsel %vm2013_vm10, %v1991_v58, %v1518_v16  ;;  %v1959_v0 = vsel %vm1947_vm8, %v1926_v6, %v1264_v26  ;;  %v11491_v16 = vld [vmem:[#allocation27_spill] sm:$0xff]  ;;  %v816_v6 = vld [vmem:[#allocation2 + $0x142] sm:$0xff] }
 0x19d   : > { %1155 = vrot.lane.b32.xlu1 %v8981_v62, %s8059_s19  ;;  %v815_v58 = vld [vmem:[#allocation2 + $0x13a] sm:$0xff] }
 0x19e   : > { %1409 = vrot.lane.b32.xlu0 %v8984_v13, %s8061_s21  ;;  %v1894_v13 = vsel %vm1881_vm6, %v1861_v42, %v11488_v9  ;;  %v1864_v42 = vsel %vm333_vm0, %v8761_v40, %v11494_v2 }
 0x19f   : > { %v1392_v53 = vpop.permute.xlu1 %1391  ;;  %v1646_v52 = vpop.permute.xlu0 %1645 }
 0x1a0   : > { %v2057_v54 = vsel %vm2046_vm11, %v2024_v30, %v1646_v52  ;;  %v1992_v57 = vsel %vm1980_vm9, %v1959_v0, %v1392_v53 }
 0x1a1   : > { %1283 = vrot.lane.b32.xlu1 %v8992_v20, %s8060_s20 }
 0x1a2   : > { %1537 = vrot.lane.b32.xlu0 %v9093_v5, %s8062_s26 }
 0x1a3   : > { %v1520_v35 = vpop.permute.xlu1 %1519  ;;  %v1774_v22 = vpop.permute.xlu0 %1773 }
 0x1a4   : > { %v2090_v19 = vsel %vm2079_vm12, %v2057_v54, %v1774_v22  ;;  %v2025_v32 = vsel %vm2013_vm10, %v1992_v57, %v1520_v35 }
 0x1a5   : > { %1411 = vrot.lane.b32.xlu1 %v812_v36, %s8061_s21  ;;  %6739 = vmatprep.mubr.msk.f32.mxu0 %vm2123_vm13, %v2090_v19  ;;  %v11490_v36 = vld [vmem:[#allocation45_spill] sm:$0xff] }
 0x1a6   : > { %1665 = vrot.lane.b32.xlu0 %v781_v60, %s8064_s10  ;;  %v1862_v28 = vsel %vm333_vm0, %v11490_v36, %v11489_v15  ;;  %v786_v36 = vld [vmem:[#allocation2 + $0x159] sm:$0xff] }
 0x1a7   : > { %v1648_v44 = vpop.permute.xlu1 %1647  ;;  %v1138_v25 = vpop.permute.xlu0 %1137  ;;  %v1895_v63 = vsel %vm1881_vm6, %v1862_v28, %v11491_v16 }
 0x1a8   : > { %v2058_v49 = vsel %vm2046_vm11, %v2025_v32, %v1648_v44  ;;  %v1927_v51 = vsel %vm1914_vm7, %v1894_v13, %v1138_v25  ;;  %v11492_v25 = vld [vmem:[#allocation6_spill] sm:$0xff]  ;;  %v11495_v13 = vld [vmem:[#allocation29_spill] sm:$0xff] }
 0x1a9   : > { %1539 = vrot.lane.b32.xlu1 %v9111_v34, %s8062_s26  ;;  %v1863_v32 = vsel %vm333_vm0, %v8751_v33, %v11492_v25 }
 0x1aa   : > { %1793 = vrot.lane.b32.xlu0 %v813_v29, %s8065_s8 }
 0x1ab   : > { %v1776_v43 = vpop.permute.xlu1 %1775 }
 0x1ac   : > { %v2091_v55 = vsel %vm2079_vm12, %v2058_v49, %v1776_v43  ;;  %v1266_v4 = vpop.permute.xlu0 %1265  ;;  %v11493_v49 = vld [vmem:[#allocation26_spill] sm:$0xff] }
 0x1ad   : > { %1667 = vrot.lane.b32.xlu1 %v782_v17, %s8064_s10  ;;  %6740 = vmatmul.mubr.msk.f32.gmra.mrb[10].mxu0 %vm2123_vm13, %v2091_v55  ;;  %v1960_v20 = vsel %vm1947_vm8, %v1927_v51, %v1266_v4  ;;  %v1896_v43 = vsel %vm1881_vm6, %v1863_v32, %v11493_v49  ;;  %v753_v55 = vld [vmem:[#allocation2 + $0x150] sm:$0xff]  ;;  %v11499_v32 = vld [vmem:[#allocation31_spill] sm:$0xff] }
 0x1ae   : > { %1157 = vrot.lane.b32.xlu0 %v9093_v5, %s8059_s19 }
 0x1af   : > { %v1140_v39 = vpop.permute.xlu1 %1139 }
 0x1b0   : > { %v1394_v41 = vpop.permute.xlu0 %1393  ;;  %v1928_v1 = vsel %vm1914_vm7, %v1895_v63, %v1140_v39  ;;  %v818_v63 = vld [vmem:[#allocation2 + $0x15a] sm:$0xff] }
 0x1b1   : > { %1795 = vrot.lane.b32.xlu1 %v814_v8, %s8065_s8  ;;  %v1993_v23 = vsel %vm1980_vm9, %v1960_v20, %v1394_v41 }
 0x1b2   : > { %1285 = vrot.lane.b32.xlu0 %v781_v60, %s8060_s20 }
 0x1b3   : > { %v1268_v10 = vpop.permute.xlu1 %1267 }
 0x1b4   : > { %v1522_v21 = vpop.permute.xlu0 %1521  ;;  %v1961_v14 = vsel %vm1947_vm8, %v1928_v1, %v1268_v10 }
 0x1b5   : > { %1159 = vrot.lane.b32.xlu1 %v9111_v34, %s8059_s19  ;;  %v2026_v61 = vsel %vm2013_vm10, %v1993_v23, %v1522_v21  ;;  %v785_v21 = vld [vmem:[#allocation2 + $0x151] sm:$0xff] }
 0x1b6   : > { %1413 = vrot.lane.b32.xlu0 %v813_v29, %s8061_s21 }
 0x1b7   : > { %v1396_v24 = vpop.permute.xlu1 %1395 }
 0x1b8   : > { %v1650_v27 = vpop.permute.xlu0 %1649  ;;  %v1994_v35 = vsel %vm1980_vm9, %v1961_v14, %v1396_v24  ;;  %v11496_v14 = vld [vmem:[#allocation8_spill] sm:$0xff] }
 0x1b9   : > { %1287 = vrot.lane.b32.xlu1 %v782_v17, %s8060_s20  ;;  %v2059_v56 = vsel %vm2046_vm11, %v2026_v61, %v1650_v27  ;;  %v754_v27 = vld [vmem:[#allocation2 + $0x158] sm:$0xff] }
 0x1ba   : > { %1541 = vrot.lane.b32.xlu0 %v751_v18, %s8062_s26 }
 0x1bb   : > { %v1524_v12 = vpop.permute.xlu1 %1523 }
 0x1bc   : > { %v1778_v26 = vpop.permute.xlu0 %1777  ;;  %v2027_v60 = vsel %vm2013_vm10, %v1994_v35, %v1524_v12  ;;  %v817_v12 = vld [vmem:[#allocation2 + $0x152] sm:$0xff] }
 0x1bd   : > { %1415 = vrot.lane.b32.xlu1 %v814_v8, %s8061_s21  ;;  %v2092_v53 = vsel %vm2079_vm12, %v2059_v56, %v1778_v26 }
 0x1be   : > { %1669 = vrot.lane.b32.xlu0 %v783_v46, %s8064_s10  ;;  %6742 = vmatprep.mubr.msk.f32.mxu0 %vm2123_vm13, %v2092_v53 }
 0x1bf   : > { %v1652_v52 = vpop.permute.xlu1 %1651 }
 0x1c0   : > { %v1142_v30 = vpop.permute.xlu0 %1141  ;;  %v2060_v54 = vsel %vm2046_vm11, %v2027_v60, %v1652_v52 }
 0x1c1   : > { %1543 = vrot.lane.b32.xlu1 %v752_v7, %s8062_s26  ;;  %v1929_v4 = vsel %vm1914_vm7, %v1896_v43, %v1142_v30  ;;  %v11497_v30 = vld [vmem:[#allocation28_spill] sm:$0xff]  ;;  %v756_v43 = vld [vmem:[#allocation2 + $0x170] sm:$0xff] }
 0x1c2   : > { %1797 = vrot.lane.b32.xlu0 %v815_v58, %s8065_s8 }
 0x1c3   : > { %v1780_v22 = vpop.permute.xlu1 %1779 }
 0x1c4   : > { %v2093_v11 = vsel %vm2079_vm12, %v2060_v54, %v1780_v22  ;;  %v1270_v19 = vpop.permute.xlu0 %1269 }
 0x1c5   : > { %1671 = vrot.lane.b32.xlu1 %v784_v37, %s8064_s10  ;;  %6743 = vmatmul.mubr.msk.f32.gmra.mrb[12].mxu0 %vm2123_vm13, %v2093_v11  ;;  %v1962_v39 = vsel %vm1947_vm8, %v1929_v4, %v1270_v19 }
 0x1c6   : > { %1161 = vrot.lane.b32.xlu0 %v751_v18, %s8059_s19  ;;  %v1897_v18 = vsel %vm1881_vm6, %v1864_v42, %v11495_v13 }
 0x1c7   : > { %v1144_v44 = vpop.permute.xlu1 %1143 }
 0x1c8   : > { %v1398_v0 = vpop.permute.xlu0 %1397  ;;  %v1930_v20 = vsel %vm1914_vm7, %v1897_v18, %v1144_v44  ;;  %v787_v44 = vld [vmem:[#allocation2 + $0x169] sm:$0xff] }
 0x1c9   : > { %1799 = vrot.lane.b32.xlu1 %v816_v6, %s8065_s8  ;;  %v1995_v41 = vsel %vm1980_vm9, %v1962_v39, %v1398_v0  ;;  %v11498_v0 = vld [vmem:[#allocation11_spill] sm:$0xff] }
 0x1ca   : > { %1289 = vrot.lane.b32.xlu0 %v783_v46, %s8060_s20 }
 0x1cb   : > { %v1272_v29 = vpop.permute.xlu1 %1271 }
 0x1cc   : > { %v1526_v57 = vpop.permute.xlu0 %1525  ;;  %v1963_v40 = vsel %vm1947_vm8, %v1930_v20, %v1272_v29  ;;  %v1866_v29 = vsel %vm333_vm0, %v8827_v50, %v11498_v0  ;;  %v11500_v20 = vld [vmem:[#allocation10_spill] sm:$0xff]  ;;  %v790_v0 = vld [vmem:[#allocation2 + $0x189] sm:$0xff] }
 0x1cd   : > { %1163 = vrot.lane.b32.xlu1 %v752_v7, %s8059_s19  ;;  %v2028_v33 = vsel %vm2013_vm10, %v1995_v41, %v1526_v57 }
 0x1ce   : > { %1417 = vrot.lane.b32.xlu0 %v815_v58, %s8061_s21  ;;  %v1865_v58 = vsel %vm333_vm0, %v8809_v38, %v11496_v14 }
 0x1cf   : > { %v1400_v17 = vpop.permute.xlu1 %1399  ;;  %v1898_v60 = vsel %vm1881_vm6, %v1865_v58, %v11497_v30 }
 0x1d0   : > { %v1654_v8 = vpop.permute.xlu0 %1653  ;;  %v1996_v61 = vsel %vm1980_vm9, %v1963_v40, %v1400_v17  ;;  %v1899_v17 = vsel %vm1881_vm6, %v1866_v29, %v11499_v32  ;;  %v3931_v32 = vld [vmem:[%s11433_s3 + $0x18] sm:$0xff] }
 0x1d1   : > { %1291 = vrot.lane.b32.xlu1 %v784_v37, %s8060_s20  ;;  %v2061_v24 = vsel %vm2046_vm11, %v2028_v33, %v1654_v8  ;;  %v755_v37 = vld [vmem:[#allocation2 + $0x168] sm:$0xff]  ;;  %v788_v33 = vld [vmem:[#allocation2 + $0x171] sm:$0xff] }
 0x1d2   : > { %1545 = vrot.lane.b32.xlu0 %v753_v55, %s8062_s26  ;;  %v819_v8 = vld [vmem:[#allocation2 + $0x16a] sm:$0xff] }
 0x1d3   : > { %v1528_v10 = vpop.permute.xlu1 %1527 }
 0x1d4   : > { %v1782_v9 = vpop.permute.xlu0 %1781  ;;  %v2029_v15 = vsel %vm2013_vm10, %v1996_v61, %v1528_v10 }
 0x1d5   : > { %1419 = vrot.lane.b32.xlu1 %v816_v6, %s8061_s21  ;;  %v2094_v51 = vsel %vm2079_vm12, %v2061_v24, %v1782_v9  ;;  %v820_v9 = vld [vmem:[#allocation2 + $0x172] sm:$0xff] }
 0x1d6   : > { %1673 = vrot.lane.b32.xlu0 %v785_v21, %s8064_s10  ;;  %6745 = vmatprep.mubr.msk.f32.mxu0 %vm2123_vm13, %v2094_v51 }
 0x1d7   : > { %v1656_v23 = vpop.permute.xlu1 %1655 }
 0x1d8   : > { %v1146_v46 = vpop.permute.xlu0 %1145  ;;  %v2062_v28 = vsel %vm2046_vm11, %v2029_v15, %v1656_v23  ;;  %v1867_v23 = vsel %vm333_vm0, %v8856_v45, %v11500_v20 }
 0x1d9   : > { %1547 = vrot.lane.b32.xlu1 %v754_v27, %s8062_s26  ;;  %v1931_v54 = vsel %vm1914_vm7, %v1898_v60, %v1146_v46  ;;  %v757_v46 = vld [vmem:[#allocation2 + $0x180] sm:$0xff] }
 0x1da   : > { %1801 = vrot.lane.b32.xlu0 %v817_v12, %s8065_s8 }
 0x1db   : > { %v1784_v56 = vpop.permute.xlu1 %1783 }
 0x1dc   : > { %v2095_v26 = vsel %vm2079_vm12, %v2062_v28, %v1784_v56  ;;  %v1274_v16 = vpop.permute.xlu0 %1273 }
 0x1dd   : > { %1675 = vrot.lane.b32.xlu1 %v786_v36, %s8064_s10  ;;  %6746 = vmatmul.mubr.msk.f32.gmra.mrb[14].mxu0 %vm2123_vm13, %v2095_v26  ;;  %v1964_v11 = vsel %vm1947_vm8, %v1931_v54, %v1274_v16  ;;  %v789_v16 = vld [vmem:[#allocation2 + $0x181] sm:$0xff] }
 0x1de   : > { %1165 = vrot.lane.b32.xlu0 %v753_v55, %s8059_s19 }
 0x1df   : > { %v1148_v53 = vpop.permute.xlu1 %1147 }
 0x1e0   : > { %v1402_v7 = vpop.permute.xlu0 %1401  ;;  %v1932_v55 = vsel %vm1914_vm7, %v1899_v17, %v1148_v53 }
 0x1e1   : > { %1803 = vrot.lane.b32.xlu1 %v818_v63, %s8065_s8  ;;  %v1997_v19 = vsel %vm1980_vm9, %v1964_v11, %v1402_v7 }
 0x1e2   : > { %1293 = vrot.lane.b32.xlu0 %v785_v21, %s8060_s20 }
 0x1e3   : > { %v1276_v1 = vpop.permute.xlu1 %1275 }
 0x1e4   : > { %v1530_v52 = vpop.permute.xlu0 %1529  ;;  %v1965_v50 = vsel %vm1947_vm8, %v1932_v55, %v1276_v1 }
 0x1e5   : > { %1167 = vrot.lane.b32.xlu1 %v754_v27, %s8059_s19  ;;  %v2030_v38 = vsel %vm2013_vm10, %v1997_v19, %v1530_v52  ;;  %v11503_v52 = vld [vmem:[#allocation33_spill] sm:$0xff] }
 0x1e6   : > { %1421 = vrot.lane.b32.xlu0 %v817_v12, %s8061_s21  ;;  %v11501_v12 = vld [vmem:[#allocation30_spill] sm:$0xff] }
 0x1e7   : > { %v1404_v35 = vpop.permute.xlu1 %1403  ;;  %v1900_v61 = vsel %vm1881_vm6, %v1867_v23, %v11501_v12  ;;  %v11504_v23 = vld [vmem:[#allocation12_spill] sm:$0xff] }
 0x1e8   : > { %v1658_v22 = vpop.permute.xlu0 %1657  ;;  %v1998_v39 = vsel %vm1980_vm9, %v1965_v50, %v1404_v35  ;;  %v758_v35 = vld [vmem:[#allocation2 + $0x188] sm:$0xff] }
 0x1e9   : > { %1295 = vrot.lane.b32.xlu1 %v786_v36, %s8060_s20  ;;  %v2063_v57 = vsel %vm2046_vm11, %v2030_v38, %v1658_v22  ;;  %v821_v22 = vld [vmem:[#allocation2 + $0x182] sm:$0xff]  ;;  %v8066_v38 = vmov 0.0|0.0   ;;  %v822_v50 = vld [vmem:[#allocation2 + $0x18a] sm:$0xff] }
 0x1ea   : > { %1549 = vrot.lane.b32.xlu0 %v755_v37, %s8062_s26  ;;  %6838 = vmatprep.subr.bf16.mxu1 %v8066_v38 }
 0x1eb   : > { %v1532_v6 = vpop.permute.xlu1 %1531  ;;  %6865 = vmatprep.subr.bf16.mxu0 %v8066_v38 }
 0x1ec   : > { %v1786_v25 = vpop.permute.xlu0 %1785  ;;  %v2031_v10 = vsel %vm2013_vm10, %v1998_v39, %v1532_v6 }
 0x1ed   : > { %1423 = vrot.lane.b32.xlu1 %v818_v63, %s8061_s21  ;;  %v2096_v49 = vsel %vm2079_vm12, %v2063_v57, %v1786_v25  ;;  %v11502_v63 = vld [vmem:[#allocation13_spill] sm:$0xff] }
 0x1ee   : > { %1677 = vrot.lane.b32.xlu0 %v787_v44, %s8064_s10  ;;  %6748 = vmatprep.mubr.msk.f32.mxu0 %vm2123_vm13, %v2096_v49  ;;  %v1868_v53 = vsel %vm333_vm0, %v8875_v3, %v11502_v63  ;;  %v3928_v3 = vld [vmem:[%s11433_s3] sm:$0xff]  ;;  %v3930_v25 = vld [vmem:[%s11433_s3 + $0x10] sm:$0xff] }
 0x1ef   : > { %v1660_v4 = vpop.permute.xlu1 %1659  ;;  %v1901_v14 = vsel %vm1881_vm6, %v1868_v53, %v11503_v52  ;;  %v9285_v49 = vld [vmem:[%s11432_s2] ss:$0 sm:$0xff]  ;;  %v3939_v52 = vld [vmem:[%s11433_s3 + $0x58] sm:$0xff] }
 0x1f0   : > { %v1150_v41 = vpop.permute.xlu0 %1149  ;;  %v2064_v21 = vsel %vm2046_vm11, %v2031_v10, %v1660_v4  ;;  %v3932_v10 = vld [vmem:[%s11433_s3 + $0x20] sm:$0xff] }
 0x1f1   : > { %1551 = vrot.lane.b32.xlu1 %v756_v43, %s8062_s26  ;;  %v1933_v15 = vsel %vm1914_vm7, %v1900_v61, %v1150_v41  ;;  %v3936_v61 = vld [vmem:[%s11433_s3 + $0x40] sm:$0xff] }
 0x1f2   : > { %1805 = vrot.lane.b32.xlu0 %v819_v8, %s8065_s8 }
 0x1f3   : > { %v1788_v2 = vpop.permute.xlu1 %1787 }
 0x1f4   : > { %v2097_v42 = vsel %vm2079_vm12, %v2064_v21, %v1788_v2  ;;  %v1278_v24 = vpop.permute.xlu0 %1277 }
 0x1f5   : > { %1679 = vrot.lane.b32.xlu1 %v788_v33, %s8064_s10  ;;  %6749 = vmatmul.mubr.msk.f32.gmra.mrb[16].mxu0 %vm2123_vm13, %v2097_v42  ;;  %v1966_v28 = vsel %vm1947_vm8, %v1933_v15, %v1278_v24  ;;  %v11505_v15 = vld [vmem:[#allocation32_spill] sm:$0xff] }
 0x1f6   : > { %1169 = vrot.lane.b32.xlu0 %v755_v37, %s8059_s19  ;;  %v3929_v37 = vld [vmem:[%s11433_s3 + $0x8] sm:$0xff] }
 0x1f7   : > { %v1152_v13 = vpop.permute.xlu1 %1151  ;;  %v6839_v11 = vpack.c.bf16 %v3929_v37, %v3928_v3  ;;  %v11507_v3 = vld [vmem:[#allocation35_spill] sm:$0xff] }
 0x1f8   : > { %v1406_v18 = vpop.permute.xlu0 %1405  ;;  %v1934_v30 = vsel %vm1914_vm7, %v1901_v14, %v1152_v13  ;;  %v11506_v14 = vld [vmem:[#allocation15_spill] sm:$0xff] }
 0x1f9   : > { %1807 = vrot.lane.b32.xlu1 %v820_v9, %s8065_s8  ;;  %v1999_v56 = vsel %vm1980_vm9, %v1966_v28, %v1406_v18  ;;  %6840 = vmatpush1.bf16.msra.mxu1 %v6839_v11  ;;  %v3934_v18 = vld [vmem:[%s11433_s3 + $0x30] sm:$0xff]  ;;  %v759_v28 = vld [vmem:[#allocation2 + $0x198] sm:$0xff] }
 0x1fa   : > { %1297 = vrot.lane.b32.xlu0 %v787_v44, %s8060_s20  ;;  %6841 = vmatprep.subr.bf16.mxu1 %v8066_v38 }
 0x1fb   : > { %v1280_v51 = vpop.permute.xlu1 %1279 }
 0x1fc   : > { %v1534_v27 = vpop.permute.xlu0 %1533  ;;  %v1967_v54 = vsel %vm1947_vm8, %v1934_v30, %v1280_v51  ;;  %v3935_v51 = vld [vmem:[%s11433_s3 + $0x38] sm:$0xff] }
 0x1fd   : > { %1171 = vrot.lane.b32.xlu1 %v756_v43, %s8059_s19  ;;  %v2032_v45 = vsel %vm2013_vm10, %v1999_v56, %v1534_v27  ;;  %v6842_v43 = vpack.c.bf16 %v3931_v32, %v3930_v25  ;;  %v6848_v27 = vpack.c.bf16 %v3935_v51, %v3934_v18  ;;  %v2547_v25 = vld [vmem:[#allocation3 + $0x9] sm:$0xff]  ;;  %v824_v51 = vld [vmem:[#allocation2 + $0x1a2] sm:$0xff] }
 0x1fe   : > { %1425 = vrot.lane.b32.xlu0 %v819_v8, %s8061_s21 }
 0x1ff   : > { %v1408_v40 = vpop.permute.xlu1 %1407  ;;  %6843 = vmatpush1.bf16.msra.mxu1 %v6842_v43 }
 0x200   : > { %v1662_v36 = vpop.permute.xlu0 %1661  ;;  %v2000_v19 = vsel %vm1980_vm9, %v1967_v54, %v1408_v40  ;;  %6844 = vmatprep.subr.bf16.mxu1 %v8066_v38  ;;  %v1869_v40 = vsel %vm333_vm0, %v8904_v48, %v11504_v23 }
 0x201   : > { %1299 = vrot.lane.b32.xlu1 %v788_v33, %s8060_s20  ;;  %v2065_v7 = vsel %vm2046_vm11, %v2032_v45, %v1662_v36  ;;  %v3933_v33 = vld [vmem:[%s11433_s3 + $0x28] sm:$0xff]  ;;  %v1902_v36 = vsel %vm1881_vm6, %v1869_v40, %v11505_v15  ;;  %v2579_v40 = vld [vmem:[#allocation3 + $0xa] sm:$0xff] }
 0x202   : > { %1553 = vrot.lane.b32.xlu0 %v757_v46, %s8062_s26  ;;  %v6845_v2 = vpack.c.bf16 %v3933_v33, %v3932_v10 }
 0x203   : > { %v1536_v26 = vpop.permute.xlu1 %1535 }
 0x204   : > { %v1790_v1 = vpop.permute.xlu0 %1789  ;;  %v2033_v44 = vsel %vm2013_vm10, %v2000_v19, %v1536_v26  ;;  %6846 = vmatpush1.bf16.msra.mxu1 %v6845_v2  ;;  %v3942_v2 = vld [vmem:[%s11433_s3 + $0x70] sm:$0xff] }
 0x205   : > { %1427 = vrot.lane.b32.xlu1 %v820_v9, %s8061_s21  ;;  %v2098_v58 = vsel %vm2079_vm12, %v2065_v7, %v1790_v1  ;;  %6847 = vmatprep.subr.bf16.mxu1 %v8066_v38  ;;  %v791_v7 = vld [vmem:[#allocation2 + $0x199] sm:$0xff]  ;;  %v3938_v1 = vld [vmem:[%s11433_s3 + $0x50] sm:$0xff] }
 0x206   : > { %1681 = vrot.lane.b32.xlu0 %v789_v16, %s8064_s10  ;;  %6751 = vmatprep.mubr.msk.f32.mxu0 %vm2123_vm13, %v2098_v58  ;;  %v1870_v58 = vsel %vm333_vm0, %v8922_v47, %v11506_v14  ;;  %v3940_v47 = vld [vmem:[%s11433_s3 + $0x60] sm:$0xff] }
 0x207   : > { %v1664_v60 = vpop.permute.xlu1 %1663  ;;  %v1903_v37 = vsel %vm1881_vm6, %v1870_v58, %v11507_v3  ;;  %v11508_v58 = vld [vmem:[#allocation14_spill] sm:$0xff] }
 0x208   : > { %v1154_v6 = vpop.permute.xlu0 %1153  ;;  %v2066_v29 = vsel %vm2046_vm11, %v2033_v44, %v1664_v60  ;;  %6849 = vmatpush1.bf16.msra.mxu1 %v6848_v27  ;;  %v6854_v60 = vpack.c.bf16 %v3939_v52, %v3938_v1  ;;  %v2578_v27 = vld [vmem:[#allocation3 + $0x2] sm:$0xff] }
 0x209   : > { %1555 = vrot.lane.b32.xlu1 %v758_v35, %s8062_s26  ;;  %6850 = vmatprep.subr.bf16.mxu1 %v8066_v38  ;;  %v1935_v48 = vsel %vm1914_vm7, %v1902_v36, %v1154_v6  ;;  %v3941_v6 = vld [vmem:[%s11433_s3 + $0x68] sm:$0xff]  ;;  %v11509_v3 = vld [vmem:[#allocation34_spill] sm:$0xff] }
 0x20a   : > { %1809 = vrot.lane.b32.xlu0 %v821_v22, %s8065_s8  ;;  %v6857_v32 = vpack.c.bf16 %v3941_v6, %v3940_v47 }
 0x20b   : > { %v1792_v57 = vpop.permute.xlu1 %1791 }
 0x20c   : > { %v2099_v17 = vsel %vm2079_vm12, %v2066_v29, %v1792_v57  ;;  %v1282_v55 = vpop.permute.xlu0 %1281  ;;  %v823_v29 = vld [vmem:[#allocation2 + $0x19a] sm:$0xff]  ;;  %v2546_v57 = vld [vmem:[#allocation3 + $0x1] sm:$0xff] }
 0x20d   : > { %1683 = vrot.lane.b32.xlu1 %v790_v0, %s8064_s10  ;;  %6752 = vmatmul.mubr.msk.f32.gmra.mrb[18].mxu0 %vm2123_vm13, %v2099_v17  ;;  %v6726_v4 = vpop.f32.mrb[0].mxu0  ;;  %v1968_v45 = vsel %vm1947_vm8, %v1935_v48, %v1282_v55 }
 0x20e   : > { %v2296_v8 = vadd.f32 %v6726_v4, %v9285_v49  ;;  %1173 = vrot.lane.b32.xlu0 %v757_v46, %s8059_s19  ;;  %v2290_v39 = vpop.f32.mrb[1].mxu0  ;;  %v3937_v46 = vld [vmem:[%s11433_s3 + $0x48] sm:$0xff] }
 0x20f   : > { %v1156_v41 = vpop.permute.xlu1 %1155  ;;  %v2291_v21 = vadd.f32 %v9285_v49, %v2290_v39  ;;  %v6851_v56 = vpack.c.bf16 %v3937_v46, %v3936_v61  ;;  %v792_v39 = vld [vmem:[#allocation2 + $0x1a1] sm:$0xff] }
 0x210   : > { %v2450_v42 = vmax.f32 %v2296_v8, 0.0  ;;  %v1410_v24 = vpop.permute.xlu0 %1409  ;;  %v1936_v11 = vsel %vm1914_vm7, %v1903_v37, %v1156_v41  ;;  %v3944_v61 = vld [vmem:[%s11433_s3 + $0x80] sm:$0xff]  ;;  %v3945_v46 = vld [vmem:[%s11433_s3 + $0x88] sm:$0xff] }
 0x211   : > { %1811 = vrot.lane.b32.xlu1 %v822_v50, %s8065_s8  ;;  %v2449_v9 = vmax.f32 %v2291_v21, 0.0  ;;  %6852 = vmatpush1.bf16.msra.mxu1 %v6851_v56  ;;  %v6997_v21 = vpack.i.bf16 %v2547_v25, %v2546_v57  ;;  %v6863_v15 = vpack.c.bf16 %v3945_v46, %v3944_v61  ;;  %v7002_v56 = vpack.i.bf16 %v2579_v40, %v2578_v27  ;;  %v11510_v57 = vld [vmem:[#allocation17_spill] sm:$0xff] }
 0x212   : > { %2483 = vst.msk [vmem:[#allocation3 + $0x21] sm:$0xff] %vm379_vm14, %v2450_v42  ;;  %1301 = vrot.lane.b32.xlu0 %v789_v16, %s8060_s20  ;;  %v2001_v16 = vsel %vm1980_vm9, %v1968_v45, %v1410_v24  ;;  %6853 = vmatprep.subr.bf16.mxu1 %v8066_v38  ;;  %v3943_v42 = vld [vmem:[%s11433_s3 + $0x78] sm:$0xff]  ;;  %v1872_v25 = vsel %vm333_vm0, %v8981_v62, %v11510_v57 }
 0x213   : > { %v1284_v13 = vpop.permute.xlu1 %1283  ;;  %2482 = vst.msk [vmem:[#allocation3 + $0x19] sm:$0xff] %vm379_vm14, %v2449_v9 }
 0x214   : > { %v1538_v20 = vpop.permute.xlu0 %1537  ;;  %v1969_v44 = vsel %vm1947_vm8, %v1936_v11, %v1284_v13  ;;  %v6860_v13 = vpack.c.bf16 %v3943_v42, %v3942_v2 }
 0x215   : > { %1175 = vrot.lane.b32.xlu1 %v758_v35, %s8059_s19  ;;  %v2034_v53 = vsel %vm2013_vm10, %v2001_v16, %v1538_v20  ;;  %6855 = vmatpush1.bf16.msra.mxu1 %v6854_v60  ;;  %s8071_s19 = smov 64  }
 0x216   : > { %1429 = vrot.lane.b32.xlu0 %v821_v22, %s8061_s21  ;;  %v760_v22 = vld [vmem:[#allocation2 + $0x1a0] sm:$0xff]  ;;  %6856 = vmatprep.subr.bf16.mxu1 %v8066_v38 }
 0x217   : > { %v1412_v12 = vpop.permute.xlu1 %1411 }
 0x218   : > { %v1666_v26 = vpop.permute.xlu0 %1665  ;;  %v2002_v17 = vsel %vm1980_vm9, %v1969_v44, %v1412_v12 }
 0x219   : > { %1303 = vrot.lane.b32.xlu1 %v790_v0, %s8060_s20  ;;  %v2067_v35 = vsel %vm2046_vm11, %v2034_v53, %v1666_v26  ;;  %6858 = vmatpush1.bf16.msra.mxu1 %v6857_v32  ;;  %v2675_v26 = vld [vmem:[#allocation3 + $0x22] sm:$0xff] }
 0x21a   : > { %1557 = vrot.lane.b32.xlu0 %v759_v28, %s8062_s26  ;;  %v9384_v20 = vld [vmem:[#allocation3 + $0x18] sm:$0xff]  ;;  %v9386_v23 = vld [vmem:[#allocation3 + $0x20] sm:$0xff]  ;;  %6859 = vmatprep.subr.bf16.mxu1 %v8066_v38 }
 0x21b   : > { %v1540_v63 = vpop.permute.xlu1 %1539  ;;  %v7007_v28 = vpack.i.bf16 %v9386_v23, %v9384_v20  ;;  %v2674_v48 = vld [vmem:[#allocation3 + $0x1a] sm:$0xff] }
 0x21c   : > { %v1794_v30 = vpop.permute.xlu0 %1793  ;;  %v2642_v16 = vld [vmem:[#allocation3 + $0x19] sm:$0xff]  ;;  %v7017_v1 = vpack.i.bf16 %v2675_v26, %v2674_v48 }
 0x21d   : > { %1431 = vrot.lane.b32.xlu1 %v822_v50, %s8061_s21  ;;  %v2100_v54 = vsel %vm2079_vm12, %v2067_v35, %v1794_v30  ;;  %v2035_v50 = vsel %vm2013_vm10, %v2002_v17, %v1540_v63  ;;  %6861 = vmatpush1.bf16.msra.mxu1 %v6860_v13  ;;  %v2643_v63 = vld [vmem:[#allocation3 + $0x21] sm:$0xff]  ;;  %v1871_v35 = vsel %vm333_vm0, %v8952_v31, %v11508_v58 }
 0x21e   : > { %1685 = vrot.lane.b32.xlu0 %v791_v7, %s8064_s10  ;;  %6754 = vmatprep.mubr.msk.f32.mxu0 %vm2123_vm13, %v2100_v54  ;;  %v7012_v60 = vpack.i.bf16 %v2643_v63, %v2642_v16  ;;  %v1904_v37 = vsel %vm1881_vm6, %v1871_v35, %v11509_v3  ;;  %v11512_v63 = vld [vmem:[#allocation16_spill] sm:$0xff] }
 0x21f   : > { %v1668_v19 = vpop.permute.xlu1 %1667  ;;  %6862 = vmatprep.subr.bf16.mxu1 %v8066_v38 }
 0x220   : > { %v6729_v0 = vpop.f32.mrb[2].mxu0  ;;  %v9365_v55 = vpop.permute.xlu0 %1157  ;;  %v2068_v41 = vsel %vm2046_vm11, %v2035_v50, %v1668_v19 }
 0x221   : > { %v2306_v43 = vadd.f32 %v6729_v0, %v9285_v49  ;;  %1559 = vrot.lane.b32.xlu1 %v760_v22, %s8062_s26  ;;  %v2300_v4 = vpop.f32.mrb[3].mxu0  ;;  %6864 = vmatpush1.bf16.msra.mxu1 %v6863_v15  ;;  %v1937_v11 = vsel %vm1914_vm7, %v1904_v37, %v9365_v55 }
 0x222   : > { %v2301_v8 = vadd.f32 %v9285_v49, %v2300_v4  ;;  %1813 = vrot.lane.b32.xlu0 %v823_v29, %s8065_s8 }
 0x223   : > { %v2452_v10 = vmax.f32 %v2306_v43, 0.0  ;;  %v1796_v33 = vpop.permute.xlu1 %1795  ;;  %v11511_v43 = vld [vmem:[#allocation37_spill] sm:$0xff] }
 0x224   : > { %v2451_v24 = vmax.f32 %v2301_v8, 0.0  ;;  %v2101_v9 = vsel %vm2079_vm12, %v2068_v41, %v1796_v33  ;;  %v1286_v18 = vpop.permute.xlu0 %1285  ;;  %v1905_v55 = vsel %vm1881_vm6, %v1872_v25, %v11511_v43 }
 0x225   : > { %2485 = vst.msk [vmem:[#allocation3 + $0x39] sm:$0xff] %vm379_vm14, %v2452_v10  ;;  %1687 = vrot.lane.b32.xlu1 %v792_v39, %s8064_s10  ;;  %6755 = vmatmul.mubr.msk.f32.gmra.mrb[20].mxu0 %vm2123_vm13, %v2101_v9  ;;  %v1970_v47 = vsel %vm1947_vm8, %v1937_v11, %v1286_v18 }
 0x226   : > { %2484 = vst.msk [vmem:[#allocation3 + $0x31] sm:$0xff] %vm379_vm14, %v2451_v24  ;;  %6998 = vrot.lane.b32.xlu0 %v6997_v21, %s8067_s15 }
 0x227   : > { %v1160_v12 = vpop.permute.xlu1 %1159 }
 0x228   : > { %v1414_v36 = vpop.permute.xlu0 %1413  ;;  %v1938_v50 = vsel %vm1914_vm7, %v1905_v55, %v1160_v12 }
 0x229   : > { %1815 = vrot.lane.b32.xlu1 %v824_v51, %s8065_s8  ;;  %s8070_s8 = smov 80   ;;  %v2003_v6 = vsel %vm1980_vm9, %v1970_v47, %v1414_v36  ;;  %v11515_v47 = vld [vmem:[#allocation39_spill] sm:$0xff] }
 0x22a   : > { %7008 = vrot.lane.b32.xlu0 %v7007_v28, %s8068_s22 }
 0x22b   : > { %v1288_v45 = vpop.permute.xlu1 %1287 }
 0x22c   : > { %v1542_v53 = vpop.permute.xlu0 %1541  ;;  %v2740_v14 = vld [vmem:[#allocation3 + $0x39] sm:$0xff]  ;;  %v1971_v62 = vsel %vm1947_vm8, %v1938_v50, %v1288_v45 }
 0x22d   : > { %7003 = vrot.lane.b32.xlu1 %v7002_v56, %s8069_s23  ;;  %v2771_v7 = vld [vmem:[#allocation3 + $0x32] sm:$0xff]  ;;  %v2036_v29 = vsel %vm2013_vm10, %v2003_v6, %v1542_v53  ;;  %v9446_v27 = vld [vmem:[#allocation3 + $0x3a] sm:$0xff]  ;;  %v1873_v53 = vsel %vm333_vm0, %v9093_v5, %v11512_v63  ;;  %v11514_v5 = vld [vmem:[#allocation19_spill] sm:$0xff] }
 0x22e   : > { %6509 = vmatprep.mubr.msk.f32.mxu1 %vm379_vm14, %v2771_v7  ;;  %v2739_v52 = vld [vmem:[#allocation3 + $0x31] sm:$0xff]  ;;  %7018 = vrot.lane.b32.xlu0 %v7017_v1, %s8070_s8  ;;  %v7052_v61 = vpack.i.bf16 %v9446_v27, %v2771_v7  ;;  %v1874_v37 = vsel %vm333_vm0, %v9111_v34, %v11514_v5  ;;  %v11519_v5 = vld [vmem:[#allocation42_spill] sm:$0xff] }
 0x22f   : > { %v1416_v30 = vpop.permute.xlu1 %1415  ;;  %v9409_v54 = vld [vmem:[#allocation3 + $0x30] sm:$0xff]  ;;  %v9411_v22 = vld [vmem:[#allocation3 + $0x38] sm:$0xff]  ;;  %v9416_v31 = vpack.i.bf16 %v2740_v14, %v2739_v52  ;;  %v1907_v6 = vsel %vm1881_vm6, %v1874_v37, %v11515_v47 }
 0x230   : > { %v1670_v19 = vpop.permute.xlu0 %1669  ;;  %v7022_v0 = vpack.i.bf16 %v9411_v22, %v9409_v54  ;;  %v2004_v41 = vsel %vm1980_vm9, %v1971_v62, %v1416_v30 }
 0x231   : > { %7013 = vrot.lane.b32.xlu1 %v7012_v60, %s8071_s19  ;;  %v2069_v32 = vsel %vm2046_vm11, %v2036_v29, %v1670_v19 }
 0x232   : > { %7028 = vrot.lane.b32.xlu0 %v9416_v31, %s8072_s24 }
 0x233   : > { %v1544_v44 = vpop.permute.xlu1 %1543 }
 0x234   : > { %v1798_v17 = vpop.permute.xlu0 %1797  ;;  %v2037_v2 = vsel %vm2013_vm10, %v2004_v41, %v1544_v44 }
 0x235   : > { %7023 = vrot.lane.b32.xlu1 %v7022_v0, %s8073_s25  ;;  %v2102_v4 = vsel %vm2079_vm12, %v2069_v32, %v1798_v17 }
 0x236   : > { %6757 = vmatprep.mubr.msk.f32.mxu0 %vm2123_vm13, %v2102_v4  ;;  %7038 = vrot.lane.b32.xlu0 %v7017_v1, %s8069_s23  ;;  %v11513_v1 = vld [vmem:[#allocation36_spill] sm:$0xff] }
 0x237   : > { %v1672_v8 = vpop.permute.xlu1 %1671  ;;  %v1906_v52 = vsel %vm1881_vm6, %v1873_v53, %v11513_v1 }
 0x238   : > { %v6732_v39 = vpop.f32.mrb[4].mxu0  ;;  %v1162_v33 = vpop.permute.xlu0 %1161  ;;  %v2070_v24 = vsel %vm2046_vm11, %v2037_v2, %v1672_v8 }
 0x239   : > { %v2316_v10 = vadd.f32 %v6732_v39, %v9285_v49  ;;  %v2310_v21 = vpop.f32.mrb[5].mxu0  ;;  %7033 = vrot.lane.b32.xlu1 %v7012_v60, %s8067_s15  ;;  %v1939_v14 = vsel %vm1914_vm7, %v1906_v52, %v1162_v33 }
 0x23a   : > { %v2311_v42 = vadd.f32 %v9285_v49, %v2310_v21  ;;  %7048 = vrot.lane.b32.xlu0 %v9416_v31, %s8071_s19 }
 0x23b   : > { %v2454_v9 = vmax.f32 %v2316_v10, 0.0  ;;  %v1800_v13 = vpop.permute.xlu1 %1799 }
 0x23c   : > { %v2453_v18 = vmax.f32 %v2311_v42, 0.0  ;;  %v2103_v51 = vsel %vm2079_vm12, %v2070_v24, %v1800_v13  ;;  %v1290_v40 = vpop.permute.xlu0 %1289 }
 0x23d   : > { %2487 = vst.msk [vmem:[#allocation3 + $0x51] sm:$0xff] %vm379_vm14, %v2454_v9  ;;  %6758 = vmatmul.mubr.msk.f32.gmra.mrb[22].mxu0 %vm2123_vm13, %v2103_v51  ;;  %7043 = vrot.lane.b32.xlu1 %v7022_v0, %s8068_s22  ;;  %v1972_v35 = vsel %vm1947_vm8, %v1939_v14, %v1290_v40  ;;  %v562_v9 = vld [vmem:[#allocation2 + $0x138] sm:$0xff] }
 0x23e   : > { %2486 = vst.msk [vmem:[#allocation3 + $0x49] sm:$0xff] %vm379_vm14, %v2453_v18 }
 0x23f   : > { %v1164_v12 = vpop.permute.xlu1 %1163 }
 0x240   : > { %v1418_v46 = vpop.permute.xlu0 %1417  ;;  %v1940_v0 = vsel %vm1914_vm7, %v1907_v6, %v1164_v12 }
 0x241   : > { %7053 = vrot.lane.b32.xlu1 %v7052_v61, %s8070_s8  ;;  %v2005_v30 = vsel %vm1980_vm9, %v1972_v35, %v1418_v46  ;;  %v11518_v35 = vld [vmem:[#allocation21_spill] sm:$0xff] }
 0x243   : > { %v1292_v15 = vpop.permute.xlu1 %1291 }
 0x244   : > { %v2742_v36 = vld [vmem:[#allocation3 + $0x51] sm:$0xff]  ;;  %v1546_v28 = vpop.permute.xlu0 %1545  ;;  %v1973_v25 = vsel %vm1947_vm8, %v1940_v0, %v1292_v15  ;;  %v11516_v15 = vld [vmem:[#allocation18_spill] sm:$0xff] }
 0x245   : > { %v9454_v56 = vld [vmem:[#allocation3 + $0x48] sm:$0xff]  ;;  %v9456_v48 = vld [vmem:[#allocation3 + $0x50] sm:$0xff]  ;;  %v2038_v3 = vsel %vm2013_vm10, %v2005_v30, %v1546_v28 }
 0x246   : > { %v2741_v26 = vld [vmem:[#allocation3 + $0x49] sm:$0xff]  ;;  %v7057_v45 = vpack.i.bf16 %v9456_v48, %v9454_v56 }
 0x247   : > { %v9460_v16 = vpack.i.bf16 %v2742_v36, %v2741_v26  ;;  %v1420_v7 = vpop.permute.xlu1 %1419  ;;  %v9486_v57 = vld [vmem:[#allocation3 + $0x4a] sm:$0xff]  ;;  %v1875_v36 = vsel %vm333_vm0, %v562_v9, %v11516_v15  ;;  %v11517_v26 = vld [vmem:[#allocation38_spill] sm:$0xff] }
 0x248   : > { %7058 = vrot.lane.b32.xlu0 %v7057_v45, %s8073_s25  ;;  %v1674_v58 = vpop.permute.xlu0 %1673  ;;  %v2006_v32 = vsel %vm1980_vm9, %v1973_v25, %v1420_v7  ;;  %v563_v7 = vld [vmem:[#allocation2 + $0x140] sm:$0xff] }
 0x249   : > { %7063 = vrot.lane.b32.xlu1 %v9460_v16, %s8072_s24  ;;  %v2071_v11 = vsel %vm2046_vm11, %v2038_v3, %v1674_v58  ;;  %v1876_v30 = vsel %vm333_vm0, %v563_v7, %v11518_v35  ;;  %v11520_v15 = vld [vmem:[#allocation20_spill] sm:$0xff]  ;;  %v565_v7 = vld [vmem:[#allocation2 + $0x158] sm:$0xff] }
 0x24a   : > { %v1909_v37 = vsel %vm1881_vm6, %v1876_v30, %v11519_v5  ;;  %v11522_v35 = vld [vmem:[#allocation23_spill] sm:$0xff]  ;;  %v11523_v5 = vld [vmem:[#allocation44_spill] sm:$0xff] }
 0x24b   : > { %v1548_v60 = vpop.permute.xlu1 %1547  ;;  %v1878_v30 = vsel %vm333_vm0, %v565_v7, %v11522_v35  ;;  %v11525_v7 = vld [vmem:[#allocation43_spill] sm:$0xff] }
 0x24c   : > { %7068 = vrot.lane.b32.xlu0 %v9416_v31, %s8067_s15  ;;  %v1802_v19 = vpop.permute.xlu0 %1801  ;;  %v9488_v31 = vld [vmem:[#allocation3 + $0x52] sm:$0xff]  ;;  %v2039_v4 = vsel %vm2013_vm10, %v2006_v32, %v1548_v60 }
 0x24d   : > { %7073 = vrot.lane.b32.xlu1 %v7052_v61, %s8069_s23  ;;  %v2104_v44 = vsel %vm2079_vm12, %v2071_v11, %v1802_v19  ;;  %v7087_v8 = vpack.i.bf16 %v9488_v31, %v9486_v57 }
 0x24e   : > { %6760 = vmatprep.mubr.msk.f32.mxu0 %vm2123_vm13, %v2104_v44 }
 0x24f   : > { %v1676_v29 = vpop.permute.xlu1 %1675 }
 0x250   : > { %v6735_v34 = vpop.f32.mrb[6].mxu0  ;;  %7078 = vrot.lane.b32.xlu0 %v7057_v45, %s8068_s22  ;;  %v1166_v43 = vpop.permute.xlu0 %1165  ;;  %v2072_v62 = vsel %vm2046_vm11, %v2039_v4, %v1676_v29  ;;  %v1908_v45 = vsel %vm1881_vm6, %v1875_v36, %v11517_v26  ;;  %v11521_v26 = vld [vmem:[#allocation40_spill] sm:$0xff] }
 0x251   : > { %7083 = vrot.lane.b32.xlu1 %v9460_v16, %s8071_s19  ;;  %v2326_v17 = vadd.f32 %v6735_v34, %v9285_v49  ;;  %v2320_v55 = vpop.f32.mrb[7].mxu0  ;;  %v1941_v63 = vsel %vm1914_vm7, %v1908_v45, %v1166_v43 }
 0x252   : > { %v2321_v50 = vadd.f32 %v9285_v49, %v2320_v55 }
 0x253   : > { %v2456_v39 = vmax.f32 %v2326_v17, 0.0  ;;  %v1804_v41 = vpop.permute.xlu1 %1803 }
 0x254   : > { %v2455_v10 = vmax.f32 %v2321_v50, 0.0  ;;  %v2105_v33 = vsel %vm2079_vm12, %v2072_v62, %v1804_v41  ;;  %7088 = vrot.lane.b32.xlu0 %v7087_v8, %s8070_s8  ;;  %v1294_v21 = vpop.permute.xlu0 %1293 }
 0x255   : > { %2489 = vst.msk [vmem:[#allocation3 + $0x69] sm:$0xff] %vm379_vm14, %v2456_v39  ;;  %6761 = vmatmul.mubr.msk.f32.gmra.mrb[24].mxu0 %vm2123_vm13, %v2105_v33  ;;  %v1974_v1 = vsel %vm1947_vm8, %v1941_v63, %v1294_v21 }
 0x256   : > { %2488 = vst.msk [vmem:[#allocation3 + $0x61] sm:$0xff] %vm379_vm14, %v2455_v10 }
 0x257   : > { %v1168_v2 = vpop.permute.xlu1 %1167 }
 0x258   : > { %v1422_v42 = vpop.permute.xlu0 %1421  ;;  %v1942_v19 = vsel %vm1914_vm7, %v1909_v37, %v1168_v2  ;;  %v564_v2 = vld [vmem:[#allocation2 + $0x150] sm:$0xff]  ;;  %v1911_v37 = vsel %vm1881_vm6, %v1878_v30, %v11523_v5  ;;  %v11526_v5 = vld [vmem:[#allocation24_spill] sm:$0xff] }
 0x259   : > { %v2007_v52 = vsel %vm1980_vm9, %v1974_v1, %v1422_v42  ;;  %v1877_v36 = vsel %vm333_vm0, %v564_v2, %v11520_v15 }
 0x25a   : > { %v1910_v45 = vsel %vm1881_vm6, %v1877_v36, %v11521_v26 }
 0x25b   : > { %v1296_v24 = vpop.permute.xlu1 %1295 }
 0x25c   : > { %v2744_v13 = vld [vmem:[#allocation3 + $0x69] sm:$0xff]  ;;  %v1550_v18 = vpop.permute.xlu0 %1549  ;;  %v1975_v44 = vsel %vm1947_vm8, %v1942_v19, %v1296_v24 }
 0x25d   : > { %v9506_v51 = vld [vmem:[#allocation3 + $0x60] sm:$0xff]  ;;  %v9508_v40 = vld [vmem:[#allocation3 + $0x68] sm:$0xff]  ;;  %v2040_v58 = vsel %vm2013_vm10, %v2007_v52, %v1550_v18 }
 0x25e   : > { %v2743_v12 = vld [vmem:[#allocation3 + $0x61] sm:$0xff]  ;;  %v7092_v61 = vpack.i.bf16 %v9508_v40, %v9506_v51 }
 0x25f   : > { %v9512_v46 = vpack.i.bf16 %v2744_v13, %v2743_v12  ;;  %v1424_v28 = vpop.permute.xlu1 %1423  ;;  %v9536_v6 = vld [vmem:[#allocation3 + $0x62] sm:$0xff] }
 0x260   : > { %7093 = vrot.lane.b32.xlu1 %v7092_v61, %s8073_s25  ;;  %v1678_v53 = vpop.permute.xlu0 %1677  ;;  %v2008_v29 = vsel %vm1980_vm9, %v1975_v44, %v1424_v28 }
 0x261   : > { %7098 = vrot.lane.b32.xlu0 %v9512_v46, %s8072_s24  ;;  %v2073_v60 = vsel %vm2046_vm11, %v2040_v58, %v1678_v53 }
 0x263   : > { %v1552_v14 = vpop.permute.xlu1 %1551 }
 0x264   : > { %7103 = vrot.lane.b32.xlu1 %v9460_v16, %s8067_s15  ;;  %v1806_v3 = vpop.permute.xlu0 %1805  ;;  %v9538_v16 = vld [vmem:[#allocation3 + $0x6a] sm:$0xff]  ;;  %v2041_v17 = vsel %vm2013_vm10, %v2008_v29, %v1552_v14 }
 0x265   : > { %7108 = vrot.lane.b32.xlu0 %v7087_v8, %s8069_s23  ;;  %v2106_v11 = vsel %vm2079_vm12, %v2073_v60, %v1806_v3  ;;  %v7122_v55 = vpack.i.bf16 %v9538_v16, %v9536_v6 }
 0x266   : > { %6763 = vmatprep.mubr.msk.f32.mxu0 %vm2123_vm13, %v2106_v11 }
 0x267   : > { %v1680_v47 = vpop.permute.xlu1 %1679 }
 0x268   : > { %v6738_v0 = vpop.f32.mrb[8].mxu0  ;;  %7113 = vrot.lane.b32.xlu1 %v7092_v61, %s8068_s22  ;;  %v1170_v34 = vpop.permute.xlu0 %1169  ;;  %v2074_v4 = vsel %vm2046_vm11, %v2041_v17, %v1680_v47 }
 0x269   : > { %7118 = vrot.lane.b32.xlu0 %v9512_v46, %s8071_s19  ;;  %v2336_v25 = vadd.f32 %v6738_v0, %v9285_v49  ;;  %v2330_v32 = vpop.f32.mrb[9].mxu0  ;;  %v1943_v63 = vsel %vm1914_vm7, %v1910_v45, %v1170_v34  ;;  %v11524_v45 = vld [vmem:[#allocation22_spill] sm:$0xff] }
 0x26a   : > { %v2331_v43 = vadd.f32 %v9285_v49, %v2330_v32 }
 0x26b   : > { %v2458_v50 = vmax.f32 %v2336_v25, 0.0  ;;  %v1808_v8 = vpop.permute.xlu1 %1807 }
 0x26c   : > { %v2457_v62 = vmax.f32 %v2331_v43, 0.0  ;;  %v2107_v39 = vsel %vm2079_vm12, %v2074_v4, %v1808_v8  ;;  %7123 = vrot.lane.b32.xlu1 %v7122_v55, %s8070_s8  ;;  %v1298_v41 = vpop.permute.xlu0 %1297 }
 0x26d   : > { %2491 = vst.msk [vmem:[#allocation3 + $0x81] sm:$0xff] %vm379_vm14, %v2458_v50  ;;  %6764 = vmatmul.mubr.msk.f32.gmra.mrb[26].mxu0 %vm2123_vm13, %v2107_v39  ;;  %v1976_v1 = vsel %vm1947_vm8, %v1943_v63, %v1298_v41 }
 0x26e   : > { %2490 = vst.msk [vmem:[#allocation3 + $0x79] sm:$0xff] %vm379_vm14, %v2457_v62 }
 0x26f   : > { %v1172_v10 = vpop.permute.xlu1 %1171 }
 0x270   : > { %v1426_v33 = vpop.permute.xlu0 %1425  ;;  %v1944_v19 = vsel %vm1914_vm7, %v1911_v37, %v1172_v10 }
 0x271   : > { %v2009_v52 = vsel %vm1980_vm9, %v1976_v1, %v1426_v33 }
 0x273   : > { %v1300_v21 = vpop.permute.xlu1 %1299 }
 0x274   : > { %v2746_v42 = vld [vmem:[#allocation3 + $0x81] sm:$0xff]  ;;  %v1554_v24 = vpop.permute.xlu0 %1553 }
 0x275   : > { %v2745_v9 = vld [vmem:[#allocation3 + $0x79] sm:$0xff]  ;;  %v2042_v58 = vsel %vm2013_vm10, %v2009_v52, %v1554_v24  ;;  %v9588_v0 = vld [vmem:[#allocation3 + $0x82] sm:$0xff] }
 0x276   : > { %v9556_v13 = vld [vmem:[#allocation3 + $0x78] sm:$0xff]  ;;  %v9558_v18 = vld [vmem:[#allocation3 + $0x80] sm:$0xff]  ;;  %v9560_v12 = vpack.i.bf16 %v2746_v42, %v2745_v9 }
 0x277   : > { %v7127_v61 = vpack.i.bf16 %v9558_v18, %v9556_v13  ;;  %v1428_v28 = vpop.permute.xlu1 %1427  ;;  %v9586_v44 = vld [vmem:[#allocation3 + $0x7a] sm:$0xff] }
 0x278   : > { %7133 = vrot.lane.b32.xlu1 %v9560_v12, %s8072_s24  ;;  %v1682_v53 = vpop.permute.xlu0 %1681  ;;  %v7157_v4 = vpack.i.bf16 %v9588_v0, %v9586_v44  ;;  %v566_v42 = vld [vmem:[#allocation2 + $0x168] sm:$0xff] }
 0x279   : > { %7128 = vrot.lane.b32.xlu0 %v7127_v61, %s8073_s25  ;;  %v2075_v60 = vsel %vm2046_vm11, %v2042_v58, %v1682_v53  ;;  %v1879_v63 = vsel %vm333_vm0, %v566_v42, %v11524_v45  ;;  %v567_v58 = vld [vmem:[#allocation2 + $0x170] sm:$0xff] }
 0x27a   : > { %v1912_v1 = vsel %vm1881_vm6, %v1879_v63, %v11525_v7  ;;  %v1880_v37 = vsel %vm333_vm0, %v567_v58, %v11526_v5  ;;  %v2514_v42 = vld [vmem:[#allocation3] sm:$0xff]  ;;  %vm3763_vm0 = vcmask 392192  }
 0x27b   : > { %v1556_v14 = vpop.permute.xlu1 %1555 }
 0x27c   : > { %7143 = vrot.lane.b32.xlu1 %v7122_v55, %s8069_s23  ;;  %v1810_v3 = vpop.permute.xlu0 %1809 }
 0x27d   : > { %7138 = vrot.lane.b32.xlu0 %v9512_v46, %s8067_s15  ;;  %v2108_v11 = vsel %vm2079_vm12, %v2075_v60, %v1810_v3  ;;  %v1977_v46 = vsel %vm1947_vm8, %v1944_v19, %v1300_v21 }
 0x27e   : > { %6766 = vmatprep.mubr.msk.f32.mxu0 %vm2123_vm13, %v2108_v11  ;;  %v2010_v25 = vsel %vm1980_vm9, %v1977_v46, %v1428_v28 }
 0x27f   : > { %v1684_v47 = vpop.permute.xlu1 %1683  ;;  %v2043_v43 = vsel %vm2013_vm10, %v2010_v25, %v1556_v14 }
 0x280   : > { %v6741_v29 = vpop.f32.mrb[10].mxu0  ;;  %7153 = vrot.lane.b32.xlu1 %v9560_v12, %s8071_s19  ;;  %v1174_v32 = vpop.permute.xlu0 %1173  ;;  %v2076_v50 = vsel %vm2046_vm11, %v2043_v43, %v1684_v47  ;;  %v11527_v47 = vld [vmem:[#allocation46_spill] sm:$0xff] }
 0x281   : > { %7148 = vrot.lane.b32.xlu0 %v7127_v61, %s8068_s22  ;;  %v2346_v34 = vadd.f32 %v6741_v29, %v9285_v49  ;;  %v2340_v17 = vpop.f32.mrb[11].mxu0  ;;  %v1945_v52 = vsel %vm1914_vm7, %v1912_v1, %v1174_v32  ;;  %v1913_v46 = vsel %vm1881_vm6, %v1880_v37, %v11527_v47  ;;  %vm3895_vm6 = vcmask 916480  }
 0x282   : > { %v2341_v55 = vadd.f32 %v9285_v49, %v2340_v17 }
 0x283   : > { %v2460_v8 = vmax.f32 %v2346_v34, 0.0  ;;  %v1812_v62 = vpop.permute.xlu1 %1811 }
 0x284   : > { %v2459_v39 = vmax.f32 %v2341_v55, 0.0  ;;  %v2109_v41 = vsel %vm2079_vm12, %v2076_v50, %v1812_v62  ;;  %v1302_v10 = vpop.permute.xlu0 %1301 }
 0x285   : > { %7158 = vrot.lane.b32.xlu0 %v7157_v4, %s8070_s8  ;;  %2493 = vst.msk [vmem:[#allocation3 + $0x99] sm:$0xff] %vm379_vm14, %v2460_v8  ;;  %6767 = vmatmul.mubr.msk.f32.gmra.mrb[28].mxu0 %vm2123_vm13, %v2109_v41  ;;  %v1978_v35 = vsel %vm1947_vm8, %v1945_v52, %v1302_v10 }
 0x286   : > { %2492 = vst.msk [vmem:[#allocation3 + $0x91] sm:$0xff] %vm379_vm14, %v2459_v39 }
 0x287   : > { %v1176_v33 = vpop.permute.xlu1 %1175 }
 0x288   : > { %v1430_v21 = vpop.permute.xlu0 %1429  ;;  %v1946_v25 = vsel %vm1914_vm7, %v1913_v46, %v1176_v33  ;;  %vm434_vm7 = vcmask 253952  }
 0x289   : > { %v2011_v30 = vsel %vm1980_vm9, %v1978_v35, %v1430_v21  ;;  %437 = vst.msk [vmem:[#allocation4 + $0x30] sm:$0x1] %vm434_vm7, %v11486_v59  ;;  %435 = vst.msk [vmem:[#allocation4] sm:$0x1] %vm434_vm7, %v11486_v59 }
 0x28a   : > { %436 = vst.msk [vmem:[#allocation4 + $0x18] sm:$0x1] %vm434_vm7, %v11486_v59  ;;  %438 = vst.msk [vmem:[#allocation4 + $0x48] sm:$0x1] %vm434_vm7, %v11486_v59 }
 0x28b   : > { %v1304_v2 = vpop.permute.xlu1 %1303  ;;  %439 = vst.msk [vmem:[#allocation4 + $0x60] sm:$0x1] %vm434_vm7, %v11486_v59  ;;  %440 = vst.msk [vmem:[#allocation4 + $0x78] sm:$0x1] %vm434_vm7, %v11486_v59 }
 0x28c   : > { %v2748_v24 = vld [vmem:[#allocation3 + $0x99] sm:$0xff]  ;;  %v1558_v9 = vpop.permute.xlu0 %1557  ;;  %v1979_v17 = vsel %vm1947_vm8, %v1946_v25, %v1304_v2  ;;  %441 = vst.msk [vmem:[#allocation4 + $0x90] sm:$0x1] %vm434_vm7, %v11486_v59  ;;  %442 = vst.msk [vmem:[#allocation4 + $0xa8] sm:$0x1] %vm434_vm7, %v11486_v59  ;;  %vm428_vm8 = vcmask 254976  }
 0x28d   : > { %v2715_v61 = vld [vmem:[#allocation3 + $0x90] sm:$0xff]  ;;  %v2716_v15 = vld [vmem:[#allocation3 + $0x98] sm:$0xff]  ;;  %v2044_v3 = vsel %vm2013_vm10, %v2011_v30, %v1558_v9  ;;  %443 = vst.msk [vmem:[#allocation4 + $0xc0] sm:$0x1] %vm434_vm7, %v11486_v59  ;;  %444 = vst.msk [vmem:[#allocation4 + $0xd8] sm:$0x1] %vm434_vm7, %v11486_v59 }
 0x28e   : > { %v2747_v36 = vld [vmem:[#allocation3 + $0x91] sm:$0xff]  ;;  %v7162_v28 = vpack.i.bf16 %v2716_v15, %v2715_v61  ;;  %445 = vst.msk [vmem:[#allocation4 + $0xf0] sm:$0x1] %vm434_vm7, %v11486_v59  ;;  %446 = vst.msk [vmem:[#allocation4 + $0x108] sm:$0x1] %vm434_vm7, %v11486_v59 }
 0x28f   : > { %v9606_v26 = vpack.i.bf16 %v2748_v24, %v2747_v36  ;;  %v1432_v53 = vpop.permute.xlu1 %1431  ;;  %v9630_v32 = vld [vmem:[#allocation3 + $0x92] sm:$0xff]  ;;  %v2515_v36 = vld [vmem:[#allocation3 + $0x8] sm:$0xff]  ;;  %447 = vst.msk [vmem:[#allocation4 + $0x120] sm:$0x1] %vm434_vm7, %v11486_v59  ;;  %448 = vst.msk [vmem:[#allocation4 + $0x138] sm:$0x1] %vm434_vm7, %v11486_v59 }
 0x290   : > { %7163 = vrot.lane.b32.xlu1 %v7162_v28, %s8073_s25  ;;  %v1686_v14 = vpop.permute.xlu0 %1685  ;;  %v2012_v55 = vsel %vm1980_vm9, %v1979_v17, %v1432_v53  ;;  %449 = vst.msk [vmem:[#allocation4 + $0x150] sm:$0x1] %vm434_vm7, %v11486_v59  ;;  %450 = vst.msk [vmem:[#allocation4 + $0x168] sm:$0x1] %vm434_vm7, %v11486_v59 }
 0x291   : > { %7168 = vrot.lane.b32.xlu0 %v9606_v26, %s8072_s24  ;;  %v2077_v11 = vsel %vm2046_vm11, %v2044_v3, %v1686_v14  ;;  %451 = vst.msk [vmem:[#allocation4 + $0x180] sm:$0x1] %vm434_vm7, %v11486_v59  ;;  %452 = vst.msk [vmem:[#allocation4 + $0x198] sm:$0x1] %vm434_vm7, %v11486_v59 }
 0x292   : > { %454 = vst.msk [vmem:[#allocation4 + $0x29] sm:$0x1] %vm434_vm7, %v11486_v59  ;;  %455 = vst.msk [vmem:[#allocation4 + $0x41] sm:$0x1] %vm434_vm7, %v11486_v59 }
 0x293   : > { %v1560_v60 = vpop.permute.xlu1 %1559  ;;  %456 = vst.msk [vmem:[#allocation4 + $0x59] sm:$0x1] %vm434_vm7, %v11486_v59  ;;  %457 = vst.msk [vmem:[#allocation4 + $0x71] sm:$0x1] %vm434_vm7, %v11486_v59 }
 0x294   : > { %7173 = vrot.lane.b32.xlu1 %v9560_v12, %s8067_s15  ;;  %v1814_v19 = vpop.permute.xlu0 %1813  ;;  %v9632_v12 = vld [vmem:[#allocation3 + $0x9a] sm:$0xff]  ;;  %v2045_v62 = vsel %vm2013_vm10, %v2012_v55, %v1560_v60  ;;  %458 = vst.msk [vmem:[#allocation4 + $0x89] sm:$0x1] %vm434_vm7, %v11486_v59  ;;  %459 = vst.msk [vmem:[#allocation4 + $0xa1] sm:$0x1] %vm434_vm7, %v11486_v59 }
 0x295   : > { %7178 = vrot.lane.b32.xlu0 %v7157_v4, %s8069_s23  ;;  %v2110_v29 = vsel %vm2079_vm12, %v2077_v11, %v1814_v19  ;;  %v7192_v41 = vpack.i.bf16 %v9632_v12, %v9630_v32  ;;  %460 = vst.msk [vmem:[#allocation4 + $0xb9] sm:$0x1] %vm434_vm7, %v11486_v59  ;;  %461 = vst.msk [vmem:[#allocation4 + $0xd1] sm:$0x1] %vm434_vm7, %v11486_v59 }
 0x296   : > { %6769 = vmatprep.mubr.msk.f32.mxu0 %vm2123_vm13, %v2110_v29  ;;  %462 = vst.msk [vmem:[#allocation4 + $0xe9] sm:$0x1] %vm434_vm7, %v11486_v59  ;;  %463 = vst.msk [vmem:[#allocation4 + $0x101] sm:$0x1] %vm434_vm7, %v11486_v59 }
 0x297   : > { %v1688_v34 = vpop.permute.xlu1 %1687  ;;  %464 = vst.msk [vmem:[#allocation4 + $0x119] sm:$0x1] %vm434_vm7, %v11486_v59  ;;  %465 = vst.msk [vmem:[#allocation4 + $0x131] sm:$0x1] %vm434_vm7, %v11486_v59 }
 0x298   : > { %v6744_v43 = vpop.f32.mrb[12].mxu0  ;;  %7183 = vrot.lane.b32.xlu1 %v7162_v28, %s8068_s22  ;;  %v6999_v50 = vpop.permute.xlu0 %6998  ;;  %v2078_v10 = vsel %vm2046_vm11, %v2045_v62, %v1688_v34  ;;  %466 = vst.msk [vmem:[#allocation4 + $0x149] sm:$0x1] %vm434_vm7, %v11486_v59  ;;  %467 = vst.msk [vmem:[#allocation4 + $0x161] sm:$0x1] %vm434_vm7, %v11486_v59 }
 0x299   : > { %7188 = vrot.lane.b32.xlu0 %v9606_v26, %s8071_s19  ;;  %v2356_v4 = vadd.f32 %v6744_v43, %v9285_v49  ;;  %v2350_v8 = vpop.f32.mrb[13].mxu0  ;;  %v7000_v21 = vunpack.i.l.bf16 %v6999_v50  ;;  %v7001_v61 = vunpack.i.h.bf16 %v6999_v50  ;;  %468 = vst.msk [vmem:[#allocation4 + $0x179] sm:$0x1] %vm434_vm7, %v11486_v59  ;;  %469 = vst.msk [vmem:[#allocation4 + $0x191] sm:$0x1] %vm434_vm7, %v11486_v59 }
 0x29a   : > { %v2351_v39 = vadd.f32 %v9285_v49, %v2350_v8  ;;  %429 = vst.msk [vmem:[#allocation4 + $0x10] sm:$0x3] %vm428_vm8, %v11486_v59  ;;  %433 = vst.msk [vmem:[#allocation4 + $0x1a8] sm:$0x3] %vm428_vm8, %v11486_v59 }
 0x29b   : > { %v2462_v33 = vmax.f32 %v2356_v4, 0.0  ;;  %v1816_v2 = vpop.permute.xlu1 %1815  ;;  %v3699_v28 = vsel %vm379_vm14, %v2514_v42, %v7000_v21  ;;  %v3700_v7 = vsel %vm379_vm14, %v2515_v36, %v7001_v61  ;;  %453 = vst.msk [vmem:[#allocation4 + $0x11] sm:$0x1] %vm434_vm7, %v11486_v59  ;;  %470 = vst.msk [vmem:[#allocation4 + $0x1a9] sm:$0x1] %vm434_vm7, %v11486_v59 }
 0x29c   : > { %v2461_v24 = vmax.f32 %v2351_v39, 0.0  ;;  %v2111_v9 = vsel %vm2079_vm12, %v2078_v10, %v1816_v2  ;;  %7193 = vrot.lane.b32.xlu1 %v7192_v41, %s8070_s8  ;;  %v7009_v15 = vpop.permute.xlu0 %7008  ;;  %vm11334_vm9 = vmpackc.low %vm379_vm14, %vm379_vm14 }
 0x29d   : > { %2495 = vst.msk [vmem:[#allocation3 + $0xb1] sm:$0xff] %vm379_vm14, %v2462_v33  ;;  %6770 = vmatmul.mubr.msk.f32.gmra.mrb[30].mxu0 %vm2123_vm13, %v2111_v9  ;;  %v7010_v14 = vunpack.i.l.bf16 %v7009_v15  ;;  %v7011_v5 = vunpack.i.h.bf16 %v7009_v15 }
 0x29e   : > { %2494 = vst.msk [vmem:[#allocation3 + $0xa9] sm:$0xff] %vm379_vm14, %v2461_v24 }
 0x29f   : > { %v7004_v45 = vpop.permute.xlu1 %7003 }
 0x2a0   : > { %v7006_v63 = vunpack.i.h.bf16 %v7004_v45  ;;  %v7005_v53 = vunpack.i.l.bf16 %v7004_v45  ;;  %v7019_v1 = vpop.permute.xlu0 %7018 }
 0x2a1   : > { %v7020_v25 = vunpack.i.l.bf16 %v7019_v1  ;;  %v7021_v62 = vunpack.i.h.bf16 %v7019_v1 }
 0x2a2   : > { %v3731_v52 = vsel %vm425_vm2, %v3699_v28, %v7005_v53  ;;  %v3732_v35 = vsel %vm425_vm2, %v3700_v7, %v7006_v63 }
 0x2a3   : > { %v7014_v58 = vpop.permute.xlu1 %7013  ;;  %v3764_v37 = vsel %vm3763_vm0, %v3731_v52, %v7010_v14  ;;  %v3765_v34 = vsel %vm3763_vm0, %v3732_v35, %v7011_v5 }
 0x2a4   : > { %v7016_v30 = vunpack.i.h.bf16 %v7014_v58  ;;  %v7015_v60 = vunpack.i.l.bf16 %v7014_v58  ;;  %v2750_v3 = vld [vmem:[#allocation3 + $0xb1] sm:$0xff]  ;;  %v7029_v29 = vpop.permute.xlu0 %7028 }
 0x2a5   : > { %v2749_v11 = vld [vmem:[#allocation3 + $0xa9] sm:$0xff]  ;;  %v7030_v39 = vunpack.i.l.bf16 %v7029_v29  ;;  %v7031_v9 = vunpack.i.h.bf16 %v7029_v29  ;;  %v9682_v53 = vld [vmem:[#allocation3 + $0xb2] sm:$0xff] }
 0x2a6   : > { %v9655_v19 = vld [vmem:[#allocation3 + $0xa8] sm:$0xff]  ;;  %v9657_v47 = vld [vmem:[#allocation3 + $0xb0] sm:$0xff]  ;;  %v3797_v46 = vsel %vm3796_vm3, %v3764_v37, %v7015_v60  ;;  %v9661_v43 = vpack.i.bf16 %v2750_v3, %v2749_v11  ;;  %v3798_v4 = vsel %vm3796_vm3, %v3765_v34, %v7016_v30 }
 0x2a7   : > { %v7024_v17 = vpop.permute.xlu1 %7023  ;;  %v7197_v55 = vpack.i.bf16 %v9657_v47, %v9655_v19  ;;  %v3830_v10 = vsel %vm3829_vm4, %v3797_v46, %v7020_v25  ;;  %v3831_v42 = vsel %vm3829_vm4, %v3798_v4, %v7021_v62  ;;  %v9680_v63 = vld [vmem:[#allocation3 + $0xaa] sm:$0xff] }
 0x2a8   : > { %v7026_v50 = vunpack.i.h.bf16 %v7024_v17  ;;  %v7025_v8 = vunpack.i.l.bf16 %v7024_v17  ;;  %7203 = vrot.lane.b32.xlu1 %v9661_v43, %s8072_s24  ;;  %v7039_v36 = vpop.permute.xlu0 %7038  ;;  %v7227_v52 = vpack.i.bf16 %v9682_v53, %v9680_v63 }
 0x2a9   : > { %7198 = vrot.lane.b32.xlu0 %v7197_v55, %s8073_s25  ;;  %v7040_v30 = vunpack.i.l.bf16 %v7039_v36 }
 0x2aa   : > { %v3863_v33 = vsel %vm3862_vm5, %v3830_v10, %v7025_v8  ;;  %v3864_v24 = vsel %vm3862_vm5, %v3831_v42, %v7026_v50 }
 0x2ab   : > { %v7034_v21 = vpop.permute.xlu1 %7033  ;;  %v3896_v2 = vsel %vm3895_vm6, %v3863_v33, %v7030_v39  ;;  %v3897_v15 = vsel %vm3895_vm6, %v3864_v24, %v7031_v9 }
 0x2ac   : > { %4114 = vmatmul.mubr.f32.vlgmr.msra.gmra.mrb[0].mxu1 %v3896_v2  ;;  %7213 = vrot.lane.b32.xlu1 %v7192_v41, %s8069_s23  ;;  %v7035_v28 = vunpack.i.l.bf16 %v7034_v21  ;;  %v7036_v7 = vunpack.i.h.bf16 %v7034_v21  ;;  %v7049_v5 = vpop.permute.xlu0 %7048 }
 0x2ad   : > { %7208 = vrot.lane.b32.xlu0 %v9606_v26, %s8067_s15  ;;  %6510 = vmatprep.mubr.msk.f32.mxu1 %vm379_vm14, %v9446_v27  ;;  %v7050_v29 = vunpack.i.l.bf16 %v7049_v5  ;;  %v7051_v34 = vunpack.i.h.bf16 %v7049_v5 }
 0x2ae   : > { %v3701_v14 = vsel %vm379_vm14, %v9384_v20, %v7035_v28  ;;  %v3702_v60 = vsel %vm379_vm14, %v9386_v23, %v7036_v7 }
 0x2af   : > { %v7044_v61 = vpop.permute.xlu1 %7043  ;;  %v3733_v37 = vsel %vm425_vm2, %v3701_v14, %v7040_v30 }
 0x2b0   : > { %v6747_v45 = vpop.f32.mrb[14].mxu0  ;;  %4119 = vmatmul.mubr.f32.gmra.mrb[2].mxu1 %v3897_v15  ;;  %7223 = vrot.lane.b32.xlu1 %v9661_v43, %s8071_s19  ;;  %v7045_v58 = vunpack.i.l.bf16 %v7044_v61  ;;  %v7046_v3 = vunpack.i.h.bf16 %v7044_v61 }
 0x2b1   : > { %v2366_v41 = vadd.f32 %v6747_v45, %v9285_v49  ;;  %7218 = vrot.lane.b32.xlu0 %v7197_v55, %s8068_s22  ;;  %v2360_v27 = vpop.f32.mrb[15].mxu0  ;;  %6511 = vmatprep.mubr.msk.f32.mxu1 %vm379_vm14, %v9486_v57  ;;  %v7041_v57 = vunpack.i.h.bf16 %v7039_v36 }
 0x2b2   : > { %v2361_v26 = vadd.f32 %v9285_v49, %v2360_v27  ;;  %v3766_v11 = vsel %vm3763_vm0, %v3733_v37, %v7045_v58 }
 0x2b3   : > { %v2464_v1 = vmax.f32 %v2366_v41, 0.0  ;;  %v7054_v49 = vpop.permute.xlu1 %7053  ;;  %v3734_v20 = vsel %vm425_vm2, %v3702_v60, %v7041_v57  ;;  %v3799_v62 = vsel %vm3796_vm3, %v3766_v11, %v7050_v29 }
 0x2b4   : > { %v2463_v35 = vmax.f32 %v2361_v26, 0.0  ;;  %v7055_v46 = vunpack.i.l.bf16 %v7054_v49  ;;  %v3767_v23 = vsel %vm3763_vm0, %v3734_v20, %v7046_v3  ;;  %v7056_v25 = vunpack.i.h.bf16 %v7054_v49 }
 0x2b5   : > { %2497 = vst.msk [vmem:[#allocation3 + $0xc9] sm:$0xff] %vm379_vm14, %v2464_v1  ;;  %7228 = vrot.lane.b32.xlu0 %v7227_v52, %s8070_s8  ;;  %v3800_v33 = vsel %vm3796_vm3, %v3767_v23, %v7051_v34 }
 0x2b6   : > { %2496 = vst.msk [vmem:[#allocation3 + $0xc1] sm:$0xff] %vm379_vm14, %v2463_v35  ;;  %v3832_v39 = vsel %vm3829_vm4, %v3799_v62, %v7055_v46  ;;  %v3833_v9 = vsel %vm3829_vm4, %v3800_v33, %v7056_v25 }
 0x2ba   : > { %v7059_v17 = vpop.permute.xlu0 %7058 }
 0x2bb   : > { %v7064_v55 = vpop.permute.xlu1 %7063  ;;  %v7061_v4 = vunpack.i.h.bf16 %v7059_v17  ;;  %v7060_v50 = vunpack.i.l.bf16 %v7059_v17 }
 0x2bc   : > { %v7065_v8 = vunpack.i.l.bf16 %v7064_v55  ;;  %v2752_v10 = vld [vmem:[#allocation3 + $0xc9] sm:$0xff]  ;;  %v7066_v61 = vunpack.i.h.bf16 %v7064_v55 }
 0x2bd   : > { %v3865_v21 = vsel %vm3862_vm5, %v3832_v39, %v7060_v50  ;;  %v9708_v2 = vld [vmem:[#allocation3 + $0xc0] sm:$0xff]  ;;  %v9710_v42 = vld [vmem:[#allocation3 + $0xc8] sm:$0xff]  ;;  %v3866_v45 = vsel %vm3862_vm5, %v3833_v9, %v7061_v4 }
 0x2be   : > { %v2751_v24 = vld [vmem:[#allocation3 + $0xc1] sm:$0xff]  ;;  %v3898_v15 = vsel %vm3895_vm6, %v3865_v21, %v7065_v8  ;;  %v7232_v36 = vpack.i.bf16 %v9710_v42, %v9708_v2  ;;  %v7069_v7 = vpop.permute.xlu0 %7068  ;;  %v3899_v41 = vsel %vm3895_vm6, %v3866_v45, %v7066_v61  ;;  %v9732_v1 = vld [vmem:[#allocation3 + $0xca] sm:$0xff] }
 0x2bf   : > { %v9716_v28 = vpack.i.bf16 %v2752_v10, %v2751_v24  ;;  %4124 = vmatmul.mubr.f32.gmra.mrb[4].mxu1 %v3898_v15  ;;  %v7074_v27 = vpop.permute.xlu1 %7073  ;;  %v7070_v14 = vunpack.i.l.bf16 %v7069_v7  ;;  %v7071_v35 = vunpack.i.h.bf16 %v7069_v7 }
 0x2c0   : > { %6512 = vmatprep.mubr.msk.f32.mxu1 %vm379_vm14, %v9488_v31  ;;  %7233 = vrot.lane.b32.xlu1 %v7232_v36, %s8073_s25  ;;  %v9730_v31 = vld [vmem:[#allocation3 + $0xc2] sm:$0xff]  ;;  %v7075_v3 = vunpack.i.l.bf16 %v7074_v27  ;;  %v7076_v57 = vunpack.i.h.bf16 %v7074_v27 }
 0x2c1   : > { %7238 = vrot.lane.b32.xlu0 %v9716_v28, %s8072_s24  ;;  %v7262_v60 = vpack.i.bf16 %v9732_v1, %v9730_v31  ;;  %v3703_v5 = vsel %vm379_vm14, %v9409_v54, %v7070_v14  ;;  %v3704_v46 = vsel %vm379_vm14, %v9411_v22, %v7071_v35 }
 0x2c2   : > { %v7079_v26 = vpop.permute.xlu0 %7078  ;;  %v3735_v34 = vsel %vm425_vm2, %v3703_v5, %v7075_v3  ;;  %v3736_v54 = vsel %vm425_vm2, %v3704_v46, %v7076_v57 }
 0x2c3   : > { %4129 = vmatmul.mubr.f32.gmra.mrb[6].mxu1 %v3899_v41  ;;  %v7084_v37 = vpop.permute.xlu1 %7083  ;;  %v7080_v20 = vunpack.i.l.bf16 %v7079_v26  ;;  %v7081_v29 = vunpack.i.h.bf16 %v7079_v26 }
 0x2c4   : > { %6513 = vmatprep.mubr.msk.f32.mxu1 %vm379_vm14, %v9536_v6  ;;  %7243 = vrot.lane.b32.xlu1 %v9661_v43, %s8067_s15  ;;  %v9738_v6 = vld [vmem:[%s11432_s2] ss:$0 sm:$0xff]  ;;  %v7085_v25 = vunpack.i.l.bf16 %v7084_v37  ;;  %v7086_v17 = vunpack.i.h.bf16 %v7084_v37 }
 0x2c5   : > { %7248 = vrot.lane.b32.xlu0 %v7227_v52, %s8069_s23  ;;  %v3768_v55 = vsel %vm3763_vm0, %v3735_v34, %v7080_v20  ;;  %v3769_v50 = vsel %vm3763_vm0, %v3736_v54, %v7081_v29 }
 0x2c6   : > { %v7089_v23 = vpop.permute.xlu0 %7088  ;;  %v3801_v21 = vsel %vm3796_vm3, %v3768_v55, %v7085_v25  ;;  %v3802_v61 = vsel %vm3796_vm3, %v3769_v50, %v7086_v17 }
 0x2c7   : > { %v7090_v4 = vunpack.i.l.bf16 %v7089_v23  ;;  %v7091_v8 = vunpack.i.h.bf16 %v7089_v23 }
 0x2c8   : > { %v6750_v58 = vpop.f32.mrb[16].mxu0  ;;  %7253 = vrot.lane.b32.xlu1 %v7232_v36, %s8068_s22 }
 0x2c9   : > { %v2376_v43 = vadd.f32 %v9738_v6, %v6750_v58  ;;  %7258 = vrot.lane.b32.xlu0 %v9716_v28, %s8071_s19  ;;  %v2370_v52 = vpop.f32.mrb[17].mxu0  ;;  %v3834_v24 = vsel %vm3829_vm4, %v3801_v21, %v7090_v4  ;;  %v3835_v41 = vsel %vm3829_vm4, %v3802_v61, %v7091_v8 }
 0x2ca   : > { %v2371_v30 = vadd.f32 %v9738_v6, %v2370_v52 }
 0x2cb   : > { %v2466_v49 = vmax.f32 %v2376_v43, 0.0 }
 0x2cc   : > { %v2465_v11 = vmax.f32 %v2371_v30, 0.0  ;;  %7263 = vrot.lane.b32.xlu1 %v7262_v60, %s8070_s8 }
 0x2cd   : > { %2499 = vst.msk [vmem:[#allocation3 + $0xe1] sm:$0xff] %vm379_vm14, %v2466_v49 }
 0x2ce   : > { %2498 = vst.msk [vmem:[#allocation3 + $0xd9] sm:$0xff] %vm379_vm14, %v2465_v11 }
 0x2d2   : > { %v7094_v62 = vpop.permute.xlu1 %7093 }
 0x2d3   : > { %v7099_v22 = vpop.permute.xlu0 %7098  ;;  %v7096_v39 = vunpack.i.h.bf16 %v7094_v62  ;;  %v7095_v10 = vunpack.i.l.bf16 %v7094_v62 }
 0x2d4   : > { %v7100_v33 = vunpack.i.l.bf16 %v7099_v22  ;;  %v2754_v9 = vld [vmem:[#allocation3 + $0xe1] sm:$0xff]  ;;  %v7101_v27 = vunpack.i.h.bf16 %v7099_v22 }
 0x2d5   : > { %v3867_v15 = vsel %vm3862_vm5, %v3834_v24, %v7095_v10  ;;  %v2753_v36 = vld [vmem:[#allocation3 + $0xd9] sm:$0xff]  ;;  %v3868_v35 = vsel %vm3862_vm5, %v3835_v41, %v7096_v39  ;;  %v9785_v57 = vld [vmem:[#allocation3 + $0xe2] sm:$0xff] }
 0x2d6   : > { %v9761_v45 = vld [vmem:[#allocation3 + $0xd8] sm:$0xff]  ;;  %v9763_v7 = vld [vmem:[#allocation3 + $0xe0] sm:$0xff]  ;;  %v3900_v26 = vsel %vm3895_vm6, %v3867_v15, %v7100_v33  ;;  %v9767_v14 = vpack.i.bf16 %v2754_v9, %v2753_v36  ;;  %v7104_v43 = vpop.permute.xlu1 %7103  ;;  %v3901_v52 = vsel %vm3895_vm6, %v3868_v35, %v7101_v27 }
 0x2d7   : > { %v7267_v58 = vpack.i.bf16 %v9763_v7, %v9761_v45  ;;  %4134 = vmatmul.mubr.f32.gmra.mrb[8].mxu1 %v3900_v26  ;;  %v7109_v30 = vpop.permute.xlu0 %7108  ;;  %v9783_v49 = vld [vmem:[#allocation3 + $0xda] sm:$0xff]  ;;  %v7105_v5 = vunpack.i.l.bf16 %v7104_v43 }
 0x2d8   : > { %7273 = vrot.lane.b32.xlu1 %v9767_v14, %s8072_s24  ;;  %6514 = vmatprep.mubr.msk.f32.mxu1 %vm379_vm14, %v9538_v16  ;;  %v7106_v16 = vunpack.i.h.bf16 %v7104_v43  ;;  %v7110_v11 = vunpack.i.l.bf16 %v7109_v30  ;;  %v7111_v23 = vunpack.i.h.bf16 %v7109_v30 }
 0x2d9   : > { %7268 = vrot.lane.b32.xlu0 %v7267_v58, %s8073_s25  ;;  %v3705_v29 = vsel %vm379_vm14, %v9454_v56, %v7105_v5 }
 0x2da   : > { %v7114_v3 = vpop.permute.xlu1 %7113  ;;  %v3706_v54 = vsel %vm379_vm14, %v9456_v48, %v7106_v16  ;;  %v3737_v50 = vsel %vm425_vm2, %v3705_v29, %v7110_v11 }
 0x2db   : > { %4139 = vmatmul.mubr.f32.gmra.mrb[10].mxu1 %v3901_v52  ;;  %v7115_v25 = vunpack.i.l.bf16 %v7114_v3  ;;  %v7119_v34 = vpop.permute.xlu0 %7118  ;;  %v7116_v55 = vunpack.i.h.bf16 %v7114_v3  ;;  %v3738_v56 = vsel %vm425_vm2, %v3706_v54, %v7111_v23 }
 0x2dc   : > { %7283 = vrot.lane.b32.xlu1 %v7262_v60, %s8069_s23  ;;  %6515 = vmatprep.mubr.msk.f32.mxu1 %vm379_vm14, %v9586_v44  ;;  %v7297_v44 = vpack.i.bf16 %v9785_v57, %v9783_v49  ;;  %v7120_v8 = vunpack.i.l.bf16 %v7119_v34  ;;  %v7121_v22 = vunpack.i.h.bf16 %v7119_v34 }
 0x2dd   : > { %7278 = vrot.lane.b32.xlu0 %v9716_v28, %s8067_s15  ;;  %v3770_v62 = vsel %vm3763_vm0, %v3737_v50, %v7115_v25  ;;  %v3771_v10 = vsel %vm3763_vm0, %v3738_v56, %v7116_v55 }
 0x2de   : > { %v7124_v4 = vpop.permute.xlu1 %7123  ;;  %v3803_v24 = vsel %vm3796_vm3, %v3770_v62, %v7120_v8  ;;  %v3804_v36 = vsel %vm3796_vm3, %v3771_v10, %v7121_v22 }
 0x2df   : > { %v7125_v39 = vunpack.i.l.bf16 %v7124_v4  ;;  %v7126_v33 = vunpack.i.h.bf16 %v7124_v4 }
 0x2e0   : > { %v6753_v37 = vpop.f32.mrb[18].mxu0  ;;  %7293 = vrot.lane.b32.xlu1 %v9767_v14, %s8071_s19 }
 0x2e1   : > { %7288 = vrot.lane.b32.xlu0 %v7267_v58, %s8068_s22  ;;  %v2386_v60 = vadd.f32 %v9738_v6, %v6753_v37  ;;  %v2380_v28 = vpop.f32.mrb[19].mxu0  ;;  %v3836_v41 = vsel %vm3829_vm4, %v3803_v24, %v7125_v39  ;;  %v3837_v52 = vsel %vm3829_vm4, %v3804_v36, %v7126_v33 }
 0x2e2   : > { %v2381_v20 = vadd.f32 %v9738_v6, %v2380_v28 }
 0x2e3   : > { %v2468_v46 = vmax.f32 %v2386_v60, 0.0 }
 0x2e4   : > { %v2467_v17 = vmax.f32 %v2381_v20, 0.0 }
 0x2e5   : > { %7298 = vrot.lane.b32.xlu0 %v7297_v44, %s8070_s8  ;;  %2501 = vst.msk [vmem:[#allocation3 + $0xf9] sm:$0xff] %vm379_vm14, %v2468_v46 }
 0x2e6   : > { %2500 = vst.msk [vmem:[#allocation3 + $0xf1] sm:$0xff] %vm379_vm14, %v2467_v17 }
 0x2ea   : > { %v7134_v21 = vpop.permute.xlu1 %7133 }
 0x2eb   : > { %v7129_v48 = vpop.permute.xlu0 %7128  ;;  %v7135_v9 = vunpack.i.l.bf16 %v7134_v21  ;;  %v7136_v30 = vunpack.i.h.bf16 %v7134_v21 }
 0x2ec   : > { %v7131_v61 = vunpack.i.h.bf16 %v7129_v48  ;;  %v7130_v15 = vunpack.i.l.bf16 %v7129_v48  ;;  %v2756_v27 = vld [vmem:[#allocation3 + $0xf9] sm:$0xff] }
 0x2ed   : > { %v2723_v58 = vld [vmem:[#allocation3 + $0xf0] sm:$0xff]  ;;  %v2724_v35 = vld [vmem:[#allocation3 + $0xf8] sm:$0xff] }
 0x2ee   : > { %v3869_v26 = vsel %vm3862_vm5, %v3836_v41, %v7130_v15  ;;  %v2755_v43 = vld [vmem:[#allocation3 + $0xf1] sm:$0xff]  ;;  %v7302_v5 = vpack.i.bf16 %v2724_v35, %v2723_v58  ;;  %v3870_v16 = vsel %vm3862_vm5, %v3837_v52, %v7131_v61  ;;  %v7144_v20 = vpop.permute.xlu1 %7143  ;;  %v9827_v29 = vld [vmem:[#allocation3 + $0xfa] sm:$0xff] }
 0x2ef   : > { %v3902_v3 = vsel %vm3895_vm6, %v3869_v26, %v7135_v9  ;;  %v9811_v37 = vpack.i.bf16 %v2756_v27, %v2755_v43  ;;  %v7139_v60 = vpop.permute.xlu0 %7138  ;;  %v3903_v28 = vsel %vm3895_vm6, %v3870_v16, %v7136_v30  ;;  %v9825_v46 = vld [vmem:[#allocation3 + $0xf2] sm:$0xff]  ;;  %v7145_v17 = vunpack.i.l.bf16 %v7144_v20 }
 0x2f0   : > { %4144 = vmatmul.mubr.f32.gmra.mrb[12].mxu1 %v3902_v3  ;;  %7303 = vrot.lane.b32.xlu1 %v7302_v5, %s8073_s25  ;;  %v7140_v23 = vunpack.i.l.bf16 %v7139_v60  ;;  %v7146_v55 = vunpack.i.h.bf16 %v7144_v20 }
 0x2f1   : > { %7308 = vrot.lane.b32.xlu0 %v9811_v37, %s8072_s24  ;;  %6516 = vmatprep.mubr.msk.f32.mxu1 %vm379_vm14, %v9588_v0  ;;  %v7141_v0 = vunpack.i.h.bf16 %v7139_v60 }
 0x2f2   : > { %v3707_v4 = vsel %vm379_vm14, %v9506_v51, %v7140_v23  ;;  %v7154_v50 = vpop.permute.xlu1 %7153 }
 0x2f3   : > { %v7149_v11 = vpop.permute.xlu0 %7148  ;;  %v3708_v62 = vsel %vm379_vm14, %v9508_v40, %v7141_v0  ;;  %v7155_v10 = vunpack.i.l.bf16 %v7154_v50  ;;  %v3739_v33 = vsel %vm425_vm2, %v3707_v4, %v7145_v17  ;;  %v7156_v21 = vunpack.i.h.bf16 %v7154_v50 }
 0x2f4   : > { %4149 = vmatmul.mubr.f32.gmra.mrb[14].mxu1 %v3903_v28  ;;  %7313 = vrot.lane.b32.xlu1 %v9767_v14, %s8067_s15  ;;  %v7150_v8 = vunpack.i.l.bf16 %v7149_v11  ;;  %v7151_v22 = vunpack.i.h.bf16 %v7149_v11  ;;  %v3740_v51 = vsel %vm425_vm2, %v3708_v62, %v7146_v55 }
 0x2f5   : > { %7318 = vrot.lane.b32.xlu0 %v7297_v44, %s8069_s23  ;;  %6517 = vmatprep.mubr.msk.f32.mxu1 %vm379_vm14, %v9630_v32  ;;  %v9836_v32 = vpack.i.bf16 %v9827_v29, %v9825_v46 }
 0x2f6   : > { %v3772_v48 = vsel %vm3763_vm0, %v3739_v33, %v7150_v8  ;;  %v3773_v9 = vsel %vm3763_vm0, %v3740_v51, %v7151_v22 }
 0x2f7   : > { %v7159_v39 = vpop.permute.xlu0 %7158  ;;  %v3805_v26 = vsel %vm3796_vm3, %v3772_v48, %v7155_v10  ;;  %v3806_v43 = vsel %vm3796_vm3, %v3773_v9, %v7156_v21 }
 0x2f8   : > { %v6756_v25 = vpop.f32.mrb[20].mxu0  ;;  %7323 = vrot.lane.b32.xlu1 %v7302_v5, %s8068_s22  ;;  %v7160_v24 = vunpack.i.l.bf16 %v7159_v39  ;;  %v7161_v61 = vunpack.i.h.bf16 %v7159_v39 }
 0x2f9   : > { %7328 = vrot.lane.b32.xlu0 %v9811_v37, %s8071_s19  ;;  %v2396_v14 = vadd.f32 %v9738_v6, %v6756_v25  ;;  %v2390_v44 = vpop.f32.mrb[21].mxu0 }
 0x2fa   : > { %v2391_v34 = vadd.f32 %v9738_v6, %v2390_v44  ;;  %v3838_v58 = vsel %vm3829_vm4, %v3805_v26, %v7160_v24  ;;  %v3839_v16 = vsel %vm3829_vm4, %v3806_v43, %v7161_v61 }
 0x2fb   : > { %v2470_v54 = vmax.f32 %v2396_v14, 0.0 }
 0x2fc   : > { %v2469_v56 = vmax.f32 %v2391_v34, 0.0  ;;  %7333 = vrot.lane.b32.xlu1 %v9836_v32, %s8070_s8 }
 0x2fd   : > { %2503 = vst.msk [vmem:[#allocation3 + $0x111] sm:$0xff] %vm379_vm14, %v2470_v54 }
 0x2fe   : > { %2502 = vst.msk [vmem:[#allocation3 + $0x109] sm:$0xff] %vm379_vm14, %v2469_v56 }
 0x302   : > { %v7164_v15 = vpop.permute.xlu1 %7163 }
 0x303   : > { %v7169_v40 = vpop.permute.xlu0 %7168  ;;  %v7166_v36 = vunpack.i.h.bf16 %v7164_v15  ;;  %v7165_v41 = vunpack.i.l.bf16 %v7164_v15 }
 0x304   : > { %v7170_v27 = vunpack.i.l.bf16 %v7169_v40  ;;  %v2758_v35 = vld [vmem:[#allocation3 + $0x111] sm:$0xff]  ;;  %v7171_v60 = vunpack.i.h.bf16 %v7169_v40 }
 0x305   : > { %v3871_v52 = vsel %vm3862_vm5, %v3838_v58, %v7165_v41  ;;  %v2757_v30 = vld [vmem:[#allocation3 + $0x109] sm:$0xff]  ;;  %v3872_v23 = vsel %vm3862_vm5, %v3839_v16, %v7166_v36  ;;  %v9947_v44 = vld [vmem:[#allocation3 + $0x112] sm:$0xff] }
 0x306   : > { %v2725_v3 = vld [vmem:[#allocation3 + $0x108] sm:$0xff]  ;;  %v2726_v5 = vld [vmem:[#allocation3 + $0x110] sm:$0xff]  ;;  %v3904_v28 = vsel %vm3895_vm6, %v3871_v52, %v7170_v27  ;;  %v9856_v20 = vpack.i.bf16 %v2758_v35, %v2757_v30  ;;  %v7174_v25 = vpop.permute.xlu1 %7173  ;;  %v3905_v0 = vsel %vm3895_vm6, %v3872_v23, %v7171_v60 }
 0x307   : > { %v7337_v11 = vpack.i.bf16 %v2726_v5, %v2725_v3  ;;  %4154 = vmatmul.mubr.f32.gmra.mrb[16].mxu1 %v3904_v28  ;;  %v9945_v14 = vld [vmem:[#allocation3 + $0x10a] sm:$0xff]  ;;  %v7175_v59 = vunpack.i.l.bf16 %v7174_v25  ;;  %v7176_v55 = vunpack.i.h.bf16 %v7174_v25 }
 0x308   : > { %7343 = vrot.lane.b32.xlu1 %v9856_v20, %s8072_s24  ;;  %6518 = vmatprep.mubr.msk.f32.mxu1 %vm379_vm14, %v9632_v12  ;;  %v7179_v12 = vpop.permute.xlu0 %7178 }
 0x309   : > { %7338 = vrot.lane.b32.xlu0 %v7337_v11, %s8073_s25  ;;  %v7180_v50 = vunpack.i.l.bf16 %v7179_v12  ;;  %v3709_v56 = vsel %vm379_vm14, %v9556_v13, %v7175_v59  ;;  %v7181_v39 = vunpack.i.h.bf16 %v7179_v12  ;;  %v3710_v33 = vsel %vm379_vm14, %v9558_v18, %v7176_v55 }
 0x30a   : > { %v7184_v34 = vpop.permute.xlu1 %7183 }
 0x30b   : > { %4159 = vmatmul.mubr.f32.gmra.mrb[18].mxu1 %v3905_v0  ;;  %v7185_v62 = vunpack.i.l.bf16 %v7184_v34  ;;  %v7186_v21 = vunpack.i.h.bf16 %v7184_v34  ;;  %v3741_v51 = vsel %vm425_vm2, %v3709_v56, %v7180_v50  ;;  %v3742_v13 = vsel %vm425_vm2, %v3710_v33, %v7181_v39 }
 0x30c   : > { %7353 = vrot.lane.b32.xlu1 %v9836_v32, %s8069_s23  ;;  %6519 = vmatprep.mubr.msk.f32.mxu1 %vm379_vm14, %v9680_v63  ;;  %v7367_v63 = vpack.i.bf16 %v9947_v44, %v9945_v14  ;;  %v7189_v22 = vpop.permute.xlu0 %7188 }
 0x30d   : > { %7348 = vrot.lane.b32.xlu0 %v9811_v37, %s8067_s15  ;;  %v7190_v48 = vunpack.i.l.bf16 %v7189_v22  ;;  %v3774_v24 = vsel %vm3763_vm0, %v3741_v51, %v7185_v62  ;;  %v7191_v61 = vunpack.i.h.bf16 %v7189_v22  ;;  %v3775_v15 = vsel %vm3763_vm0, %v3742_v13, %v7186_v21  ;;  %v2527_v22 = vld [vmem:[#allocation3 + $0x98] sm:$0xff] }
 0x30e   : > { %v7194_v10 = vpop.permute.xlu1 %7193 }
 0x30f   : > { %v7195_v9 = vunpack.i.l.bf16 %v7194_v10  ;;  %v7196_v40 = vunpack.i.h.bf16 %v7194_v10  ;;  %v3807_v27 = vsel %vm3796_vm3, %v3774_v24, %v7190_v48  ;;  %v3808_v5 = vsel %vm3796_vm3, %v3775_v15, %v7191_v61 }
 0x310   : > { %v6759_v17 = vpop.f32.mrb[22].mxu0  ;;  %7363 = vrot.lane.b32.xlu1 %v9856_v20, %s8071_s19 }
 0x311   : > { %7358 = vrot.lane.b32.xlu0 %v7337_v11, %s8068_s22  ;;  %v2406_v32 = vadd.f32 %v9738_v6, %v6759_v17  ;;  %v2400_v54 = vpop.f32.mrb[23].mxu0  ;;  %v3840_v43 = vsel %vm3829_vm4, %v3807_v27, %v7195_v9  ;;  %v3841_v25 = vsel %vm3829_vm4, %v3808_v5, %v7196_v40 }
 0x312   : > { %v2401_v37 = vadd.f32 %v9738_v6, %v2400_v54 }
 0x313   : > { %v2472_v4 = vmax.f32 %v2406_v32, 0.0 }
 0x314   : > { %v2471_v8 = vmax.f32 %v2401_v37, 0.0 }
 0x315   : > { %7368 = vrot.lane.b32.xlu0 %v7367_v63, %s8070_s8  ;;  %2505 = vst.msk [vmem:[#allocation3 + $0x129] sm:$0xff] %vm379_vm14, %v2472_v4 }
 0x316   : > { %2504 = vst.msk [vmem:[#allocation3 + $0x121] sm:$0xff] %vm379_vm14, %v2471_v8  ;;  %v2526_v8 = vld [vmem:[#allocation3 + $0x90] sm:$0xff] }
 0x31a   : > { %v7204_v36 = vpop.permute.xlu1 %7203 }
 0x31b   : > { %v7199_v41 = vpop.permute.xlu0 %7198  ;;  %v7205_v26 = vunpack.i.l.bf16 %v7204_v36  ;;  %v7206_v11 = vunpack.i.h.bf16 %v7204_v36 }
 0x31c   : > { %v7201_v58 = vunpack.i.h.bf16 %v7199_v41  ;;  %v7200_v18 = vunpack.i.l.bf16 %v7199_v41  ;;  %v2760_v35 = vld [vmem:[#allocation3 + $0x129] sm:$0xff] }
 0x31d   : > { %v2727_v52 = vld [vmem:[#allocation3 + $0x120] sm:$0xff]  ;;  %v2728_v30 = vld [vmem:[#allocation3 + $0x128] sm:$0xff] }
 0x31e   : > { %v2759_v3 = vld [vmem:[#allocation3 + $0x121] sm:$0xff]  ;;  %v3873_v16 = vsel %vm3862_vm5, %v3840_v43, %v7200_v18  ;;  %v7372_v60 = vpack.i.bf16 %v2728_v30, %v2727_v52  ;;  %v3874_v0 = vsel %vm3862_vm5, %v3841_v25, %v7201_v58  ;;  %v7214_v17 = vpop.permute.xlu1 %7213  ;;  %v9989_v54 = vld [vmem:[#allocation3 + $0x12a] sm:$0xff] }
 0x31f   : > { %v9971_v28 = vpack.i.bf16 %v2760_v35, %v2759_v3  ;;  %v3906_v23 = vsel %vm3895_vm6, %v3873_v16, %v7205_v26  ;;  %v7209_v12 = vpop.permute.xlu0 %7208  ;;  %v3907_v34 = vsel %vm3895_vm6, %v3874_v0, %v7206_v11  ;;  %v9987_v32 = vld [vmem:[#allocation3 + $0x122] sm:$0xff]  ;;  %v7215_v50 = vunpack.i.l.bf16 %v7214_v17 }
 0x320   : > { %4164 = vmatmul.mubr.f32.gmra.mrb[20].mxu1 %v3906_v23  ;;  %7373 = vrot.lane.b32.xlu1 %v7372_v60, %s8073_s25  ;;  %v7210_v37 = vunpack.i.l.bf16 %v7209_v12  ;;  %v7216_v62 = vunpack.i.h.bf16 %v7214_v17 }
 0x321   : > { %7378 = vrot.lane.b32.xlu0 %v9971_v28, %s8072_s24  ;;  %6520 = vmatprep.mubr.msk.f32.mxu1 %vm379_vm14, %v9682_v53  ;;  %v7211_v53 = vunpack.i.h.bf16 %v7209_v12 }
 0x322   : > { %v3711_v39 = vsel %vm379_vm14, %v2526_v8, %v7210_v37  ;;  %v7224_v10 = vpop.permute.xlu1 %7223 }
 0x323   : > { %v7219_v59 = vpop.permute.xlu0 %7218  ;;  %v3712_v51 = vsel %vm379_vm14, %v2527_v22, %v7211_v53  ;;  %v7225_v9 = vunpack.i.l.bf16 %v7224_v10  ;;  %v3743_v13 = vsel %vm425_vm2, %v3711_v39, %v7215_v50  ;;  %v7226_v61 = vunpack.i.h.bf16 %v7224_v10 }
 0x324   : > { %4169 = vmatmul.mubr.f32.gmra.mrb[22].mxu1 %v3907_v34  ;;  %7383 = vrot.lane.b32.xlu1 %v9856_v20, %s8067_s15  ;;  %v7220_v33 = vunpack.i.l.bf16 %v7219_v59  ;;  %v7221_v48 = vunpack.i.h.bf16 %v7219_v59  ;;  %v3744_v15 = vsel %vm425_vm2, %v3712_v51, %v7216_v62 }
 0x325   : > { %7388 = vrot.lane.b32.xlu0 %v7367_v63, %s8069_s23  ;;  %6521 = vmatprep.mubr.msk.f32.mxu1 %vm379_vm14, %v9730_v31  ;;  %v7402_v31 = vpack.i.bf16 %v9989_v54, %v9987_v32 }
 0x326   : > { %v3776_v40 = vsel %vm3763_vm0, %v3743_v13, %v7220_v33  ;;  %v3777_v41 = vsel %vm3763_vm0, %v3744_v15, %v7221_v48 }
 0x327   : > { %v7229_v24 = vpop.permute.xlu0 %7228  ;;  %v3809_v43 = vsel %vm3796_vm3, %v3776_v40, %v7225_v9  ;;  %v3810_v5 = vsel %vm3796_vm3, %v3777_v41, %v7226_v61 }
 0x328   : > { %v6762_v55 = vpop.f32.mrb[24].mxu0  ;;  %7393 = vrot.lane.b32.xlu1 %v7372_v60, %s8068_s22  ;;  %v7230_v36 = vunpack.i.l.bf16 %v7229_v24  ;;  %v7231_v27 = vunpack.i.h.bf16 %v7229_v24 }
 0x329   : > { %v2416_v4 = vadd.f32 %v9738_v6, %v6762_v55  ;;  %7398 = vrot.lane.b32.xlu0 %v9971_v28, %s8071_s19  ;;  %v2410_v20 = vpop.f32.mrb[25].mxu0 }
 0x32a   : > { %v2411_v63 = vadd.f32 %v9738_v6, %v2410_v20  ;;  %v3842_v30 = vsel %vm3829_vm4, %v3809_v43, %v7230_v36  ;;  %v3843_v25 = vsel %vm3829_vm4, %v3810_v5, %v7231_v27 }
 0x32b   : > { %v2474_v56 = vmax.f32 %v2416_v4, 0.0 }
 0x32c   : > { %v2473_v21 = vmax.f32 %v2411_v63, 0.0  ;;  %7403 = vrot.lane.b32.xlu1 %v7402_v31, %s8070_s8 }
 0x32d   : > { %2507 = vst.msk [vmem:[#allocation3 + $0x141] sm:$0xff] %vm379_vm14, %v2474_v56 }
 0x32e   : > { %2506 = vst.msk [vmem:[#allocation3 + $0x139] sm:$0xff] %vm379_vm14, %v2473_v21 }
 0x332   : > { %v7234_v26 = vpop.permute.xlu1 %7233 }
 0x333   : > { %v7236_v58 = vunpack.i.h.bf16 %v7234_v26  ;;  %v7235_v18 = vunpack.i.l.bf16 %v7234_v26  ;;  %v7239_v35 = vpop.permute.xlu0 %7238 }
 0x334   : > { %v7240_v52 = vunpack.i.l.bf16 %v7239_v35  ;;  %v2762_v3 = vld [vmem:[#allocation3 + $0x141] sm:$0xff]  ;;  %v7241_v0 = vunpack.i.h.bf16 %v7239_v35 }
 0x335   : > { %v3875_v16 = vsel %vm3862_vm5, %v3842_v30, %v7235_v18  ;;  %v2761_v60 = vld [vmem:[#allocation3 + $0x139] sm:$0xff]  ;;  %v3876_v59 = vsel %vm3862_vm5, %v3843_v25, %v7236_v58  ;;  %v10029_v63 = vld [vmem:[#allocation3 + $0x142] sm:$0xff] }
 0x336   : > { %v2729_v11 = vld [vmem:[#allocation3 + $0x138] sm:$0xff]  ;;  %v2730_v23 = vld [vmem:[#allocation3 + $0x140] sm:$0xff]  ;;  %v3908_v12 = vsel %vm3895_vm6, %v3875_v16, %v7240_v52  ;;  %v10013_v34 = vpack.i.bf16 %v2762_v3, %v2761_v60  ;;  %v7244_v37 = vpop.permute.xlu1 %7243  ;;  %v3909_v55 = vsel %vm3895_vm6, %v3876_v59, %v7241_v0 }
 0x337   : > { %v7407_v17 = vpack.i.bf16 %v2730_v23, %v2729_v11  ;;  %4174 = vmatmul.mubr.f32.gmra.mrb[24].mxu1 %v3908_v12  ;;  %v7249_v53 = vpop.permute.xlu0 %7248  ;;  %v10027_v20 = vld [vmem:[#allocation3 + $0x13a] sm:$0xff]  ;;  %v7245_v50 = vunpack.i.l.bf16 %v7244_v37 }
 0x338   : > { %7413 = vrot.lane.b32.xlu1 %v10013_v34, %s8072_s24  ;;  %6522 = vmatprep.mubr.msk.f32.mxu1 %vm379_vm14, %v9732_v1  ;;  %v7246_v1 = vunpack.i.h.bf16 %v7244_v37  ;;  %v7250_v62 = vunpack.i.l.bf16 %v7249_v53  ;;  %v7251_v10 = vunpack.i.h.bf16 %v7249_v53 }
 0x339   : > { %7408 = vrot.lane.b32.xlu0 %v7407_v17, %s8073_s25  ;;  %v3713_v39 = vsel %vm379_vm14, %v9655_v19, %v7245_v50 }
 0x33a   : > { %v7254_v4 = vpop.permute.xlu1 %7253  ;;  %v3714_v48 = vsel %vm379_vm14, %v9657_v47, %v7246_v1  ;;  %v3745_v13 = vsel %vm425_vm2, %v3713_v39, %v7250_v62 }
 0x33b   : > { %4179 = vmatmul.mubr.f32.gmra.mrb[26].mxu1 %v3909_v55  ;;  %v7255_v33 = vunpack.i.l.bf16 %v7254_v4  ;;  %v7259_v21 = vpop.permute.xlu0 %7258  ;;  %v7256_v24 = vunpack.i.h.bf16 %v7254_v4  ;;  %v3746_v19 = vsel %vm425_vm2, %v3714_v48, %v7251_v10 }
 0x33c   : > { %7423 = vrot.lane.b32.xlu1 %v7402_v31, %s8069_s23  ;;  %6523 = vmatprep.mubr.msk.f32.mxu1 %vm379_vm14, %v9783_v49  ;;  %v7437_v49 = vpack.i.bf16 %v10029_v63, %v10027_v20  ;;  %v7260_v61 = vunpack.i.l.bf16 %v7259_v21  ;;  %v7261_v40 = vunpack.i.h.bf16 %v7259_v21 }
 0x33d   : > { %7418 = vrot.lane.b32.xlu0 %v9971_v28, %s8067_s15  ;;  %v3778_v15 = vsel %vm3763_vm0, %v3745_v13, %v7255_v33  ;;  %v3779_v41 = vsel %vm3763_vm0, %v3746_v19, %v7256_v24 }
 0x33e   : > { %v7264_v9 = vpop.permute.xlu1 %7263  ;;  %v3811_v58 = vsel %vm3796_vm3, %v3778_v15, %v7260_v61  ;;  %v3812_v52 = vsel %vm3796_vm3, %v3779_v41, %v7261_v40  ;;  %v5591_v61 = vld [vmem:[%s11435_s5 + $0x18] sm:$0xff] }
 0x33f   : > { %v7265_v36 = vunpack.i.l.bf16 %v7264_v9  ;;  %v7266_v27 = vunpack.i.h.bf16 %v7264_v9 }
 0x340   : > { %v6765_v8 = vpop.f32.mrb[26].mxu0  ;;  %7433 = vrot.lane.b32.xlu1 %v10013_v34, %s8071_s19 }
 0x341   : > { %7428 = vrot.lane.b32.xlu0 %v7407_v17, %s8068_s22  ;;  %v2426_v31 = vadd.f32 %v9738_v6, %v6765_v8  ;;  %v2420_v28 = vpop.f32.mrb[27].mxu0  ;;  %v3844_v30 = vsel %vm3829_vm4, %v3811_v58, %v7265_v36  ;;  %v3845_v23 = vsel %vm3829_vm4, %v3812_v52, %v7266_v27  ;;  %v5592_v58 = vld [vmem:[%s11435_s5 + $0x20] sm:$0xff] }
 0x342   : > { %v2421_v56 = vadd.f32 %v9738_v6, %v2420_v28 }
 0x343   : > { %v2476_v22 = vmax.f32 %v2426_v31, 0.0 }
 0x344   : > { %v2475_v51 = vmax.f32 %v2421_v56, 0.0  ;;  %v5589_v56 = vld [vmem:[%s11435_s5 + $0x8] sm:$0xff] }
 0x345   : > { %7438 = vrot.lane.b32.xlu0 %v7437_v49, %s8070_s8  ;;  %2509 = vst.msk [vmem:[#allocation3 + $0x159] sm:$0xff] %vm379_vm14, %v2476_v22 }
 0x346   : > { %2508 = vst.msk [vmem:[#allocation3 + $0x151] sm:$0xff] %vm379_vm14, %v2475_v51 }
 0x34a   : > { %v7274_v26 = vpop.permute.xlu1 %7273 }
 0x34b   : > { %v7269_v47 = vpop.permute.xlu0 %7268  ;;  %v7275_v18 = vunpack.i.l.bf16 %v7274_v26  ;;  %v7276_v25 = vunpack.i.h.bf16 %v7274_v26 }
 0x34c   : > { %v7271_v35 = vunpack.i.h.bf16 %v7269_v47  ;;  %v7270_v43 = vunpack.i.l.bf16 %v7269_v47  ;;  %v2764_v3 = vld [vmem:[#allocation3 + $0x159] sm:$0xff] }
 0x34d   : > { %v2731_v16 = vld [vmem:[#allocation3 + $0x150] sm:$0xff]  ;;  %v2732_v60 = vld [vmem:[#allocation3 + $0x158] sm:$0xff] }
 0x34e   : > { %v3877_v5 = vsel %vm3862_vm5, %v3844_v30, %v7270_v43  ;;  %v2763_v11 = vld [vmem:[#allocation3 + $0x151] sm:$0xff]  ;;  %v7442_v12 = vpack.i.bf16 %v2732_v60, %v2731_v16  ;;  %v3878_v59 = vsel %vm3862_vm5, %v3845_v23, %v7271_v35  ;;  %v7284_v53 = vpop.permute.xlu1 %7283  ;;  %v10071_v8 = vld [vmem:[#allocation3 + $0x15a] sm:$0xff] }
 0x34f   : > { %v3910_v0 = vsel %vm3895_vm6, %v3877_v5, %v7275_v18  ;;  %v10055_v17 = vpack.i.bf16 %v2764_v3, %v2763_v11  ;;  %v7279_v37 = vpop.permute.xlu0 %7278  ;;  %v3911_v55 = vsel %vm3895_vm6, %v3878_v59, %v7276_v25  ;;  %v10069_v50 = vld [vmem:[#allocation3 + $0x152] sm:$0xff]  ;;  %v7285_v39 = vunpack.i.l.bf16 %v7284_v53 }
 0x350   : > { %4184 = vmatmul.mubr.f32.gmra.mrb[28].mxu1 %v3910_v0  ;;  %7443 = vrot.lane.b32.xlu1 %v7442_v12, %s8073_s25  ;;  %v7280_v1 = vunpack.i.l.bf16 %v7279_v37  ;;  %v10086_v62 = vpack.i.bf16 %v10071_v8, %v10069_v50  ;;  %v7286_v33 = vunpack.i.h.bf16 %v7284_v53  ;;  %v5593_v18 = vld [vmem:[%s11435_s5 + $0x28] sm:$0xff] }
 0x351   : > { %7448 = vrot.lane.b32.xlu0 %v10055_v17, %s8072_s24  ;;  %6524 = vmatprep.mubr.msk.f32.mxu1 %vm379_vm14, %v9785_v57  ;;  %v7281_v57 = vunpack.i.h.bf16 %v7279_v37  ;;  %v6872_v52 = vpack.c.bf16 %v5593_v18, %v5592_v58 }
 0x352   : > { %v3715_v21 = vsel %vm379_vm14, %v9708_v2, %v7280_v1  ;;  %v7294_v51 = vpop.permute.xlu1 %7293  ;;  %v5590_v2 = vld [vmem:[%s11435_s5 + $0x10] sm:$0xff] }
 0x353   : > { %v7289_v4 = vpop.permute.xlu0 %7288  ;;  %v6869_v19 = vpack.c.bf16 %v5591_v61, %v5590_v2  ;;  %v7295_v15 = vunpack.i.l.bf16 %v7294_v51  ;;  %v7296_v40 = vunpack.i.h.bf16 %v7294_v51  ;;  %v5600_v2 = vld [vmem:[%s11435_s5 + $0x60] sm:$0xff]  ;;  %v5601_v61 = vld [vmem:[%s11435_s5 + $0x68] sm:$0xff] }
 0x354   : > { %4189 = vmatmul.mubr.f32.gmra.mrb[30].mxu1 %v3911_v55  ;;  %7453 = vrot.lane.b32.xlu1 %v10013_v34, %s8067_s15  ;;  %v7290_v48 = vunpack.i.l.bf16 %v7289_v4  ;;  %v7291_v9 = vunpack.i.h.bf16 %v7289_v4 }
 0x355   : > { %7458 = vrot.lane.b32.xlu0 %v7437_v49, %s8069_s23  ;;  %6525 = vmatprep.mubr.msk.f32.mxu1 %vm379_vm14, %v9825_v46  ;;  %v5588_v46 = vld [vmem:[%s11435_s5] sm:$0xff] }
 0x356   : > { %v6866_v22 = vpack.c.bf16 %v5589_v56, %v5588_v46  ;;  %v5596_v56 = vld [vmem:[%s11435_s5 + $0x40] sm:$0xff] }
 0x357   : > { %v7299_v13 = vpop.permute.xlu0 %7298 }
 0x358   : > { %v6768_v31 = vpop.f32.mrb[28].mxu0  ;;  %7463 = vrot.lane.b32.xlu1 %v7442_v12, %s8068_s22  ;;  %6867 = vmatpush1.bf16.msra.mxu0 %v6866_v22  ;;  %v7300_v27 = vunpack.i.l.bf16 %v7299_v13  ;;  %v7301_v47 = vunpack.i.h.bf16 %v7299_v13 }
 0x359   : > { %7468 = vrot.lane.b32.xlu0 %v10055_v17, %s8071_s19  ;;  %v2436_v34 = vadd.f32 %v9738_v6, %v6768_v31  ;;  %v2430_v28 = vpop.f32.mrb[29].mxu0  ;;  %6868 = vmatprep.subr.bf16.mxu0 %v8066_v38  ;;  %v5594_v31 = vld [vmem:[%s11435_s5 + $0x30] sm:$0xff] }
 0x35a   : > { %v2431_v49 = vadd.f32 %v9738_v6, %v2430_v28  ;;  %v3716_v6 = vsel %vm379_vm14, %v9710_v42, %v7281_v57  ;;  %v3747_v42 = vsel %vm425_vm2, %v3715_v21, %v7285_v39  ;;  %v5595_v57 = vld [vmem:[%s11435_s5 + $0x38] sm:$0xff] }
 0x35b   : > { %v2478_v10 = vmax.f32 %v2436_v34, 0.0  ;;  %v3748_v36 = vsel %vm425_vm2, %v3716_v6, %v7286_v33  ;;  %v3780_v41 = vsel %vm3763_vm0, %v3747_v42, %v7290_v48  ;;  %v6875_v28 = vpack.c.bf16 %v5595_v57, %v5594_v31  ;;  %v8039_v6 = vld [vmem:[%s11432_s2] ss:$0 sm:$0xff] }
 0x35c   : > { %v2477_v24 = vmax.f32 %v2431_v49, 0.0  ;;  %7473 = vrot.lane.b32.xlu1 %v10086_v62, %s8070_s8  ;;  %6870 = vmatpush1.bf16.msra.mxu0 %v6869_v19  ;;  %v3781_v26 = vsel %vm3763_vm0, %v3748_v36, %v7291_v9  ;;  %v3813_v16 = vsel %vm3796_vm3, %v3780_v41, %v7295_v15  ;;  %v5597_v49 = vld [vmem:[%s11435_s5 + $0x48] sm:$0xff]  ;;  %v6884_v42 = vpack.c.bf16 %v5601_v61, %v5600_v2 }
 0x35d   : > { %2511 = vst.msk [vmem:[#allocation3 + $0x171] sm:$0xff] %vm379_vm14, %v2478_v10  ;;  %6871 = vmatprep.subr.bf16.mxu0 %v8066_v38  ;;  %v3846_v60 = vsel %vm3829_vm4, %v3813_v16, %v7300_v27  ;;  %v3814_v23 = vsel %vm3796_vm3, %v3781_v26, %v7296_v40  ;;  %v6878_v39 = vpack.c.bf16 %v5597_v49, %v5596_v56  ;;  %v5599_v10 = vld [vmem:[%s11435_s5 + $0x58] sm:$0xff] }
 0x35e   : > { %2510 = vst.msk [vmem:[#allocation3 + $0x169] sm:$0xff] %vm379_vm14, %v2477_v24  ;;  %v3847_v37 = vsel %vm3829_vm4, %v3814_v23, %v7301_v47 }
 0x360   : > { %6873 = vmatpush1.bf16.msra.mxu0 %v6872_v52  ;;  %v5602_v52 = vld [vmem:[%s11435_s5 + $0x70] sm:$0xff] }
 0x361   : > { %6874 = vmatprep.subr.bf16.mxu0 %v8066_v38 }
 0x362   : > { %v7304_v35 = vpop.permute.xlu1 %7303 }
 0x363   : > { %v7309_v43 = vpop.permute.xlu0 %7308  ;;  %v7306_v30 = vunpack.i.h.bf16 %v7304_v35  ;;  %v7305_v3 = vunpack.i.l.bf16 %v7304_v35 }
 0x364   : > { %v7310_v5 = vunpack.i.l.bf16 %v7309_v43  ;;  %v2766_v11 = vld [vmem:[#allocation3 + $0x171] sm:$0xff]  ;;  %v7311_v55 = vunpack.i.h.bf16 %v7309_v43  ;;  %6876 = vmatpush1.bf16.msra.mxu0 %v6875_v28  ;;  %v10208_v28 = vld [vmem:[%s11434_s4] ss:$0 sm:$0xff] }
 0x365   : > { %v3879_v25 = vsel %vm3862_vm5, %v3846_v60, %v7305_v3  ;;  %v2765_v0 = vld [vmem:[#allocation3 + $0x169] sm:$0xff]  ;;  %v3880_v34 = vsel %vm3862_vm5, %v3847_v37, %v7306_v30  ;;  %6877 = vmatprep.subr.bf16.mxu0 %v8066_v38 }
 0x366   : > { %v2733_v12 = vld [vmem:[#allocation3 + $0x168] sm:$0xff]  ;;  %v2734_v59 = vld [vmem:[#allocation3 + $0x170] sm:$0xff]  ;;  %v3912_v53 = vsel %vm3895_vm6, %v3879_v25, %v7310_v5  ;;  %v10121_v4 = vpack.i.bf16 %v2766_v11, %v2765_v0  ;;  %v7314_v46 = vpop.permute.xlu1 %7313  ;;  %v3913_v22 = vsel %vm3895_vm6, %v3880_v34, %v7311_v55 }
 0x367   : > { %v7477_v1 = vpack.i.bf16 %v2734_v59, %v2733_v12  ;;  %4194 = vmatmul.mubr.f32.gmra.mrb[32].mxu1 %v3912_v53  ;;  %v7319_v33 = vpop.permute.xlu0 %7318  ;;  %v10155_v48 = vld [vmem:[#allocation3 + $0x16a] sm:$0xff]  ;;  %v7316_v24 = vunpack.i.h.bf16 %v7314_v46  ;;  %v5605_v12 = vld [vmem:[%s11435_s5 + $0x88] sm:$0xff] }
 0x368   : > { %7483 = vrot.lane.b32.xlu1 %v10121_v4, %s8072_s24  ;;  %6526 = vmatprep.mubr.msk.f32.mxu1 %vm379_vm14, %v9827_v29  ;;  %v5598_v29 = vld [vmem:[%s11435_s5 + $0x50] sm:$0xff]  ;;  %v7320_v40 = vunpack.i.l.bf16 %v7319_v33  ;;  %v7321_v27 = vunpack.i.h.bf16 %v7319_v33  ;;  %v5604_v0 = vld [vmem:[%s11435_s5 + $0x80] sm:$0xff] }
 0x369   : > { %7478 = vrot.lane.b32.xlu0 %v7477_v1, %s8073_s25  ;;  %6879 = vmatpush1.bf16.msra.mxu0 %v6878_v39  ;;  %v6881_v21 = vpack.c.bf16 %v5599_v10, %v5598_v29  ;;  %v3718_v18 = vsel %vm379_vm14, %v9763_v7, %v7316_v24  ;;  %v6890_v55 = vpack.c.bf16 %v5605_v12, %v5604_v0  ;;  %v5607_v24 = vld [vmem:[%s11435_s5 + $0x98] sm:$0xff]  ;;  %v5613_v0 = vld [vmem:[%s11435_s5 + $0xc8] sm:$0xff]  ;;  %v5622_v12 = vld [vmem:[%s11435_s5 + $0x110] sm:$0xff] }
 0x36a   : > { %v7324_v51 = vpop.permute.xlu1 %7323  ;;  %6880 = vmatprep.subr.bf16.mxu0 %v8066_v38  ;;  %v3750_v7 = vsel %vm425_vm2, %v3718_v18, %v7321_v27  ;;  %v2738_v18 = vld [vmem:[#allocation3 + $0x1a0] sm:$0xff] }
 0x36b   : > { %4199 = vmatmul.mubr.f32.gmra.mrb[34].mxu1 %v3913_v22  ;;  %v7325_v26 = vunpack.i.l.bf16 %v7324_v51  ;;  %v7329_v47 = vpop.permute.xlu0 %7328  ;;  %v7326_v35 = vunpack.i.h.bf16 %v7324_v51 }
 0x36c   : > { %7493 = vrot.lane.b32.xlu1 %v10086_v62, %s8069_s23  ;;  %6527 = vmatprep.mubr.msk.f32.mxu1 %vm379_vm14, %v9945_v14  ;;  %v10157_v62 = vld [vmem:[#allocation3 + $0x172] sm:$0xff]  ;;  %v7330_v5 = vunpack.i.l.bf16 %v7329_v47  ;;  %v7331_v60 = vunpack.i.h.bf16 %v7329_v47 }
 0x36d   : > { %7488 = vrot.lane.b32.xlu0 %v10055_v17, %s8067_s15  ;;  %v7315_v17 = vunpack.i.l.bf16 %v7314_v46  ;;  %v10174_v15 = vpack.i.bf16 %v10157_v62, %v10155_v48  ;;  %6882 = vmatpush1.bf16.msra.mxu0 %v6881_v21  ;;  %v3783_v23 = vsel %vm3763_vm0, %v3750_v7, %v7326_v35  ;;  %v5610_v35 = vld [vmem:[%s11435_s5 + $0xb0] sm:$0xff] }
 0x36e   : > { %6883 = vmatprep.subr.bf16.mxu0 %v8066_v38  ;;  %v7334_v43 = vpop.permute.xlu1 %7333  ;;  %v3816_v34 = vsel %vm3796_vm3, %v3783_v23, %v7331_v60  ;;  %v2770_v23 = vld [vmem:[#allocation3 + $0x1a1] sm:$0xff] }
 0x36f   : > { %v3717_v41 = vsel %vm379_vm14, %v9761_v45, %v7315_v17  ;;  %v5603_v45 = vld [vmem:[%s11435_s5 + $0x78] sm:$0xff]  ;;  %v7335_v11 = vunpack.i.l.bf16 %v7334_v43  ;;  %v7336_v25 = vunpack.i.h.bf16 %v7334_v43 }
 0x370   : > { %v6771_v14 = vpop.f32.mrb[30].mxu0  ;;  %7503 = vrot.lane.b32.xlu1 %v10121_v4, %s8071_s19  ;;  %v6887_v30 = vpack.c.bf16 %v5603_v45, %v5602_v52  ;;  %v3749_v3 = vsel %vm425_vm2, %v3717_v41, %v7320_v40  ;;  %v5609_v40 = vld [vmem:[%s11435_s5 + $0xa8] sm:$0xff]  ;;  %v5611_v43 = vld [vmem:[%s11435_s5 + $0xb8] sm:$0xff] }
 0x371   : > { %7498 = vrot.lane.b32.xlu0 %v7477_v1, %s8068_s22  ;;  %v2446_v9 = vadd.f32 %v8039_v6, %v6771_v14  ;;  %v2440_v13 = vpop.f32.mrb[31].mxu0  ;;  %6885 = vmatpush1.bf16.msra.mxu0 %v6884_v42  ;;  %v3782_v16 = vsel %vm3763_vm0, %v3749_v3, %v7325_v26  ;;  %v3849_v10 = vsel %vm3829_vm4, %v3816_v34, %v7336_v25  ;;  %v5606_v14 = vld [vmem:[%s11435_s5 + $0x90] sm:$0xff]  ;;  %v5608_v42 = vld [vmem:[%s11435_s5 + $0xa0] sm:$0xff] }
 0x372   : > { %v2441_v19 = vadd.f32 %v8039_v6, %v2440_v13  ;;  %6886 = vmatprep.subr.bf16.mxu0 %v8066_v38  ;;  %v3815_v53 = vsel %vm3796_vm3, %v3782_v16, %v7330_v5  ;;  %v6893_v61 = vpack.c.bf16 %v5607_v24, %v5606_v14  ;;  %v6896_v27 = vpack.c.bf16 %v5609_v40, %v5608_v42  ;;  %v5612_v25 = vld [vmem:[%s11435_s5 + $0xc0] sm:$0xff] }
 0x373   : > { %v2480_v36 = vmax.f32 %v2446_v9, 0.0  ;;  %v3848_v46 = vsel %vm3829_vm4, %v3815_v53, %v7335_v11  ;;  %v2769_v11 = vld [vmem:[#allocation3 + $0x199] sm:$0xff]  ;;  %v5623_v53 = vld [vmem:[%s11435_s5 + $0x118] sm:$0xff]  ;;  %v5616_v40 = vld [vmem:[%s11435_s5 + $0xe0] sm:$0xff] }
 0x374   : > { %v2479_v58 = vmax.f32 %v2441_v19, 0.0 }
 0x375   : > { %7508 = vrot.lane.b32.xlu0 %v10174_v15, %s8070_s8  ;;  %2513 = vst.msk [vmem:[#allocation3 + $0x189] sm:$0xff] %vm379_vm14, %v2480_v36  ;;  %6888 = vmatpush1.bf16.msra.mxu0 %v6887_v30 }
 0x376   : > { %2512 = vst.msk [vmem:[#allocation3 + $0x181] sm:$0xff] %vm379_vm14, %v2479_v58  ;;  %6889 = vmatprep.subr.bf16.mxu0 %v8066_v38  ;;  %v2737_v58 = vld [vmem:[#allocation3 + $0x198] sm:$0xff] }
 0x377   : > { %v7547_v60 = vpack.i.bf16 %v2738_v18, %v2737_v58 }
 0x379   : > { %6891 = vmatpush1.bf16.msra.mxu0 %v6890_v55  ;;  %v6902_v55 = vpack.c.bf16 %v5613_v0, %v5612_v25 }
 0x37a   : > { %v7344_v59 = vpop.permute.xlu1 %7343  ;;  %6892 = vmatprep.subr.bf16.mxu0 %v8066_v38 }
 0x37b   : > { %v7339_v37 = vpop.permute.xlu0 %7338  ;;  %v7345_v1 = vunpack.i.l.bf16 %v7344_v59  ;;  %v7346_v33 = vunpack.i.h.bf16 %v7344_v59 }
 0x37c   : > { %v7341_v31 = vunpack.i.h.bf16 %v7339_v37  ;;  %v7340_v57 = vunpack.i.l.bf16 %v7339_v37  ;;  %v2768_v56 = vld [vmem:[#allocation3 + $0x189] sm:$0xff] }
 0x37d   : > { %v2735_v22 = vld [vmem:[#allocation3 + $0x180] sm:$0xff]  ;;  %v2736_v39 = vld [vmem:[#allocation3 + $0x188] sm:$0xff]  ;;  %6894 = vmatpush1.bf16.msra.mxu0 %v6893_v61 }
 0x37e   : > { %v3881_v49 = vsel %vm3862_vm5, %v3848_v46, %v7340_v57  ;;  %v2767_v29 = vld [vmem:[#allocation3 + $0x181] sm:$0xff]  ;;  %v7512_v51 = vpack.i.bf16 %v2736_v39, %v2735_v22  ;;  %v3882_v9 = vsel %vm3862_vm5, %v3849_v10, %v7341_v31  ;;  %6895 = vmatprep.subr.bf16.mxu0 %v8066_v38  ;;  %v7354_v52 = vpop.permute.xlu1 %7353  ;;  %v10259_v5 = vld [vmem:[#allocation3 + $0x18a] sm:$0xff]  ;;  %v6917_v31 = vpack.c.bf16 %v5623_v53, %v5622_v12 }
 0x37f   : > { %v3914_v21 = vsel %vm3895_vm6, %v3881_v49, %v7345_v1  ;;  %v7517_v17 = vpack.i.bf16 %v2768_v56, %v2767_v29  ;;  %v4115_v6 = vpop.f32.mrb[0].mxu1  ;;  %v10225_v19 = vpop.permute.xlu0 %7348  ;;  %v3915_v41 = vsel %vm3895_vm6, %v3882_v9, %v7346_v33  ;;  %v10257_v3 = vld [vmem:[#allocation3 + $0x182] sm:$0xff]  ;;  %v7355_v1 = vunpack.i.l.bf16 %v7354_v52  ;;  %v8040_v57 = vld [vmem:[#allocation3 + $0xf0] sm:$0xff] }
 0x380   : > { %4204 = vmatmul.mubr.f32.gmra.mrb[36].mxu1 %v3914_v21  ;;  %v4116_v13 = vadd.f32 %v10208_v28, %v4115_v6  ;;  %v4117_v2 = vpop.f32.mrb[1].mxu1  ;;  %7513 = vrot.lane.b32.xlu1 %v7512_v51, %s8073_s25  ;;  %v7350_v16 = vunpack.i.l.bf16 %v10225_v19  ;;  %v7351_v59 = vunpack.i.h.bf16 %v10225_v19  ;;  %v7542_v37 = vpack.i.bf16 %v10259_v5, %v10257_v3  ;;  %v4371_v29 = vld [vmem:[#allocation4 + $0x1] sm:$0xff]  ;;  %v5614_v10 = vld [vmem:[%s11435_s5 + $0xd0] sm:$0xff]  ;;  %v5615_v33 = vld [vmem:[%s11435_s5 + $0xd8] sm:$0xff] }
 0x381   : > { %7518 = vrot.lane.b32.xlu0 %v7517_v17, %s8072_s24  ;;  %6528 = vmatprep.mubr.msk.f32.mxu1 %vm379_vm14, %v9947_v44  ;;  %v7552_v49 = vpack.i.bf16 %v2770_v23, %v2769_v11  ;;  %v7356_v22 = vunpack.i.h.bf16 %v7354_v52  ;;  %v8041_v21 = vld [vmem:[#allocation3 + $0xf8] sm:$0xff]  ;;  %v6905_v14 = vpack.c.bf16 %v5615_v33, %v5614_v10 }
 0x382   : > { %v4274_v36 = vmax.f32 %v4116_v13, 0.0  ;;  %6897 = vmatpush1.bf16.msra.mxu0 %v6896_v27  ;;  %v3719_v34 = vsel %vm379_vm14, %v8040_v57, %v7350_v16  ;;  %v7364_v46 = vpop.permute.xlu1 %7363  ;;  %v5618_v16 = vld [vmem:[%s11435_s5 + $0xf0] sm:$0xff]  ;;  %v4403_v57 = vld [vmem:[#allocation4 + $0x2] sm:$0xff] }
 0x383   : > { %v4120_v26 = vpop.f32.mrb[2].mxu1  ;;  %v7359_v30 = vpop.permute.xlu0 %7358  ;;  %6898 = vmatprep.subr.bf16.mxu0 %v8066_v38  ;;  %v7365_v24 = vunpack.i.l.bf16 %v7364_v46  ;;  %v3751_v6 = vsel %vm425_vm2, %v3719_v34, %v7355_v1  ;;  %v7366_v19 = vunpack.i.h.bf16 %v7364_v46  ;;  %v4404_v33 = vld [vmem:[#allocation4 + $0xa] sm:$0xff] }
 0x384   : > { %4209 = vmatmul.mubr.f32.gmra.mrb[38].mxu1 %v3915_v41  ;;  %4307 = vst.msk [vmem:[#allocation4 + $0x19] sm:$0xff] %vm425_vm2, %v4274_v36  ;;  %v4121_v44 = vadd.f32 %v10208_v28, %v4120_v26  ;;  %v4122_v47 = vpop.f32.mrb[3].mxu1  ;;  %7523 = vrot.lane.b32.xlu1 %v10121_v4, %s8067_s15  ;;  %v5620_v4 = vld [vmem:[%s11435_s5 + $0x100] sm:$0xff]  ;;  %v7360_v56 = vunpack.i.l.bf16 %v7359_v30  ;;  %v5617_v36 = vld [vmem:[%s11435_s5 + $0xe8] sm:$0xff] }
 0x385   : > { %7528 = vrot.lane.b32.xlu0 %v10174_v15, %s8069_s23  ;;  %6529 = vmatprep.mubr.msk.f32.mxu1 %vm379_vm14, %v9987_v32  ;;  %v6899_v15 = vpack.c.bf16 %v5611_v43, %v5610_v35  ;;  %v5621_v32 = vld [vmem:[%s11435_s5 + $0x108] sm:$0xff]  ;;  %v6908_v47 = vpack.c.bf16 %v5617_v36, %v5616_v40  ;;  %v8043_v36 = vld [vmem:[#allocation3 + $0x110] sm:$0xff] }
 0x386   : > { %v4275_v45 = vmax.f32 %v4121_v44, 0.0  ;;  %v6913_v7 = vpack.c.bf16 %v5621_v32, %v5620_v4  ;;  %v3784_v13 = vsel %vm3763_vm0, %v3751_v6, %v7360_v56 }
 0x387   : > { %6900 = vmatpush1.bf16.msra.mxu0 %v6899_v15  ;;  %v7369_v39 = vpop.permute.xlu0 %7368  ;;  %v3817_v52 = vsel %vm3796_vm3, %v3784_v13, %v7365_v24  ;;  %v8042_v24 = vld [vmem:[#allocation3 + $0x108] sm:$0xff] }
 0x388   : > { %4308 = vst.msk [vmem:[#allocation4 + $0x21] sm:$0xff] %vm425_vm2, %v4275_v45  ;;  %7533 = vrot.lane.b32.xlu1 %v7512_v51, %s8068_s22  ;;  %6914 = vmatprep.subr.bf16.mxu1 %v6913_v7  ;;  %v3720_v51 = vsel %vm379_vm14, %v8041_v21, %v7351_v59  ;;  %v7370_v2 = vunpack.i.l.bf16 %v7369_v39  ;;  %v7371_v27 = vunpack.i.h.bf16 %v7369_v39 }
 0x389   : > { %7538 = vrot.lane.b32.xlu0 %v7517_v17, %s8071_s19  ;;  %6916 = vmatpush3.bf16.msra.mxu1 %v6913_v7  ;;  %v7361_v17 = vunpack.i.h.bf16 %v7359_v30  ;;  %v3752_v42 = vsel %vm425_vm2, %v3720_v51, %v7356_v22 }
 0x38a   : > { %6901 = vmatprep.subr.bf16.mxu0 %v8066_v38  ;;  %6918 = vmatprep.subr.bf16.mxu1 %v6917_v31  ;;  %v3850_v15 = vsel %vm3829_vm4, %v3817_v52, %v7370_v2 }
 0x38b   : > { %6903 = vmatpush1.bf16.msra.mxu0 %v6902_v55  ;;  %v3785_v41 = vsel %vm3763_vm0, %v3752_v42, %v7361_v17  ;;  %v4435_v56 = vld [vmem:[#allocation4 + $0x18] sm:$0xff] }
 0x38c   : > { %7543 = vrot.lane.b32.xlu1 %v7542_v37, %s8070_s8  ;;  %6904 = vmatprep.subr.bf16.mxu0 %v8066_v38  ;;  %v3818_v7 = vsel %vm3796_vm3, %v3785_v41, %v7366_v19 }
 0x38d   : > { %7548 = vrot.lane.b32.xlu0 %v7547_v60, %s8073_s25  ;;  %6920 = vmatpush3.bf16.msra.mxu1 %v6917_v31  ;;  %v5619_v60 = vld [vmem:[%s11435_s5 + $0xf8] sm:$0xff]  ;;  %v3851_v0 = vsel %vm3829_vm4, %v3818_v7, %v7371_v27 }
 0x38e   : > { %v6911_v12 = vpack.c.bf16 %v5619_v60, %v5618_v16 }
 0x38f   : > { %v10293_v9 = vld [vmem:[#allocation4 + $0x1a] sm:$0xff]  ;;  %6906 = vmatpush1.bf16.msra.mxu0 %v6905_v14  ;;  %v10338_v10 = vld [vmem:[#allocation4 + $0x22] sm:$0xff] }
 0x390   : > { %7553 = vrot.lane.b32.xlu1 %v7552_v49, %s8072_s24  ;;  %v7557_v61 = vpack.i.bf16 %v4371_v29, %v10293_v9  ;;  %6907 = vmatprep.subr.bf16.mxu0 %v8066_v38  ;;  %v4372_v29 = vld [vmem:[#allocation4 + $0x9] sm:$0xff] }
 0x391   : > { %v7572_v17 = vpack.i.bf16 %v4372_v29, %v10338_v10 }
 0x392   : > { %v4125_v26 = vpop.f32.mrb[4].mxu1  ;;  %v7374_v44 = vpop.permute.xlu1 %7373  ;;  %7558 = vrot.lane.b32.xlu0 %v7557_v61, %s8069_s23 }
 0x393   : > { %v4126_v58 = vadd.f32 %v10208_v28, %v4125_v26  ;;  %v7376_v18 = vunpack.i.h.bf16 %v7374_v44  ;;  %v7375_v35 = vunpack.i.l.bf16 %v7374_v44  ;;  %v7379_v43 = vpop.permute.xlu0 %7378  ;;  %v4127_v4 = vpop.f32.mrb[5].mxu1  ;;  %6909 = vmatpush1.bf16.msra.mxu0 %v6908_v47  ;;  %v4436_v26 = vld [vmem:[#allocation4 + $0x20] sm:$0xff] }
 0x394   : > { %v7380_v45 = vunpack.i.l.bf16 %v7379_v43  ;;  %v7381_v11 = vunpack.i.h.bf16 %v7379_v43  ;;  %6910 = vmatprep.subr.bf16.mxu0 %v8066_v38  ;;  %v10354_v44 = vld [vmem:[#allocation4 + $0x19] sm:$0xff] }
 0x395   : > { %v4276_v32 = vmax.f32 %v4126_v58, 0.0  ;;  %v3883_v30 = vsel %vm3862_vm5, %v3850_v15, %v7375_v35  ;;  %v3884_v55 = vsel %vm3862_vm5, %v3851_v0, %v7376_v18 }
 0x396   : > { %v4130_v23 = vpop.f32.mrb[6].mxu1  ;;  %v3916_v25 = vsel %vm3895_vm6, %v3883_v30, %v7380_v45  ;;  %v7384_v1 = vpop.permute.xlu1 %7383  ;;  %v3917_v31 = vsel %vm3895_vm6, %v3884_v55, %v7381_v11 }
 0x397   : > { %4309 = vst.msk [vmem:[#allocation4 + $0x31] sm:$0xff] %vm425_vm2, %v4276_v32  ;;  %v4131_v59 = vadd.f32 %v10208_v28, %v4130_v23  ;;  %v4132_v37 = vpop.f32.mrb[7].mxu1  ;;  %4214 = vmatmul.mubr.f32.gmra.mrb[40].mxu1 %v3916_v25  ;;  %6912 = vmatpush1.bf16.msra.mxu0 %v6911_v12  ;;  %v7389_v34 = vpop.permute.xlu0 %7388  ;;  %v7385_v39 = vunpack.i.l.bf16 %v7384_v1 }
 0x398   : > { %6530 = vmatprep.mubr.msk.f32.mxu1 %vm379_vm14, %v9989_v54  ;;  %v7390_v51 = vunpack.i.l.bf16 %v7389_v34  ;;  %v7391_v42 = vunpack.i.h.bf16 %v7389_v34 }
 0x399   : > { %v4277_v53 = vmax.f32 %v4131_v59, 0.0  ;;  %v3721_v6 = vsel %vm379_vm14, %v8042_v24, %v7385_v39 }
 0x39a   : > { %v7394_v49 = vpop.permute.xlu1 %7393  ;;  %v3753_v47 = vsel %vm425_vm2, %v3721_v6, %v7390_v51 }
 0x39b   : > { %4310 = vst.msk [vmem:[#allocation4 + $0x39] sm:$0xff] %vm425_vm2, %v4277_v53  ;;  %4219 = vmatmul.mubr.f32.gmra.mrb[42].mxu1 %v3917_v31  ;;  %v7395_v13 = vunpack.i.l.bf16 %v7394_v49  ;;  %v7399_v2 = vpop.permute.xlu0 %7398  ;;  %v7396_v27 = vunpack.i.h.bf16 %v7394_v49 }
 0x39c   : > { %6531 = vmatprep.mubr.msk.f32.mxu1 %vm379_vm14, %v10027_v20  ;;  %v7386_v20 = vunpack.i.h.bf16 %v7384_v1  ;;  %v7400_v58 = vunpack.i.l.bf16 %v7399_v2  ;;  %v7401_v45 = vunpack.i.h.bf16 %v7399_v2  ;;  %v2538_v2 = vld [vmem:[#allocation3 + $0x120] sm:$0xff] }
 0x39d   : > { %v3786_v43 = vsel %vm3763_vm0, %v3753_v47, %v7395_v13  ;;  %v2539_v47 = vld [vmem:[#allocation3 + $0x128] sm:$0xff] }
 0x39e   : > { %v10332_v46 = vld [vmem:[#allocation4 + $0x30] sm:$0xff]  ;;  %v7404_v40 = vpop.permute.xlu1 %7403  ;;  %v3722_v41 = vsel %vm379_vm14, %v8043_v36, %v7386_v20  ;;  %v3819_v16 = vsel %vm3796_vm3, %v3786_v43, %v7400_v58 }
 0x39f   : > { %v10334_v38 = vld [vmem:[#allocation4 + $0x31] sm:$0xff]  ;;  %v7562_v54 = vpack.i.bf16 %v4403_v57, %v10332_v46  ;;  %v7405_v4 = vunpack.i.l.bf16 %v7404_v40  ;;  %v3754_v52 = vsel %vm425_vm2, %v3722_v41, %v7391_v42  ;;  %v7406_v32 = vunpack.i.h.bf16 %v7404_v40  ;;  %v10395_v40 = vld [vmem:[#allocation4 + $0x21] sm:$0xff] }
 0x3a0   : > { %v7567_v22 = vpack.i.bf16 %v4435_v56, %v10334_v38  ;;  %v3787_v15 = vsel %vm3763_vm0, %v3754_v52, %v7396_v27 }
 0x3a1   : > { %7563 = vrot.lane.b32.xlu1 %v7562_v54, %s8071_s19  ;;  %v3852_v59 = vsel %vm3829_vm4, %v3819_v16, %v7405_v4  ;;  %v3820_v37 = vsel %vm3796_vm3, %v3787_v15, %v7401_v45 }
 0x3a2   : > { %7568 = vrot.lane.b32.xlu0 %v7567_v22, %s8073_s25  ;;  %v10342_v21 = vld [vmem:[#allocation4 + $0x38] sm:$0xff]  ;;  %v3853_v57 = vsel %vm3829_vm4, %v3820_v37, %v7406_v32 }
 0x3a3   : > { %v7577_v14 = vpack.i.bf16 %v4404_v33, %v10342_v21  ;;  %v10347_v61 = vld [vmem:[#allocation4 + $0x39] sm:$0xff] }
 0x3a4   : > { %v10349_v19 = vld [vmem:[#allocation4 + $0x32] sm:$0xff]  ;;  %v7582_v18 = vpack.i.bf16 %v4436_v26, %v10347_v61  ;;  %v10389_v6 = vld [vmem:[#allocation4 + $0x3a] sm:$0xff] }
 0x3a5   : > { %7573 = vrot.lane.b32.xlu1 %v7572_v17, %s8069_s23  ;;  %v7587_v35 = vpack.i.bf16 %v10354_v44, %v10349_v19  ;;  %v7602_v27 = vpack.i.bf16 %v10395_v40, %v10389_v6 }
 0x3a6   : > { %7578 = vrot.lane.b32.xlu0 %v7577_v14, %s8071_s19 }
 0x3a9   : > { %7583 = vrot.lane.b32.xlu1 %v7582_v18, %s8073_s25 }
 0x3aa   : > { %7588 = vrot.lane.b32.xlu0 %v7587_v35, %s8069_s23  ;;  %v7414_v30 = vpop.permute.xlu1 %7413  ;;  %v4135_v25 = vpop.f32.mrb[8].mxu1 }
 0x3ab   : > { %v7409_v7 = vpop.permute.xlu0 %7408  ;;  %v7415_v60 = vunpack.i.l.bf16 %v7414_v30  ;;  %v4136_v0 = vadd.f32 %v10208_v28, %v4135_v25  ;;  %v4137_v12 = vpop.f32.mrb[9].mxu1  ;;  %v7416_v53 = vunpack.i.h.bf16 %v7414_v30 }
 0x3ac   : > { %v7411_v11 = vunpack.i.h.bf16 %v7409_v7  ;;  %v7410_v23 = vunpack.i.l.bf16 %v7409_v7 }
 0x3ad   : > { %v4278_v1 = vmax.f32 %v4136_v0, 0.0 }
 0x3ae   : > { %v3885_v55 = vsel %vm3862_vm5, %v3852_v59, %v7410_v23  ;;  %v4140_v34 = vpop.f32.mrb[10].mxu1  ;;  %v3886_v56 = vsel %vm3862_vm5, %v3853_v57, %v7411_v11  ;;  %v7424_v33 = vpop.permute.xlu1 %7423 }
 0x3af   : > { %v3918_v31 = vsel %vm3895_vm6, %v3885_v55, %v7415_v60  ;;  %4311 = vst.msk [vmem:[#allocation4 + $0x49] sm:$0xff] %vm425_vm2, %v4278_v1  ;;  %v4141_v49 = vadd.f32 %v10208_v28, %v4140_v34  ;;  %v4142_v54 = vpop.f32.mrb[11].mxu1  ;;  %v7419_v22 = vpop.permute.xlu0 %7418  ;;  %v3919_v29 = vsel %vm3895_vm6, %v3886_v56, %v7416_v53  ;;  %v7426_v26 = vunpack.i.h.bf16 %v7424_v33 }
 0x3b0   : > { %4224 = vmatmul.mubr.f32.gmra.mrb[44].mxu1 %v3918_v31  ;;  %v7420_v14 = vunpack.i.l.bf16 %v7419_v22  ;;  %v7421_v13 = vunpack.i.h.bf16 %v7419_v22 }
 0x3b1   : > { %6532 = vmatprep.mubr.msk.f32.mxu1 %vm379_vm14, %v10029_v63  ;;  %v4279_v39 = vmax.f32 %v4141_v49, 0.0 }
 0x3b2   : > { %v3723_v36 = vsel %vm379_vm14, %v2538_v2, %v7420_v14  ;;  %v7434_v41 = vpop.permute.xlu1 %7433  ;;  %v3724_v43 = vsel %vm379_vm14, %v2539_v47, %v7421_v13 }
 0x3b3   : > { %4312 = vst.msk [vmem:[#allocation4 + $0x51] sm:$0xff] %vm425_vm2, %v4279_v39  ;;  %v7429_v20 = vpop.permute.xlu0 %7428  ;;  %v7435_v52 = vunpack.i.l.bf16 %v7434_v41  ;;  %v7436_v7 = vunpack.i.h.bf16 %v7434_v41  ;;  %v3756_v16 = vsel %vm425_vm2, %v3724_v43, %v7426_v26 }
 0x3b4   : > { %4229 = vmatmul.mubr.f32.gmra.mrb[46].mxu1 %v3919_v29  ;;  %v7431_v4 = vunpack.i.h.bf16 %v7429_v20 }
 0x3b5   : > { %6533 = vmatprep.mubr.msk.f32.mxu1 %vm379_vm14, %v10069_v50  ;;  %v7425_v50 = vunpack.i.l.bf16 %v7424_v33 }
 0x3b6   : > { %v10381_v51 = vld [vmem:[#allocation4 + $0x49] sm:$0xff]  ;;  %v3789_v60 = vsel %vm3763_vm0, %v3756_v16, %v7431_v4 }
 0x3b7   : > { %v10383_v17 = vld [vmem:[#allocation4 + $0x48] sm:$0xff]  ;;  %v7597_v63 = vpack.i.bf16 %v10332_v46, %v10381_v51  ;;  %v7430_v46 = vunpack.i.l.bf16 %v7429_v20  ;;  %v7439_v58 = vpop.permute.xlu0 %7438  ;;  %v3822_v31 = vsel %vm3796_vm3, %v3789_v60, %v7436_v7 }
 0x3b8   : > { %v7592_v24 = vpack.i.bf16 %v10293_v9, %v10383_v17  ;;  %v7440_v15 = vunpack.i.l.bf16 %v7439_v58  ;;  %v7441_v11 = vunpack.i.h.bf16 %v7439_v58 }
 0x3b9   : > { %7598 = vrot.lane.b32.xlu0 %v7597_v63, %s8073_s25 }
 0x3ba   : > { %7593 = vrot.lane.b32.xlu1 %v7592_v24, %s8071_s19  ;;  %v10393_v42 = vld [vmem:[#allocation4 + $0x50] sm:$0xff]  ;;  %v3855_v49 = vsel %vm3829_vm4, %v3822_v31, %v7441_v11 }
 0x3bb   : > { %v7607_v9 = vpack.i.bf16 %v10338_v10, %v10393_v42  ;;  %v10402_v18 = vld [vmem:[#allocation4 + $0x51] sm:$0xff]  ;;  %v3755_v10 = vsel %vm425_vm2, %v3723_v36, %v7425_v50 }
 0x3bc   : > { %v10404_v35 = vld [vmem:[#allocation4 + $0x4a] sm:$0xff]  ;;  %v3788_v45 = vsel %vm3763_vm0, %v3755_v10, %v7430_v46  ;;  %v7612_v32 = vpack.i.bf16 %v10342_v21, %v10402_v18  ;;  %v10443_v41 = vld [vmem:[#allocation4 + $0x52] sm:$0xff] }
 0x3bd   : > { %7608 = vrot.lane.b32.xlu0 %v7607_v9, %s8071_s19  ;;  %v7617_v30 = vpack.i.bf16 %v10334_v38, %v10404_v35  ;;  %v3821_v21 = vsel %vm3796_vm3, %v3788_v45, %v7435_v52  ;;  %v7632_v43 = vpack.i.bf16 %v10347_v61, %v10443_v41 }
 0x3be   : > { %7603 = vrot.lane.b32.xlu1 %v7602_v27, %s8069_s23  ;;  %v3854_v53 = vsel %vm3829_vm4, %v3821_v21, %v7440_v15  ;;  %v8044_v27 = vld [vmem:[#allocation3 + $0x138] sm:$0xff]  ;;  %v8045_v15 = vld [vmem:[#allocation3 + $0x140] sm:$0xff] }
 0x3c1   : > { %7618 = vrot.lane.b32.xlu0 %v7617_v30, %s8069_s23 }
 0x3c2   : > { %7613 = vrot.lane.b32.xlu1 %v7612_v32, %s8073_s25  ;;  %v7444_v23 = vpop.permute.xlu1 %7443 }
 0x3c3   : > { %v7449_v25 = vpop.permute.xlu0 %7448  ;;  %v7446_v0 = vunpack.i.h.bf16 %v7444_v23  ;;  %v7445_v12 = vunpack.i.l.bf16 %v7444_v23  ;;  %v4145_v37 = vpop.f32.mrb[12].mxu1 }
 0x3c4   : > { %v7450_v59 = vunpack.i.l.bf16 %v7449_v25  ;;  %v4146_v38 = vadd.f32 %v10208_v28, %v4145_v37  ;;  %v4147_v55 = vpop.f32.mrb[13].mxu1  ;;  %v7451_v57 = vunpack.i.h.bf16 %v7449_v25 }
 0x3c5   : > { %v3887_v1 = vsel %vm3862_vm5, %v3854_v53, %v7445_v12  ;;  %v3888_v22 = vsel %vm3862_vm5, %v3855_v49, %v7446_v0 }
 0x3c6   : > { %v4280_v34 = vmax.f32 %v4146_v38, 0.0  ;;  %v3920_v56 = vsel %vm3895_vm6, %v3887_v1, %v7450_v59  ;;  %v7454_v33 = vpop.permute.xlu1 %7453  ;;  %v3921_v14 = vsel %vm3895_vm6, %v3888_v22, %v7451_v57 }
 0x3c7   : > { %v4150_v54 = vpop.f32.mrb[14].mxu1  ;;  %4234 = vmatmul.mubr.f32.gmra.mrb[48].mxu1 %v3920_v56  ;;  %v7459_v63 = vpop.permute.xlu0 %7458  ;;  %v7455_v2 = vunpack.i.l.bf16 %v7454_v33  ;;  %v7456_v46 = vunpack.i.h.bf16 %v7454_v33 }
 0x3c8   : > { %4313 = vst.msk [vmem:[#allocation4 + $0x61] sm:$0xff] %vm425_vm2, %v4280_v34  ;;  %v4151_v39 = vadd.f32 %v10208_v28, %v4150_v54  ;;  %v4152_v29 = vpop.f32.mrb[15].mxu1  ;;  %6534 = vmatprep.mubr.msk.f32.mxu1 %vm379_vm14, %v10071_v8  ;;  %v7461_v4 = vunpack.i.h.bf16 %v7459_v63 }
 0x3c9   : > { %v3725_v26 = vsel %vm379_vm14, %v8044_v27, %v7455_v2  ;;  %v3726_v32 = vsel %vm379_vm14, %v8045_v15, %v7456_v46 }
 0x3ca   : > { %v4281_v20 = vmax.f32 %v4151_v39, 0.0  ;;  %v7464_v24 = vpop.permute.xlu1 %7463  ;;  %v3758_v25 = vsel %vm425_vm2, %v3726_v32, %v7461_v4 }
 0x3cb   : > { %4239 = vmatmul.mubr.f32.gmra.mrb[50].mxu1 %v3921_v14  ;;  %v7465_v47 = vunpack.i.l.bf16 %v7464_v24  ;;  %v7469_v58 = vpop.permute.xlu0 %7468  ;;  %v7466_v30 = vunpack.i.h.bf16 %v7464_v24 }
 0x3cc   : > { %4314 = vst.msk [vmem:[#allocation4 + $0x69] sm:$0xff] %vm425_vm2, %v4281_v20  ;;  %6535 = vmatprep.mubr.msk.f32.mxu1 %vm379_vm14, %v10155_v48  ;;  %v7460_v48 = vunpack.i.l.bf16 %v7459_v63  ;;  %v7470_v61 = vunpack.i.l.bf16 %v7469_v58  ;;  %v7471_v0 = vunpack.i.h.bf16 %v7469_v58 }
 0x3cd   : > { %v3791_v12 = vsel %vm3763_vm0, %v3758_v25, %v7466_v30 }
 0x3ce   : > { %v7474_v52 = vpop.permute.xlu1 %7473  ;;  %v3757_v7 = vsel %vm425_vm2, %v3725_v26, %v7460_v48  ;;  %v3824_v34 = vsel %vm3796_vm3, %v3791_v12, %v7471_v0 }
 0x3cf   : > { %v10435_v13 = vld [vmem:[#allocation4 + $0x60] sm:$0xff]  ;;  %v3790_v16 = vsel %vm3763_vm0, %v3757_v7, %v7465_v47  ;;  %v7475_v60 = vunpack.i.l.bf16 %v7474_v52  ;;  %v7476_v59 = vunpack.i.h.bf16 %v7474_v52  ;;  %v2543_v7 = vld [vmem:[#allocation3 + $0x158] sm:$0xff] }
 0x3d0   : > { %v10437_v50 = vld [vmem:[#allocation4 + $0x61] sm:$0xff]  ;;  %v7622_v8 = vpack.i.bf16 %v10349_v19, %v10435_v13  ;;  %v3823_v38 = vsel %vm3796_vm3, %v3790_v16, %v7470_v61 }
 0x3d1   : > { %v7627_v36 = vpack.i.bf16 %v10383_v17, %v10437_v50  ;;  %v3856_v57 = vsel %vm3829_vm4, %v3823_v38, %v7475_v60  ;;  %v3857_v39 = vsel %vm3829_vm4, %v3824_v34, %v7476_v59 }
 0x3d2   : > { %7623 = vrot.lane.b32.xlu1 %v7622_v8, %s8071_s19 }
 0x3d3   : > { %7628 = vrot.lane.b32.xlu0 %v7627_v36, %s8073_s25  ;;  %v10447_v9 = vld [vmem:[#allocation4 + $0x68] sm:$0xff] }
 0x3d4   : > { %v7637_v17 = vpack.i.bf16 %v10389_v6, %v10447_v9  ;;  %v10454_v10 = vld [vmem:[#allocation4 + $0x69] sm:$0xff] }
 0x3d5   : > { %v10456_v45 = vld [vmem:[#allocation4 + $0x62] sm:$0xff]  ;;  %v7642_v11 = vpack.i.bf16 %v10393_v42, %v10454_v10  ;;  %v10495_v47 = vld [vmem:[#allocation4 + $0x6a] sm:$0xff] }
 0x3d6   : > { %7633 = vrot.lane.b32.xlu1 %v7632_v43, %s8069_s23  ;;  %v7647_v23 = vpack.i.bf16 %v10381_v51, %v10456_v45  ;;  %v2542_v43 = vld [vmem:[#allocation3 + $0x150] sm:$0xff]  ;;  %v7662_v32 = vpack.i.bf16 %v10402_v18, %v10495_v47 }
 0x3d7   : > { %7638 = vrot.lane.b32.xlu0 %v7637_v17, %s8071_s19 }
 0x3da   : > { %7643 = vrot.lane.b32.xlu1 %v7642_v11, %s8073_s25  ;;  %v7484_v37 = vpop.permute.xlu1 %7483  ;;  %v4155_v1 = vpop.f32.mrb[16].mxu1 }
 0x3db   : > { %7648 = vrot.lane.b32.xlu0 %v7647_v23, %s8069_s23  ;;  %v7479_v21 = vpop.permute.xlu0 %7478  ;;  %v7485_v55 = vunpack.i.l.bf16 %v7484_v37  ;;  %v4156_v51 = vadd.f32 %v10208_v28, %v4155_v1  ;;  %v4157_v31 = vpop.f32.mrb[17].mxu1  ;;  %v7486_v49 = vunpack.i.h.bf16 %v7484_v37 }
 0x3dc   : > { %v7481_v53 = vunpack.i.h.bf16 %v7479_v21  ;;  %v7480_v42 = vunpack.i.l.bf16 %v7479_v21 }
 0x3dd   : > { %v4282_v54 = vmax.f32 %v4156_v51, 0.0 }
 0x3de   : > { %v3889_v56 = vsel %vm3862_vm5, %v3856_v57, %v7480_v42  ;;  %v4160_v29 = vpop.f32.mrb[18].mxu1  ;;  %v3890_v33 = vsel %vm3862_vm5, %v3857_v39, %v7481_v53  ;;  %v7494_v8 = vpop.permute.xlu1 %7493 }
 0x3df   : > { %v3922_v22 = vsel %vm3895_vm6, %v3889_v56, %v7485_v55  ;;  %4315 = vst.msk [vmem:[#allocation4 + $0x79] sm:$0xff] %vm425_vm2, %v4282_v54  ;;  %v4161_v20 = vadd.f32 %v10208_v28, %v4160_v29  ;;  %v4162_v14 = vpop.f32.mrb[19].mxu1  ;;  %v7489_v63 = vpop.permute.xlu0 %7488  ;;  %v3923_v2 = vsel %vm3895_vm6, %v3890_v33, %v7486_v49  ;;  %v7496_v30 = vunpack.i.h.bf16 %v7494_v8 }
 0x3e0   : > { %4244 = vmatmul.mubr.f32.gmra.mrb[52].mxu1 %v3922_v22  ;;  %v7490_v27 = vunpack.i.l.bf16 %v7489_v63  ;;  %v7491_v58 = vunpack.i.h.bf16 %v7489_v63 }
 0x3e1   : > { %6536 = vmatprep.mubr.msk.f32.mxu1 %vm379_vm14, %v10157_v62  ;;  %v4283_v24 = vmax.f32 %v4161_v20, 0.0 }
 0x3e2   : > { %v3727_v4 = vsel %vm379_vm14, %v2542_v43, %v7490_v27  ;;  %v7504_v52 = vpop.permute.xlu1 %7503  ;;  %v3728_v11 = vsel %vm379_vm14, %v2543_v7, %v7491_v58 }
 0x3e3   : > { %4316 = vst.msk [vmem:[#allocation4 + $0x81] sm:$0xff] %vm425_vm2, %v4283_v24  ;;  %v7499_v36 = vpop.permute.xlu0 %7498  ;;  %v7505_v25 = vunpack.i.l.bf16 %v7504_v52  ;;  %v7506_v21 = vunpack.i.h.bf16 %v7504_v52  ;;  %v3760_v38 = vsel %vm425_vm2, %v3728_v11, %v7496_v30 }
 0x3e4   : > { %4249 = vmatmul.mubr.f32.gmra.mrb[54].mxu1 %v3923_v2  ;;  %v7500_v15 = vunpack.i.l.bf16 %v7499_v36  ;;  %v7501_v23 = vunpack.i.h.bf16 %v7499_v36  ;;  %v2544_v36 = vld [vmem:[#allocation3 + $0x168] sm:$0xff] }
 0x3e5   : > { %6537 = vmatprep.mubr.msk.f32.mxu1 %vm379_vm14, %v10257_v3  ;;  %v7495_v3 = vunpack.i.l.bf16 %v7494_v8 }
 0x3e6   : > { %v10487_v46 = vld [vmem:[#allocation4 + $0x78] sm:$0xff]  ;;  %v3793_v55 = vsel %vm3763_vm0, %v3760_v38, %v7501_v23 }
 0x3e7   : > { %v10489_v48 = vld [vmem:[#allocation4 + $0x79] sm:$0xff]  ;;  %v7652_v62 = vpack.i.bf16 %v10404_v35, %v10487_v46  ;;  %v7509_v61 = vpop.permute.xlu0 %7508  ;;  %v3759_v18 = vsel %vm425_vm2, %v3727_v4, %v7495_v3  ;;  %v3826_v22 = vsel %vm3796_vm3, %v3793_v55, %v7506_v21  ;;  %v2801_v3 = vld [vmem:[#allocation3 + $0x19a] sm:$0xff] }
 0x3e8   : > { %v7657_v26 = vpack.i.bf16 %v10435_v13, %v10489_v48  ;;  %v3792_v0 = vsel %vm3763_vm0, %v3759_v18, %v7500_v15  ;;  %v7510_v12 = vunpack.i.l.bf16 %v7509_v61  ;;  %v7511_v53 = vunpack.i.h.bf16 %v7509_v61  ;;  %v2545_v61 = vld [vmem:[#allocation3 + $0x170] sm:$0xff] }
 0x3e9   : > { %7653 = vrot.lane.b32.xlu1 %v7652_v62, %s8071_s19 }
 0x3ea   : > { %7658 = vrot.lane.b32.xlu0 %v7657_v26, %s8073_s25  ;;  %v10499_v17 = vld [vmem:[#allocation4 + $0x80] sm:$0xff]  ;;  %v3859_v63 = vsel %vm3829_vm4, %v3826_v22, %v7511_v53 }
 0x3eb   : > { %v7667_v13 = vpack.i.bf16 %v10443_v41, %v10499_v17  ;;  %v10506_v16 = vld [vmem:[#allocation4 + $0x81] sm:$0xff] }
 0x3ec   : > { %v10508_v60 = vld [vmem:[#allocation4 + $0x7a] sm:$0xff]  ;;  %v7672_v59 = vpack.i.bf16 %v10447_v9, %v10506_v16  ;;  %v3825_v9 = vsel %vm3796_vm3, %v3792_v0, %v7505_v25 }
 0x3ed   : > { %7663 = vrot.lane.b32.xlu1 %v7662_v32, %s8069_s23  ;;  %v7677_v37 = vpack.i.bf16 %v10437_v50, %v10508_v60  ;;  %v3858_v49 = vsel %vm3829_vm4, %v3825_v9, %v7510_v12 }
 0x3ee   : > { %7668 = vrot.lane.b32.xlu0 %v7667_v13, %s8071_s19 }
 0x3f1   : > { %7673 = vrot.lane.b32.xlu1 %v7672_v59, %s8073_s25 }
 0x3f2   : > { %7678 = vrot.lane.b32.xlu0 %v7677_v37, %s8069_s23  ;;  %v7514_v42 = vpop.permute.xlu1 %7513 }
 0x3f3   : > { %v7519_v1 = vpop.permute.xlu0 %7518  ;;  %v7516_v51 = vunpack.i.h.bf16 %v7514_v42  ;;  %v7515_v31 = vunpack.i.l.bf16 %v7514_v42  ;;  %v4165_v34 = vpop.f32.mrb[20].mxu1 }
 0x3f4   : > { %v7520_v57 = vunpack.i.l.bf16 %v7519_v1  ;;  %v4166_v50 = vadd.f32 %v10208_v28, %v4165_v34  ;;  %v4167_v56 = vpop.f32.mrb[21].mxu1  ;;  %v7521_v39 = vunpack.i.h.bf16 %v7519_v1 }
 0x3f5   : > { %v3891_v54 = vsel %vm3862_vm5, %v3858_v49, %v7515_v31  ;;  %v3892_v8 = vsel %vm3862_vm5, %v3859_v63, %v7516_v51  ;;  %v10552_v51 = vld [vmem:[#allocation4 + $0x82] sm:$0xff] }
 0x3f6   : > { %v4284_v29 = vmax.f32 %v4166_v50, 0.0  ;;  %v7524_v33 = vpop.permute.xlu1 %7523  ;;  %v3924_v14 = vsel %vm3895_vm6, %v3891_v54, %v7520_v57  ;;  %v3925_v32 = vsel %vm3895_vm6, %v3892_v8, %v7521_v39 }
 0x3f7   : > { %v7529_v20 = vpop.permute.xlu0 %7528  ;;  %v7525_v24 = vunpack.i.l.bf16 %v7524_v33  ;;  %v4170_v2 = vpop.f32.mrb[22].mxu1  ;;  %4254 = vmatmul.mubr.f32.gmra.mrb[56].mxu1 %v3924_v14  ;;  %v7526_v43 = vunpack.i.h.bf16 %v7524_v33  ;;  %v2802_v33 = vld [vmem:[#allocation3 + $0x1a2] sm:$0xff] }
 0x3f8   : > { %4317 = vst.msk [vmem:[#allocation4 + $0x91] sm:$0xff] %vm425_vm2, %v4284_v29  ;;  %v7530_v27 = vunpack.i.l.bf16 %v7529_v20  ;;  %v4171_v62 = vadd.f32 %v10208_v28, %v4170_v2  ;;  %v4172_v26 = vpop.f32.mrb[23].mxu1  ;;  %6538 = vmatprep.mubr.msk.f32.mxu1 %vm379_vm14, %v10259_v5  ;;  %v7531_v5 = vunpack.i.h.bf16 %v7529_v20 }
 0x3f9   : > { %v3729_v58 = vsel %vm379_vm14, %v2544_v36, %v7525_v24  ;;  %v3730_v23 = vsel %vm379_vm14, %v2545_v61, %v7526_v43 }
 0x3fa   : > { %v4285_v4 = vmax.f32 %v4171_v62, 0.0  ;;  %v7534_v52 = vpop.permute.xlu1 %7533  ;;  %v3761_v30 = vsel %vm425_vm2, %v3729_v58, %v7530_v27  ;;  %v3762_v42 = vsel %vm425_vm2, %v3730_v23, %v7531_v5 }
 0x3fb   : > { %v7539_v15 = vpop.permute.xlu0 %7538  ;;  %v7535_v13 = vunpack.i.l.bf16 %v7534_v52  ;;  %4259 = vmatmul.mubr.f32.gmra.mrb[58].mxu1 %v3925_v32  ;;  %v7536_v25 = vunpack.i.h.bf16 %v7534_v52  ;;  %v4339_v32 = vld [vmem:[#allocation4] sm:$0xff] }
 0x3fc   : > { %4318 = vst.msk [vmem:[#allocation4 + $0x99] sm:$0xff] %vm425_vm2, %v4285_v4  ;;  %v7540_v7 = vunpack.i.l.bf16 %v7539_v15  ;;  %6539 = vmatprep.mubr.msk.f32.mxu1 %vm379_vm14, %v2801_v3  ;;  %v7541_v1 = vunpack.i.h.bf16 %v7539_v15 }
 0x3fd   : > { %v3794_v11 = vsel %vm3763_vm0, %v3761_v30, %v7535_v13  ;;  %v3795_v57 = vsel %vm3763_vm0, %v3762_v42, %v7536_v25 }
 0x3fe   : > { %v7544_v18 = vpop.permute.xlu1 %7543  ;;  %v3827_v21 = vsel %vm3796_vm3, %v3794_v11, %v7540_v7  ;;  %v3828_v22 = vsel %vm3796_vm3, %v3795_v57, %v7541_v1 }
 0x3ff   : > { %v7549_v0 = vpop.permute.xlu0 %7548  ;;  %v7545_v12 = vunpack.i.l.bf16 %v7544_v18  ;;  %v10542_v59 = vld [vmem:[#allocation4 + $0x90] sm:$0xff]  ;;  %v7546_v34 = vunpack.i.h.bf16 %v7544_v18 }
 0x400   : > { %v10544_v37 = vld [vmem:[#allocation4 + $0x91] sm:$0xff]  ;;  %v7550_v38 = vunpack.i.l.bf16 %v7549_v0  ;;  %v7682_v55 = vpack.i.bf16 %v10456_v45, %v10542_v59  ;;  %v7551_v39 = vunpack.i.h.bf16 %v7549_v0 }
 0x401   : > { %v7687_v53 = vpack.i.bf16 %v10487_v46, %v10544_v37  ;;  %v3860_v31 = vsel %vm3829_vm4, %v3827_v21, %v7545_v12  ;;  %v7692_v46 = vpack.i.bf16 %v10454_v10, %v10552_v51  ;;  %v3861_v10 = vsel %vm3829_vm4, %v3828_v22, %v7546_v34  ;;  %v4340_v21 = vld [vmem:[#allocation4 + $0x8] sm:$0xff] }
 0x402   : > { %7683 = vrot.lane.b32.xlu1 %v7682_v55, %s8071_s19  ;;  %v7554_v9 = vpop.permute.xlu1 %7553  ;;  %v3893_v54 = vsel %vm3862_vm5, %v3860_v31, %v7550_v38  ;;  %v3894_v8 = vsel %vm3862_vm5, %v3861_v10, %v7551_v39 }
 0x403   : > { %7688 = vrot.lane.b32.xlu0 %v7687_v53, %s8073_s25  ;;  %v7555_v50 = vunpack.i.l.bf16 %v7554_v9  ;;  %v10558_v56 = vld [vmem:[#allocation4 + $0x98] sm:$0xff]  ;;  %v7556_v63 = vunpack.i.h.bf16 %v7554_v9 }
 0x404   : > { %v7697_v49 = vpack.i.bf16 %v10495_v47, %v10558_v56  ;;  %v10567_v20 = vld [vmem:[#allocation4 + $0x99] sm:$0xff]  ;;  %v7559_v58 = vpop.permute.xlu0 %7558 }
 0x405   : > { %v3926_v29 = vsel %vm3895_vm6, %v3893_v54, %v7555_v50  ;;  %v10569_v14 = vld [vmem:[#allocation4 + $0x92] sm:$0xff]  ;;  %v7702_v24 = vpack.i.bf16 %v10499_v17, %v10567_v20  ;;  %v3927_v27 = vsel %vm3895_vm6, %v3894_v8, %v7556_v63  ;;  %v7561_v4 = vunpack.i.h.bf16 %v7559_v58  ;;  %v10658_v63 = vld [vmem:[%s11434_s4] ss:$0 sm:$0xff] }
 0x406   : > { %7693 = vrot.lane.b32.xlu1 %v7692_v46, %s8069_s23  ;;  %4264 = vmatmul.mubr.f32.gmra.mrb[60].mxu1 %v3926_v29  ;;  %v7707_v2 = vpack.i.bf16 %v10489_v48, %v10569_v14  ;;  %v7560_v52 = vunpack.i.l.bf16 %v7559_v58 }
 0x407   : > { %7698 = vrot.lane.b32.xlu0 %v7697_v49, %s8071_s19  ;;  %6540 = vmatprep.mubr.msk.f32.mxu1 %vm379_vm14, %v2802_v33 }
 0x40a   : > { %7703 = vrot.lane.b32.xlu1 %v7702_v24, %s8073_s25  ;;  %v4175_v36 = vpop.f32.mrb[24].mxu1  ;;  %4269 = vmatmul.mubr.f32.gmra.mrb[62].mxu1 %v3927_v27 }
 0x40b   : > { %7708 = vrot.lane.b32.xlu0 %v7707_v2, %s8069_s23  ;;  %v4176_v62 = vadd.f32 %v10208_v28, %v4175_v36  ;;  %v4177_v26 = vpop.f32.mrb[25].mxu1  ;;  %6780 = vmatprep.mubr.msk.f32.mxu1 %vm425_vm2, %v10349_v19 }
 0x40d   : > { %v4286_v17 = vmax.f32 %v4176_v62, 0.0 }
 0x40e   : > { %v4180_v3 = vpop.f32.mrb[26].mxu1  ;;  %6781 = vmatmul.mubr.msk.f32.vlgmr.msra.gmra.mrb[64].mxu1 %vm425_vm2, %v10389_v6  ;;  %v5396_v6 = vsel %vm425_vm2, %v4339_v32, %v7561_v4  ;;  %v4341_v32 = vld [vmem:[#allocation4 + $0x18] sm:$0xff] }
 0x40f   : > { %4319 = vst.msk [vmem:[#allocation4 + $0xa9] sm:$0xff] %vm425_vm2, %v4286_v17  ;;  %v4181_v48 = vadd.f32 %v10208_v28, %v4180_v3  ;;  %v4182_v43 = vpop.f32.mrb[27].mxu1  ;;  %6783 = vmatprep.mubr.msk.f32.mxu1 %vm425_vm2, %v10404_v35  ;;  %v5492_v35 = vsel %vm425_vm2, %v10354_v44, %v7560_v52 }
 0x411   : > { %v4287_v15 = vmax.f32 %v4181_v48, 0.0 }
 0x412   : > { %6784 = vmatmul.mubr.msk.f32.gmra.mrb[66].mxu1 %vm425_vm2, %v10443_v41 }
 0x413   : > { %4320 = vst.msk [vmem:[#allocation4 + $0xb1] sm:$0xff] %vm425_vm2, %v4287_v15  ;;  %v7564_v19 = vpop.permute.xlu1 %7563  ;;  %6786 = vmatprep.mubr.msk.f32.mxu1 %vm425_vm2, %v10456_v45  ;;  %v4469_v15 = vld [vmem:[#allocation4 + $0x31] sm:$0xff] }
 0x414   : > { %v7569_v13 = vpop.permute.xlu0 %7568  ;;  %v7566_v30 = vunpack.i.h.bf16 %v7564_v19  ;;  %v7565_v28 = vunpack.i.l.bf16 %v7564_v19 }
 0x415   : > { %v7571_v7 = vunpack.i.h.bf16 %v7569_v13  ;;  %v7570_v61 = vunpack.i.l.bf16 %v7569_v13 }
 0x416   : > { %v5428_v5 = vsel %vm3796_vm3, %v5396_v6, %v7566_v30  ;;  %v5524_v11 = vsel %vm3796_vm3, %v5492_v35, %v7565_v28  ;;  %v10602_v23 = vld [vmem:[#allocation4 + $0xa8] sm:$0xff]  ;;  %6787 = vmatmul.mubr.msk.f32.gmra.mrb[68].mxu1 %vm425_vm2, %v10495_v47  ;;  %v10616_v47 = vld [vmem:[#allocation4 + $0x9a] sm:$0xff] }
 0x417   : > { %v10604_v41 = vld [vmem:[#allocation4 + $0xa9] sm:$0xff]  ;;  %v7574_v25 = vpop.permute.xlu1 %7573  ;;  %v5556_v45 = vsel %vm3862_vm5, %v5524_v11, %v7570_v61  ;;  %v5460_v0 = vsel %vm3862_vm5, %v5428_v5, %v7571_v7  ;;  %v7712_v44 = vpack.i.bf16 %v10508_v60, %v10602_v23  ;;  %6789 = vmatprep.mubr.msk.f32.mxu1 %vm425_vm2, %v10508_v60  ;;  %v7722_v57 = vpack.i.bf16 %v10506_v16, %v10616_v47 }
 0x418   : > { %v7579_v18 = vpop.permute.xlu0 %7578  ;;  %v7717_v12 = vpack.i.bf16 %v10542_v59, %v10604_v41  ;;  %v7576_v38 = vunpack.i.h.bf16 %v7574_v25  ;;  %v7575_v55 = vunpack.i.l.bf16 %v7574_v25  ;;  %5791 = vmatprep.mubr.f32.mxu0 %v5556_v45 }
 0x419   : > { %v7581_v53 = vunpack.i.h.bf16 %v7579_v18  ;;  %v7580_v42 = vunpack.i.l.bf16 %v7579_v18  ;;  %5792 = vmatmul.mubr.f32.vlgmr.msra.gmra.mrb[32].mxu0 %v5460_v0  ;;  %7713 = vrot.lane.b32.xlu1 %v7712_v44, %s8071_s19  ;;  %v4470_v44 = vld [vmem:[#allocation4 + $0x39] sm:$0xff] }
 0x41a   : > { %7718 = vrot.lane.b32.xlu0 %v7717_v12, %s8073_s25  ;;  %v10620_v1 = vld [vmem:[#allocation4 + $0xb0] sm:$0xff]  ;;  %v5493_v59 = vsel %vm425_vm2, %v10395_v40, %v7575_v55  ;;  %v5397_v31 = vsel %vm425_vm2, %v4340_v21, %v7576_v38  ;;  %6790 = vmatmul.mubr.msk.f32.gmra.mrb[70].mxu1 %vm425_vm2, %v10552_v51  ;;  %v4342_v12 = vld [vmem:[#allocation4 + $0x20] sm:$0xff] }
 0x41b   : > { %v7584_v60 = vpop.permute.xlu1 %7583  ;;  %v7727_v34 = vpack.i.bf16 %v10552_v51, %v10620_v1  ;;  %6792 = vmatprep.mubr.msk.f32.mxu1 %vm425_vm2, %v10569_v14  ;;  %v10633_v46 = vld [vmem:[#allocation4 + $0xb1] sm:$0xff]  ;;  %v5525_v40 = vsel %vm3796_vm3, %v5493_v59, %v7580_v42  ;;  %v5429_v54 = vsel %vm3796_vm3, %v5397_v31, %v7581_v53 }
 0x41c   : > { %v7586_v9 = vunpack.i.h.bf16 %v7584_v60  ;;  %v7585_v50 = vunpack.i.l.bf16 %v7584_v60  ;;  %v10637_v49 = vld [vmem:[#allocation4 + $0xaa] sm:$0xff]  ;;  %v7732_v22 = vpack.i.bf16 %v10558_v56, %v10633_v46  ;;  %v10653_v33 = vld [vmem:[#allocation4 + $0xb2] sm:$0xff]  ;;  %v7589_v8 = vpop.permute.xlu0 %7588 }
 0x41d   : > { %7723 = vrot.lane.b32.xlu1 %v7722_v57, %s8069_s23  ;;  %v7737_v39 = vpack.i.bf16 %v10544_v37, %v10637_v49  ;;  %v7591_v26 = vunpack.i.h.bf16 %v7589_v8  ;;  %v7590_v17 = vunpack.i.l.bf16 %v7589_v8  ;;  %v7752_v53 = vpack.i.bf16 %v10567_v20, %v10653_v33 }
 0x41e   : > { %7728 = vrot.lane.b32.xlu0 %v7727_v34, %s8071_s19  ;;  %v5557_v16 = vsel %vm3862_vm5, %v5525_v40, %v7585_v50  ;;  %v5461_v51 = vsel %vm3862_vm5, %v5429_v54, %v7586_v9  ;;  %6793 = vmatmul.mubr.msk.f32.gmra.mrb[72].mxu1 %vm425_vm2, %v10616_v47 }
 0x41f   : > { %5796 = vmatprep.mubr.f32.mxu0 %v5557_v16  ;;  %6795 = vmatprep.mubr.msk.f32.mxu1 %vm425_vm2, %v10637_v49  ;;  %v5494_v19 = vsel %vm425_vm2, %v4469_v15, %v7590_v17  ;;  %v5398_v13 = vsel %vm425_vm2, %v4341_v32, %v7591_v26 }
 0x420   : > { %5797 = vmatmul.mubr.f32.gmra.mrb[34].mxu0 %v5461_v51 }
 0x421   : > { %7733 = vrot.lane.b32.xlu1 %v7732_v22, %s8073_s25 }
 0x422   : > { %7738 = vrot.lane.b32.xlu0 %v7737_v39, %s8069_s23  ;;  %6796 = vmatmul.mubr.msk.f32.gmra.mrb[74].mxu1 %vm425_vm2, %v10653_v33 }
 0x423   : > { %v4185_v29 = vpop.f32.mrb[28].mxu1 }
 0x424   : > { %v4186_v56 = vadd.f32 %v10658_v63, %v4185_v29  ;;  %v4187_v10 = vpop.f32.mrb[29].mxu1 }
 0x426   : > { %v4288_v24 = vmax.f32 %v4186_v56, 0.0 }
 0x427   : > { %v4190_v2 = vpop.f32.mrb[30].mxu1 }
 0x428   : > { %4321 = vst.msk [vmem:[#allocation4 + $0xc1] sm:$0xff] %vm425_vm2, %v4288_v24  ;;  %v4191_v36 = vadd.f32 %v10658_v63, %v4190_v2  ;;  %v4192_v27 = vpop.f32.mrb[31].mxu1 }
 0x42a   : > { %v4289_v62 = vmax.f32 %v4191_v36, 0.0 }
 0x42b   : > { %v7599_v58 = vpop.permute.xlu0 %7598 }
 0x42c   : > { %4322 = vst.msk [vmem:[#allocation4 + $0xc9] sm:$0xff] %vm425_vm2, %v4289_v62  ;;  %v7594_v3 = vpop.permute.xlu1 %7593  ;;  %v7601_v48 = vunpack.i.h.bf16 %v7599_v58  ;;  %v7600_v43 = vunpack.i.l.bf16 %v7599_v58 }
 0x42d   : > { %v7596_v4 = vunpack.i.h.bf16 %v7594_v3  ;;  %v7595_v52 = vunpack.i.l.bf16 %v7594_v3 }
 0x42f   : > { %v10668_v30 = vld [vmem:[#allocation4 + $0xc0] sm:$0xff]  ;;  %v5526_v7 = vsel %vm3796_vm3, %v5494_v19, %v7595_v52  ;;  %v5430_v61 = vsel %vm3796_vm3, %v5398_v13, %v7596_v4  ;;  %v7609_v5 = vpop.permute.xlu0 %7608  ;;  %v4343_v4 = vld [vmem:[#allocation4 + $0x30] sm:$0xff] }
 0x430   : > { %v10670_v28 = vld [vmem:[#allocation4 + $0xc1] sm:$0xff]  ;;  %v7742_v6 = vpack.i.bf16 %v10569_v14, %v10668_v30  ;;  %v7604_v11 = vpop.permute.xlu1 %7603  ;;  %v5558_v25 = vsel %vm3862_vm5, %v5526_v7, %v7600_v43  ;;  %v5462_v18 = vsel %vm3862_vm5, %v5430_v61, %v7601_v48  ;;  %v7611_v21 = vunpack.i.h.bf16 %v7609_v5  ;;  %v4471_v43 = vld [vmem:[#allocation4 + $0x49] sm:$0xff] }
 0x431   : > { %v7747_v35 = vpack.i.bf16 %v10602_v23, %v10670_v28  ;;  %v7606_v45 = vunpack.i.h.bf16 %v7604_v11  ;;  %v7605_v0 = vunpack.i.l.bf16 %v7604_v11  ;;  %5801 = vmatprep.mubr.f32.mxu0 %v5558_v25  ;;  %v7610_v38 = vunpack.i.l.bf16 %v7609_v5 }
 0x432   : > { %7743 = vrot.lane.b32.xlu1 %v7742_v6, %s8071_s19  ;;  %5802 = vmatmul.mubr.f32.gmra.mrb[36].mxu0 %v5462_v18 }
 0x433   : > { %7748 = vrot.lane.b32.xlu0 %v7747_v35, %s8073_s25  ;;  %v10682_v14 = vld [vmem:[#allocation4 + $0xc2] sm:$0xff]  ;;  %v10684_v23 = vld [vmem:[#allocation4 + $0xca] sm:$0xff]  ;;  %v5495_v59 = vsel %vm425_vm2, %v4470_v44, %v7605_v0  ;;  %v5399_v31 = vsel %vm425_vm2, %v4342_v12, %v7606_v45  ;;  %v7619_v24 = vpop.permute.xlu0 %7618  ;;  %v4344_v44 = vld [vmem:[#allocation4 + $0x38] sm:$0xff] }
 0x434   : > { %v10686_v55 = vld [vmem:[#allocation4 + $0xc8] sm:$0xff]  ;;  %6798 = vmatprep.mubr.msk.f32.mxu1 %vm425_vm2, %v10682_v14  ;;  %v7614_v60 = vpop.permute.xlu1 %7613  ;;  %v5527_v50 = vsel %vm3796_vm3, %v5495_v59, %v7610_v38  ;;  %v7767_v51 = vpack.i.bf16 %v10604_v41, %v10682_v14  ;;  %v7621_v36 = vunpack.i.h.bf16 %v7619_v24  ;;  %v7620_v27 = vunpack.i.l.bf16 %v7619_v24  ;;  %v4472_v0 = vld [vmem:[#allocation4 + $0x51] sm:$0xff] }
 0x435   : > { %v7757_v42 = vpack.i.bf16 %v10616_v47, %v10686_v55  ;;  %6799 = vmatmul.mubr.msk.f32.gmra.mrb[76].mxu1 %vm425_vm2, %v10684_v23  ;;  %v10698_v57 = vld [vmem:[#allocation4 + $0xc9] sm:$0xff]  ;;  %v7616_v34 = vunpack.i.h.bf16 %v7614_v60  ;;  %v7615_v9 = vunpack.i.l.bf16 %v7614_v60  ;;  %v5431_v47 = vsel %vm3796_vm3, %v5399_v31, %v7611_v21 }
 0x436   : > { %7753 = vrot.lane.b32.xlu1 %v7752_v53, %s8069_s23  ;;  %v7762_v16 = vpack.i.bf16 %v10620_v1, %v10698_v57  ;;  %v5496_v52 = vsel %vm425_vm2, %v4471_v43, %v7620_v27  ;;  %v5400_v15 = vsel %vm425_vm2, %v4343_v4, %v7621_v36  ;;  %v7782_v53 = vpack.i.bf16 %v10633_v46, %v10684_v23  ;;  %v4345_v43 = vld [vmem:[#allocation4 + $0x48] sm:$0xff] }
 0x437   : > { %7758 = vrot.lane.b32.xlu0 %v7757_v42, %s8071_s19  ;;  %v5559_v40 = vsel %vm3862_vm5, %v5527_v50, %v7615_v9  ;;  %v5463_v54 = vsel %vm3862_vm5, %v5431_v47, %v7616_v34 }
 0x438   : > { %5806 = vmatprep.mubr.f32.mxu0 %v5559_v40 }
 0x439   : > { %5807 = vmatmul.mubr.f32.gmra.mrb[38].mxu0 %v5463_v54 }
 0x43a   : > { %7763 = vrot.lane.b32.xlu1 %v7762_v16, %s8073_s25  ;;  %v4195_v22 = vpop.f32.mrb[32].mxu1 }
 0x43b   : > { %7768 = vrot.lane.b32.xlu0 %v7767_v51, %s8069_s23  ;;  %v4196_v39 = vadd.f32 %v10658_v63, %v4195_v22  ;;  %v4197_v29 = vpop.f32.mrb[33].mxu1 }
 0x43d   : > { %v4290_v56 = vmax.f32 %v4196_v39, 0.0 }
 0x43e   : > { %v4200_v10 = vpop.f32.mrb[34].mxu1 }
 0x43f   : > { %4323 = vst.msk [vmem:[#allocation4 + $0xd9] sm:$0xff] %vm425_vm2, %v4290_v56  ;;  %v4201_v1 = vadd.f32 %v10658_v63, %v4200_v10  ;;  %v4202_v2 = vpop.f32.mrb[35].mxu1 }
 0x441   : > { %v4291_v8 = vmax.f32 %v4201_v1, 0.0 }
 0x443   : > { %4324 = vst.msk [vmem:[#allocation4 + $0xe1] sm:$0xff] %vm425_vm2, %v4291_v8 }
 0x444   : > { %v7624_v62 = vpop.permute.xlu1 %7623 }
 0x445   : > { %v7629_v26 = vpop.permute.xlu0 %7628  ;;  %v7626_v17 = vunpack.i.h.bf16 %v7624_v62  ;;  %v7625_v58 = vunpack.i.l.bf16 %v7624_v62 }
 0x446   : > { %v7631_v3 = vunpack.i.h.bf16 %v7629_v26  ;;  %v7630_v48 = vunpack.i.l.bf16 %v7629_v26  ;;  %v10718_v32 = vld [vmem:[#allocation4 + $0xd8] sm:$0xff] }
 0x447   : > { %v10720_v19 = vld [vmem:[#allocation4 + $0xd9] sm:$0xff]  ;;  %v5528_v13 = vsel %vm3796_vm3, %v5496_v52, %v7625_v58  ;;  %v5432_v7 = vsel %vm3796_vm3, %v5400_v15, %v7626_v17  ;;  %v7772_v61 = vpack.i.bf16 %v10637_v49, %v10718_v32 }
 0x448   : > { %v7777_v6 = vpack.i.bf16 %v10668_v30, %v10720_v19  ;;  %v7634_v35 = vpop.permute.xlu1 %7633  ;;  %v5560_v11 = vsel %vm3862_vm5, %v5528_v13, %v7630_v48  ;;  %v5464_v25 = vsel %vm3862_vm5, %v5432_v7, %v7631_v3  ;;  %v4473_v48 = vld [vmem:[#allocation4 + $0x61] sm:$0xff] }
 0x449   : > { %v7639_v5 = vpop.permute.xlu0 %7638  ;;  %v7636_v18 = vunpack.i.h.bf16 %v7634_v35  ;;  %v7635_v45 = vunpack.i.l.bf16 %v7634_v35  ;;  %5811 = vmatprep.mubr.f32.mxu0 %v5560_v11  ;;  %7773 = vrot.lane.b32.xlu1 %v7772_v61, %s8071_s19 }
 0x44a   : > { %v7641_v12 = vunpack.i.h.bf16 %v7639_v5  ;;  %v7640_v21 = vunpack.i.l.bf16 %v7639_v5  ;;  %5812 = vmatmul.mubr.f32.gmra.mrb[40].mxu0 %v5464_v25  ;;  %7778 = vrot.lane.b32.xlu0 %v7777_v6, %s8073_s25  ;;  %v10732_v49 = vld [vmem:[#allocation4 + $0xda] sm:$0xff]  ;;  %v10734_v30 = vld [vmem:[#allocation4 + $0xe2] sm:$0xff] }
 0x44b   : > { %v10736_v38 = vld [vmem:[#allocation4 + $0xe0] sm:$0xff]  ;;  %6801 = vmatprep.mubr.msk.f32.mxu1 %vm425_vm2, %v10732_v49  ;;  %v5497_v59 = vsel %vm425_vm2, %v4472_v0, %v7635_v45  ;;  %v5401_v31 = vsel %vm425_vm2, %v4344_v44, %v7636_v18  ;;  %v7797_v51 = vpack.i.bf16 %v10670_v28, %v10732_v49  ;;  %v4474_v44 = vld [vmem:[#allocation4 + $0x69] sm:$0xff] }
 0x44c   : > { %v7787_v42 = vpack.i.bf16 %v10653_v33, %v10736_v38  ;;  %v7644_v60 = vpop.permute.xlu1 %7643  ;;  %6802 = vmatmul.mubr.msk.f32.gmra.mrb[78].mxu1 %vm425_vm2, %v10734_v30  ;;  %v10748_v34 = vld [vmem:[#allocation4 + $0xe1] sm:$0xff]  ;;  %v5529_v47 = vsel %vm3796_vm3, %v5497_v59, %v7640_v21  ;;  %v5433_v33 = vsel %vm3796_vm3, %v5401_v31, %v7641_v12  ;;  %v4346_v12 = vld [vmem:[#allocation4 + $0x50] sm:$0xff]  ;;  %v7812_v59 = vpack.i.bf16 %v10698_v57, %v10734_v30 }
 0x44d   : > { %v7646_v9 = vunpack.i.h.bf16 %v7644_v60  ;;  %v7645_v50 = vunpack.i.l.bf16 %v7644_v60  ;;  %7783 = vrot.lane.b32.xlu1 %v7782_v53, %s8069_s23  ;;  %v7792_v16 = vpack.i.bf16 %v10686_v55, %v10748_v34  ;;  %v7649_v24 = vpop.permute.xlu0 %7648 }
 0x44e   : > { %7788 = vrot.lane.b32.xlu0 %v7787_v42, %s8071_s19  ;;  %v7651_v8 = vunpack.i.h.bf16 %v7649_v24  ;;  %v7650_v36 = vunpack.i.l.bf16 %v7649_v24 }
 0x44f   : > { %v5561_v40 = vsel %vm3862_vm5, %v5529_v47, %v7645_v50  ;;  %v5465_v54 = vsel %vm3862_vm5, %v5433_v33, %v7646_v9 }
 0x450   : > { %5816 = vmatprep.mubr.f32.mxu0 %v5561_v40  ;;  %v5498_v4 = vsel %vm425_vm2, %v4473_v48, %v7650_v36  ;;  %v5402_v13 = vsel %vm425_vm2, %v4345_v43, %v7651_v8  ;;  %v4475_v43 = vld [vmem:[#allocation4 + $0x79] sm:$0xff] }
 0x451   : > { %5817 = vmatmul.mubr.f32.gmra.mrb[42].mxu0 %v5465_v54  ;;  %7793 = vrot.lane.b32.xlu1 %v7792_v16, %s8073_s25 }
 0x452   : > { %7798 = vrot.lane.b32.xlu0 %v7797_v51, %s8069_s23 }
 0x453   : > { %v4205_v22 = vpop.f32.mrb[36].mxu1 }
 0x454   : > { %v4206_v39 = vadd.f32 %v10658_v63, %v4205_v22  ;;  %v4207_v29 = vpop.f32.mrb[37].mxu1 }
 0x456   : > { %v4292_v56 = vmax.f32 %v4206_v39, 0.0 }
 0x457   : > { %v4210_v10 = vpop.f32.mrb[38].mxu1 }
 0x458   : > { %4325 = vst.msk [vmem:[#allocation4 + $0xf1] sm:$0xff] %vm425_vm2, %v4292_v56  ;;  %v4211_v55 = vadd.f32 %v10658_v63, %v4210_v10  ;;  %v4212_v1 = vpop.f32.mrb[39].mxu1 }
 0x45a   : > { %v4293_v2 = vmax.f32 %v4211_v55, 0.0 }
 0x45b   : > { %v7654_v27 = vpop.permute.xlu1 %7653 }
 0x45c   : > { %4326 = vst.msk [vmem:[#allocation4 + $0xf9] sm:$0xff] %vm425_vm2, %v4293_v2  ;;  %v7659_v62 = vpop.permute.xlu0 %7658  ;;  %v7656_v26 = vunpack.i.h.bf16 %v7654_v27  ;;  %v7655_v17 = vunpack.i.l.bf16 %v7654_v27 }
 0x45d   : > { %v7661_v58 = vunpack.i.h.bf16 %v7659_v62  ;;  %v7660_v3 = vunpack.i.l.bf16 %v7659_v62 }
 0x45e   : > { %v5530_v7 = vsel %vm3796_vm3, %v5498_v4, %v7655_v17  ;;  %v5434_v35 = vsel %vm3796_vm3, %v5402_v13, %v7656_v26  ;;  %v4347_v4 = vld [vmem:[#allocation4 + $0x60] sm:$0xff] }
 0x45f   : > { %v10767_v52 = vld [vmem:[#allocation4 + $0xf0] sm:$0xff]  ;;  %v7664_v5 = vpop.permute.xlu1 %7663  ;;  %v5562_v25 = vsel %vm3862_vm5, %v5530_v7, %v7660_v3  ;;  %v5466_v18 = vsel %vm3862_vm5, %v5434_v35, %v7661_v58 }
 0x460   : > { %v10769_v15 = vld [vmem:[#allocation4 + $0xf1] sm:$0xff]  ;;  %v7802_v61 = vpack.i.bf16 %v10682_v14, %v10767_v52  ;;  %v7669_v11 = vpop.permute.xlu0 %7668  ;;  %v7666_v45 = vunpack.i.h.bf16 %v7664_v5  ;;  %v7665_v0 = vunpack.i.l.bf16 %v7664_v5  ;;  %5821 = vmatprep.mubr.f32.mxu0 %v5562_v25 }
 0x461   : > { %v7807_v6 = vpack.i.bf16 %v10718_v32, %v10769_v15  ;;  %v7671_v21 = vunpack.i.h.bf16 %v7669_v11  ;;  %v7670_v14 = vunpack.i.l.bf16 %v7669_v11  ;;  %5822 = vmatmul.mubr.f32.gmra.mrb[44].mxu0 %v5466_v18 }
 0x462   : > { %7803 = vrot.lane.b32.xlu1 %v7802_v61, %s8071_s19  ;;  %v5499_v60 = vsel %vm425_vm2, %v4474_v44, %v7665_v0  ;;  %v5403_v9 = vsel %vm425_vm2, %v4346_v12, %v7666_v45 }
 0x463   : > { %7808 = vrot.lane.b32.xlu0 %v7807_v6, %s8073_s25  ;;  %v10782_v32 = vld [vmem:[#allocation4 + $0xf2] sm:$0xff]  ;;  %v10784_v53 = vld [vmem:[#allocation4 + $0xfa] sm:$0xff]  ;;  %v7674_v50 = vpop.permute.xlu1 %7673  ;;  %v5531_v54 = vsel %vm3796_vm3, %v5499_v60, %v7670_v14 }
 0x464   : > { %v10786_v42 = vld [vmem:[#allocation4 + $0xf8] sm:$0xff]  ;;  %6804 = vmatprep.mubr.msk.f32.mxu1 %vm425_vm2, %v10782_v32  ;;  %v7676_v33 = vunpack.i.h.bf16 %v7674_v50  ;;  %v7675_v40 = vunpack.i.l.bf16 %v7674_v50  ;;  %v7827_v39 = vpack.i.bf16 %v10720_v19, %v10782_v32  ;;  %v7679_v1 = vpop.permute.xlu0 %7678  ;;  %v4476_v14 = vld [vmem:[#allocation4 + $0x81] sm:$0xff]  ;;  %v7842_v50 = vpack.i.bf16 %v10748_v34, %v10784_v53 }
 0x465   : > { %v7817_v31 = vpack.i.bf16 %v10684_v23, %v10786_v42  ;;  %6805 = vmatmul.mubr.msk.f32.gmra.mrb[80].mxu1 %vm425_vm2, %v10784_v53  ;;  %v10798_v47 = vld [vmem:[#allocation4 + $0xf9] sm:$0xff]  ;;  %v5435_v23 = vsel %vm3796_vm3, %v5403_v9, %v7671_v21  ;;  %v7681_v36 = vunpack.i.h.bf16 %v7679_v1  ;;  %v7680_v27 = vunpack.i.l.bf16 %v7679_v1 }
 0x466   : > { %7813 = vrot.lane.b32.xlu1 %v7812_v59, %s8069_s23  ;;  %v5563_v16 = vsel %vm3862_vm5, %v5531_v54, %v7675_v40  ;;  %v5467_v51 = vsel %vm3862_vm5, %v5435_v23, %v7676_v33  ;;  %v7822_v22 = vpack.i.bf16 %v10736_v38, %v10798_v47  ;;  %v4348_v59 = vld [vmem:[#allocation4 + $0x68] sm:$0xff] }
 0x467   : > { %7818 = vrot.lane.b32.xlu0 %v7817_v31, %s8071_s19  ;;  %5826 = vmatprep.mubr.f32.mxu0 %v5563_v16  ;;  %v5500_v13 = vsel %vm425_vm2, %v4475_v43, %v7680_v27  ;;  %v5404_v6 = vsel %vm425_vm2, %v4347_v4, %v7681_v36  ;;  %v4349_v4 = vld [vmem:[#allocation4 + $0x78] sm:$0xff] }
 0x468   : > { %5827 = vmatmul.mubr.f32.gmra.mrb[46].mxu0 %v5467_v51 }
 0x46a   : > { %7823 = vrot.lane.b32.xlu1 %v7822_v22, %s8073_s25  ;;  %v4215_v29 = vpop.f32.mrb[40].mxu1 }
 0x46b   : > { %7828 = vrot.lane.b32.xlu0 %v7827_v39, %s8069_s23  ;;  %v4216_v56 = vadd.f32 %v10658_v63, %v4215_v29  ;;  %v4217_v10 = vpop.f32.mrb[41].mxu1 }
 0x46d   : > { %v4294_v24 = vmax.f32 %v4216_v56, 0.0 }
 0x46e   : > { %v4220_v55 = vpop.f32.mrb[42].mxu1 }
 0x46f   : > { %4327 = vst.msk [vmem:[#allocation4 + $0x109] sm:$0xff] %vm425_vm2, %v4294_v24  ;;  %v4221_v38 = vadd.f32 %v10658_v63, %v4220_v55  ;;  %v4222_v2 = vpop.f32.mrb[43].mxu1 }
 0x471   : > { %v4295_v8 = vmax.f32 %v4221_v38, 0.0 }
 0x473   : > { %4328 = vst.msk [vmem:[#allocation4 + $0x111] sm:$0xff] %vm425_vm2, %v4295_v8 }
 0x474   : > { %v7684_v62 = vpop.permute.xlu1 %7683 }
 0x475   : > { %v7689_v26 = vpop.permute.xlu0 %7688  ;;  %v7686_v17 = vunpack.i.h.bf16 %v7684_v62  ;;  %v7685_v58 = vunpack.i.l.bf16 %v7684_v62 }
 0x476   : > { %v7691_v3 = vunpack.i.h.bf16 %v7689_v26  ;;  %v7690_v48 = vunpack.i.l.bf16 %v7689_v26  ;;  %v10817_v7 = vld [vmem:[#allocation4 + $0x108] sm:$0xff] }
 0x477   : > { %v10819_v61 = vld [vmem:[#allocation4 + $0x109] sm:$0xff]  ;;  %v5532_v35 = vsel %vm3796_vm3, %v5500_v13, %v7685_v58  ;;  %v7832_v5 = vpack.i.bf16 %v10732_v49, %v10817_v7  ;;  %v5436_v25 = vsel %vm3796_vm3, %v5404_v6, %v7686_v17 }
 0x478   : > { %v7837_v11 = vpack.i.bf16 %v10767_v52, %v10819_v61  ;;  %v7694_v18 = vpop.permute.xlu1 %7693  ;;  %v5564_v0 = vsel %vm3862_vm5, %v5532_v35, %v7690_v48  ;;  %v5468_v44 = vsel %vm3862_vm5, %v5436_v25, %v7691_v3 }
 0x479   : > { %v7699_v45 = vpop.permute.xlu0 %7698  ;;  %v7696_v12 = vunpack.i.h.bf16 %v7694_v18  ;;  %v7695_v21 = vunpack.i.l.bf16 %v7694_v18  ;;  %5831 = vmatprep.mubr.f32.mxu0 %v5564_v0  ;;  %7833 = vrot.lane.b32.xlu1 %v7832_v5, %s8071_s19 }
 0x47a   : > { %v7701_v31 = vunpack.i.h.bf16 %v7699_v45  ;;  %v7700_v49 = vunpack.i.l.bf16 %v7699_v45  ;;  %7838 = vrot.lane.b32.xlu0 %v7837_v11, %s8073_s25  ;;  %5832 = vmatmul.mubr.f32.gmra.mrb[48].mxu0 %v5468_v44  ;;  %v10832_v52 = vld [vmem:[#allocation4 + $0x10a] sm:$0xff]  ;;  %v10834_v60 = vld [vmem:[#allocation4 + $0x112] sm:$0xff] }
 0x47b   : > { %v10836_v9 = vld [vmem:[#allocation4 + $0x110] sm:$0xff]  ;;  %6807 = vmatprep.mubr.msk.f32.mxu1 %vm425_vm2, %v10832_v52  ;;  %v5501_v40 = vsel %vm425_vm2, %v4476_v14, %v7695_v21  ;;  %v5405_v54 = vsel %vm425_vm2, %v4348_v59, %v7696_v12  ;;  %v7857_v24 = vpack.i.bf16 %v10769_v15, %v10832_v52 }
 0x47c   : > { %v7847_v33 = vpack.i.bf16 %v10734_v30, %v10836_v9  ;;  %v7704_v23 = vpop.permute.xlu1 %7703  ;;  %6808 = vmatmul.mubr.msk.f32.gmra.mrb[82].mxu1 %vm425_vm2, %v10834_v60  ;;  %v10848_v16 = vld [vmem:[#allocation4 + $0x111] sm:$0xff]  ;;  %v5533_v39 = vsel %vm3796_vm3, %v5501_v40, %v7700_v49  ;;  %v5437_v30 = vsel %vm3796_vm3, %v5405_v54, %v7701_v31 }
 0x47d   : > { %v7706_v51 = vunpack.i.h.bf16 %v7704_v23  ;;  %v7705_v22 = vunpack.i.l.bf16 %v7704_v23  ;;  %7843 = vrot.lane.b32.xlu1 %v7842_v50, %s8069_s23  ;;  %v7852_v10 = vpack.i.bf16 %v10786_v42, %v10848_v16  ;;  %v7709_v8 = vpop.permute.xlu0 %7708 }
 0x47e   : > { %7848 = vrot.lane.b32.xlu0 %v7847_v33, %s8071_s19  ;;  %v7711_v62 = vunpack.i.h.bf16 %v7709_v8  ;;  %v7710_v26 = vunpack.i.l.bf16 %v7709_v8  ;;  %v4350_v33 = vld [vmem:[#allocation4 + $0x80] sm:$0xff] }
 0x47f   : > { %v5565_v29 = vsel %vm3862_vm5, %v5533_v39, %v7705_v22  ;;  %v5469_v56 = vsel %vm3862_vm5, %v5437_v30, %v7706_v51  ;;  %v7872_v22 = vpack.i.bf16 %v10798_v47, %v10834_v60 }
 0x480   : > { %5836 = vmatprep.mubr.f32.mxu0 %v5565_v29  ;;  %v5502_v35 = vsel %vm425_vm2, %v10544_v37, %v7710_v26  ;;  %v5406_v5 = vsel %vm425_vm2, %v4349_v4, %v7711_v62 }
 0x481   : > { %5837 = vmatmul.mubr.f32.gmra.mrb[50].mxu0 %v5469_v56  ;;  %7853 = vrot.lane.b32.xlu1 %v7852_v10, %s8073_s25 }
 0x482   : > { %7858 = vrot.lane.b32.xlu0 %v7857_v24, %s8069_s23 }
 0x483   : > { %v4225_v55 = vpop.f32.mrb[44].mxu1 }
 0x484   : > { %v4226_v1 = vadd.f32 %v10658_v63, %v4225_v55  ;;  %v4227_v38 = vpop.f32.mrb[45].mxu1 }
 0x486   : > { %v4296_v2 = vmax.f32 %v4226_v1, 0.0 }
 0x487   : > { %v4230_v36 = vpop.f32.mrb[46].mxu1 }
 0x488   : > { %4329 = vst.msk [vmem:[#allocation4 + $0x121] sm:$0xff] %vm425_vm2, %v4296_v2  ;;  %v4231_v42 = vadd.f32 %v10658_v63, %v4230_v36  ;;  %v4232_v27 = vpop.f32.mrb[47].mxu1 }
 0x48a   : > { %v4297_v17 = vmax.f32 %v4231_v42, 0.0 }
 0x48b   : > { %v7714_v58 = vpop.permute.xlu1 %7713 }
 0x48c   : > { %4330 = vst.msk [vmem:[#allocation4 + $0x129] sm:$0xff] %vm425_vm2, %v4297_v17  ;;  %v7716_v3 = vunpack.i.h.bf16 %v7714_v58  ;;  %v7715_v48 = vunpack.i.l.bf16 %v7714_v58  ;;  %v7719_v43 = vpop.permute.xlu0 %7718 }
 0x48d   : > { %v7721_v13 = vunpack.i.h.bf16 %v7719_v43  ;;  %v7720_v6 = vunpack.i.l.bf16 %v7719_v43 }
 0x48e   : > { %v5534_v11 = vsel %vm3796_vm3, %v5502_v35, %v7715_v48  ;;  %v5438_v45 = vsel %vm3796_vm3, %v5406_v5, %v7716_v3 }
 0x48f   : > { %v10870_v25 = vld [vmem:[#allocation4 + $0x120] sm:$0xff]  ;;  %v7724_v0 = vpop.permute.xlu1 %7723  ;;  %v5566_v44 = vsel %vm3862_vm5, %v5534_v11, %v7720_v6  ;;  %v5470_v37 = vsel %vm3862_vm5, %v5438_v45, %v7721_v13  ;;  %v4351_v13 = vld [vmem:[#allocation4 + $0x90] sm:$0xff] }
 0x490   : > { %v10872_v18 = vld [vmem:[#allocation4 + $0x121] sm:$0xff]  ;;  %v7862_v12 = vpack.i.bf16 %v10782_v32, %v10870_v25  ;;  %v7726_v14 = vunpack.i.h.bf16 %v7724_v0  ;;  %v7725_v59 = vunpack.i.l.bf16 %v7724_v0  ;;  %v7729_v31 = vpop.permute.xlu0 %7728  ;;  %5841 = vmatprep.mubr.f32.mxu0 %v5566_v44 }
 0x491   : > { %v7867_v21 = vpack.i.bf16 %v10817_v7, %v10872_v18  ;;  %v7731_v49 = vunpack.i.h.bf16 %v7729_v31  ;;  %v7730_v50 = vunpack.i.l.bf16 %v7729_v31  ;;  %5842 = vmatmul.mubr.f32.gmra.mrb[52].mxu0 %v5470_v37 }
 0x492   : > { %7863 = vrot.lane.b32.xlu1 %v7862_v12, %s8071_s19  ;;  %v5503_v7 = vsel %vm425_vm2, %v10567_v20, %v7725_v59  ;;  %v5407_v23 = vsel %vm425_vm2, %v4350_v33, %v7726_v14 }
 0x493   : > { %7868 = vrot.lane.b32.xlu0 %v7867_v21, %s8073_s25  ;;  %v10883_v40 = vld [vmem:[#allocation4 + $0x122] sm:$0xff]  ;;  %v10885_v32 = vld [vmem:[#allocation4 + $0x12a] sm:$0xff]  ;;  %v7734_v51 = vpop.permute.xlu1 %7733  ;;  %v5535_v20 = vsel %vm3796_vm3, %v5503_v7, %v7730_v50  ;;  %v5439_v10 = vsel %vm3796_vm3, %v5407_v23, %v7731_v49  ;;  %v4352_v23 = vld [vmem:[#allocation4 + $0x98] sm:$0xff] }
 0x494   : > { %v10887_v54 = vld [vmem:[#allocation4 + $0x128] sm:$0xff]  ;;  %6810 = vmatprep.mubr.msk.f32.mxu1 %vm425_vm2, %v10883_v40  ;;  %v7736_v30 = vunpack.i.h.bf16 %v7734_v51  ;;  %v7735_v29 = vunpack.i.l.bf16 %v7734_v51  ;;  %v7887_v1 = vpack.i.bf16 %v10819_v61, %v10883_v40  ;;  %v7739_v42 = vpop.permute.xlu0 %7738 }
 0x495   : > { %v7877_v39 = vpack.i.bf16 %v10784_v53, %v10887_v54  ;;  %6811 = vmatmul.mubr.msk.f32.gmra.mrb[84].mxu1 %vm425_vm2, %v10885_v32  ;;  %v10900_v56 = vld [vmem:[#allocation4 + $0x129] sm:$0xff]  ;;  %v7741_v26 = vunpack.i.h.bf16 %v7739_v42  ;;  %v7740_v17 = vunpack.i.l.bf16 %v7739_v42 }
 0x496   : > { %7873 = vrot.lane.b32.xlu1 %v7872_v22, %s8069_s23  ;;  %v5567_v24 = vsel %vm3862_vm5, %v5535_v20, %v7735_v29  ;;  %v5471_v55 = vsel %vm3862_vm5, %v5439_v10, %v7736_v30  ;;  %v7882_v53 = vpack.i.bf16 %v10836_v9, %v10900_v56  ;;  %v7902_v29 = vpack.i.bf16 %v10848_v16, %v10885_v32 }
 0x497   : > { %7878 = vrot.lane.b32.xlu0 %v7877_v39, %s8071_s19  ;;  %5846 = vmatprep.mubr.f32.mxu0 %v5567_v24  ;;  %v5504_v5 = vsel %vm425_vm2, %v10604_v41, %v7740_v17  ;;  %v5408_v11 = vsel %vm425_vm2, %v4351_v13, %v7741_v26 }
 0x498   : > { %5847 = vmatmul.mubr.f32.gmra.mrb[54].mxu0 %v5471_v55 }
 0x49a   : > { %7883 = vrot.lane.b32.xlu1 %v7882_v53, %s8073_s25  ;;  %v4235_v38 = vpop.f32.mrb[48].mxu1 }
 0x49b   : > { %7888 = vrot.lane.b32.xlu0 %v7887_v1, %s8069_s23  ;;  %v4236_v2 = vadd.f32 %v10658_v63, %v4235_v38  ;;  %v4237_v8 = vpop.f32.mrb[49].mxu1 }
 0x49d   : > { %v4298_v36 = vmax.f32 %v4236_v2, 0.0 }
 0x49e   : > { %v4240_v27 = vpop.f32.mrb[50].mxu1 }
 0x49f   : > { %4331 = vst.msk [vmem:[#allocation4 + $0x139] sm:$0xff] %vm425_vm2, %v4298_v36  ;;  %v4241_v62 = vadd.f32 %v10658_v63, %v4240_v27  ;;  %v4242_v9 = vpop.f32.mrb[51].mxu1 }
 0x4a1   : > { %v4299_v58 = vmax.f32 %v4241_v62, 0.0 }
 0x4a3   : > { %4332 = vst.msk [vmem:[#allocation4 + $0x141] sm:$0xff] %vm425_vm2, %v4299_v58 }
 0x4a4   : > { %v7744_v3 = vpop.permute.xlu1 %7743 }
 0x4a5   : > { %v7746_v48 = vunpack.i.h.bf16 %v7744_v3  ;;  %v7745_v43 = vunpack.i.l.bf16 %v7744_v3  ;;  %v7749_v4 = vpop.permute.xlu0 %7748 }
 0x4a6   : > { %v7751_v6 = vunpack.i.h.bf16 %v7749_v4  ;;  %v7750_v35 = vunpack.i.l.bf16 %v7749_v4  ;;  %v10922_v0 = vld [vmem:[#allocation4 + $0x138] sm:$0xff] }
 0x4a7   : > { %v5536_v45 = vsel %vm3796_vm3, %v5504_v5, %v7745_v43  ;;  %v10924_v44 = vld [vmem:[#allocation4 + $0x139] sm:$0xff]  ;;  %v5440_v12 = vsel %vm3796_vm3, %v5408_v11, %v7746_v48  ;;  %v7892_v14 = vpack.i.bf16 %v10832_v52, %v10922_v0 }
 0x4a8   : > { %v7754_v21 = vpop.permute.xlu1 %7753  ;;  %v5568_v37 = vsel %vm3862_vm5, %v5536_v45, %v7750_v35  ;;  %v7897_v59 = vpack.i.bf16 %v10870_v25, %v10924_v44  ;;  %v5472_v41 = vsel %vm3862_vm5, %v5440_v12, %v7751_v6  ;;  %v4353_v6 = vld [vmem:[#allocation4 + $0xa8] sm:$0xff] }
 0x4a9   : > { %v7756_v31 = vunpack.i.h.bf16 %v7754_v21  ;;  %v7755_v49 = vunpack.i.l.bf16 %v7754_v21  ;;  %v7759_v50 = vpop.permute.xlu0 %7758  ;;  %5851 = vmatprep.mubr.f32.mxu0 %v5568_v37  ;;  %7893 = vrot.lane.b32.xlu1 %v7892_v14, %s8071_s19 }
 0x4aa   : > { %v7761_v33 = vunpack.i.h.bf16 %v7759_v50  ;;  %v7760_v7 = vunpack.i.l.bf16 %v7759_v50  ;;  %7898 = vrot.lane.b32.xlu0 %v7897_v59, %s8073_s25  ;;  %5852 = vmatmul.mubr.f32.gmra.mrb[56].mxu0 %v5472_v41  ;;  %v10935_v51 = vld [vmem:[#allocation4 + $0x13a] sm:$0xff]  ;;  %v10937_v52 = vld [vmem:[#allocation4 + $0x142] sm:$0xff] }
 0x4ab   : > { %v10939_v22 = vld [vmem:[#allocation4 + $0x140] sm:$0xff]  ;;  %v5505_v25 = vsel %vm425_vm2, %v10633_v46, %v7755_v49  ;;  %v5409_v39 = vsel %vm425_vm2, %v4352_v23, %v7756_v31  ;;  %6813 = vmatprep.mubr.msk.f32.mxu1 %vm425_vm2, %v10935_v51  ;;  %v7917_v2 = vpack.i.bf16 %v10872_v18, %v10935_v51 }
 0x4ac   : > { %v7764_v30 = vpop.permute.xlu1 %7763  ;;  %v7907_v20 = vpack.i.bf16 %v10834_v60, %v10939_v22  ;;  %6814 = vmatmul.mubr.msk.f32.gmra.mrb[86].mxu1 %vm425_vm2, %v10937_v52  ;;  %v10952_v55 = vld [vmem:[#allocation4 + $0x141] sm:$0xff]  ;;  %v5537_v46 = vsel %vm3796_vm3, %v5505_v25, %v7760_v7  ;;  %v5441_v53 = vsel %vm3796_vm3, %v5409_v39, %v7761_v33  ;;  %v4354_v39 = vld [vmem:[#allocation4 + $0xb0] sm:$0xff] }
 0x4ad   : > { %v7766_v10 = vunpack.i.h.bf16 %v7764_v30  ;;  %v7765_v24 = vunpack.i.l.bf16 %v7764_v30  ;;  %7903 = vrot.lane.b32.xlu1 %v7902_v29, %s8069_s23  ;;  %v7912_v60 = vpack.i.bf16 %v10887_v54, %v10952_v55  ;;  %v7769_v62 = vpop.permute.xlu0 %7768 }
 0x4ae   : > { %7908 = vrot.lane.b32.xlu0 %v7907_v20, %s8071_s19  ;;  %v7771_v17 = vunpack.i.h.bf16 %v7769_v62  ;;  %v7770_v58 = vunpack.i.l.bf16 %v7769_v62 }
 0x4af   : > { %v5569_v1 = vsel %vm3862_vm5, %v5537_v46, %v7765_v24  ;;  %v5473_v38 = vsel %vm3862_vm5, %v5441_v53, %v7766_v10  ;;  %v7932_v46 = vpack.i.bf16 %v10900_v56, %v10937_v52 }
 0x4b0   : > { %5856 = vmatprep.mubr.f32.mxu0 %v5569_v1  ;;  %v5506_v11 = vsel %vm425_vm2, %v10670_v28, %v7770_v58  ;;  %v5410_v45 = vsel %vm425_vm2, %v4353_v6, %v7771_v17 }
 0x4b1   : > { %5857 = vmatmul.mubr.f32.gmra.mrb[58].mxu0 %v5473_v38  ;;  %7913 = vrot.lane.b32.xlu1 %v7912_v60, %s8073_s25 }
 0x4b2   : > { %7918 = vrot.lane.b32.xlu0 %v7917_v2, %s8069_s23 }
 0x4b3   : > { %v4245_v8 = vpop.f32.mrb[52].mxu1 }
 0x4b4   : > { %v4246_v36 = vadd.f32 %v10658_v63, %v4245_v8  ;;  %v4247_v42 = vpop.f32.mrb[53].mxu1 }
 0x4b6   : > { %v4300_v27 = vmax.f32 %v4246_v36, 0.0 }
 0x4b7   : > { %v4250_v9 = vpop.f32.mrb[54].mxu1 }
 0x4b8   : > { %4333 = vst.msk [vmem:[#allocation4 + $0x151] sm:$0xff] %vm425_vm2, %v4300_v27  ;;  %v4251_v26 = vadd.f32 %v10658_v63, %v4250_v9  ;;  %v4252_v54 = vpop.f32.mrb[55].mxu1 }
 0x4ba   : > { %v4301_v3 = vmax.f32 %v4251_v26, 0.0 }
 0x4bb   : > { %v7774_v48 = vpop.permute.xlu1 %7773 }
 0x4bc   : > { %4334 = vst.msk [vmem:[#allocation4 + $0x159] sm:$0xff] %vm425_vm2, %v4301_v3  ;;  %v7776_v43 = vunpack.i.h.bf16 %v7774_v48  ;;  %v7775_v4 = vunpack.i.l.bf16 %v7774_v48  ;;  %v7779_v13 = vpop.permute.xlu0 %7778 }
 0x4bd   : > { %v7781_v35 = vunpack.i.h.bf16 %v7779_v13  ;;  %v7780_v5 = vunpack.i.l.bf16 %v7779_v13 }
 0x4be   : > { %v5538_v12 = vsel %vm3796_vm3, %v5506_v11, %v7775_v4  ;;  %v5442_v14 = vsel %vm3796_vm3, %v5410_v45, %v7776_v43  ;;  %v4355_v11 = vld [vmem:[#allocation4 + $0xc0] sm:$0xff] }
 0x4bf   : > { %v10974_v21 = vld [vmem:[#allocation4 + $0x150] sm:$0xff]  ;;  %v7784_v59 = vpop.permute.xlu1 %7783  ;;  %v5570_v41 = vsel %vm3862_vm5, %v5538_v12, %v7780_v5  ;;  %v5474_v28 = vsel %vm3862_vm5, %v5442_v14, %v7781_v35 }
 0x4c0   : > { %v10976_v37 = vld [vmem:[#allocation4 + $0x151] sm:$0xff]  ;;  %v7922_v31 = vpack.i.bf16 %v10883_v40, %v10974_v21  ;;  %v7786_v50 = vunpack.i.h.bf16 %v7784_v59  ;;  %v7785_v33 = vunpack.i.l.bf16 %v7784_v59  ;;  %v7789_v7 = vpop.permute.xlu0 %7788  ;;  %5861 = vmatprep.mubr.f32.mxu0 %v5570_v41 }
 0x4c1   : > { %v7927_v49 = vpack.i.bf16 %v10922_v0, %v10976_v37  ;;  %v7791_v23 = vunpack.i.h.bf16 %v7789_v7  ;;  %v7790_v25 = vunpack.i.l.bf16 %v7789_v7  ;;  %5862 = vmatmul.mubr.f32.gmra.mrb[60].mxu0 %v5474_v28 }
 0x4c2   : > { %7923 = vrot.lane.b32.xlu1 %v7922_v31, %s8071_s19  ;;  %v5507_v20 = vsel %vm425_vm2, %v10698_v57, %v7785_v33  ;;  %v5411_v10 = vsel %vm425_vm2, %v4354_v39, %v7786_v50 }
 0x4c3   : > { %7928 = vrot.lane.b32.xlu0 %v7927_v49, %s8073_s25  ;;  %v10987_v30 = vld [vmem:[#allocation4 + $0x152] sm:$0xff]  ;;  %v10989_v40 = vld [vmem:[#allocation4 + $0x15a] sm:$0xff]  ;;  %v7794_v24 = vpop.permute.xlu1 %7793  ;;  %v5539_v57 = vsel %vm3796_vm3, %v5507_v20, %v7790_v25  ;;  %v5443_v2 = vsel %vm3796_vm3, %v5411_v10, %v7791_v23 }
 0x4c4   : > { %v10991_v29 = vld [vmem:[#allocation4 + $0x158] sm:$0xff]  ;;  %6816 = vmatprep.mubr.msk.f32.mxu1 %vm425_vm2, %v10987_v30  ;;  %v7796_v1 = vunpack.i.h.bf16 %v7794_v24  ;;  %v7795_v38 = vunpack.i.l.bf16 %v7794_v24  ;;  %v7947_v42 = vpack.i.bf16 %v10924_v44, %v10987_v30  ;;  %v7799_v54 = vpop.permute.xlu0 %7798  ;;  %v4356_v24 = vld [vmem:[#allocation4 + $0xc8] sm:$0xff] }
 0x4c5   : > { %v7937_v53 = vpack.i.bf16 %v10885_v32, %v10991_v29  ;;  %6817 = vmatmul.mubr.msk.f32.gmra.mrb[88].mxu1 %vm425_vm2, %v10989_v40  ;;  %v11004_v60 = vld [vmem:[#allocation4 + $0x159] sm:$0xff]  ;;  %v7801_v48 = vunpack.i.h.bf16 %v7799_v54  ;;  %v7800_v43 = vunpack.i.l.bf16 %v7799_v54 }
 0x4c6   : > { %7933 = vrot.lane.b32.xlu1 %v7932_v46, %s8069_s23  ;;  %v5571_v8 = vsel %vm3862_vm5, %v5539_v57, %v7795_v38  ;;  %v5475_v36 = vsel %vm3862_vm5, %v5443_v2, %v7796_v1  ;;  %v7942_v32 = vpack.i.bf16 %v10939_v22, %v11004_v60  ;;  %v8047_v2 = vld [vmem:[%s11434_s4] ss:$0 sm:$0xff] }
 0x4c7   : > { %7938 = vrot.lane.b32.xlu0 %v7937_v53, %s8071_s19  ;;  %5866 = vmatprep.mubr.f32.mxu0 %v5571_v8  ;;  %v5508_v14 = vsel %vm425_vm2, %v10720_v19, %v7800_v43  ;;  %v5412_v59 = vsel %vm425_vm2, %v4355_v11, %v7801_v48 }
 0x4c8   : > { %5867 = vmatmul.mubr.f32.gmra.mrb[62].mxu0 %v5475_v36 }
 0x4ca   : > { %7943 = vrot.lane.b32.xlu1 %v7942_v32, %s8073_s25  ;;  %v4255_v27 = vpop.f32.mrb[56].mxu1 }
 0x4cb   : > { %7948 = vrot.lane.b32.xlu0 %v7947_v42, %s8069_s23  ;;  %v4256_v62 = vadd.f32 %v10658_v63, %v4255_v27  ;;  %v4257_v9 = vpop.f32.mrb[57].mxu1  ;;  %v7962_v42 = vpack.i.bf16 %v10952_v55, %v10989_v40 }
 0x4cd   : > { %v4302_v26 = vmax.f32 %v4256_v62, 0.0 }
 0x4ce   : > { %v4260_v17 = vpop.f32.mrb[58].mxu1 }
 0x4cf   : > { %4335 = vst.msk [vmem:[#allocation4 + $0x169] sm:$0xff] %vm425_vm2, %v4302_v26  ;;  %v4261_v58 = vadd.f32 %v10658_v63, %v4260_v17  ;;  %v4262_v3 = vpop.f32.mrb[59].mxu1 }
 0x4d1   : > { %v4303_v4 = vmax.f32 %v4261_v58, 0.0 }
 0x4d3   : > { %4336 = vst.msk [vmem:[#allocation4 + $0x171] sm:$0xff] %vm425_vm2, %v4303_v4 }
 0x4d4   : > { %v7804_v13 = vpop.permute.xlu1 %7803 }
 0x4d5   : > { %v7806_v6 = vunpack.i.h.bf16 %v7804_v13  ;;  %v7805_v35 = vunpack.i.l.bf16 %v7804_v13  ;;  %v7809_v5 = vpop.permute.xlu0 %7808 }
 0x4d6   : > { %v7811_v45 = vunpack.i.h.bf16 %v7809_v5  ;;  %v7810_v12 = vunpack.i.l.bf16 %v7809_v5  ;;  %v11026_v41 = vld [vmem:[#allocation4 + $0x168] sm:$0xff] }
 0x4d7   : > { %v5540_v63 = vsel %vm3796_vm3, %v5508_v14, %v7805_v35  ;;  %v11028_v31 = vld [vmem:[#allocation4 + $0x169] sm:$0xff]  ;;  %v5444_v49 = vsel %vm3796_vm3, %v5412_v59, %v7806_v6  ;;  %v7952_v33 = vpack.i.bf16 %v10935_v51, %v11026_v41 }
 0x4d8   : > { %v7814_v28 = vpop.permute.xlu1 %7813  ;;  %v5572_v50 = vsel %vm3862_vm5, %v5540_v63, %v7810_v12  ;;  %v7957_v7 = vpack.i.bf16 %v10974_v21, %v11028_v31  ;;  %v5476_v19 = vsel %vm3862_vm5, %v5444_v49, %v7811_v45 }
 0x4d9   : > { %v7816_v23 = vunpack.i.h.bf16 %v7814_v28  ;;  %v7815_v25 = vunpack.i.l.bf16 %v7814_v28  ;;  %v7819_v39 = vpop.permute.xlu0 %7818  ;;  %5871 = vmatprep.mubr.f32.mxu0 %v5572_v50  ;;  %7953 = vrot.lane.b32.xlu1 %v7952_v33, %s8071_s19  ;;  %v4265_v46 = vpop.f32.mrb[60].mxu1  ;;  %v11094_v33 = vld [vmem:[%s11436_s6] ss:$0 sm:$0xff] }
 0x4da   : > { %v7821_v20 = vunpack.i.h.bf16 %v7819_v39  ;;  %v7820_v10 = vunpack.i.l.bf16 %v7819_v39  ;;  %7958 = vrot.lane.b32.xlu0 %v7957_v7, %s8073_s25  ;;  %5872 = vmatmul.mubr.f32.gmra.mrb[64].mxu0 %v5476_v19  ;;  %v11039_v53 = vld [vmem:[#allocation4 + $0x16a] sm:$0xff]  ;;  %v11041_v51 = vld [vmem:[#allocation4 + $0x172] sm:$0xff]  ;;  %v4266_v8 = vadd.f32 %v8047_v2, %v4265_v46  ;;  %v4267_v36 = vpop.f32.mrb[61].mxu1 }
 0x4db   : > { %v11043_v1 = vld [vmem:[#allocation4 + $0x170] sm:$0xff]  ;;  %v5509_v38 = vsel %vm425_vm2, %v10748_v34, %v7815_v25  ;;  %v5413_v57 = vsel %vm425_vm2, %v4356_v24, %v7816_v23  ;;  %6819 = vmatprep.mubr.msk.f32.mxu1 %vm425_vm2, %v11039_v53  ;;  %v7977_v13 = vpack.i.bf16 %v10976_v37, %v11039_v53  ;;  %v4357_v36 = vld [vmem:[#allocation4 + $0xd8] sm:$0xff] }
 0x4dc   : > { %v7824_v32 = vpop.permute.xlu1 %7823  ;;  %v7967_v27 = vpack.i.bf16 %v10937_v52, %v11043_v1  ;;  %6820 = vmatmul.mubr.msk.f32.gmra.mrb[90].mxu1 %vm425_vm2, %v11041_v51  ;;  %v11059_v9 = vld [vmem:[#allocation4 + $0x171] sm:$0xff]  ;;  %v4304_v26 = vmax.f32 %v4266_v8, 0.0  ;;  %v5541_v54 = vsel %vm3796_vm3, %v5509_v38, %v7820_v10  ;;  %v5445_v17 = vsel %vm3796_vm3, %v5413_v57, %v7821_v20 }
 0x4dd   : > { %v7826_v62 = vunpack.i.h.bf16 %v7824_v32  ;;  %v7825_v34 = vunpack.i.l.bf16 %v7824_v32  ;;  %7963 = vrot.lane.b32.xlu1 %v7962_v42, %s8069_s23  ;;  %v4270_v58 = vpop.f32.mrb[62].mxu1  ;;  %v7972_v4 = vpack.i.bf16 %v10991_v29, %v11059_v9  ;;  %v7829_v11 = vpop.permute.xlu0 %7828  ;;  %v7992_v20 = vpack.i.bf16 %v11004_v60, %v11041_v51 }
 0x4de   : > { %7968 = vrot.lane.b32.xlu0 %v7967_v27, %s8071_s19  ;;  %4337 = vst.msk [vmem:[#allocation4 + $0x181] sm:$0xff] %vm425_vm2, %v4304_v26  ;;  %v4271_v48 = vadd.f32 %v8047_v2, %v4270_v58  ;;  %v4272_v43 = vpop.f32.mrb[63].mxu1  ;;  %v7830_v28 = vunpack.i.l.bf16 %v7829_v11  ;;  %v7831_v50 = vunpack.i.h.bf16 %v7829_v11 }
 0x4df   : > { %v5573_v3 = vsel %vm3862_vm5, %v5541_v54, %v7825_v34  ;;  %v5477_v52 = vsel %vm3862_vm5, %v5445_v17, %v7826_v62  ;;  %v4626_v17 = vld [vmem:[#allocation4 + $0x19a] sm:$0xff] }
 0x4e0   : > { %5876 = vmatprep.mubr.f32.mxu0 %v5573_v3  ;;  %v4305_v6 = vmax.f32 %v4271_v48, 0.0  ;;  %v5510_v8 = vsel %vm425_vm2, %v10769_v15, %v7830_v28  ;;  %v5414_v62 = vsel %vm425_vm2, %v4357_v36, %v7831_v50  ;;  %v4594_v28 = vld [vmem:[#allocation4 + $0x199] sm:$0xff] }
 0x4e1   : > { %5877 = vmatmul.mubr.f32.gmra.mrb[66].mxu0 %v5477_v52  ;;  %7973 = vrot.lane.b32.xlu1 %v7972_v4, %s8073_s25  ;;  %v11074_v35 = vpop.f32.mrb[64].mxu1 }
 0x4e2   : > { %7978 = vrot.lane.b32.xlu0 %v7977_v13, %s8069_s23  ;;  %4338 = vst.msk [vmem:[#allocation4 + $0x189] sm:$0xff] %vm425_vm2, %v4305_v6  ;;  %v6018_v5 = vpop.f32.mrb[65].mxu1  ;;  %v4627_v13 = vld [vmem:[#allocation4 + $0x1a2] sm:$0xff] }
 0x4e5   : > { %v11077_v45 = vpop.f32.mrb[66].mxu1  ;;  %v11079_v12 = vld [vmem:[#allocation4 + $0x180] sm:$0xff] }
 0x4e6   : > { %v11081_v14 = vld [vmem:[#allocation4 + $0x181] sm:$0xff]  ;;  %v11083_v59 = vpop.f32.mrb[67].mxu1  ;;  %v7982_v63 = vpack.i.bf16 %v10987_v30, %v11079_v12 }
 0x4e7   : > { %v7987_v49 = vpack.i.bf16 %v11026_v41, %v11081_v14 }
 0x4e8   : > { %7983 = vrot.lane.b32.xlu1 %v7982_v63, %s8071_s19 }
 0x4e9   : > { %7988 = vrot.lane.b32.xlu0 %v7987_v49, %s8073_s25  ;;  %v11096_v7 = vpop.f32.mrb[68].mxu1  ;;  %v4624_v19 = vld [vmem:[#allocation4 + $0x182] sm:$0xff]  ;;  %v11098_v23 = vld [vmem:[#allocation4 + $0x18a] sm:$0xff]  ;;  %v4562_v49 = vld [vmem:[#allocation4 + $0x198] sm:$0xff] }
 0x4ea   : > { %v11100_v30 = vld [vmem:[#allocation4 + $0x188] sm:$0xff]  ;;  %v11102_v25 = vpop.f32.mrb[69].mxu1  ;;  %6822 = vmatprep.mubr.msk.f32.mxu1 %vm425_vm2, %v4624_v19  ;;  %v8007_v26 = vpack.i.bf16 %v11028_v31, %v4624_v19 }
 0x4eb   : > { %v7834_v39 = vpop.permute.xlu1 %7833  ;;  %v7997_v10 = vpack.i.bf16 %v10989_v40, %v11100_v30  ;;  %6823 = vmatmul.mubr.msk.f32.gmra.mrb[92].mxu1 %vm425_vm2, %v11098_v23  ;;  %v11111_v2 = vld [vmem:[#allocation4 + $0x189] sm:$0xff] }
 0x4ec   : > { %v7836_v24 = vunpack.i.h.bf16 %v7834_v39  ;;  %v7835_v46 = vunpack.i.l.bf16 %v7834_v39  ;;  %v7839_v38 = vpop.permute.xlu0 %7838  ;;  %v5793_v57 = vpop.f32.mrb[32].mxu0  ;;  %7993 = vrot.lane.b32.xlu1 %v7992_v20, %s8069_s23  ;;  %v8002_v48 = vpack.i.bf16 %v11043_v1, %v11111_v2  ;;  %6825 = vmatprep.mubr.msk.f32.mxu1 %vm425_vm2, %v4626_v17  ;;  %v4358_v39 = vld [vmem:[#allocation4 + $0xe0] sm:$0xff] }
 0x4ed   : > { %v7841_v32 = vunpack.i.h.bf16 %v7839_v38  ;;  %v7840_v42 = vunpack.i.l.bf16 %v7839_v38  ;;  %v5794_v27 = vadd.f32 %v11094_v33, %v5793_v57  ;;  %7998 = vrot.lane.b32.xlu0 %v7997_v10, %s8071_s19  ;;  %v5795_v40 = vpop.f32.mrb[33].mxu0  ;;  %v11119_v34 = vpop.f32.mrb[70].mxu1 }
 0x4ee   : > { %v5542_v54 = vsel %vm3796_vm3, %v5510_v8, %v7835_v46  ;;  %v5446_v15 = vsel %vm3796_vm3, %v5414_v62, %v7836_v24  ;;  %v11124_v3 = vpop.f32.mrb[71].mxu1  ;;  %v8012_v24 = vpack.i.bf16 %v11039_v53, %v4562_v49  ;;  %v8017_v46 = vpack.i.bf16 %v11079_v12, %v4594_v28 }
 0x4ef   : > { %v6019_v58 = vadd.f32 %v6018_v5, %v5794_v27  ;;  %v7844_v52 = vpop.permute.xlu1 %7843  ;;  %v5574_v43 = vsel %vm3862_vm5, %v5542_v54, %v7840_v42  ;;  %v5478_v4 = vsel %vm3862_vm5, %v5446_v15, %v7841_v32  ;;  %6826 = vmatmul.mubr.msk.f32.gmra.mrb[94].mxu1 %vm425_vm2, %v4627_v13  ;;  %v4563_v32 = vld [vmem:[#allocation4 + $0x1a0] sm:$0xff]  ;;  %v8022_v15 = vpack.i.bf16 %v11059_v9, %v11098_v23 }
 0x4f0   : > { %v7846_v6 = vunpack.i.h.bf16 %v7844_v52  ;;  %v7845_v11 = vunpack.i.l.bf16 %v7844_v52  ;;  %v7849_v63 = vpop.permute.xlu0 %7848  ;;  %5881 = vmatprep.mubr.f32.mxu0 %v5574_v43  ;;  %8003 = vrot.lane.b32.xlu1 %v8002_v48, %s8073_s25  ;;  %v8027_v17 = vpack.i.bf16 %v11041_v51, %v4563_v32 }
 0x4f1   : > { %8008 = vrot.lane.b32.xlu0 %v8007_v26, %s8069_s23  ;;  %v7851_v5 = vunpack.i.h.bf16 %v7849_v63  ;;  %v7850_v50 = vunpack.i.l.bf16 %v7849_v63  ;;  %5882 = vmatmul.mubr.f32.gmra.mrb[68].mxu0 %v5478_v4  ;;  %v11134_v19 = vpop.f32.mrb[72].mxu1  ;;  %v6177_v48 = vmax.f32 %v6019_v58, 0.0 }
 0x4f2   : > { %v11136_v20 = vpop.f32.mrb[73].mxu1  ;;  %v5511_v38 = vsel %vm425_vm2, %v10798_v47, %v7845_v11  ;;  %v5415_v57 = vsel %vm425_vm2, %v4358_v39, %v7846_v6 }
 0x4f3   : > { %v5798_v10 = vpop.f32.mrb[34].mxu0  ;;  %v7854_v36 = vpop.permute.xlu1 %7853  ;;  %v5543_v12 = vsel %vm3796_vm3, %v5511_v38, %v7850_v50  ;;  %v5447_v47 = vsel %vm3796_vm3, %v5415_v57, %v7851_v5  ;;  %v4359_v50 = vld [vmem:[#allocation4 + $0xf0] sm:$0xff] }
 0x4f4   : > { %v5799_v8 = vadd.f32 %v11094_v33, %v5798_v10  ;;  %v7856_v42 = vunpack.i.h.bf16 %v7854_v36  ;;  %v7855_v27 = vunpack.i.l.bf16 %v7854_v36  ;;  %v5800_v40 = vpop.f32.mrb[35].mxu0  ;;  %8013 = vrot.lane.b32.xlu1 %v8012_v24, %s8071_s19  ;;  %v7859_v23 = vpop.permute.xlu0 %7858 }
 0x4f5   : > { %8018 = vrot.lane.b32.xlu0 %v8017_v46, %s8073_s25  ;;  %v11147_v62 = vpop.f32.mrb[74].mxu1  ;;  %v7861_v6 = vunpack.i.h.bf16 %v7859_v23  ;;  %v7860_v51 = vunpack.i.l.bf16 %v7859_v23 }
 0x4f6   : > { %v6024_v53 = vadd.f32 %v11074_v35, %v5799_v8  ;;  %v11151_v26 = vpop.f32.mrb[75].mxu1  ;;  %v5575_v54 = vsel %vm3862_vm5, %v5543_v12, %v7855_v27  ;;  %v5479_v52 = vsel %vm3862_vm5, %v5447_v47, %v7856_v42  ;;  %v4595_v35 = vld [vmem:[#allocation4 + $0x1a1] sm:$0xff] }
 0x4f7   : > { %5886 = vmatprep.mubr.f32.mxu0 %v5575_v54  ;;  %v8032_v13 = vpack.i.bf16 %v11100_v30, %v4595_v35  ;;  %v5512_v10 = vsel %vm425_vm2, %v10819_v61, %v7860_v51  ;;  %v5416_v24 = vsel %vm425_vm2, %v4359_v50, %v7861_v6 }
 0x4f8   : > { %v6178_v43 = vmax.f32 %v6024_v53, 0.0  ;;  %8023 = vrot.lane.b32.xlu1 %v8022_v15, %s8069_s23  ;;  %5887 = vmatmul.mubr.f32.gmra.mrb[70].mxu0 %v5479_v52  ;;  %v4360_v15 = vld [vmem:[#allocation4 + $0xf8] sm:$0xff] }
 0x4f9   : > { %8028 = vrot.lane.b32.xlu0 %v8027_v17, %s8071_s19 }
 0x4fa   : > { %v11160_v4 = vpack.c.bf16 %v6178_v43, %v6177_v48 }
 0x4fc   : > { %8033 = vrot.lane.b32.xlu1 %v8032_v13, %s8073_s25  ;;  %s6473_s25 = sshll.u32 %s11531_s12, 1 }
 0x4fd   : > { %s332_s21 = scalar_lea.vmem %s11439_s9, %s6473_s25 }
 0x504   : > { %v7864_v11 = vpop.permute.xlu1 %7863 }
 0x505   : > { %v7869_v63 = vpop.permute.xlu0 %7868  ;;  %v7866_v58 = vunpack.i.h.bf16 %v7864_v11  ;;  %v7865_v49 = vunpack.i.l.bf16 %v7864_v11  ;;  %v5803_v39 = vpop.f32.mrb[36].mxu0 }
 0x506   : > { %v7871_v28 = vunpack.i.h.bf16 %v7869_v63  ;;  %v7870_v5 = vunpack.i.l.bf16 %v7869_v63  ;;  %v5804_v30 = vadd.f32 %v11094_v33, %v5803_v39  ;;  %v5805_v46 = vpop.f32.mrb[37].mxu0 }
 0x507   : > { %v5544_v38 = vsel %vm3796_vm3, %v5512_v10, %v7865_v49  ;;  %v5448_v57 = vsel %vm3796_vm3, %v5416_v24, %v7866_v58 }
 0x508   : > { %v11170_v8 = vpop.f32.mrb[76].mxu1  ;;  %v7874_v36 = vpop.permute.xlu1 %7873  ;;  %v5576_v32 = vsel %vm3862_vm5, %v5544_v38, %v7870_v5  ;;  %v5480_v42 = vsel %vm3862_vm5, %v5448_v57, %v7871_v28  ;;  %v6029_v27 = vadd.f32 %v11083_v59, %v5804_v30 }
 0x509   : > { %v7876_v40 = vunpack.i.h.bf16 %v7874_v36  ;;  %v7875_v61 = vunpack.i.l.bf16 %v7874_v36  ;;  %v7879_v53 = vpop.permute.xlu0 %7878  ;;  %5891 = vmatprep.mubr.f32.mxu0 %v5576_v32  ;;  %v11175_v12 = vpop.f32.mrb[77].mxu1  ;;  %v4361_v36 = vld [vmem:[#allocation4 + $0x108] sm:$0xff] }
 0x50a   : > { %v7881_v47 = vunpack.i.h.bf16 %v7879_v53  ;;  %v7880_v54 = vunpack.i.l.bf16 %v7879_v53  ;;  %5892 = vmatmul.mubr.f32.gmra.mrb[72].mxu0 %v5480_v42 }
 0x50b   : > { %v5513_v17 = vsel %vm425_vm2, %v10848_v16, %v7875_v61  ;;  %v5417_v52 = vsel %vm425_vm2, %v4360_v15, %v7876_v40  ;;  %v6179_v16 = vmax.f32 %v6029_v27, 0.0 }
 0x50c   : > { %v7884_v48 = vpop.permute.xlu1 %7883  ;;  %v5808_v43 = vpop.f32.mrb[38].mxu0  ;;  %v5545_v6 = vsel %vm3796_vm3, %v5513_v17, %v7880_v54  ;;  %v5449_v51 = vsel %vm3796_vm3, %v5417_v52, %v7881_v47 }
 0x50d   : > { %v7886_v35 = vunpack.i.h.bf16 %v7884_v48  ;;  %v7885_v13 = vunpack.i.l.bf16 %v7884_v48  ;;  %v5809_v59 = vadd.f32 %v11094_v33, %v5808_v43  ;;  %v5810_v23 = vpop.f32.mrb[39].mxu0  ;;  %v7889_v5 = vpop.permute.xlu0 %7888 }
 0x50e   : > { %v7891_v50 = vunpack.i.h.bf16 %v7889_v5  ;;  %v7890_v39 = vunpack.i.l.bf16 %v7889_v5  ;;  %v4362_v23 = vld [vmem:[#allocation4 + $0x110] sm:$0xff] }
 0x50f   : > { %v5577_v11 = vsel %vm3862_vm5, %v5545_v6, %v7885_v13  ;;  %v5481_v63 = vsel %vm3862_vm5, %v5449_v51, %v7886_v35  ;;  %v6034_v58 = vadd.f32 %v11077_v45, %v5809_v59 }
 0x510   : > { %5896 = vmatprep.mubr.f32.mxu0 %v5577_v11  ;;  %v5514_v45 = vsel %vm425_vm2, %v10872_v18, %v7890_v39  ;;  %v5418_v42 = vsel %vm425_vm2, %v4361_v36, %v7891_v50 }
 0x511   : > { %5897 = vmatmul.mubr.f32.gmra.mrb[74].mxu0 %v5481_v63  ;;  %v6180_v49 = vmax.f32 %v6034_v58, 0.0 }
 0x513   : > { %v11186_v28 = vpack.c.bf16 %v6180_v49, %v6179_v16 }
 0x51b   : > { %v7894_v10 = vpop.permute.xlu1 %7893 }
 0x51c   : > { %v7899_v24 = vpop.permute.xlu0 %7898  ;;  %v7896_v30 = vunpack.i.h.bf16 %v7894_v10  ;;  %v7895_v46 = vunpack.i.l.bf16 %v7894_v10 }
 0x51d   : > { %v7901_v38 = vunpack.i.h.bf16 %v7899_v24  ;;  %v7900_v57 = vunpack.i.l.bf16 %v7899_v24  ;;  %v5813_v32 = vpop.f32.mrb[40].mxu0 }
 0x51e   : > { %v5814_v27 = vadd.f32 %v11094_v33, %v5813_v32  ;;  %v5815_v40 = vpop.f32.mrb[41].mxu0  ;;  %v5546_v61 = vsel %vm3796_vm3, %v5514_v45, %v7895_v46  ;;  %v5450_v53 = vsel %vm3796_vm3, %v5418_v42, %v7896_v30 }
 0x51f   : > { %v11194_v47 = vpop.f32.mrb[78].mxu1  ;;  %v7904_v54 = vpop.permute.xlu1 %7903  ;;  %v5578_v15 = vsel %vm3862_vm5, %v5546_v61, %v7900_v57  ;;  %v5482_v17 = vsel %vm3862_vm5, %v5450_v53, %v7901_v38  ;;  %v4363_v53 = vld [vmem:[#allocation4 + $0x120] sm:$0xff] }
 0x520   : > { %v6039_v52 = vadd.f32 %v11102_v25, %v5814_v27  ;;  %v7906_v48 = vunpack.i.h.bf16 %v7904_v54  ;;  %v7905_v18 = vunpack.i.l.bf16 %v7904_v54  ;;  %v7909_v43 = vpop.permute.xlu0 %7908  ;;  %5901 = vmatprep.mubr.f32.mxu0 %v5578_v15  ;;  %v11199_v35 = vpop.f32.mrb[79].mxu1 }
 0x521   : > { %v7911_v13 = vunpack.i.h.bf16 %v7909_v43  ;;  %v7910_v59 = vunpack.i.l.bf16 %v7909_v43  ;;  %5902 = vmatmul.mubr.f32.gmra.mrb[76].mxu0 %v5482_v17 }
 0x522   : > { %v5515_v6 = vsel %vm425_vm2, %v10900_v56, %v7905_v18  ;;  %v5419_v51 = vsel %vm425_vm2, %v4362_v23, %v7906_v48  ;;  %v6181_v56 = vmax.f32 %v6039_v52, 0.0 }
 0x523   : > { %v7914_v11 = vpop.permute.xlu1 %7913  ;;  %v5547_v5 = vsel %vm3796_vm3, %v5515_v6, %v7910_v59  ;;  %v5451_v50 = vsel %vm3796_vm3, %v5419_v51, %v7911_v13 }
 0x524   : > { %v5818_v63 = vpop.f32.mrb[42].mxu0  ;;  %v7916_v58 = vunpack.i.h.bf16 %v7914_v11  ;;  %v7915_v16 = vunpack.i.l.bf16 %v7914_v11  ;;  %v7919_v38 = vpop.permute.xlu0 %7918 }
 0x525   : > { %v5819_v25 = vadd.f32 %v11094_v33, %v5818_v63  ;;  %v5820_v49 = vpop.f32.mrb[43].mxu0  ;;  %v7921_v57 = vunpack.i.h.bf16 %v7919_v38  ;;  %v7920_v36 = vunpack.i.l.bf16 %v7919_v38 }
 0x526   : > { %v5579_v39 = vsel %vm3862_vm5, %v5547_v5, %v7915_v16  ;;  %v5483_v10 = vsel %vm3862_vm5, %v5451_v50, %v7916_v58 }
 0x527   : > { %v6044_v24 = vadd.f32 %v11096_v7, %v5819_v25  ;;  %5906 = vmatprep.mubr.f32.mxu0 %v5579_v39  ;;  %v5516_v7 = vsel %vm425_vm2, %v10924_v44, %v7920_v36  ;;  %v5420_v15 = vsel %vm425_vm2, %v4363_v53, %v7921_v57  ;;  %v4364_v25 = vld [vmem:[#allocation4 + $0x128] sm:$0xff] }
 0x528   : > { %5907 = vmatmul.mubr.f32.gmra.mrb[78].mxu0 %v5483_v10 }
 0x529   : > { %v6182_v30 = vmax.f32 %v6044_v24, 0.0 }
 0x52b   : > { %v11210_v46 = vpack.c.bf16 %v6182_v30, %v6181_v56 }
 0x534   : > { %v7924_v32 = vpop.permute.xlu1 %7923  ;;  %v5823_v54 = vpop.f32.mrb[44].mxu0 }
 0x535   : > { %v7929_v45 = vpop.permute.xlu0 %7928  ;;  %v7926_v42 = vunpack.i.h.bf16 %v7924_v32  ;;  %v7925_v27 = vunpack.i.l.bf16 %v7924_v32  ;;  %v5824_v17 = vadd.f32 %v11094_v33, %v5823_v54  ;;  %v5825_v52 = vpop.f32.mrb[45].mxu0 }
 0x536   : > { %v7931_v40 = vunpack.i.h.bf16 %v7929_v45  ;;  %v7930_v61 = vunpack.i.l.bf16 %v7929_v45 }
 0x537   : > { %v5548_v48 = vsel %vm3796_vm3, %v5516_v7, %v7925_v27  ;;  %v5452_v18 = vsel %vm3796_vm3, %v5420_v15, %v7926_v42  ;;  %v6049_v6 = vadd.f32 %v11124_v3, %v5824_v17 }
 0x538   : > { %v11218_v43 = vpop.f32.mrb[80].mxu1  ;;  %v7934_v13 = vpop.permute.xlu1 %7933  ;;  %v5580_v59 = vsel %vm3862_vm5, %v5548_v48, %v7930_v61  ;;  %v5484_v23 = vsel %vm3862_vm5, %v5452_v18, %v7931_v40 }
 0x539   : > { %v7936_v51 = vunpack.i.h.bf16 %v7934_v13  ;;  %v7935_v44 = vunpack.i.l.bf16 %v7934_v13  ;;  %v7939_v11 = vpop.permute.xlu0 %7938  ;;  %5911 = vmatprep.mubr.f32.mxu0 %v5580_v59  ;;  %v11223_v63 = vpop.f32.mrb[81].mxu1 }
 0x53a   : > { %v7941_v58 = vunpack.i.h.bf16 %v7939_v11  ;;  %v7940_v16 = vunpack.i.l.bf16 %v7939_v11  ;;  %5912 = vmatmul.mubr.f32.gmra.mrb[80].mxu0 %v5484_v23 }
 0x53b   : > { %v5517_v49 = vsel %vm425_vm2, %v10952_v55, %v7935_v44  ;;  %v5421_v5 = vsel %vm425_vm2, %v4364_v25, %v7936_v51  ;;  %v5828_v24 = vpop.f32.mrb[46].mxu0  ;;  %v6183_v55 = vmax.f32 %v6049_v6, 0.0 }
 0x53c   : > { %v7944_v50 = vpop.permute.xlu1 %7943  ;;  %v5829_v3 = vadd.f32 %v11094_v33, %v5828_v24  ;;  %v5830_v56 = vpop.f32.mrb[47].mxu0  ;;  %v5549_v30 = vsel %vm3796_vm3, %v5517_v49, %v7940_v16  ;;  %v5453_v38 = vsel %vm3796_vm3, %v5421_v5, %v7941_v58 }
 0x53d   : > { %v7946_v39 = vunpack.i.h.bf16 %v7944_v50  ;;  %v7945_v10 = vunpack.i.l.bf16 %v7944_v50  ;;  %v7949_v27 = vpop.permute.xlu0 %7948 }
 0x53e   : > { %v6054_v32 = vadd.f32 %v11119_v34, %v5829_v3  ;;  %v7951_v40 = vunpack.i.h.bf16 %v7949_v27  ;;  %v7950_v61 = vunpack.i.l.bf16 %v7949_v27 }
 0x53f   : > { %v5581_v57 = vsel %vm3862_vm5, %v5549_v30, %v7945_v10  ;;  %v5485_v36 = vsel %vm3862_vm5, %v5453_v38, %v7946_v39 }
 0x540   : > { %5916 = vmatprep.mubr.f32.mxu0 %v5581_v57  ;;  %v6184_v45 = vmax.f32 %v6054_v32, 0.0  ;;  %v5518_v18 = vsel %vm425_vm2, %v10976_v37, %v7950_v61  ;;  %v5422_v34 = vsel %vm425_vm2, %v10922_v0, %v7951_v40 }
 0x541   : > { %5917 = vmatmul.mubr.f32.gmra.mrb[82].mxu0 %v5485_v36 }
 0x542   : > { %v11234_v42 = vpack.c.bf16 %v6184_v45, %v6183_v55 }
 0x54b   : > { %v7954_v53 = vpop.permute.xlu1 %7953 }
 0x54c   : > { %v7959_v54 = vpop.permute.xlu0 %7958  ;;  %v7956_v7 = vunpack.i.h.bf16 %v7954_v53  ;;  %v7955_v15 = vunpack.i.l.bf16 %v7954_v53 }
 0x54d   : > { %v7961_v17 = vunpack.i.h.bf16 %v7959_v54  ;;  %v7960_v52 = vunpack.i.l.bf16 %v7959_v54  ;;  %v5833_v48 = vpop.f32.mrb[48].mxu0 }
 0x54e   : > { %v5834_v13 = vadd.f32 %v11094_v33, %v5833_v48  ;;  %v5835_v59 = vpop.f32.mrb[49].mxu0  ;;  %v5550_v23 = vsel %vm3796_vm3, %v5518_v18, %v7955_v15  ;;  %v5454_v6 = vsel %vm3796_vm3, %v5422_v34, %v7956_v7 }
 0x54f   : > { %v11243_v51 = vpop.f32.mrb[82].mxu1  ;;  %v7964_v44 = vpop.permute.xlu1 %7963  ;;  %v5582_v11 = vsel %vm3862_vm5, %v5550_v23, %v7960_v52  ;;  %v5486_v58 = vsel %vm3862_vm5, %v5454_v6, %v7961_v17 }
 0x550   : > { %v6059_v16 = vadd.f32 %v11136_v20, %v5834_v13  ;;  %v7966_v37 = vunpack.i.h.bf16 %v7964_v44  ;;  %v7965_v25 = vunpack.i.l.bf16 %v7964_v44  ;;  %v7969_v49 = vpop.permute.xlu0 %7968  ;;  %5921 = vmatprep.mubr.f32.mxu0 %v5582_v11  ;;  %v11248_v0 = vpop.f32.mrb[83].mxu1 }
 0x551   : > { %v7971_v5 = vunpack.i.h.bf16 %v7969_v49  ;;  %v7970_v50 = vunpack.i.l.bf16 %v7969_v49  ;;  %5922 = vmatmul.mubr.f32.gmra.mrb[84].mxu0 %v5486_v58 }
 0x552   : > { %v5519_v39 = vsel %vm425_vm2, %v11004_v60, %v7965_v25  ;;  %v5423_v10 = vsel %vm425_vm2, %v10939_v22, %v7966_v37  ;;  %v6185_v22 = vmax.f32 %v6059_v16, 0.0 }
 0x553   : > { %v7974_v24 = vpop.permute.xlu1 %7973  ;;  %v5551_v57 = vsel %vm3796_vm3, %v5519_v39, %v7970_v50  ;;  %v5455_v36 = vsel %vm3796_vm3, %v5423_v10, %v7971_v5 }
 0x554   : > { %v7976_v3 = vunpack.i.h.bf16 %v7974_v24  ;;  %v7975_v56 = vunpack.i.l.bf16 %v7974_v24  ;;  %v5838_v30 = vpop.f32.mrb[50].mxu0  ;;  %v7979_v32 = vpop.permute.xlu0 %7978 }
 0x555   : > { %v5839_v20 = vadd.f32 %v11094_v33, %v5838_v30  ;;  %v5840_v38 = vpop.f32.mrb[51].mxu0  ;;  %v7981_v27 = vunpack.i.h.bf16 %v7979_v32  ;;  %v7980_v40 = vunpack.i.l.bf16 %v7979_v32 }
 0x556   : > { %v5583_v55 = vsel %vm3862_vm5, %v5551_v57, %v7975_v56  ;;  %v5487_v45 = vsel %vm3862_vm5, %v5455_v36, %v7976_v3 }
 0x557   : > { %v6064_v60 = vadd.f32 %v11134_v19, %v5839_v20  ;;  %5926 = vmatprep.mubr.f32.mxu0 %v5583_v55  ;;  %v5520_v18 = vsel %vm425_vm2, %v11028_v31, %v7980_v40  ;;  %v5424_v19 = vsel %vm425_vm2, %v10974_v21, %v7981_v27 }
 0x558   : > { %5927 = vmatmul.mubr.f32.gmra.mrb[86].mxu0 %v5487_v45 }
 0x559   : > { %v6186_v61 = vmax.f32 %v6064_v60, 0.0 }
 0x55a   : > { %v7984_v54 = vpop.permute.xlu1 %7983 }
 0x55b   : > { %v11260_v53 = vpack.c.bf16 %v6186_v61, %v6185_v22  ;;  %v7989_v7 = vpop.permute.xlu0 %7988  ;;  %v7986_v15 = vunpack.i.h.bf16 %v7984_v54  ;;  %v7985_v17 = vunpack.i.l.bf16 %v7984_v54 }
 0x55c   : > { %v7991_v52 = vunpack.i.h.bf16 %v7989_v7  ;;  %v7990_v48 = vunpack.i.l.bf16 %v7989_v7 }
 0x55d   : > { %v5552_v34 = vsel %vm3796_vm3, %v5520_v18, %v7985_v17  ;;  %v5456_v13 = vsel %vm3796_vm3, %v5424_v19, %v7986_v15 }
 0x55e   : > { %v7994_v59 = vpop.permute.xlu1 %7993  ;;  %v5584_v6 = vsel %vm3862_vm5, %v5552_v34, %v7990_v48  ;;  %v5488_v44 = vsel %vm3862_vm5, %v5456_v13, %v7991_v52 }
 0x55f   : > { %v7999_v23 = vpop.permute.xlu0 %7998  ;;  %v7996_v11 = vunpack.i.h.bf16 %v7994_v59  ;;  %v7995_v58 = vunpack.i.l.bf16 %v7994_v59  ;;  %5931 = vmatprep.mubr.f32.mxu0 %v5584_v6 }
 0x560   : > { %v8001_v16 = vunpack.i.h.bf16 %v7999_v23  ;;  %v8000_v37 = vunpack.i.l.bf16 %v7999_v23  ;;  %5932 = vmatmul.mubr.f32.gmra.mrb[88].mxu0 %v5488_v44 }
 0x561   : > { %v5521_v31 = vsel %vm425_vm2, %v11059_v9, %v7995_v58  ;;  %v5425_v21 = vsel %vm425_vm2, %v10991_v29, %v7996_v11 }
 0x562   : > { %v8004_v25 = vpop.permute.xlu1 %8003  ;;  %v5553_v3 = vsel %vm3796_vm3, %v5521_v31, %v8000_v37  ;;  %v5457_v56 = vsel %vm3796_vm3, %v5425_v21, %v8001_v16 }
 0x563   : > { %v8009_v49 = vpop.permute.xlu0 %8008  ;;  %v8006_v5 = vunpack.i.h.bf16 %v8004_v25  ;;  %v8005_v50 = vunpack.i.l.bf16 %v8004_v25 }
 0x564   : > { %v8011_v39 = vunpack.i.h.bf16 %v8009_v49  ;;  %v8010_v10 = vunpack.i.l.bf16 %v8009_v49  ;;  %v5843_v24 = vpop.f32.mrb[52].mxu0 }
 0x565   : > { %v5844_v30 = vadd.f32 %v11094_v33, %v5843_v24  ;;  %v5845_v20 = vpop.f32.mrb[53].mxu0  ;;  %v5585_v38 = vsel %vm3862_vm5, %v5553_v3, %v8005_v50  ;;  %v5489_v9 = vsel %vm3862_vm5, %v5457_v56, %v8006_v5 }
 0x566   : > { %v8014_v57 = vpop.permute.xlu1 %8013  ;;  %5936 = vmatprep.mubr.f32.mxu0 %v5585_v38  ;;  %v5522_v40 = vsel %vm425_vm2, %v11081_v14, %v8010_v10  ;;  %v5426_v61 = vsel %vm425_vm2, %v11026_v41, %v8011_v39 }
 0x567   : > { %v8019_v29 = vpop.permute.xlu0 %8018  ;;  %v6069_v36 = vadd.f32 %v11151_v26, %v5844_v30  ;;  %v8016_v32 = vunpack.i.h.bf16 %v8014_v57  ;;  %v8015_v55 = vunpack.i.l.bf16 %v8014_v57  ;;  %5937 = vmatmul.mubr.f32.gmra.mrb[90].mxu0 %v5489_v9 }
 0x568   : > { %v8021_v45 = vunpack.i.h.bf16 %v8019_v29  ;;  %v11280_v60 = vpop.f32.mrb[84].mxu1  ;;  %v8020_v22 = vunpack.i.l.bf16 %v8019_v29 }
 0x569   : > { %v11282_v27 = vpop.f32.mrb[85].mxu1  ;;  %v5554_v54 = vsel %vm3796_vm3, %v5522_v40, %v8015_v55  ;;  %v5458_v7 = vsel %vm3796_vm3, %v5426_v61, %v8016_v32  ;;  %v6187_v16 = vmax.f32 %v6069_v36, 0.0 }
 0x56a   : > { %v8024_v26 = vpop.permute.xlu1 %8023  ;;  %v5586_v17 = vsel %vm3862_vm5, %v5554_v54, %v8020_v22  ;;  %v5490_v52 = vsel %vm3862_vm5, %v5458_v7, %v8021_v45 }
 0x56b   : > { %v8029_v15 = vpop.permute.xlu0 %8028  ;;  %v8026_v48 = vunpack.i.h.bf16 %v8024_v26  ;;  %v8025_v18 = vunpack.i.l.bf16 %v8024_v26  ;;  %v5848_v19 = vpop.f32.mrb[54].mxu0  ;;  %5941 = vmatprep.mubr.f32.mxu0 %v5586_v17 }
 0x56c   : > { %v8031_v34 = vunpack.i.h.bf16 %v8029_v15  ;;  %v8030_v13 = vunpack.i.l.bf16 %v8029_v15  ;;  %v5849_v14 = vadd.f32 %v11094_v33, %v5848_v19  ;;  %v5850_v59 = vpop.f32.mrb[55].mxu0  ;;  %5942 = vmatmul.mubr.f32.gmra.mrb[92].mxu0 %v5490_v52 }
 0x56d   : > { %v5523_v41 = vsel %vm425_vm2, %v11111_v2, %v8025_v18  ;;  %v5427_v23 = vsel %vm425_vm2, %v11043_v1, %v8026_v48 }
 0x56e   : > { %v6074_v6 = vadd.f32 %v11147_v62, %v5849_v14  ;;  %v8034_v44 = vpop.permute.xlu1 %8033  ;;  %v5555_v31 = vsel %vm3796_vm3, %v5523_v41, %v8030_v13  ;;  %v5459_v21 = vsel %vm3796_vm3, %v5427_v23, %v8031_v34 }
 0x56f   : > { %v8036_v11 = vunpack.i.h.bf16 %v8034_v44  ;;  %v8035_v58 = vunpack.i.l.bf16 %v8034_v44 }
 0x570   : > { %v6188_v37 = vmax.f32 %v6074_v6, 0.0 }
 0x571   : > { %v5587_v25 = vsel %vm3862_vm5, %v5555_v31, %v8035_v58  ;;  %v5491_v49 = vsel %vm3862_vm5, %v5459_v21, %v8036_v11 }
 0x572   : > { %v11302_v5 = vpack.c.bf16 %v6188_v37, %v6187_v16  ;;  %5946 = vmatprep.mubr.f32.mxu0 %v5587_v25  ;;  %v11358_v25 = vld [vmem:[%s11437_s7] sm:$0x1] }
 0x573   : > { %5947 = vmatmul.mubr.f32.gmra.mrb[94].mxu0 %v5491_v49 }
 0x574   : > { %6714 = vmatprep.mubr.msk.f32.mxu0 %vm379_vm14, %v11358_v25 }
 0x57d   : > { %v5853_v1 = vpop.f32.mrb[56].mxu0 }
 0x57e   : > { %v5854_v2 = vadd.f32 %v11094_v33, %v5853_v1  ;;  %v5855_v62 = vpop.f32.mrb[57].mxu0 }
 0x57f   : > { %v11305_v50 = vpop.f32.mrb[86].mxu1 }
 0x580   : > { %v6079_v39 = vadd.f32 %v11175_v12, %v5854_v2  ;;  %v11308_v10 = vpop.f32.mrb[87].mxu1 }
 0x582   : > { %v6189_v20 = vmax.f32 %v6079_v39, 0.0 }
 0x584   : > { %v5858_v24 = vpop.f32.mrb[58].mxu0 }
 0x585   : > { %v5859_v3 = vadd.f32 %v11094_v33, %v5858_v24  ;;  %v5860_v56 = vpop.f32.mrb[59].mxu0 }
 0x587   : > { %v6084_v30 = vadd.f32 %v11170_v8, %v5859_v3 }
 0x589   : > { %v6190_v38 = vmax.f32 %v6084_v30, 0.0 }
 0x58b   : > { %v11312_v9 = vpack.c.bf16 %v6190_v38, %v6189_v20 }
 0x594   : > { %v5863_v57 = vpop.f32.mrb[60].mxu0 }
 0x595   : > { %v5864_v29 = vadd.f32 %v11094_v33, %v5863_v57  ;;  %v5865_v36 = vpop.f32.mrb[61].mxu0 }
 0x597   : > { %v6089_v12 = vadd.f32 %v11199_v35, %v5864_v29 }
 0x598   : > { %v11315_v32 = vpop.f32.mrb[88].mxu1 }
 0x599   : > { %v11318_v55 = vpop.f32.mrb[89].mxu1  ;;  %v6191_v61 = vmax.f32 %v6089_v12, 0.0 }
 0x59b   : > { %v5868_v45 = vpop.f32.mrb[62].mxu0 }
 0x59c   : > { %v5869_v22 = vadd.f32 %v11094_v33, %v5868_v45  ;;  %v5870_v40 = vpop.f32.mrb[63].mxu0 }
 0x59e   : > { %v6094_v8 = vadd.f32 %v11194_v47, %v5869_v22 }
 0x5a0   : > { %v6192_v54 = vmax.f32 %v6094_v8, 0.0 }
 0x5a2   : > { %v11322_v7 = vpack.c.bf16 %v6192_v54, %v6191_v61 }
 0x5ad   : > { %v5873_v26 = vpop.f32.mrb[64].mxu0 }
 0x5ae   : > { %v5874_v15 = vadd.f32 %v11094_v33, %v5873_v26  ;;  %v5875_v17 = vpop.f32.mrb[65].mxu0 }
 0x5af   : > { %v11325_v52 = vpop.f32.mrb[90].mxu1 }
 0x5b0   : > { %v6099_v35 = vadd.f32 %v11223_v63, %v5874_v15  ;;  %v11328_v48 = vpop.f32.mrb[91].mxu1 }
 0x5b2   : > { %v6193_v13 = vmax.f32 %v6099_v35, 0.0 }
 0x5b4   : > { %v5878_v18 = vpop.f32.mrb[66].mxu0 }
 0x5b5   : > { %v5879_v19 = vadd.f32 %v11094_v33, %v5878_v18  ;;  %v5880_v34 = vpop.f32.mrb[67].mxu0 }
 0x5b7   : > { %v6104_v47 = vadd.f32 %v11218_v43, %v5879_v19 }
 0x5b9   : > { %v6194_v14 = vmax.f32 %v6104_v47, 0.0 }
 0x5bb   : > { %v6921_v41 = vpack.c.bf16 %v6194_v14, %v6193_v13 }
 0x5bd   : > { %6923 = vmatprep.subr.msk.bf16.mxu0 %vm11334_vm9, %v6921_v41 }
 0x5be   : > { %6926 = vmatpush3.bf16.xpose.msk.msra.mxu0 %vm11334_vm9, %v11160_v4  ;;  %v11343_v63 = vpop.f32.mrb[92].mxu1 }
 0x5bf   : > { %v11345_v23 = vpop.f32.mrb[93].mxu1 }
 0x5c2   : > { %v11347_v43 = vpop.f32.mrb[94].mxu1 }
 0x5c3   : > { %v11349_v6 = vpop.f32.mrb[95].mxu1 }
 0x5c4   : > { %v5883_v44 = vpop.f32.mrb[68].mxu0 }
 0x5c5   : > { %v5884_v11 = vadd.f32 %v11094_v33, %v5883_v44  ;;  %v5885_v58 = vpop.f32.mrb[69].mxu0 }
 0x5c7   : > { %v6109_v16 = vadd.f32 %v11248_v0, %v5884_v11  ;;  %v6210_v0 = vld [vmem:[#allocation5] sm:$0x1] }
 0x5c9   : > { %v6195_v49 = vmax.f32 %v6109_v16, 0.0 }
 0x5cb   : > { %v5888_v37 = vpop.f32.mrb[70].mxu0 }
 0x5cc   : > { %v5889_v31 = vadd.f32 %v11094_v33, %v5888_v37  ;;  %v5890_v21 = vpop.f32.mrb[71].mxu0 }
 0x5ce   : > { %v6114_v4 = vadd.f32 %v11243_v51, %v5889_v31  ;;  %v8074_v51 = vmov 0  }
 0x5cf   : > { %8037 = vset.pattern.permute.xlu0 %v8074_v51 }
 0x5d0   : > { %v6196_v1 = vmax.f32 %v6114_v4, 0.0  ;;  %6213 = vperm.xlu0 %8037, %v6210_v0  }
 0x5d2   : > { %v6927_v2 = vpack.c.bf16 %v6196_v1, %v6195_v49 }
 0x5d4   : > { %6929 = vmatprep.subr.msk.bf16.mxu0 %vm11334_vm9, %v6927_v2 }
 0x5d5   : > { %6932 = vmatpush3.bf16.xpose.msk.msra.mxu0 %vm11334_vm9, %v11186_v28 }
 0x5dd   : > { %v5893_v62 = vpop.f32.mrb[72].mxu0 }
 0x5de   : > { %v5894_v39 = vadd.f32 %v11094_v33, %v5893_v62  ;;  %v5895_v24 = vpop.f32.mrb[73].mxu0 }
 0x5e0   : > { %v6119_v3 = vadd.f32 %v11282_v27, %v5894_v39 }
 0x5e2   : > { %v6197_v57 = vmax.f32 %v6119_v3, 0.0 }
 0x5e4   : > { %v5898_v56 = vpop.f32.mrb[74].mxu0 }
 0x5e5   : > { %v5899_v30 = vadd.f32 %v11094_v33, %v5898_v56  ;;  %v5900_v20 = vpop.f32.mrb[75].mxu0 }
 0x5e7   : > { %v6124_v38 = vadd.f32 %v11280_v60, %v5899_v30 }
 0x5e9   : > { %v6198_v29 = vmax.f32 %v6124_v38, 0.0 }
 0x5eb   : > { %v6933_v36 = vpack.c.bf16 %v6198_v29, %v6197_v57 }
 0x5ed   : > { %6935 = vmatprep.subr.msk.bf16.mxu0 %vm11334_vm9, %v6933_v36  ;;  %v8075_v36 = vmov 1966171168  }
 0x5ee   : > { %6938 = vmatpush3.bf16.xpose.msk.msra.mxu0 %vm11334_vm9, %v11210_v46 }
 0x5f4   : > { %v5903_v28 = vpop.f32.mrb[76].mxu0 }
 0x5f5   : > { %v5904_v12 = vadd.f32 %v11094_v33, %v5903_v28  ;;  %v5905_v27 = vpop.f32.mrb[77].mxu0 }
 0x5f7   : > { %v6129_v45 = vadd.f32 %v11308_v10, %v5904_v12 }
 0x5f9   : > { %v6199_v61 = vmax.f32 %v6129_v45, 0.0 }
 0x5fb   : > { %v5908_v22 = vpop.f32.mrb[78].mxu0 }
 0x5fc   : > { %v5909_v40 = vadd.f32 %v11094_v33, %v5908_v22  ;;  %v5910_v60 = vpop.f32.mrb[79].mxu0 }
 0x5fe   : > { %v6134_v8 = vadd.f32 %v11305_v50, %v5909_v40 }
 0x600   : > { %v6200_v54 = vmax.f32 %v6134_v8, 0.0 }
 0x602   : > { %v6939_v26 = vpack.c.bf16 %v6200_v54, %v6199_v61 }
 0x604   : > { %6941 = vmatprep.subr.msk.bf16.mxu0 %vm11334_vm9, %v6939_v26 }
 0x605   : > { %6944 = vmatpush3.bf16.xpose.msk.msra.mxu0 %vm11334_vm9, %v11234_v42 }
 0x60d   : > { %v5913_v46 = vpop.f32.mrb[80].mxu0 }
 0x60e   : > { %v5914_v15 = vadd.f32 %v11094_v33, %v5913_v46  ;;  %v5915_v10 = vpop.f32.mrb[81].mxu0 }
 0x610   : > { %v6139_v17 = vadd.f32 %v11318_v55, %v5914_v15 }
 0x612   : > { %v6201_v34 = vmax.f32 %v6139_v17, 0.0 }
 0x614   : > { %v5918_v35 = vpop.f32.mrb[82].mxu0 }
 0x615   : > { %v5919_v18 = vadd.f32 %v11094_v33, %v5918_v35  ;;  %v5920_v50 = vpop.f32.mrb[83].mxu0 }
 0x617   : > { %v6144_v19 = vadd.f32 %v11315_v32, %v5919_v18 }
 0x619   : > { %v6202_v47 = vmax.f32 %v6144_v19, 0.0 }
 0x61b   : > { %v6945_v13 = vpack.c.bf16 %v6202_v47, %v6201_v34 }
 0x61d   : > { %6947 = vmatprep.subr.msk.bf16.mxu0 %vm11334_vm9, %v6945_v13 }
 0x61e   : > { %6950 = vmatpush3.bf16.xpose.msk.msra.mxu0 %vm11334_vm9, %v11260_v53 }
 0x624   : > { %v5923_v42 = vpop.f32.mrb[84].mxu0 }
 0x625   : > { %v5924_v14 = vadd.f32 %v11094_v33, %v5923_v42  ;;  %v5925_v55 = vpop.f32.mrb[85].mxu0 }
 0x627   : > { %v6149_v41 = vadd.f32 %v11328_v48, %v5924_v14 }
 0x629   : > { %v6203_v16 = vmax.f32 %v6149_v41, 0.0 }
 0x62b   : > { %v5928_v44 = vpop.f32.mrb[86].mxu0 }
 0x62c   : > { %v5929_v11 = vadd.f32 %v11094_v33, %v5928_v44  ;;  %v5930_v32 = vpop.f32.mrb[87].mxu0 }
 0x62e   : > { %v6154_v58 = vadd.f32 %v11325_v52, %v5929_v11 }
 0x630   : > { %v6204_v37 = vmax.f32 %v6154_v58, 0.0 }
 0x632   : > { %v6951_v31 = vpack.c.bf16 %v6204_v37, %v6203_v16 }
 0x633   : > { %v5933_v21 = vpop.f32.mrb[88].mxu0 }
 0x634   : > { %6953 = vmatprep.subr.msk.bf16.mxu0 %vm11334_vm9, %v6951_v31  ;;  %v5934_v53 = vadd.f32 %v11094_v33, %v5933_v21  ;;  %v5935_v4 = vpop.f32.mrb[89].mxu0 }
 0x635   : > { %6956 = vmatpush3.bf16.xpose.msk.msra.mxu0 %vm11334_vm9, %v11302_v5 }
 0x636   : > { %v6159_v48 = vadd.f32 %v11345_v23, %v5934_v53 }
 0x638   : > { %v6205_v0 = vmax.f32 %v6159_v48, 0.0 }
 0x63a   : > { %v5938_v49 = vpop.f32.mrb[90].mxu0 }
 0x63b   : > { %v5939_v1 = vadd.f32 %v11094_v33, %v5938_v49  ;;  %v5940_v52 = vpop.f32.mrb[91].mxu0 }
 0x63d   : > { %v6164_v2 = vadd.f32 %v11343_v63, %v5939_v1 }
 0x63f   : > { %v6206_v51 = vmax.f32 %v6164_v2, 0.0  ;;  %v5943_v62 = vpop.f32.mrb[92].mxu0 }
 0x640   : > { %v5944_v39 = vadd.f32 %v11094_v33, %v5943_v62  ;;  %v5945_v24 = vpop.f32.mrb[93].mxu0 }
 0x641   : > { %v6957_v3 = vpack.c.bf16 %v6206_v51, %v6205_v0 }
 0x642   : > { %v6169_v56 = vadd.f32 %v11349_v6, %v5944_v39 }
 0x643   : > { %6959 = vmatprep.subr.msk.bf16.mxu0 %vm11334_vm9, %v6957_v3 }
 0x644   : > { %6962 = vmatpush3.bf16.xpose.msk.msra.mxu0 %vm11334_vm9, %v11312_v9  ;;  %v6207_v20 = vmax.f32 %v6169_v56, 0.0  ;;  %v6216_v9 = vlaneseq }
 0x646   : > { %v5948_v5 = vpop.f32.mrb[94].mxu0  ;;  %v6217_v6 = vshrl.u32 %v6216_v9, 7  ;;  %vm6410_vm10 = vcmp.lt.s32.totalorder %v6216_v9, 256 }
 0x647   : > { %v5949_v23 = vadd.f32 %v11094_v33, %v5948_v5  ;;  %v5950_v63 = vpop.f32.mrb[95].mxu0 }
 0x648   : > { %v6218_v33 = vsub.s32 0, %v6217_v6 }
 0x649   : > { %v6174_v30 = vadd.f32 %v11347_v43, %v5949_v23  ;;  %v6394_v43 = vunpack.c.l.s4 %v8075_v36 }
 0x64b   : > { %v6208_v38 = vmax.f32 %v6174_v30, 0.0  ;;  %v6395_v12 = vunpack.c.0.s8 %v6394_v43 }
 0x64d   : > { %v6963_v57 = vpack.c.bf16 %v6208_v38, %v6207_v20  ;;  %v6398_v60 = vsub.s32 %v6395_v12, %v6217_v6 }
 0x64f   : > { %6965 = vmatprep.subr.msk.bf16.mxu0 %vm11334_vm9, %v6963_v57  ;;  %v6214_v29 = vpop.permute.xlu0 %6213 }
 0x650   : > { %6968 = vmatpush3.bf16.xpose.msk.msra.mxu0 %vm11334_vm9, %v11322_v7  ;;  %v6219_v28 = vrot.slane %v6214_v29, %v6218_v33 }
 0x657   : > { %6715 = vmatmul.mubr.msk.f32.vlgmr.msra.gmra.mrb[96].mxu0 %vm379_vm14, %v11358_v25 }
 0x72a   : > { %v6385_v27 = vpop.f32.mrb[96].mxu0 }
 0x72b   : > { %v6386_v45 = vadd.f32 %v6385_v27, %v6219_v28  ;;  %v6387_v22 = vpop.f32.mrb[97].mxu0 }
 0x72c   : > { %v6388_v40 = vadd.f32 %v6387_v22, %v6219_v28 }
 0x72e   : > { %v6392_v59 = vcombine.low %v6386_v45, %v6388_v40 }
 0x730   : > { %v6399_v8 = vrot.slane %v6392_v59, %v6398_v60 }
 0x732   : > { %v6406_v7 = vrot.slane %v6399_v8, %v6398_v60 }
 0x734   : > { %6412 = vst.msk [vmem:[%s332_s21] sm:$0x3] %vm6410_vm10, %v6406_v7 }
 0x735 PF: > { %s21_s11 = sadd.s32 1, %s8054_s11  }
 0x736   : > { %p18_p4 = scmp.ge.s32.totalorder %s21_s11, 4  }
 0x738   :  { %20 = sbr.rel (!%p18_p4) target bundleno = 3 (0x3), region = 95 }

</bundles_post_ra>
